<compile_context>
chip_gen: v6e
topology: v6e:2x2x1
jax: 0.10.0
libtpu: 0.0.40
codegen_flags: <defaults>
</compile_context>

<pallas_src>
import functools

import jax
import jax.numpy as jnp
from jax import lax
from jax.experimental import pallas as pl
from jax.experimental.pallas import tpu as pltpu

K = 2048  # codebook size fixed by the module: nn.Embedding(2048, dmodel)


def _tpu_vmem_capacity_bytes():
    """Physical per-core VMEM; used to pick per-generation tile / limit sizes."""
    try:
        info = pltpu.get_tpu_info()
        for attr in ("vmem_capacity_bytes", "vmem_bytes", "vmem_size_bytes"):
            v = getattr(info, attr, None)
            if v:
                return int(v)
    except Exception:
        pass
    return 64 * 1024 * 1024  # conservative default: v7x per-TensorCore VMEM


def _vq_kernel(x_ref, wt_ref, w_ref, hwsq_ref, q_ref, ids_ref, loss_ref, *,
               k_chunk, use_bf16_scores):
    x = x_ref[...]                       # (tile_n, D) f32
    tile_n, d = x.shape
    m = tile_n // 128
    num_chunks = K // k_chunk

    # Scores operand dtype: bf16 keeps the dominant MXU matmul single-pass; the
    # cast of the small x tile is negligible (the resident codebook was pre-cast
    # in the wrapper, once, HBM-side).
    x_mm = x.astype(jnp.bfloat16) if use_bf16_scores else x

    # Running accumulators for the streaming argmin + gather over the codebook.
    best_min = jnp.full((tile_n, 1), jnp.inf, dtype=jnp.float32)
    best_id = jnp.zeros((tile_n, 1), dtype=jnp.int32)
    best_q = jnp.zeros((tile_n, d), dtype=jnp.float32)

    # K-chunked loop.  num_chunks is a small static int, so a Python loop fully
    # unrolls (equivalent to lax.fori_loop(unroll=True)) while every intermediate
    # stays bounded to (tile_n, k_chunk) instead of (tile_n, K).
    for c in range(num_chunks):
        lo = c * k_chunk
        wt_c = wt_ref[:, lo:lo + k_chunk]        # (D, Kc)  pre-transposed (bf16/f32)
        w_c = w_ref[lo:lo + k_chunk, :]          # (Kc, D)  f32, exact gather operand
        hwsq_c = hwsq_ref[:, lo:lo + k_chunk]    # (1, Kc)  0.5 * sum(W^2)

        # ||x||^2 is constant per row so it cannot change the argmin;
        # 0.5*||w||^2 - x.w has the same minimizer as the full squared distance.
        xw = jnp.dot(x_mm, wt_c, preferred_element_type=jnp.float32)   # (tile_n, Kc)
        scores = hwsq_c - xw

        # Chunk-local argmin with first-index tie break (like torch.argmin).
        iota = lax.broadcasted_iota(jnp.int32, scores.shape, 1)        # (tile_n, Kc)
        cmin = jnp.min(scores, axis=-1, keepdims=True)                 # (tile_n, 1)
        local = jnp.min(jnp.where(scores == cmin, iota, k_chunk),
                        axis=-1, keepdims=True)                        # (tile_n, 1)

        # Exact gather of W[local] via a one-hot matmul on the MXU (f32 codebook).
        onehot = (iota == local).astype(jnp.float32)                   # (tile_n, Kc)
        qc = jnp.dot(onehot, w_c, preferred_element_type=jnp.float32)  # (tile_n, D)

        # Strict '<' keeps the earlier chunk on ties -> global first-index argmin.
        better = cmin < best_min                                        # (tile_n, 1)
        best_min = jnp.where(better, cmin, best_min)
        best_id = jnp.where(better, local + lo, best_id)
        best_q = jnp.where(better, qc, best_q)

    q_ref[...] = best_q.astype(q_ref.dtype)
    loss_ref[...] = ((best_q - x) ** 2).astype(loss_ref.dtype)

    # Lane-dense ids store, int32 end-to-end: repack the (tile_n, 1) column into
    # (m, 128) rows so every store uses all 128 lanes.  Built only from broadcast /
    # select / cross-sublane reduce (robust lowering; no sublane->lane reshape).
    ids_b = jnp.broadcast_to(best_id, (tile_n, 128))                   # int32
    sub = lax.broadcasted_iota(jnp.int32, (128, 128), 0)
    lane = lax.broadcasted_iota(jnp.int32, (128, 128), 1)
    diag = sub == lane
    rows = []
    for r in range(m):
        grp = ids_b[r * 128:(r + 1) * 128, :]                          # (128, 128)
        # picks grp[c, c] == id of global row r*128 + c, for each lane c
        rows.append(jnp.sum(jnp.where(diag, grp, 0), axis=0, keepdims=True))
    packed = rows[0] if m == 1 else jnp.concatenate(rows, axis=0)      # (m, 128)
    ids_ref[0] = packed


def vq_embedding(x, codebook, *, tile_n=512, k_chunk=512, use_bf16_scores=True):
    """x: (B, T, D), codebook: (K, D).

    Returns (quantized (B,T,D), ids (B,T) int32, losses dict of (B,T,D))."""
    orig_dtype = x.dtype
    B, T, D = x.shape
    Kc_, Dc = codebook.shape
    assert Dc == D and Kc_ == K
    assert K % k_chunk == 0 and k_chunk % 128 == 0
    N = B * T

    # Per-generation sizing: 128-MiB VMEM parts (v5e/v6e) get bigger tiles and a
    # ~100 MiB limit; 64-MiB parts (v7x) stay <= 512 rows and <= 48 MiB requested.
    phys_vmem = _tpu_vmem_capacity_bytes()
    big_vmem = phys_vmem >= 96 * 1024 * 1024
    if not big_vmem:
        tile_n = min(tile_n, 512)

    # tile_n must be a multiple of 128 (lane-dense ids slabs); shrink for tiny
    # inputs so we do not pad excessively.
    tile_n = max(128, min(tile_n, 128 * pl.cdiv(N, 128)))
    # Prefer >= 2 grid steps so dimension_semantics=("parallel",) can split work
    # across the two v7x TensorCores (and megacore on other parts).
    if N > 128 and pl.cdiv(N, tile_n) < 2:
        tile_n = max(128, 128 * pl.cdiv(pl.cdiv(N, 2), 128))
    assert tile_n % 128 == 0
    m = tile_n // 128
    n_pad = pl.cdiv(N, tile_n) * tile_n
    num_tiles = n_pad // tile_n

    x2d = x.reshape(N, D).astype(jnp.float32)
    if n_pad != N:
        x2d = jnp.pad(x2d, ((0, n_pad - N), (0, 0)))

    wf = codebook.astype(jnp.float32)                       # (K, D) exact gather operand
    score_dtype = jnp.bfloat16 if use_bf16_scores else jnp.float32
    wt = wf.T.astype(score_dtype)                           # (D, K) pre-transposed, pre-cast once
    half_wsq = 0.5 * jnp.sum(wf * wf, axis=-1)[None, :]     # (1, K) f32

    # Rough VMEM budget: double-buffered x/q/loss tiles, resident codebook copies,
    # per-chunk (tile_n, k_chunk) temporaries, carries and ids-packing temps.
    sdb = 2 if use_bf16_scores else 4
    vmem_est = (
        3 * 2 * tile_n * D * 4                    # x / q / loss tiles, double-buffered
        + 2 * (D * K * sdb + K * D * 4 + K * 4)   # wT + w + half_wsq (default double buffer)
        + 2 * m * 128 * 4                         # packed ids tiles
        + 8 * tile_n * k_chunk * 4                # xw / scores / iota / onehot / temps
        + 4 * tile_n * D * 4                      # argmin / gather carries
        + 4 * tile_n * 128 * 4                    # ids packing temporaries
    )
    vmem_cap = (100 if big_vmem else 48) * 1024 * 1024
    vmem_limit = int(min(max(int(vmem_est * 1.5), 32 * 1024 * 1024), vmem_cap))

    kernel = functools.partial(_vq_kernel, k_chunk=k_chunk,
                               use_bf16_scores=use_bf16_scores)

    out_shapes = (
        jax.ShapeDtypeStruct((n_pad, D), jnp.float32),            # quantized
        jax.ShapeDtypeStruct((num_tiles, m, 128), jnp.int32),     # ids (lane-dense slabs)
        jax.ShapeDtypeStruct((n_pad, D), jnp.float32),            # (q - x)^2, written once
    )

    q2d, ids_pk, loss2d = pl.pallas_call(
        kernel,
        out_shape=out_shapes,
        grid_spec=pltpu.PrefetchScalarGridSpec(
            num_scalar_prefetch=0,
            grid=(num_tiles,),
            in_specs=[
                pl.BlockSpec((tile_n, D), lambda i: (i, 0)),      # x tile
                pl.BlockSpec((D, K), lambda i: (0, 0)),           # wT (resident, scores dtype)
                pl.BlockSpec((K, D), lambda i: (0, 0)),           # w  (resident, f32 gather)
                pl.BlockSpec((1, K), lambda i: (0, 0)),           # 0.5 * sum(W^2)
            ],
            out_specs=[
                pl.BlockSpec((tile_n, D), lambda i: (i, 0)),
                pl.BlockSpec((1, m, 128), lambda i: (i, 0, 0)),
                pl.BlockSpec((tile_n, D), lambda i: (i, 0)),
            ],
        ),
        compiler_params=pltpu.CompilerParams(
            dimension_semantics=("parallel",),
            vmem_limit_bytes=vmem_limit,
        ),
    )(x2d, wt, wf, half_wsq)

    quantized = q2d[:N].reshape(B, T, D).astype(orig_dtype)
    ids = ids_pk.reshape(-1)[:N].reshape(B, T)
    diff2 = loss2d[:N].reshape(B, T, D).astype(orig_dtype)
    # Both losses have identical forward values (detach only affects gradients);
    # the kernel writes the tensor once and both keys alias it.
    losses = {"commitment": diff2, "codebook": diff2}
    # TODO(synk): straight-through estimator ((q - x).detach() + x) and the
    # commitment/codebook detach split are gradient-only rewrites; forward values
    # are identical and returned as-is.
    return quantized, ids, losses


def _reference(x, codebook):
    B, T, D = x.shape
    xf = x.reshape(-1, D)
    dist = (jnp.sum(xf ** 2, axis=-1, keepdims=True)
            - 2.0 * xf @ codebook.T
            + jnp.sum(codebook ** 2, axis=-1))
    ids = jnp.argmin(dist, axis=-1)
    q = codebook[ids]
    loss = (q - xf) ** 2
    return q.reshape(B, T, D), ids.reshape(B, T), loss.reshape(B, T, D)


if __name__ == "__main__":
    # Small shapes: batch=2, seq=8, dmodel(hidden)=32
    B, T, D = 2, 8, 32
    key = jax.random.PRNGKey(0)
    k_x, k_w, k_x2 = jax.random.split(key, 3)
    x = jax.random.normal(k_x, (B, T, D), dtype=jnp.float32)
    codebook = 0.02 * jax.random.normal(k_w, (K, D), dtype=jnp.float32)

    # 1) Exact path (f32 scores): matches the f32 PyTorch forward bit-for-bit on ids.
    q, ids, losses = vq_embedding(x, codebook, use_bf16_scores=False)
    jax.block_until_ready((q, ids, losses))
    q_ref, ids_ref, loss_ref = _reference(x, codebook)
    assert jnp.array_equal(ids, ids_ref.astype(jnp.int32))
    assert jnp.allclose(q, q_ref, atol=1e-5, rtol=1e-5)
    assert jnp.allclose(losses["commitment"], loss_ref, atol=1e-5, rtol=1e-5)
    assert jnp.allclose(losses["codebook"], loss_ref, atol=1e-5, rtol=1e-5)

    # 2) Default fast path (bf16 scores, exact f32 gather): self-consistency checks
    #    (ids may legitimately differ from the f32 reference only on exact near-ties).
    q_b, ids_b, losses_b = vq_embedding(x, codebook)
    jax.block_until_ready((q_b, ids_b, losses_b))
    assert ids_b.shape == (B, T) and ids_b.dtype == jnp.int32
    q_gather = codebook[ids_b.reshape(-1)].reshape(B, T, D)
    assert jnp.allclose(q_b, q_gather, atol=1e-5, rtol=1e-5)
    assert jnp.allclose(losses_b["commitment"], (q_b - x) ** 2, atol=1e-5, rtol=1e-5)

    # 3) Multi-tile + padding path (N not a multiple of the tile; >= 2 grid steps).
    B2, T2 = 2, 200
    x2 = jax.random.normal(k_x2, (B2, T2, D), dtype=jnp.float32)
    q2, ids2, losses2 = vq_embedding(x2, codebook, use_bf16_scores=False)
    jax.block_until_ready((q2, ids2, losses2))
    q2_ref, ids2_ref, loss2_ref = _reference(x2, codebook)
    assert jnp.array_equal(ids2, ids2_ref.astype(jnp.int32))
    assert jnp.allclose(q2, q2_ref, atol=1e-5, rtol=1e-5)
    assert jnp.allclose(losses2["commitment"], loss2_ref, atol=1e-5, rtol=1e-5)

    print("KERNEL_OK")
</pallas_src>

<mosaic_0001>
module attributes {stable_mosaic.version = 11 : i64} {
  func.func @_vq_kernel(%arg0: i32, %arg1: memref<128x32xf32, #tpu.memory_space<vmem>>, %arg2: memref<32x2048xf32, #tpu.memory_space<vmem>>, %arg3: memref<2048x32xf32, #tpu.memory_space<vmem>>, %arg4: memref<1x2048xf32, #tpu.memory_space<vmem>>, %arg5: memref<128x32xf32, #tpu.memory_space<vmem>>, %arg6: memref<1x1x128xi32, #tpu.memory_space<vmem>>, %arg7: memref<128x32xf32, #tpu.memory_space<vmem>>) attributes {dimension_semantics = [#tpu.dimension_semantics<parallel>], iteration_bounds = array<i64: 1>, scalar_prefetch = 0 : i64, scratch_operands = 0 : i64, tpu.core_type = #tpu.core_type<tc>, window_params = [{transform_indices = @transform_0, window_bounds = array<i64: 128, 32>}, {pipeline_mode = #tpu.pipeline_mode<synchronous>, transform_indices = @transform_1, window_bounds = array<i64: 32, 2048>}, {pipeline_mode = #tpu.pipeline_mode<synchronous>, transform_indices = @transform_2, window_bounds = array<i64: 2048, 32>}, {pipeline_mode = #tpu.pipeline_mode<synchronous>, transform_indices = @transform_3, window_bounds = array<i64: 1, 2048>}, {transform_indices = @transform_4, window_bounds = array<i64: 128, 32>}, {transform_indices = @transform_5, window_bounds = array<i64: 1, 1, 128>}, {transform_indices = @transform_6, window_bounds = array<i64: 128, 32>}]} {
    %c0 = arith.constant 0 : index
    %c0_0 = arith.constant 0 : index
    %0 = vector.load %arg1[%c0, %c0_0] : memref<128x32xf32, #tpu.memory_space<vmem>>, vector<128x32xf32>
    %cst = arith.constant 0x7F800000 : f32
    %1 = vector.broadcast %cst : f32 to vector<128x1xf32>
    %c0_i32 = arith.constant 0 : i32
    %2 = vector.broadcast %c0_i32 : i32 to vector<128x1xi32>
    %cst_1 = arith.constant 0.000000e+00 : f32
    %3 = vector.broadcast %cst_1 : f32 to vector<128x32xf32>
    %c0_2 = arith.constant 0 : index
    %c0_3 = arith.constant 0 : index
    %4 = vector.load %arg2[%c0_2, %c0_3] : memref<32x2048xf32, #tpu.memory_space<vmem>>, vector<32x512xf32>
    %c0_4 = arith.constant 0 : index
    %c0_5 = arith.constant 0 : index
    %5 = vector.load %arg3[%c0_4, %c0_5] : memref<2048x32xf32, #tpu.memory_space<vmem>>, vector<512x32xf32>
    %c0_6 = arith.constant 0 : index
    %c0_7 = arith.constant 0 : index
    %6 = vector.load %arg4[%c0_6, %c0_7] : memref<1x2048xf32, #tpu.memory_space<vmem>>, vector<1x512xf32>
    %cst_8 = arith.constant dense<0.000000e+00> : vector<128x512xf32>
    %7 = tpu.matmul %0, %4, %cst_8 {dimension_numbers = #tpu.dot_dimension_numbers<[1], [0], [0], [1], [0, 0, 1, 1], [], []>} : vector<128x32xf32>, vector<32x512xf32>, vector<128x512xf32> -> vector<128x512xf32>
    %8 = vector.broadcast %6 : vector<1x512xf32> to vector<128x512xf32>
    %9 = arith.subf %8, %7 : vector<128x512xf32>
    %10 = tpu.iota {dimensions = array<i32: 1>} : vector<128x512xi32>
    %cst_9 = arith.constant dense<0x7F800000> : vector<128xf32>
    %11 = vector.multi_reduction <minimumf>, %9, %cst_9 [1] : vector<128x512xf32> to vector<128xf32>
    %12 = vector.shape_cast %11 : vector<128xf32> to vector<128x1xf32>
    %13 = vector.broadcast %12 : vector<128x1xf32> to vector<128x512xf32>
    %14 = arith.cmpf oeq, %9, %13 : vector<128x512xf32>
    %c512_i32 = arith.constant 512 : i32
    %15 = vector.broadcast %c512_i32 : i32 to vector<128x512xi32>
    %16 = arith.select %14, %10, %15 : vector<128x512xi1>, vector<128x512xi32>
    %cst_10 = arith.constant dense<2147483647> : vector<128xi32>
    %17 = vector.multi_reduction <minsi>, %16, %cst_10 [1] : vector<128x512xi32> to vector<128xi32>
    %18 = vector.shape_cast %17 : vector<128xi32> to vector<128x1xi32>
    %19 = vector.broadcast %18 : vector<128x1xi32> to vector<128x512xi32>
    %20 = arith.cmpi eq, %10, %19 : vector<128x512xi32>
    %21 = arith.extui %20 : vector<128x512xi1> to vector<128x512xi32>
    %22 = arith.sitofp %21 : vector<128x512xi32> to vector<128x512xf32>
    %cst_11 = arith.constant dense<0.000000e+00> : vector<128x32xf32>
    %23 = tpu.matmul %22, %5, %cst_11 {dimension_numbers = #tpu.dot_dimension_numbers<[1], [0], [0], [1], [0, 0, 1, 1], [], []>} : vector<128x512xf32>, vector<512x32xf32>, vector<128x32xf32> -> vector<128x32xf32>
    %24 = arith.cmpf olt, %12, %1 : vector<128x1xf32>
    %25 = arith.select %24, %12, %1 : vector<128x1xi1>, vector<128x1xf32>
    %c0_i32_12 = arith.constant 0 : i32
    %26 = vector.broadcast %c0_i32_12 : i32 to vector<128x1xi32>
    %27 = arith.addi %18, %26 : vector<128x1xi32>
    %28 = arith.select %24, %27, %2 : vector<128x1xi1>, vector<128x1xi32>
    %29 = vector.shape_cast %24 : vector<128x1xi1> to vector<128x1xi1>
    %30 = vector.broadcast %29 : vector<128x1xi1> to vector<128x32xi1>
    %31 = arith.select %30, %23, %3 : vector<128x32xi1>, vector<128x32xf32>
    %c0_13 = arith.constant 0 : index
    %c512 = arith.constant 512 : index
    %32 = vector.load %arg2[%c0_13, %c512] : memref<32x2048xf32, #tpu.memory_space<vmem>>, vector<32x512xf32>
    %c512_14 = arith.constant 512 : index
    %c0_15 = arith.constant 0 : index
    %33 = vector.load %arg3[%c512_14, %c0_15] : memref<2048x32xf32, #tpu.memory_space<vmem>>, vector<512x32xf32>
    %c0_16 = arith.constant 0 : index
    %c512_17 = arith.constant 512 : index
    %34 = vector.load %arg4[%c0_16, %c512_17] : memref<1x2048xf32, #tpu.memory_space<vmem>>, vector<1x512xf32>
    %cst_18 = arith.constant dense<0.000000e+00> : vector<128x512xf32>
    %35 = tpu.matmul %0, %32, %cst_18 {dimension_numbers = #tpu.dot_dimension_numbers<[1], [0], [0], [1], [0, 0, 1, 1], [], []>} : vector<128x32xf32>, vector<32x512xf32>, vector<128x512xf32> -> vector<128x512xf32>
    %36 = vector.broadcast %34 : vector<1x512xf32> to vector<128x512xf32>
    %37 = arith.subf %36, %35 : vector<128x512xf32>
    %38 = tpu.iota {dimensions = array<i32: 1>} : vector<128x512xi32>
    %cst_19 = arith.constant dense<0x7F800000> : vector<128xf32>
    %39 = vector.multi_reduction <minimumf>, %37, %cst_19 [1] : vector<128x512xf32> to vector<128xf32>
    %40 = vector.shape_cast %39 : vector<128xf32> to vector<128x1xf32>
    %41 = vector.broadcast %40 : vector<128x1xf32> to vector<128x512xf32>
    %42 = arith.cmpf oeq, %37, %41 : vector<128x512xf32>
    %c512_i32_20 = arith.constant 512 : i32
    %43 = vector.broadcast %c512_i32_20 : i32 to vector<128x512xi32>
    %44 = arith.select %42, %38, %43 : vector<128x512xi1>, vector<128x512xi32>
    %cst_21 = arith.constant dense<2147483647> : vector<128xi32>
    %45 = vector.multi_reduction <minsi>, %44, %cst_21 [1] : vector<128x512xi32> to vector<128xi32>
    %46 = vector.shape_cast %45 : vector<128xi32> to vector<128x1xi32>
    %47 = vector.broadcast %46 : vector<128x1xi32> to vector<128x512xi32>
    %48 = arith.cmpi eq, %38, %47 : vector<128x512xi32>
    %49 = arith.extui %48 : vector<128x512xi1> to vector<128x512xi32>
    %50 = arith.sitofp %49 : vector<128x512xi32> to vector<128x512xf32>
    %cst_22 = arith.constant dense<0.000000e+00> : vector<128x32xf32>
    %51 = tpu.matmul %50, %33, %cst_22 {dimension_numbers = #tpu.dot_dimension_numbers<[1], [0], [0], [1], [0, 0, 1, 1], [], []>} : vector<128x512xf32>, vector<512x32xf32>, vector<128x32xf32> -> vector<128x32xf32>
    %52 = arith.cmpf olt, %40, %25 : vector<128x1xf32>
    %53 = arith.select %52, %40, %25 : vector<128x1xi1>, vector<128x1xf32>
    %c512_i32_23 = arith.constant 512 : i32
    %54 = vector.broadcast %c512_i32_23 : i32 to vector<128x1xi32>
    %55 = arith.addi %46, %54 : vector<128x1xi32>
    %56 = arith.select %52, %55, %28 : vector<128x1xi1>, vector<128x1xi32>
    %57 = vector.shape_cast %52 : vector<128x1xi1> to vector<128x1xi1>
    %58 = vector.broadcast %57 : vector<128x1xi1> to vector<128x32xi1>
    %59 = arith.select %58, %51, %31 : vector<128x32xi1>, vector<128x32xf32>
    %c0_24 = arith.constant 0 : index
    %c1024 = arith.constant 1024 : index
    %60 = vector.load %arg2[%c0_24, %c1024] : memref<32x2048xf32, #tpu.memory_space<vmem>>, vector<32x512xf32>
    %c1024_25 = arith.constant 1024 : index
    %c0_26 = arith.constant 0 : index
    %61 = vector.load %arg3[%c1024_25, %c0_26] : memref<2048x32xf32, #tpu.memory_space<vmem>>, vector<512x32xf32>
    %c0_27 = arith.constant 0 : index
    %c1024_28 = arith.constant 1024 : index
    %62 = vector.load %arg4[%c0_27, %c1024_28] : memref<1x2048xf32, #tpu.memory_space<vmem>>, vector<1x512xf32>
    %cst_29 = arith.constant dense<0.000000e+00> : vector<128x512xf32>
    %63 = tpu.matmul %0, %60, %cst_29 {dimension_numbers = #tpu.dot_dimension_numbers<[1], [0], [0], [1], [0, 0, 1, 1], [], []>} : vector<128x32xf32>, vector<32x512xf32>, vector<128x512xf32> -> vector<128x512xf32>
    %64 = vector.broadcast %62 : vector<1x512xf32> to vector<128x512xf32>
    %65 = arith.subf %64, %63 : vector<128x512xf32>
    %66 = tpu.iota {dimensions = array<i32: 1>} : vector<128x512xi32>
    %cst_30 = arith.constant dense<0x7F800000> : vector<128xf32>
    %67 = vector.multi_reduction <minimumf>, %65, %cst_30 [1] : vector<128x512xf32> to vector<128xf32>
    %68 = vector.shape_cast %67 : vector<128xf32> to vector<128x1xf32>
    %69 = vector.broadcast %68 : vector<128x1xf32> to vector<128x512xf32>
    %70 = arith.cmpf oeq, %65, %69 : vector<128x512xf32>
    %c512_i32_31 = arith.constant 512 : i32
    %71 = vector.broadcast %c512_i32_31 : i32 to vector<128x512xi32>
    %72 = arith.select %70, %66, %71 : vector<128x512xi1>, vector<128x512xi32>
    %cst_32 = arith.constant dense<2147483647> : vector<128xi32>
    %73 = vector.multi_reduction <minsi>, %72, %cst_32 [1] : vector<128x512xi32> to vector<128xi32>
    %74 = vector.shape_cast %73 : vector<128xi32> to vector<128x1xi32>
    %75 = vector.broadcast %74 : vector<128x1xi32> to vector<128x512xi32>
    %76 = arith.cmpi eq, %66, %75 : vector<128x512xi32>
    %77 = arith.extui %76 : vector<128x512xi1> to vector<128x512xi32>
    %78 = arith.sitofp %77 : vector<128x512xi32> to vector<128x512xf32>
    %cst_33 = arith.constant dense<0.000000e+00> : vector<128x32xf32>
    %79 = tpu.matmul %78, %61, %cst_33 {dimension_numbers = #tpu.dot_dimension_numbers<[1], [0], [0], [1], [0, 0, 1, 1], [], []>} : vector<128x512xf32>, vector<512x32xf32>, vector<128x32xf32> -> vector<128x32xf32>
    %80 = arith.cmpf olt, %68, %53 : vector<128x1xf32>
    %81 = arith.select %80, %68, %53 : vector<128x1xi1>, vector<128x1xf32>
    %c1024_i32 = arith.constant 1024 : i32
    %82 = vector.broadcast %c1024_i32 : i32 to vector<128x1xi32>
    %83 = arith.addi %74, %82 : vector<128x1xi32>
    %84 = arith.select %80, %83, %56 : vector<128x1xi1>, vector<128x1xi32>
    %85 = vector.shape_cast %80 : vector<128x1xi1> to vector<128x1xi1>
    %86 = vector.broadcast %85 : vector<128x1xi1> to vector<128x32xi1>
    %87 = arith.select %86, %79, %59 : vector<128x32xi1>, vector<128x32xf32>
    %c0_34 = arith.constant 0 : index
    %c1536 = arith.constant 1536 : index
    %88 = vector.load %arg2[%c0_34, %c1536] : memref<32x2048xf32, #tpu.memory_space<vmem>>, vector<32x512xf32>
    %c1536_35 = arith.constant 1536 : index
    %c0_36 = arith.constant 0 : index
    %89 = vector.load %arg3[%c1536_35, %c0_36] : memref<2048x32xf32, #tpu.memory_space<vmem>>, vector<512x32xf32>
    %c0_37 = arith.constant 0 : index
    %c1536_38 = arith.constant 1536 : index
    %90 = vector.load %arg4[%c0_37, %c1536_38] : memref<1x2048xf32, #tpu.memory_space<vmem>>, vector<1x512xf32>
    %cst_39 = arith.constant dense<0.000000e+00> : vector<128x512xf32>
    %91 = tpu.matmul %0, %88, %cst_39 {dimension_numbers = #tpu.dot_dimension_numbers<[1], [0], [0], [1], [0, 0, 1, 1], [], []>} : vector<128x32xf32>, vector<32x512xf32>, vector<128x512xf32> -> vector<128x512xf32>
    %92 = vector.broadcast %90 : vector<1x512xf32> to vector<128x512xf32>
    %93 = arith.subf %92, %91 : vector<128x512xf32>
    %94 = tpu.iota {dimensions = array<i32: 1>} : vector<128x512xi32>
    %cst_40 = arith.constant dense<0x7F800000> : vector<128xf32>
    %95 = vector.multi_reduction <minimumf>, %93, %cst_40 [1] : vector<128x512xf32> to vector<128xf32>
    %96 = vector.shape_cast %95 : vector<128xf32> to vector<128x1xf32>
    %97 = vector.broadcast %96 : vector<128x1xf32> to vector<128x512xf32>
    %98 = arith.cmpf oeq, %93, %97 : vector<128x512xf32>
    %c512_i32_41 = arith.constant 512 : i32
    %99 = vector.broadcast %c512_i32_41 : i32 to vector<128x512xi32>
    %100 = arith.select %98, %94, %99 : vector<128x512xi1>, vector<128x512xi32>
    %cst_42 = arith.constant dense<2147483647> : vector<128xi32>
    %101 = vector.multi_reduction <minsi>, %100, %cst_42 [1] : vector<128x512xi32> to vector<128xi32>
    %102 = vector.shape_cast %101 : vector<128xi32> to vector<128x1xi32>
    %103 = vector.broadcast %102 : vector<128x1xi32> to vector<128x512xi32>
    %104 = arith.cmpi eq, %94, %103 : vector<128x512xi32>
    %105 = arith.extui %104 : vector<128x512xi1> to vector<128x512xi32>
    %106 = arith.sitofp %105 : vector<128x512xi32> to vector<128x512xf32>
    %cst_43 = arith.constant dense<0.000000e+00> : vector<128x32xf32>
    %107 = tpu.matmul %106, %89, %cst_43 {dimension_numbers = #tpu.dot_dimension_numbers<[1], [0], [0], [1], [0, 0, 1, 1], [], []>} : vector<128x512xf32>, vector<512x32xf32>, vector<128x32xf32> -> vector<128x32xf32>
    %108 = arith.cmpf olt, %96, %81 : vector<128x1xf32>
    %c1536_i32 = arith.constant 1536 : i32
    %109 = vector.broadcast %c1536_i32 : i32 to vector<128x1xi32>
    %110 = arith.addi %102, %109 : vector<128x1xi32>
    %111 = arith.select %108, %110, %84 : vector<128x1xi1>, vector<128x1xi32>
    %112 = vector.shape_cast %108 : vector<128x1xi1> to vector<128x1xi1>
    %113 = vector.broadcast %112 : vector<128x1xi1> to vector<128x32xi1>
    %114 = arith.select %113, %107, %87 : vector<128x32xi1>, vector<128x32xf32>
    %c0_44 = arith.constant 0 : index
    %c0_45 = arith.constant 0 : index
    %115 = vector.load %arg5[%c0_44, %c0_45] : memref<128x32xf32, #tpu.memory_space<vmem>>, vector<128x32xf32>
    tpu.vector_store %arg5[%c0_44, %c0_45], %114 {strides = array<i32>} : memref<128x32xf32, #tpu.memory_space<vmem>>, vector<128x32xf32>,
    %116 = arith.subf %114, %0 : vector<128x32xf32>
    %117 = arith.mulf %116, %116 : vector<128x32xf32>
    %c0_46 = arith.constant 0 : index
    %c0_47 = arith.constant 0 : index
    %118 = vector.load %arg7[%c0_46, %c0_47] : memref<128x32xf32, #tpu.memory_space<vmem>>, vector<128x32xf32>
    tpu.vector_store %arg7[%c0_46, %c0_47], %117 {strides = array<i32>} : memref<128x32xf32, #tpu.memory_space<vmem>>, vector<128x32xf32>,
    %119 = vector.shape_cast %111 : vector<128x1xi32> to vector<128x1xi32>
    %120 = vector.broadcast %119 : vector<128x1xi32> to vector<128x128xi32>
    %121 = tpu.iota {dimensions = array<i32: 0>} : vector<128x128xi32>
    %122 = tpu.iota {dimensions = array<i32: 1>} : vector<128x128xi32>
    %123 = arith.cmpi eq, %121, %122 : vector<128x128xi32>
    %c0_i32_48 = arith.constant 0 : i32
    %124 = vector.broadcast %c0_i32_48 : i32 to vector<128x128xi32>
    %125 = arith.select %123, %120, %124 : vector<128x128xi1>, vector<128x128xi32>
    %cst_49 = arith.constant dense<0> : vector<128xi32>
    %126 = vector.multi_reduction <add>, %125, %cst_49 [0] : vector<128x128xi32> to vector<128xi32>
    %127 = vector.shape_cast %126 : vector<128xi32> to vector<1x128xi32>
    %c0_50 = arith.constant 0 : index
    %c0_51 = arith.constant 0 : index
    %c0_52 = arith.constant 0 : index
    %128 = vector.load %arg6[%c0_50, %c0_51, %c0_52] : memref<1x1x128xi32, #tpu.memory_space<vmem>>, vector<1x1x128xi32>
    %129 = vector.shape_cast %128 : vector<1x1x128xi32> to vector<1x128xi32>
    %130 = vector.shape_cast %127 : vector<1x128xi32> to vector<1x1x128xi32>
    tpu.vector_store %arg6[%c0_50, %c0_51, %c0_52], %130 {strides = array<i32>} : memref<1x1x128xi32, #tpu.memory_space<vmem>>, vector<1x1x128xi32>,
    return
  }
  func.func @transform_0(%arg0: i32) -> (i32, i32) {
    %c0_i32 = arith.constant 0 : i32
    %c0_i32_0 = arith.constant 0 : i32
    return %arg0, %c0_i32 : i32, i32
  }
  func.func @transform_1(%arg0: i32) -> (i32, i32) {
    %c0_i32 = arith.constant 0 : i32
    %c0_i32_0 = arith.constant 0 : i32
    %c0_i32_1 = arith.constant 0 : i32
    return %c0_i32, %c0_i32_0 : i32, i32
  }
  func.func @transform_2(%arg0: i32) -> (i32, i32) {
    %c0_i32 = arith.constant 0 : i32
    %c0_i32_0 = arith.constant 0 : i32
    %c0_i32_1 = arith.constant 0 : i32
    return %c0_i32, %c0_i32_0 : i32, i32
  }
  func.func @transform_3(%arg0: i32) -> (i32, i32) {
    %c0_i32 = arith.constant 0 : i32
    %c0_i32_0 = arith.constant 0 : i32
    %c0_i32_1 = arith.constant 0 : i32
    return %c0_i32, %c0_i32_0 : i32, i32
  }
  func.func @transform_4(%arg0: i32) -> (i32, i32) {
    %c0_i32 = arith.constant 0 : i32
    %c0_i32_0 = arith.constant 0 : i32
    return %arg0, %c0_i32 : i32, i32
  }
  func.func @transform_5(%arg0: i32) -> (i32, i32, i32) {
    %c0_i32 = arith.constant 0 : i32
    %c0_i32_0 = arith.constant 0 : i32
    %c0_i32_1 = arith.constant 0 : i32
    return %arg0, %c0_i32, %c0_i32_0 : i32, i32, i32
  }
  func.func @transform_6(%arg0: i32) -> (i32, i32) {
    %c0_i32 = arith.constant 0 : i32
    %c0_i32_0 = arith.constant 0 : i32
    return %arg0, %c0_i32 : i32, i32
  }
}

</mosaic_0001>

<bundles_post_ra>
// kernel: tpu_custom_call.1
= control target key start
LH: loop header
LB: loop body
LE: loop exit
PB: predicated region body
PF: predicated region fallthrough
CT: control target
= control target key end

     0   :  { %v14241_v6 = vmov 0.0   ;;  %vm14523_vm0 = vcmask 261120   ;;  %s14234_s0 = inlined_call_operand.vmem [shape: f32[128,32], index: 0, kind: input, shape index: {}]   ;;  %s14235_s1 = inlined_call_operand.vmem [shape: f32[32,2048], index: 1, kind: input, shape index: {}]   ;;  %s14236_s2 = inlined_call_operand.vmem [shape: f32[2048,32], index: 2, kind: input, shape index: {}]   ;;  %s14237_s3 = inlined_call_operand.vmem [shape: f32[1,2048], index: 3, kind: input, shape index: {}]   ;;  %s14238_s4 = inlined_call_operand.vmem [shape: f32[128,32], index: 4, kind: output, shape index: {0}]   ;;  %s14239_s5 = inlined_call_operand.hbm [shape: s32[1,1,128], index: 5, kind: output, shape index: {1}]   ;;  %s14240_s6 = inlined_call_operand.vmem [shape: f32[128,32], index: 6, kind: output, shape index: {2}]  }
   0x1   :  { %v50_v0 = vld [vmem:[%s14235_s1 + $0x188] sm:$0xff]  ;;  %v49_v1 = vld [vmem:[%s14235_s1 + $0x180] sm:$0xff]  ;;  %v52_v3 = vld [vmem:[%s14235_s1 + $0x198] sm:$0xff]  ;;  %231 = vmatprep.mubr.f32.mxu0 %v14241_v6  ;;  %392 = vmatprep.mubr.f32.mxu1 %v14241_v6 }
   0x2   :  { %v46_v2 = vld [vmem:[%s14235_s1 + $0x108] sm:$0xff]  ;;  %191 = vmatprep.subr.mxu0 %v50_v0  ;;  %v45_v4 = vld [vmem:[%s14235_s1 + $0x100] sm:$0xff]  ;;  %v51_v5 = vld [vmem:[%s14235_s1 + $0x190] sm:$0xff]  ;;  %352 = vmatprep.subr.mxu1 %v52_v3 }
   0x3   :  { %192 = vmatpush1.msra.mxu0 %v49_v1  ;;  %v42_v7 = vld [vmem:[%s14235_s1 + $0x88] sm:$0xff]  ;;  %v48_v8 = vld [vmem:[%s14235_s1 + $0x118] sm:$0xff]  ;;  %353 = vmatpush1.msra.mxu1 %v51_v5  ;;  %v41_v9 = vld [vmem:[%s14235_s1 + $0x80] sm:$0xff] }
   0x4   :  { %193 = vmatprep.subr.mxu0 %v46_v2  ;;  %v47_v10 = vld [vmem:[%s14235_s1 + $0x110] sm:$0xff]  ;;  %v44_v11 = vld [vmem:[%s14235_s1 + $0x98] sm:$0xff]  ;;  %354 = vmatprep.subr.mxu1 %v48_v8  ;;  %v38_v12 = vld [vmem:[%s14235_s1 + $0x8] sm:$0xff] }
   0x5   :  { %194 = vmatpush1.msra.mxu0 %v45_v4  ;;  %v43_v13 = vld [vmem:[%s14235_s1 + $0x90] sm:$0xff]  ;;  %355 = vmatpush1.msra.mxu1 %v47_v10  ;;  %v37_v14 = vld [vmem:[%s14235_s1] sm:$0xff]  ;;  %v40_v15 = vld [vmem:[%s14235_s1 + $0x18] sm:$0xff] }
   0x6   :  { %195 = vmatprep.subr.mxu0 %v42_v7  ;;  %356 = vmatprep.subr.mxu1 %v44_v11  ;;  %v21_v16 = vld [vmem:[%s14234_s0] sm:$0xff]  ;;  %v39_v17 = vld [vmem:[%s14235_s1 + $0x10] sm:$0xff]  ;;  %v22_v18 = vld [vmem:[%s14234_s0 + $0x8] sm:$0xff] }
   0x7   :  { %196 = vmatpush1.msra.mxu0 %v41_v9  ;;  %357 = vmatpush1.msra.mxu1 %v43_v13 }
   0x8   :  { %197 = vmatprep.subr.mxu0 %v38_v12  ;;  %358 = vmatprep.subr.mxu1 %v40_v15 }
   0x9   :  { %198 = vmatpush1.msra.mxu0 %v37_v14  ;;  %359 = vmatpush1.msra.mxu1 %v39_v17 }
   0xa   :  { %6656 = vmatmul.mubr.msk.f32.vlgmr.msra.gmra.mxu0 %vm14523_vm0, %v21_v16  ;;  %6672 = vmatmul.mubr.msk.f32.vlgmr.msra.gmra.mxu1 %vm14523_vm0, %v21_v16 }
   0xb   :  { %237 = vmatprep.mubr.f32.mxu0 %v14241_v6 }
   0xc   :  { %12 = vsyncpa [#allocation3], 0  ;;  %398 = vmatprep.mubr.f32.mxu1 %v14241_v6  ;;  %v23_v19 = vld [vmem:[%s14234_s0 + $0x10] sm:$0xff]  ;;  %v24_v20 = vld [vmem:[%s14234_s0 + $0x18] sm:$0xff]  ;;  %v14243_v33 = vlaneseq }
   0xd   :  { %v25_v21 = vld [vmem:[%s14234_s0 + $0x20] sm:$0xff]  ;;  %v26_v22 = vld [vmem:[%s14234_s0 + $0x28] sm:$0xff]  ;;  %v27_v23 = vld [vmem:[%s14234_s0 + $0x30] sm:$0xff] }
   0xe   :  { %6657 = vmatmul.mubr.msk.f32.gmra.mxu0 %vm14523_vm0, %v22_v18  ;;  %6673 = vmatmul.mubr.msk.f32.gmra.mxu1 %vm14523_vm0, %v22_v18  ;;  %v28_v24 = vld [vmem:[%s14234_s0 + $0x38] sm:$0xff]  ;;  %v29_v25 = vld [vmem:[%s14234_s0 + $0x40] sm:$0xff]  ;;  %v30_v26 = vld [vmem:[%s14234_s0 + $0x48] sm:$0xff]  ;;  %v8224_v34 = vshrl.u32 %v14243_v33, 7 }
   0xf   :  { %243 = vmatprep.mubr.f32.mxu0 %v14241_v6  ;;  %404 = vmatprep.mubr.f32.mxu1 %v14241_v6  ;;  %v31_v27 = vld [vmem:[%s14234_s0 + $0x50] sm:$0xff]  ;;  %v32_v28 = vld [vmem:[%s14234_s0 + $0x58] sm:$0xff]  ;;  %v33_v29 = vld [vmem:[%s14234_s0 + $0x60] sm:$0xff] }
  0x10   :  { %v34_v30 = vld [vmem:[%s14234_s0 + $0x68] sm:$0xff]  ;;  %v35_v31 = vld [vmem:[%s14234_s0 + $0x70] sm:$0xff]  ;;  %v36_v32 = vld [vmem:[%s14234_s0 + $0x78] sm:$0xff]  ;;  %14554 = vst [vmem:[#allocation5_spill] sm:$0xff] %v8224_v34  ;;  %v8227_v35 = vsub.s32 0, %v8224_v34  ;;  %v8230_v36 = vsub.s32 1, %v8224_v34 }
  0x11   :  { %v8233_v37 = vsub.s32 2, %v8224_v34  ;;  %v117_v38 = vld [vmem:[%s14237_s3] sm:$0xf]  ;;  %v8248_v42 = vsub.s32 3, %v8224_v34 }
  0x12   :  { %6658 = vmatmul.mubr.msk.f32.gmra.mxu0 %vm14523_vm0, %v23_v19  ;;  %6674 = vmatmul.mubr.msk.f32.gmra.mxu1 %vm14523_vm0, %v23_v19  ;;  %14555 = vst [vmem:[#allocation6_spill] sm:$0xff] %v8227_v35  ;;  %14556 = vst [vmem:[#allocation7_spill] sm:$0xff] %v8230_v36  ;;  %v8239_v39 = vrot.slane %v117_v38, %v8227_v35  ;;  %v8242_v40 = vrot.slane %v117_v38, %v8230_v36 }
  0x13   :  { %249 = vmatprep.mubr.f32.mxu0 %v14241_v6  ;;  %410 = vmatprep.mubr.f32.mxu1 %v14241_v6  ;;  %14557 = vst [vmem:[#allocation8_spill] sm:$0xff] %v8233_v37  ;;  %v8245_v41 = vrot.slane %v117_v38, %v8233_v37  ;;  %14558 = vst [vmem:[#allocation9_spill] sm:$0xff] %v8248_v42  ;;  %v8260_v49 = vrot.slane %v117_v38, %v8248_v42 }
  0x16   :  { %6659 = vmatmul.mubr.msk.f32.gmra.mxu0 %vm14523_vm0, %v24_v20  ;;  %6675 = vmatmul.mubr.msk.f32.gmra.mxu1 %vm14523_vm0, %v24_v20 }
  0x17   :  { %255 = vmatprep.mubr.f32.mxu0 %v14241_v6  ;;  %416 = vmatprep.mubr.f32.mxu1 %v14241_v6 }
  0x1a   :  { %6660 = vmatmul.mubr.msk.f32.gmra.mxu0 %vm14523_vm0, %v25_v21  ;;  %6676 = vmatmul.mubr.msk.f32.gmra.mxu1 %vm14523_vm0, %v25_v21 }
  0x1b   :  { %261 = vmatprep.mubr.f32.mxu0 %v14241_v6  ;;  %422 = vmatprep.mubr.f32.mxu1 %v14241_v6 }
  0x1e   :  { %6661 = vmatmul.mubr.msk.f32.gmra.mxu0 %vm14523_vm0, %v26_v22  ;;  %6677 = vmatmul.mubr.msk.f32.gmra.mxu1 %vm14523_vm0, %v26_v22 }
  0x1f   :  { %267 = vmatprep.mubr.f32.mxu0 %v14241_v6  ;;  %428 = vmatprep.mubr.f32.mxu1 %v14241_v6 }
  0x22   :  { %6662 = vmatmul.mubr.msk.f32.gmra.mxu0 %vm14523_vm0, %v27_v23  ;;  %6678 = vmatmul.mubr.msk.f32.gmra.mxu1 %vm14523_vm0, %v27_v23 }
  0x23   :  { %273 = vmatprep.mubr.f32.mxu0 %v14241_v6  ;;  %434 = vmatprep.mubr.f32.mxu1 %v14241_v6 }
  0x26   :  { %6663 = vmatmul.mubr.msk.f32.gmra.mxu0 %vm14523_vm0, %v28_v24  ;;  %6679 = vmatmul.mubr.msk.f32.gmra.mxu1 %vm14523_vm0, %v28_v24 }
  0x27   :  { %279 = vmatprep.mubr.f32.mxu0 %v14241_v6  ;;  %440 = vmatprep.mubr.f32.mxu1 %v14241_v6 }
  0x2a   :  { %6664 = vmatmul.mubr.msk.f32.gmra.mxu0 %vm14523_vm0, %v29_v25  ;;  %6680 = vmatmul.mubr.msk.f32.gmra.mxu1 %vm14523_vm0, %v29_v25 }
  0x2b   :  { %285 = vmatprep.mubr.f32.mxu0 %v14241_v6  ;;  %446 = vmatprep.mubr.f32.mxu1 %v14241_v6 }
  0x2e   :  { %6665 = vmatmul.mubr.msk.f32.gmra.mxu0 %vm14523_vm0, %v30_v26  ;;  %6681 = vmatmul.mubr.msk.f32.gmra.mxu1 %vm14523_vm0, %v30_v26 }
  0x2f   :  { %291 = vmatprep.mubr.f32.mxu0 %v14241_v6  ;;  %452 = vmatprep.mubr.f32.mxu1 %v14241_v6 }
  0x32   :  { %6666 = vmatmul.mubr.msk.f32.gmra.mxu0 %vm14523_vm0, %v31_v27  ;;  %6682 = vmatmul.mubr.msk.f32.gmra.mxu1 %vm14523_vm0, %v31_v27 }
  0x33   :  { %297 = vmatprep.mubr.f32.mxu0 %v14241_v6  ;;  %458 = vmatprep.mubr.f32.mxu1 %v14241_v6 }
  0x36   :  { %6667 = vmatmul.mubr.msk.f32.gmra.mxu0 %vm14523_vm0, %v32_v28  ;;  %6683 = vmatmul.mubr.msk.f32.gmra.mxu1 %vm14523_vm0, %v32_v28 }
  0x37   :  { %303 = vmatprep.mubr.f32.mxu0 %v14241_v6  ;;  %464 = vmatprep.mubr.f32.mxu1 %v14241_v6 }
  0x3a   :  { %6668 = vmatmul.mubr.msk.f32.gmra.mxu0 %vm14523_vm0, %v33_v29  ;;  %6684 = vmatmul.mubr.msk.f32.gmra.mxu1 %vm14523_vm0, %v33_v29 }
  0x3b   :  { %309 = vmatprep.mubr.f32.mxu0 %v14241_v6  ;;  %470 = vmatprep.mubr.f32.mxu1 %v14241_v6 }
  0x3e   :  { %6669 = vmatmul.mubr.msk.f32.gmra.mxu0 %vm14523_vm0, %v34_v30  ;;  %6685 = vmatmul.mubr.msk.f32.gmra.mxu1 %vm14523_vm0, %v34_v30 }
  0x3f   :  { %315 = vmatprep.mubr.f32.mxu0 %v14241_v6  ;;  %476 = vmatprep.mubr.f32.mxu1 %v14241_v6 }
  0x42   :  { %6670 = vmatmul.mubr.msk.f32.gmra.mxu0 %vm14523_vm0, %v35_v31  ;;  %6686 = vmatmul.mubr.msk.f32.gmra.mxu1 %vm14523_vm0, %v35_v31 }
  0x43   :  { %321 = vmatprep.mubr.f32.mxu0 %v14241_v6  ;;  %482 = vmatprep.mubr.f32.mxu1 %v14241_v6 }
  0x46   :  { %6671 = vmatmul.mubr.msk.f32.gmra.mxu0 %vm14523_vm0, %v36_v32  ;;  %6687 = vmatmul.mubr.msk.f32.gmra.mxu1 %vm14523_vm0, %v36_v32 }
  0xca   :  { %v233_v43 = vpop.f32.mrf.mxu0  ;;  %v394_v45 = vpop.f32.mrf.mxu1 }
  0xcb   :  { %v8251_v46 = vsub.f32 %v8239_v39, %v233_v43  ;;  %v8257_v48 = vsub.f32 %v8245_v41, %v394_v45 }
  0xcc   :  { %v235_v44 = vpop.f32.mrf.mxu0  ;;  %v396_v51 = vpop.f32.mrf.mxu1 }
  0xcd   :  { %v8254_v47 = vsub.f32 %v8242_v40, %v235_v44  ;;  %v8268_v56 = vsub.f32 %v8260_v49, %v396_v51 }
  0xce   :  { %v239_v50 = vpop.f32.mrf.mxu0  ;;  %v400_v55 = vpop.f32.mrf.mxu1 }
  0xcf   :  { %v579_v52 = vmin.f32 %v8251_v46, %v8254_v47  ;;  %v8265_v53 = vsub.f32 %v8239_v39, %v239_v50  ;;  %v8274_v58 = vsub.f32 %v8245_v41, %v400_v55 }
  0xd0   :  { %v241_v54 = vpop.f32.mrf.mxu0  ;;  %v402_v61 = vpop.f32.mrf.mxu1 }
  0xd1   :  { %v8271_v57 = vsub.f32 %v8242_v40, %v241_v54  ;;  %v580_v59 = vmin.f32 %v579_v52, %v8257_v48  ;;  %v8285_v4 = vsub.f32 %v8260_v49, %v402_v61 }
  0xd2   :  { %v245_v60 = vpop.f32.mrf.mxu0  ;;  %v406_v2 = vpop.f32.mrf.mxu1 }
  0xd3   :  { %v584_v62 = vmin.f32 %v8265_v53, %v8271_v57  ;;  %v581_v63 = vmin.f32 %v580_v59, %v8268_v56  ;;  %v8281_v0 = vsub.f32 %v8239_v39, %v245_v60  ;;  %v8291_v7 = vsub.f32 %v8245_v41, %v406_v2 }
  0xd4   :  { %v247_v1 = vpop.f32.mrf.mxu0  ;;  %v408_v9 = vpop.f32.mrf.mxu1 }
  0xd5   :  { %v585_v3 = vmin.f32 %v584_v62, %v8274_v58  ;;  %v8288_v5 = vsub.f32 %v8242_v40, %v247_v1  ;;  %582 = vmin.xlane.f32.xlu0 %v581_v63  ;;  %v8300_v15 = vsub.f32 %v8260_v49, %v408_v9 }
  0xd6   :  { %v251_v8 = vpop.f32.mrf.mxu0  ;;  %v412_v14 = vpop.f32.mrf.mxu1 }
  0xd7   :  { %v589_v10 = vmin.f32 %v8281_v0, %v8288_v5  ;;  %v586_v11 = vmin.f32 %v585_v3, %v8285_v4  ;;  %v8297_v12 = vsub.f32 %v8239_v39, %v251_v8  ;;  %v8306_v17 = vsub.f32 %v8245_v41, %v412_v14 }
  0xd8   :  { %v253_v13 = vpop.f32.mrf.mxu0  ;;  %v414_v20 = vpop.f32.mrf.mxu1 }
  0xd9   :  { %v8303_v16 = vsub.f32 %v8242_v40, %v253_v13  ;;  %587 = vmin.xlane.f32.xlu0 %v586_v11  ;;  %v590_v18 = vmin.f32 %v589_v10, %v8291_v7  ;;  %v8317_v27 = vsub.f32 %v8260_v49, %v414_v20 }
  0xda   :  { %v257_v19 = vpop.f32.mrf.mxu0  ;;  %v418_v25 = vpop.f32.mrf.mxu1 }
  0xdb   :  { %v594_v21 = vmin.f32 %v8297_v12, %v8303_v16  ;;  %v591_v22 = vmin.f32 %v590_v18, %v8300_v15  ;;  %v8313_v23 = vsub.f32 %v8239_v39, %v257_v19  ;;  %v8323_v29 = vsub.f32 %v8245_v41, %v418_v25 }
  0xdc   :  { %v259_v24 = vpop.f32.mrf.mxu0  ;;  %v420_v31 = vpop.f32.mrf.mxu1 }
  0xdd   :  { %v595_v26 = vmin.f32 %v594_v21, %v8306_v17  ;;  %v8320_v28 = vsub.f32 %v8242_v40, %v259_v24  ;;  %592 = vmin.xlane.f32.xlu1 %v591_v22  ;;  %v8333_v51 = vsub.f32 %v8260_v49, %v420_v31 }
  0xde   :  { %v263_v30 = vpop.f32.mrf.mxu0  ;;  %v424_v45 = vpop.f32.mrf.mxu1 }
  0xdf   :  { %v599_v32 = vmin.f32 %v8313_v23, %v8320_v28  ;;  %v596_v38 = vmin.f32 %v595_v26, %v8317_v27  ;;  %v8329_v43 = vsub.f32 %v8239_v39, %v263_v30  ;;  %v8339_v54 = vsub.f32 %v8245_v41, %v424_v45 }
  0xe0   :  { %v265_v44 = vpop.f32.mrf.mxu0  ;;  %v426_v59 = vpop.f32.mrf.mxu1 }
  0xe1   :  { %v600_v50 = vmin.f32 %v599_v32, %v8323_v29  ;;  %v8336_v52 = vsub.f32 %v8242_v40, %v265_v44  ;;  %597 = vmin.xlane.f32.xlu1 %v596_v38  ;;  %v8349_v3 = vsub.f32 %v8260_v49, %v426_v59 }
  0xe2   :  { %v269_v55 = vpop.f32.mrf.mxu0  ;;  %v430_v1 = vpop.f32.mrf.mxu1 }
  0xe3   :  { %v604_v60 = vmin.f32 %v8329_v43, %v8336_v52  ;;  %v601_v61 = vmin.f32 %v600_v50, %v8333_v51  ;;  %v8345_v62 = vsub.f32 %v8239_v39, %v269_v55  ;;  %v8355_v9 = vsub.f32 %v8245_v41, %v430_v1 }
  0xe4   :  { %v271_v63 = vpop.f32.mrf.mxu0  ;;  %v432_v11 = vpop.f32.mrf.mxu1 }
  0xe5   :  { %v605_v2 = vmin.f32 %v604_v60, %v8339_v54  ;;  %v8352_v8 = vsub.f32 %v8242_v40, %v271_v63  ;;  %602 = vmin.xlane.f32.xlu0 %v601_v61  ;;  %v8365_v22 = vsub.f32 %v8260_v49, %v432_v11 }
  0xe6   :  { %v275_v10 = vpop.f32.mrf.mxu0  ;;  %v436_v20 = vpop.f32.mrf.mxu1 }
  0xe7   :  { %v609_v13 = vmin.f32 %v8345_v62, %v8352_v8  ;;  %v606_v14 = vmin.f32 %v605_v2, %v8349_v3  ;;  %v8361_v18 = vsub.f32 %v8239_v39, %v275_v10  ;;  %v8371_v25 = vsub.f32 %v8245_v41, %v436_v20 }
  0xe8   :  { %v277_v19 = vpop.f32.mrf.mxu0  ;;  %v438_v30 = vpop.f32.mrf.mxu1 }
  0xe9   :  { %v610_v21 = vmin.f32 %v609_v13, %v8355_v9  ;;  %v8368_v24 = vsub.f32 %v8242_v40, %v277_v19  ;;  %607 = vmin.xlane.f32.xlu1 %v606_v14  ;;  %v8381_v55 = vsub.f32 %v8260_v49, %v438_v30 }
  0xea   :  { %v281_v26 = vpop.f32.mrf.mxu0  ;;  %v442_v45 = vpop.f32.mrf.mxu1 }
  0xeb   :  { %v614_v31 = vmin.f32 %v8361_v18, %v8368_v24  ;;  %v611_v32 = vmin.f32 %v610_v21, %v8365_v22  ;;  %v8377_v38 = vsub.f32 %v8239_v39, %v281_v26  ;;  %v8387_v60 = vsub.f32 %v8245_v41, %v442_v45 }
  0xec   :  { %v283_v44 = vpop.f32.mrf.mxu0  ;;  %v444_v63 = vpop.f32.mrf.mxu1 }
  0xed   :  { %v615_v50 = vmin.f32 %v614_v31, %v8371_v25  ;;  %v8384_v59 = vsub.f32 %v8242_v40, %v283_v44  ;;  %612 = vmin.xlane.f32.xlu0 %v611_v32  ;;  %v8397_v19 = vsub.f32 %v8260_v49, %v444_v63 }
  0xee   :  { %v287_v61 = vpop.f32.mrf.mxu0  ;;  %v448_v13 = vpop.f32.mrf.mxu1 }
  0xef   :  { %v619_v1 = vmin.f32 %v8377_v38, %v8384_v59  ;;  %v616_v2 = vmin.f32 %v615_v50, %v8381_v55  ;;  %v8393_v10 = vsub.f32 %v8239_v39, %v287_v61  ;;  %v8403_v21 = vsub.f32 %v8245_v41, %v448_v13 }
  0xf0   :  { %v289_v11 = vpop.f32.mrf.mxu0  ;;  %v450_v30 = vpop.f32.mrf.mxu1 }
  0xf1   :  { %v620_v14 = vmin.f32 %v619_v1, %v8387_v60  ;;  %v8400_v20 = vsub.f32 %v8242_v40, %v289_v11  ;;  %617 = vmin.xlane.f32.xlu1 %v616_v2  ;;  %v8413_v63 = vsub.f32 %v8260_v49, %v450_v30 }
  0xf2   :  { %v293_v26 = vpop.f32.mrf.mxu0  ;;  %v454_v50 = vpop.f32.mrf.mxu1 }
  0xf3   :  { %v624_v31 = vmin.f32 %v8393_v10, %v8400_v20  ;;  %v621_v32 = vmin.f32 %v620_v14, %v8397_v19  ;;  %v8409_v44 = vsub.f32 %v8239_v39, %v293_v26  ;;  %v8419_v2 = vsub.f32 %v8245_v41, %v454_v50 }
  0xf4   :  { %v295_v45 = vpop.f32.mrf.mxu0  ;;  %v456_v13 = vpop.f32.mrf.mxu1 }
  0xf5   :  { %v625_v61 = vmin.f32 %v624_v31, %v8403_v21  ;;  %v8416_v1 = vsub.f32 %v8242_v40, %v295_v45  ;;  %622 = vmin.xlane.f32.xlu0 %v621_v32  ;;  %v8429_v45 = vsub.f32 %v8260_v49, %v456_v13 }
  0xf6   :  { %v299_v11 = vpop.f32.mrf.mxu0  ;;  %v460_v30 = vpop.f32.mrf.mxu1 }
  0xf7   :  { %v629_v14 = vmin.f32 %v8409_v44, %v8416_v1  ;;  %v626_v26 = vmin.f32 %v625_v61, %v8413_v63  ;;  %v8425_v6 = vsub.f32 %v8239_v39, %v299_v11  ;;  %v8435_v32 = vsub.f32 %v8245_v41, %v460_v30 }
  0xf8   :  { %v301_v31 = vpop.f32.mrf.mxu0  ;;  %v462_v42 = vpop.f32.mrf.mxu1 }
  0xf9   :  { %14559 = vst [vmem:[#allocation10_spill] sm:$0xff] %v8425_v6  ;;  %v630_v33 = vmin.f32 %v629_v14, %v8419_v2  ;;  %v8432_v50 = vsub.f32 %v8242_v40, %v301_v31  ;;  %14561 = vst [vmem:[#allocation12_spill] sm:$0xff] %v8435_v32  ;;  %627 = vmin.xlane.f32.xlu1 %v626_v26  ;;  %v8445_v31 = vsub.f32 %v8260_v49, %v462_v42 }
  0xfa   :  { %v305_v34 = vpop.f32.mrf.mxu0  ;;  %v466_v13 = vpop.f32.mrf.mxu1 }
  0xfb   :  { %14560 = vst [vmem:[#allocation11_spill] sm:$0xff] %v8432_v50  ;;  %v634_v61 = vmin.f32 %v8425_v6, %v8432_v50  ;;  %v631_v11 = vmin.f32 %v630_v33, %v8429_v45  ;;  %v8441_v37 = vsub.f32 %v8239_v39, %v305_v34  ;;  %14563 = vst [vmem:[#allocation14_spill] sm:$0xff] %v8445_v31 }
  0xfc   :  { %v307_v14 = vpop.f32.mrf.mxu0  ;;  %v8451_v26 = vsub.f32 %v8245_v41, %v466_v13  ;;  %v468_v50 = vpop.f32.mrf.mxu1 }
  0xfd   :  { %14562 = vst [vmem:[#allocation13_spill] sm:$0xff] %v8441_v37  ;;  %v635_v36 = vmin.f32 %v634_v61, %v8435_v32  ;;  %v8448_v30 = vsub.f32 %v8242_v40, %v307_v14  ;;  %632 = vmin.xlane.f32.xlu0 %v631_v11  ;;  %v8461_v14 = vsub.f32 %v8260_v49, %v468_v50 }
  0xfe   :  { %14565 = vst [vmem:[#allocation16_spill] sm:$0xff] %v8451_v26  ;;  %v311_v35 = vpop.f32.mrf.mxu0  ;;  %v472_v42 = vpop.f32.mrf.mxu1 }
  0xff   :  { %14564 = vst [vmem:[#allocation15_spill] sm:$0xff] %v8448_v30  ;;  %v639_v33 = vmin.f32 %v8441_v37, %v8448_v30  ;;  %v636_v34 = vmin.f32 %v635_v36, %v8445_v31  ;;  %v8457_v6 = vsub.f32 %v8239_v39, %v311_v35  ;;  %14567 = vst [vmem:[#allocation18_spill] sm:$0xff] %v8461_v14 }
 0x100   :  { %v313_v61 = vpop.f32.mrf.mxu0  ;;  %v8467_v11 = vsub.f32 %v8245_v41, %v472_v42  ;;  %v474_v37 = vpop.f32.mrf.mxu1 }
 0x101   :  { %14566 = vst [vmem:[#allocation17_spill] sm:$0xff] %v8457_v6  ;;  %v640_v32 = vmin.f32 %v639_v33, %v8451_v26  ;;  %v8464_v13 = vsub.f32 %v8242_v40, %v313_v61  ;;  %637 = vmin.xlane.f32.xlu1 %v636_v34  ;;  %v8477_v61 = vsub.f32 %v8260_v49, %v474_v37 }
 0x102   :  { %14569 = vst [vmem:[#allocation20_spill] sm:$0xff] %v8467_v11  ;;  %v317_v30 = vpop.f32.mrf.mxu0  ;;  %v478_v50 = vpop.f32.mrf.mxu1 }
 0x103   :  { %14568 = vst [vmem:[#allocation19_spill] sm:$0xff] %v8464_v13  ;;  %v644_v35 = vmin.f32 %v8457_v6, %v8464_v13  ;;  %v641_v36 = vmin.f32 %v640_v32, %v8461_v14  ;;  %v8473_v31 = vsub.f32 %v8239_v39, %v317_v30  ;;  %v8483_v34 = vsub.f32 %v8245_v41, %v478_v50 }
 0x104   :  { %v319_v33 = vpop.f32.mrf.mxu0  ;;  %v480_v6 = vpop.f32.mrf.mxu1 }
 0x105   :  { %v645_v26 = vmin.f32 %v644_v35, %v8467_v11  ;;  %v8480_v42 = vsub.f32 %v8242_v40, %v319_v33  ;;  %642 = vmin.xlane.f32.xlu0 %v641_v36  ;;  %v8493_v33 = vsub.f32 %v8260_v49, %v480_v6 }
 0x106   :  { %v323_v13 = vpop.f32.mrf.mxu0  ;;  %v484_v37 = vpop.f32.mrf.mxu1 }
 0x107   :  { %14570 = vst [vmem:[#allocation21_spill] sm:$0xff] %v8480_v42  ;;  %v649_v32 = vmin.f32 %v8473_v31, %v8480_v42  ;;  %v646_v30 = vmin.f32 %v645_v26, %v8477_v61  ;;  %v8489_v14 = vsub.f32 %v8239_v39, %v323_v13  ;;  %v8499_v36 = vsub.f32 %v8245_v41, %v484_v37 }
 0x108   :  { %v325_v35 = vpop.f32.mrf.mxu0  ;;  %v486_v42 = vpop.f32.mrf.mxu1 }
 0x109   :  { %v650_v11 = vmin.f32 %v649_v32, %v8483_v34  ;;  %v8496_v50 = vsub.f32 %v8242_v40, %v325_v35  ;;  %647 = vmin.xlane.f32.xlu1 %v646_v30  ;;  %v8506_v32 = vsub.f32 %v8260_v49, %v486_v42  ;;  %v14571_v40 = vlaneseq }
 0x10b   :  { %v654_v26 = vmin.f32 %v8489_v14, %v8496_v50  ;;  %v651_v39 = vmin.f32 %v650_v11, %v8493_v33  ;;  %v8510_v35 = vand.u32 127, %v14571_v40 }
 0x10d   :  { %v655_v13 = vmin.f32 %v654_v26, %v8499_v36  ;;  %652 = vmin.xlane.f32.xlu0 %v651_v39  ;;  %14572 = vst [vmem:[#allocation22_spill] sm:$0xff] %v8510_v35  ;;  %v8513_v41 = vadd.s32 128, %v8510_v35  ;;  %v8518_v37 = vadd.s32 256, %v8510_v35  ;;  %v8527_v49 = vadd.s32 384, %v8510_v35 }
 0x10f   :  { %v656_v6 = vmin.f32 %v655_v13, %v8506_v32  ;;  %14573 = vst [vmem:[#allocation23_spill] sm:$0xff] %v8513_v41  ;;  %14575 = vst [vmem:[#allocation25_spill] sm:$0xff] %v8518_v37 }
 0x110   :  { %14576 = vst [vmem:[#allocation26_spill] sm:$0xff] %v8527_v49 }
 0x111   :  { %657 = vmin.xlane.f32.xlu1 %v656_v6 }
 0x15e   :  { %v8515_v30 = vpop.xlane.xlu0 %582 }
 0x15f   :  { %14574 = vst [vmem:[#allocation24_spill] sm:$0xff] %v8515_v30  ;;  %vm659_vm1 = vcmp.eq.f32.partialorder %v8251_v46, %v8515_v30  ;;  %vm660_vm2 = vcmp.eq.f32.partialorder %v8254_v47, %v8515_v30  ;;  %vm661_vm3 = vcmp.eq.f32.partialorder %v8257_v48, %v8515_v30  ;;  %vm662_vm4 = vcmp.eq.f32.partialorder %v8268_v56, %v8515_v30 }
 0x160   :  { %v723_v11 = vsel %vm659_vm1, %v8510_v35, 512  ;;  %v724_v42 = vsel %vm660_vm2, %v8513_v41, 512  ;;  %v725_v46 = vsel %vm661_vm3, %v8518_v37, 512  ;;  %v726_v47 = vsel %vm662_vm4, %v8527_v49, 512 }
 0x161   :  { %vm787_vm5 = vcmp.lt.s32.totalorder %v723_v11, %v724_v42 }
 0x162   :  { %v8533_v26 = vpop.xlane.xlu0 %587  ;;  %v788_v39 = vsel %vm787_vm5, %v723_v11, %v724_v42 }
 0x163   :  { %14577 = vst [vmem:[#allocation27_spill] sm:$0xff] %v8533_v26  ;;  %vm789_vm6 = vcmp.lt.s32.totalorder %v788_v39, %v725_v46  ;;  %vm663_vm7 = vcmp.eq.f32.partialorder %v8265_v53, %v8533_v26  ;;  %vm664_vm8 = vcmp.eq.f32.partialorder %v8271_v57, %v8533_v26  ;;  %vm665_vm9 = vcmp.eq.f32.partialorder %v8274_v58, %v8533_v26 }
 0x164   :  { %v790_v48 = vsel %vm789_vm6, %v788_v39, %v725_v46  ;;  %v727_v56 = vsel %vm663_vm7, %v8510_v35, 512  ;;  %v728_v13 = vsel %vm664_vm8, %v8513_v41, 512  ;;  %vm666_vm11 = vcmp.eq.f32.partialorder %v8285_v4, %v8533_v26 }
 0x165   :  { %vm791_vm10 = vcmp.lt.s32.totalorder %v790_v48, %v726_v47  ;;  %vm807_vm12 = vcmp.lt.s32.totalorder %v727_v56, %v728_v13  ;;  %v729_v57 = vsel %vm665_vm9, %v8518_v37, 512  ;;  %v730_v11 = vsel %vm666_vm11, %v8527_v49, 512 }
 0x166   :  { %v8547_v6 = vpop.xlane.xlu1 %592  ;;  %v8549_v53 = vsel %vm791_vm10, %v790_v48, %v726_v47  ;;  %v808_v40 = vsel %vm807_vm12, %v727_v56, %v728_v13 }
 0x167   :  { %14578 = vst [vmem:[#allocation28_spill] sm:$0xff] %v8547_v6  ;;  %v794_v58 = vshra.s32 %v8549_v53, 16  ;;  %vm809_vm13 = vcmp.lt.s32.totalorder %v808_v40, %v729_v57  ;;  %vm667_vm14 = vcmp.eq.f32.partialorder %v8281_v0, %v8547_v6  ;;  %vm668_vm15 = vcmp.eq.f32.partialorder %v8288_v5, %v8547_v6 }
 0x168   :  { %v810_v4 = vsel %vm809_vm13, %v808_v40, %v729_v57  ;;  %vm669_vm1 = vcmp.eq.f32.partialorder %v8291_v7, %v8547_v6  ;;  %v731_v42 = vsel %vm667_vm14, %v8510_v35, 512  ;;  %vm670_vm3 = vcmp.eq.f32.partialorder %v8300_v15, %v8547_v6 }
 0x169   :  { %v8561_v46 = vcvt.s32.f32 %v794_v58  ;;  %vm811_vm2 = vcmp.lt.s32.totalorder %v810_v4, %v730_v11  ;;  %v732_v39 = vsel %vm668_vm15, %v8513_v41, 512  ;;  %v733_v5 = vsel %vm669_vm1, %v8518_v37, 512 }
 0x16a   :  { %v8566_v0 = vpop.xlane.xlu1 %597  ;;  %v8568_v47 = vsel %vm811_vm2, %v810_v4, %v730_v11  ;;  %vm827_vm4 = vcmp.lt.s32.totalorder %v731_v42, %v732_v39  ;;  %v734_v15 = vsel %vm670_vm3, %v8527_v49, 512 }
 0x16b   :  { %14579 = vst [vmem:[#allocation29_spill] sm:$0xff] %v8566_v0  ;;  %797 = vmin.xlane.f32.xlu0 %v8561_v46  ;;  %v814_v7 = vshra.s32 %v8568_v47, 16  ;;  %v828_v48 = vsel %vm827_vm4, %v731_v42, %v732_v39  ;;  %vm671_vm5 = vcmp.eq.f32.partialorder %v8297_v12, %v8566_v0  ;;  %vm672_vm6 = vcmp.eq.f32.partialorder %v8303_v16, %v8566_v0 }
 0x16c   :  { %vm829_vm7 = vcmp.lt.s32.totalorder %v828_v48, %v733_v5  ;;  %vm673_vm8 = vcmp.eq.f32.partialorder %v8306_v17, %v8566_v0  ;;  %v735_v56 = vsel %vm671_vm5, %v8510_v35, 512  ;;  %vm674_vm9 = vcmp.eq.f32.partialorder %v8317_v27, %v8566_v0 }
 0x16d   :  { %v8581_v13 = vcvt.s32.f32 %v814_v7  ;;  %v830_v57 = vsel %vm829_vm7, %v828_v48, %v733_v5  ;;  %v736_v40 = vsel %vm672_vm6, %v8513_v41, 512  ;;  %v737_v16 = vsel %vm673_vm8, %v8518_v37, 512 }
 0x16e   :  { %v8586_v12 = vpop.xlane.xlu0 %602  ;;  %vm831_vm10 = vcmp.lt.s32.totalorder %v830_v57, %v734_v15  ;;  %vm847_vm11 = vcmp.lt.s32.totalorder %v735_v56, %v736_v40  ;;  %v738_v11 = vsel %vm674_vm9, %v8527_v49, 512 }
 0x16f   :  { %14580 = vst [vmem:[#allocation30_spill] sm:$0xff] %v8586_v12  ;;  %817 = vmin.xlane.f32.xlu1 %v8581_v13  ;;  %v8590_v58 = vsel %vm831_vm10, %v830_v57, %v734_v15  ;;  %v848_v17 = vsel %vm847_vm11, %v735_v56, %v736_v40  ;;  %vm675_vm12 = vcmp.eq.f32.partialorder %v8313_v23, %v8586_v12 }
 0x170   :  { %vm676_vm13 = vcmp.eq.f32.partialorder %v8320_v28, %v8586_v12  ;;  %v834_v27 = vshra.s32 %v8590_v58, 16  ;;  %vm849_vm14 = vcmp.lt.s32.totalorder %v848_v17, %v737_v16  ;;  %vm677_vm15 = vcmp.eq.f32.partialorder %v8323_v29, %v8586_v12 }
 0x171   :  { %v850_v4 = vsel %vm849_vm14, %v848_v17, %v737_v16  ;;  %vm678_vm1 = vcmp.eq.f32.partialorder %v8333_v51, %v8586_v12  ;;  %v739_v42 = vsel %vm675_vm12, %v8510_v35, 512  ;;  %v740_v39 = vsel %vm676_vm13, %v8513_v41, 512 }
 0x172   :  { %v8604_v23 = vpop.xlane.xlu1 %607  ;;  %v8606_v5 = vcvt.s32.f32 %v834_v27  ;;  %vm851_vm2 = vcmp.lt.s32.totalorder %v850_v4, %v738_v11  ;;  %v741_v28 = vsel %vm677_vm15, %v8518_v37, 512  ;;  %vm867_vm3 = vcmp.lt.s32.totalorder %v739_v42, %v740_v39 }
 0x173   :  { %14581 = vst [vmem:[#allocation31_spill] sm:$0xff] %v8604_v23  ;;  %v8609_v7 = vsel %vm851_vm2, %v850_v4, %v738_v11  ;;  %v868_v48 = vsel %vm867_vm3, %v739_v42, %v740_v39  ;;  %vm679_vm4 = vcmp.eq.f32.partialorder %v8329_v43, %v8604_v23  ;;  %vm680_vm5 = vcmp.eq.f32.partialorder %v8336_v52, %v8604_v23 }
 0x174   :  { %837 = vmin.xlane.f32.xlu0 %v8606_v5  ;;  %v854_v29 = vshra.s32 %v8609_v7, 16  ;;  %v742_v51 = vsel %vm678_vm1, %v8527_v49, 512  ;;  %vm869_vm6 = vcmp.lt.s32.totalorder %v868_v48, %v741_v28  ;;  %vm681_vm7 = vcmp.eq.f32.partialorder %v8339_v54, %v8604_v23 }
 0x175   :  { %v870_v15 = vsel %vm869_vm6, %v868_v48, %v741_v28  ;;  %vm682_vm8 = vcmp.eq.f32.partialorder %v8349_v3, %v8604_v23  ;;  %v743_v56 = vsel %vm679_vm4, %v8510_v35, 512  ;;  %v744_v43 = vsel %vm680_vm5, %v8513_v41, 512 }
 0x176   :  { %v8624_v57 = vpop.xlane.xlu0 %612  ;;  %v8626_v52 = vcvt.s32.f32 %v854_v29  ;;  %vm871_vm9 = vcmp.lt.s32.totalorder %v870_v15, %v742_v51  ;;  %v745_v40 = vsel %vm681_vm7, %v8518_v37, 512  ;;  %vm887_vm10 = vcmp.lt.s32.totalorder %v743_v56, %v744_v43 }
 0x177   :  { %14582 = vst [vmem:[#allocation32_spill] sm:$0xff] %v8624_v57  ;;  %v8629_v16 = vsel %vm871_vm9, %v870_v15, %v742_v51  ;;  %v888_v17 = vsel %vm887_vm10, %v743_v56, %v744_v43  ;;  %vm683_vm11 = vcmp.eq.f32.partialorder %v8345_v62, %v8624_v57  ;;  %vm684_vm12 = vcmp.eq.f32.partialorder %v8352_v8, %v8624_v57 }
 0x178   :  { %857 = vmin.xlane.f32.xlu1 %v8626_v52  ;;  %v874_v54 = vshra.s32 %v8629_v16, 16  ;;  %v746_v3 = vsel %vm682_vm8, %v8527_v49, 512  ;;  %vm889_vm13 = vcmp.lt.s32.totalorder %v888_v17, %v745_v40  ;;  %vm685_vm14 = vcmp.eq.f32.partialorder %v8355_v9, %v8624_v57 }
 0x179   :  { %v890_v27 = vsel %vm889_vm13, %v888_v17, %v745_v40  ;;  %vm686_vm15 = vcmp.eq.f32.partialorder %v8365_v22, %v8624_v57  ;;  %v747_v11 = vsel %vm683_vm11, %v8510_v35, 512  ;;  %v748_v62 = vsel %vm684_vm12, %v8513_v41, 512 }
 0x17a   :  { %v8644_v4 = vpop.xlane.xlu1 %617  ;;  %v8646_v8 = vcvt.s32.f32 %v874_v54  ;;  %vm891_vm1 = vcmp.lt.s32.totalorder %v890_v27, %v746_v3  ;;  %v749_v42 = vsel %vm685_vm14, %v8518_v37, 512  ;;  %vm907_vm2 = vcmp.lt.s32.totalorder %v747_v11, %v748_v62 }
 0x17b   :  { %14583 = vst [vmem:[#allocation33_spill] sm:$0xff] %v8644_v4  ;;  %v8649_v39 = vsel %vm891_vm1, %v890_v27, %v746_v3  ;;  %v908_v28 = vsel %vm907_vm2, %v747_v11, %v748_v62  ;;  %vm687_vm3 = vcmp.eq.f32.partialorder %v8361_v18, %v8644_v4  ;;  %vm688_vm4 = vcmp.eq.f32.partialorder %v8368_v24, %v8644_v4 }
 0x17c   :  { %877 = vmin.xlane.f32.xlu0 %v8646_v8  ;;  %v894_v9 = vshra.s32 %v8649_v39, 16  ;;  %v750_v22 = vsel %vm686_vm15, %v8527_v49, 512  ;;  %vm909_vm5 = vcmp.lt.s32.totalorder %v908_v28, %v749_v42  ;;  %vm689_vm6 = vcmp.eq.f32.partialorder %v8371_v25, %v8644_v4 }
 0x17d   :  { %v910_v48 = vsel %vm909_vm5, %v908_v28, %v749_v42  ;;  %vm690_vm7 = vcmp.eq.f32.partialorder %v8381_v55, %v8644_v4  ;;  %v751_v29 = vsel %vm687_vm3, %v8510_v35, 512  ;;  %v752_v18 = vsel %vm688_vm4, %v8513_v41, 512 }
 0x17e   :  { %v8664_v51 = vpop.xlane.xlu0 %622  ;;  %v8666_v24 = vcvt.s32.f32 %v894_v9  ;;  %vm911_vm8 = vcmp.lt.s32.totalorder %v910_v48, %v750_v22  ;;  %v753_v15 = vsel %vm689_vm6, %v8518_v37, 512  ;;  %vm927_vm9 = vcmp.lt.s32.totalorder %v751_v29, %v752_v18 }
 0x17f   :  { %14584 = vst [vmem:[#allocation34_spill] sm:$0xff] %v8664_v51  ;;  %v8669_v56 = vsel %vm911_vm8, %v910_v48, %v750_v22  ;;  %v928_v43 = vsel %vm927_vm9, %v751_v29, %v752_v18  ;;  %vm691_vm10 = vcmp.eq.f32.partialorder %v8377_v38, %v8664_v51  ;;  %vm692_vm11 = vcmp.eq.f32.partialorder %v8384_v59, %v8664_v51 }
 0x180   :  { %897 = vmin.xlane.f32.xlu1 %v8666_v24  ;;  %v914_v25 = vshra.s32 %v8669_v56, 16  ;;  %v754_v55 = vsel %vm690_vm7, %v8527_v49, 512  ;;  %vm929_vm12 = vcmp.lt.s32.totalorder %v928_v43, %v753_v15  ;;  %vm693_vm13 = vcmp.eq.f32.partialorder %v8387_v60, %v8664_v51 }
 0x181   :  { %v930_v40 = vsel %vm929_vm12, %v928_v43, %v753_v15  ;;  %vm694_vm14 = vcmp.eq.f32.partialorder %v8397_v19, %v8664_v51  ;;  %v755_v17 = vsel %vm691_vm10, %v8510_v35, 512  ;;  %v756_v38 = vsel %vm692_vm11, %v8513_v41, 512 }
 0x182   :  { %v8684_v54 = vpop.xlane.xlu1 %627  ;;  %v8686_v59 = vcvt.s32.f32 %v914_v25  ;;  %vm931_vm15 = vcmp.lt.s32.totalorder %v930_v40, %v754_v55  ;;  %v757_v3 = vsel %vm693_vm13, %v8518_v37, 512  ;;  %vm947_vm1 = vcmp.lt.s32.totalorder %v755_v17, %v756_v38 }
 0x183   :  { %14585 = vst [vmem:[#allocation35_spill] sm:$0xff] %v8684_v54  ;;  %v8689_v27 = vsel %vm931_vm15, %v930_v40, %v754_v55  ;;  %v948_v11 = vsel %vm947_vm1, %v755_v17, %v756_v38  ;;  %vm695_vm2 = vcmp.eq.f32.partialorder %v8393_v10, %v8684_v54  ;;  %vm696_vm3 = vcmp.eq.f32.partialorder %v8400_v20, %v8684_v54  ;;  %v14590_v38 = vld [vmem:[#allocation12_spill] sm:$0xff] }
 0x184   :  { %917 = vmin.xlane.f32.xlu0 %v8686_v59  ;;  %v934_v60 = vshra.s32 %v8689_v27, 16  ;;  %v758_v19 = vsel %vm694_vm14, %v8527_v49, 512  ;;  %vm949_vm4 = vcmp.lt.s32.totalorder %v948_v11, %v757_v3  ;;  %vm697_vm5 = vcmp.eq.f32.partialorder %v8403_v21, %v8684_v54 }
 0x185   :  { %v950_v62 = vsel %vm949_vm4, %v948_v11, %v757_v3  ;;  %vm698_vm6 = vcmp.eq.f32.partialorder %v8413_v63, %v8684_v54  ;;  %v759_v42 = vsel %vm695_vm2, %v8510_v35, 512  ;;  %v760_v10 = vsel %vm696_vm3, %v8513_v41, 512  ;;  %v14591_v11 = vld [vmem:[#allocation14_spill] sm:$0xff] }
 0x186   :  { %v8704_v28 = vpop.xlane.xlu0 %632  ;;  %v8706_v20 = vcvt.s32.f32 %v934_v60  ;;  %vm951_vm7 = vcmp.lt.s32.totalorder %v950_v62, %v758_v19  ;;  %v761_v9 = vsel %vm697_vm5, %v8518_v37, 512  ;;  %vm967_vm8 = vcmp.lt.s32.totalorder %v759_v42, %v760_v10 }
 0x187   :  { %14586 = vst [vmem:[#allocation36_spill] sm:$0xff] %v8704_v28  ;;  %v8709_v22 = vsel %vm951_vm7, %v950_v62, %v758_v19  ;;  %v968_v48 = vsel %vm967_vm8, %v759_v42, %v760_v10  ;;  %vm699_vm9 = vcmp.eq.f32.partialorder %v8409_v44, %v8704_v28  ;;  %vm700_vm10 = vcmp.eq.f32.partialorder %v8416_v1, %v8704_v28 }
 0x188   :  { %937 = vmin.xlane.f32.xlu1 %v8706_v20  ;;  %v954_v21 = vshra.s32 %v8709_v22, 16  ;;  %v762_v63 = vsel %vm698_vm6, %v8527_v49, 512  ;;  %vm969_vm11 = vcmp.lt.s32.totalorder %v968_v48, %v761_v9  ;;  %vm701_vm12 = vcmp.eq.f32.partialorder %v8419_v2, %v8704_v28  ;;  %v14588_v2 = vld [vmem:[#allocation10_spill] sm:$0xff] }
 0x189   :  { %v970_v29 = vsel %vm969_vm11, %v968_v48, %v761_v9  ;;  %vm702_vm13 = vcmp.eq.f32.partialorder %v8429_v45, %v8704_v28  ;;  %v763_v18 = vsel %vm699_vm9, %v8510_v35, 512  ;;  %v764_v44 = vsel %vm700_vm10, %v8513_v41, 512  ;;  %v14589_v45 = vld [vmem:[#allocation11_spill] sm:$0xff] }
 0x18a   :  { %v8724_v15 = vpop.xlane.xlu1 %637  ;;  %v8726_v1 = vcvt.s32.f32 %v954_v21  ;;  %vm971_vm14 = vcmp.lt.s32.totalorder %v970_v29, %v762_v63  ;;  %v765_v43 = vsel %vm701_vm12, %v8518_v37, 512  ;;  %vm987_vm15 = vcmp.lt.s32.totalorder %v763_v18, %v764_v44  ;;  %v14593_v21 = vld [vmem:[#allocation13_spill] sm:$0xff] }
 0x18b   :  { %14587 = vst [vmem:[#allocation37_spill] sm:$0xff] %v8724_v15  ;;  %v8729_v25 = vsel %vm971_vm14, %v970_v29, %v762_v63  ;;  %v988_v55 = vsel %vm987_vm15, %v763_v18, %v764_v44  ;;  %vm703_vm1 = vcmp.eq.f32.partialorder %v14588_v2, %v8724_v15  ;;  %vm704_vm2 = vcmp.eq.f32.partialorder %v14589_v45, %v8724_v15  ;;  %v14594_v63 = vld [vmem:[#allocation15_spill] sm:$0xff]  ;;  %v14595_v44 = vld [vmem:[#allocation16_spill] sm:$0xff] }
 0x18c   :  { %957 = vmin.xlane.f32.xlu0 %v8726_v1  ;;  %v974_v40 = vshra.s32 %v8729_v25, 16  ;;  %v766_v17 = vsel %vm702_vm13, %v8527_v49, 512  ;;  %vm989_vm3 = vcmp.lt.s32.totalorder %v988_v55, %v765_v43  ;;  %vm705_vm4 = vcmp.eq.f32.partialorder %v14590_v38, %v8724_v15 }
 0x18d   :  { %v990_v3 = vsel %vm989_vm3, %v988_v55, %v765_v43  ;;  %vm706_vm5 = vcmp.eq.f32.partialorder %v14591_v11, %v8724_v15  ;;  %v767_v60 = vsel %vm703_vm1, %v8510_v35, 512  ;;  %v768_v19 = vsel %vm704_vm2, %v8513_v41, 512  ;;  %v14596_v55 = vld [vmem:[#allocation18_spill] sm:$0xff] }
 0x18e   :  { %v8744_v62 = vpop.xlane.xlu0 %642  ;;  %v8746_v42 = vcvt.s32.f32 %v974_v40  ;;  %vm991_vm6 = vcmp.lt.s32.totalorder %v990_v3, %v766_v17  ;;  %v769_v10 = vsel %vm705_vm4, %v8518_v37, 512  ;;  %vm1007_vm7 = vcmp.lt.s32.totalorder %v767_v60, %v768_v19 }
 0x18f   :  { %14592 = vst [vmem:[#allocation10_spill] sm:$0xff] %v8744_v62  ;;  %v8749_v9 = vsel %vm991_vm6, %v990_v3, %v766_v17  ;;  %v1008_v48 = vsel %vm1007_vm7, %v767_v60, %v768_v19  ;;  %vm707_vm8 = vcmp.eq.f32.partialorder %v14593_v21, %v8744_v62  ;;  %vm708_vm9 = vcmp.eq.f32.partialorder %v14594_v63, %v8744_v62  ;;  %v14598_v60 = vld [vmem:[#allocation17_spill] sm:$0xff]  ;;  %v14599_v19 = vld [vmem:[#allocation19_spill] sm:$0xff]  ;;  %v14600_v21 = vld [vmem:[#allocation20_spill] sm:$0xff] }
 0x190   :  { %977 = vmin.xlane.f32.xlu1 %v8746_v42  ;;  %v994_v29 = vshra.s32 %v8749_v9, 16  ;;  %v770_v18 = vsel %vm706_vm5, %v8527_v49, 512  ;;  %vm1009_vm10 = vcmp.lt.s32.totalorder %v1008_v48, %v769_v10  ;;  %vm709_vm11 = vcmp.eq.f32.partialorder %v14595_v44, %v8744_v62 }
 0x191   :  { %v1010_v43 = vsel %vm1009_vm10, %v1008_v48, %v769_v10  ;;  %vm710_vm12 = vcmp.eq.f32.partialorder %v14596_v55, %v8744_v62  ;;  %v771_v2 = vsel %vm707_vm8, %v8510_v35, 512  ;;  %v772_v45 = vsel %vm708_vm9, %v8513_v41, 512 }
 0x192   :  { %v8764_v40 = vpop.xlane.xlu1 %647  ;;  %v8766_v17 = vcvt.s32.f32 %v994_v29  ;;  %vm1011_vm13 = vcmp.lt.s32.totalorder %v1010_v43, %v770_v18  ;;  %v773_v38 = vsel %vm709_vm11, %v8518_v37, 512  ;;  %vm1027_vm14 = vcmp.lt.s32.totalorder %v771_v2, %v772_v45 }
 0x193   :  { %14597 = vst [vmem:[#allocation11_spill] sm:$0xff] %v8764_v40  ;;  %v8769_v3 = vsel %vm1011_vm13, %v1010_v43, %v770_v18  ;;  %v1028_v11 = vsel %vm1027_vm14, %v771_v2, %v772_v45  ;;  %vm711_vm15 = vcmp.eq.f32.partialorder %v14598_v60, %v8764_v40  ;;  %vm712_vm1 = vcmp.eq.f32.partialorder %v14599_v19, %v8764_v40 }
 0x194   :  { %997 = vmin.xlane.f32.xlu0 %v8766_v17  ;;  %v1014_v10 = vshra.s32 %v8769_v3, 16  ;;  %v774_v48 = vsel %vm710_vm12, %v8527_v49, 512  ;;  %vm1029_vm2 = vcmp.lt.s32.totalorder %v1028_v11, %v773_v38  ;;  %vm713_vm3 = vcmp.eq.f32.partialorder %v14600_v21, %v8764_v40 }
 0x195   :  { %v1030_v63 = vsel %vm1029_vm2, %v1028_v11, %v773_v38  ;;  %vm714_vm4 = vcmp.eq.f32.partialorder %v8477_v61, %v8764_v40  ;;  %v775_v29 = vsel %vm711_vm15, %v8510_v35, 512  ;;  %v776_v18 = vsel %vm712_vm1, %v8513_v41, 512  ;;  %v14602_v61 = vld [vmem:[#allocation21_spill] sm:$0xff] }
 0x196   :  { %v8784_v44 = vpop.xlane.xlu0 %652  ;;  %v8786_v43 = vcvt.s32.f32 %v1014_v10  ;;  %vm1031_vm5 = vcmp.lt.s32.totalorder %v1030_v63, %v774_v48  ;;  %v777_v55 = vsel %vm713_vm3, %v8518_v37, 512  ;;  %vm1047_vm6 = vcmp.lt.s32.totalorder %v775_v29, %v776_v18 }
 0x197   :  { %14601 = vst [vmem:[#allocation12_spill] sm:$0xff] %v8784_v44  ;;  %v8789_v2 = vsel %vm1031_vm5, %v1030_v63, %v774_v48  ;;  %v1048_v45 = vsel %vm1047_vm6, %v775_v29, %v776_v18  ;;  %vm715_vm7 = vcmp.eq.f32.partialorder %v8473_v31, %v8784_v44  ;;  %vm716_vm8 = vcmp.eq.f32.partialorder %v14602_v61, %v8784_v44 }
 0x198   :  { %1017 = vmin.xlane.f32.xlu1 %v8786_v43  ;;  %v1034_v38 = vshra.s32 %v8789_v2, 16  ;;  %v778_v11 = vsel %vm714_vm4, %v8527_v49, 512  ;;  %vm1049_vm9 = vcmp.lt.s32.totalorder %v1048_v45, %v777_v55  ;;  %vm717_vm10 = vcmp.eq.f32.partialorder %v8483_v34, %v8784_v44 }
 0x199   :  { %v1050_v60 = vsel %vm1049_vm9, %v1048_v45, %v777_v55  ;;  %vm718_vm11 = vcmp.eq.f32.partialorder %v8493_v33, %v8784_v44  ;;  %v779_v19 = vsel %vm715_vm7, %v8510_v35, 512  ;;  %v780_v31 = vsel %vm716_vm8, %v8513_v41, 512 }
 0x19a   :  { %v8804_v10 = vpop.xlane.xlu1 %657  ;;  %v8806_v48 = vcvt.s32.f32 %v1034_v38  ;;  %vm1051_vm12 = vcmp.lt.s32.totalorder %v1050_v60, %v778_v11  ;;  %v781_v21 = vsel %vm717_vm10, %v8518_v37, 512  ;;  %vm1067_vm13 = vcmp.lt.s32.totalorder %v779_v19, %v780_v31 }
 0x19b   :  { %14603 = vst [vmem:[#allocation14_spill] sm:$0xff] %v8804_v10  ;;  %v8809_v63 = vsel %vm1051_vm12, %v1050_v60, %v778_v11  ;;  %v1068_v29 = vsel %vm1067_vm13, %v779_v19, %v780_v31  ;;  %vm719_vm14 = vcmp.eq.f32.partialorder %v8489_v14, %v8804_v10  ;;  %vm720_vm15 = vcmp.eq.f32.partialorder %v8496_v50, %v8804_v10 }
 0x19c   :  { %1037 = vmin.xlane.f32.xlu0 %v8806_v48  ;;  %v1054_v34 = vshra.s32 %v8809_v63, 16  ;;  %vm1069_vm1 = vcmp.lt.s32.totalorder %v1068_v29, %v781_v21  ;;  %vm721_vm2 = vcmp.eq.f32.partialorder %v8499_v36, %v8804_v10  ;;  %v782_v18 = vsel %vm718_vm11, %v8527_v49, 512 }
 0x19d   :  { %v1070_v55 = vsel %vm1069_vm1, %v1068_v29, %v781_v21  ;;  %v783_v45 = vsel %vm719_vm14, %v8510_v35, 512  ;;  %v784_v14 = vsel %vm720_vm15, %v8513_v41, 512  ;;  %vm722_vm4 = vcmp.eq.f32.partialorder %v8506_v32, %v8804_v10  ;;  %v84_v29 = vld [vmem:[%s14236_s2 + $0xf8] sm:$0xff] }
 0x19e   :  { %v8825_v61 = vcvt.s32.f32 %v1054_v34  ;;  %vm1071_vm3 = vcmp.lt.s32.totalorder %v1070_v55, %v782_v18  ;;  %vm1087_vm5 = vcmp.lt.s32.totalorder %v783_v45, %v784_v14  ;;  %v785_v36 = vsel %vm721_vm2, %v8518_v37, 512  ;;  %v68_v34 = vld [vmem:[%s14236_s2 + $0x78] sm:$0xff]  ;;  %7296 = vmatprep.subr.mxu0 %v84_v29  ;;  %v98_v29 = vld [vmem:[%s14236_s2 + $0x168] sm:$0xff] }
 0x19f   :  { %v8829_v50 = vsel %vm1071_vm3, %v1070_v55, %v782_v18  ;;  %v1088_v38 = vsel %vm1087_vm5, %v783_v45, %v784_v14  ;;  %v786_v11 = vsel %vm722_vm4, %v8527_v49, 512  ;;  %v83_v18 = vld [vmem:[%s14236_s2 + $0xf0] sm:$0xff]  ;;  %v116_v55 = vld [vmem:[%s14236_s2 + $0x1f8] sm:$0xff]  ;;  %7297 = vmatpush3.msra.mxu0 %v68_v34  ;;  %v65_v34 = vld [vmem:[%s14236_s2 + $0x60] sm:$0xff] }
 0x1a0   :  { %1057 = vmin.xlane.f32.xlu1 %v8825_v61  ;;  %v1074_v33 = vshra.s32 %v8829_v50, 16  ;;  %vm1089_vm6 = vcmp.lt.s32.totalorder %v1088_v38, %v785_v36  ;;  %v67_v45 = vld [vmem:[%s14236_s2 + $0x70] sm:$0xff]  ;;  %v100_v14 = vld [vmem:[%s14236_s2 + $0x178] sm:$0xff]  ;;  %7376 = vmatprep.subr.mxu1 %v116_v55 }
 0x1a1   :  { %v1090_v60 = vsel %vm1089_vm6, %v1088_v38, %v785_v36  ;;  %v82_v36 = vld [vmem:[%s14236_s2 + $0xe8] sm:$0xff]  ;;  %v115_v38 = vld [vmem:[%s14236_s2 + $0x1f0] sm:$0xff]  ;;  %7298 = vmatprep.subr.mxu0 %v83_v18  ;;  %7377 = vmatpush3.msra.mxu1 %v100_v14  ;;  %v113_v18 = vld [vmem:[%s14236_s2 + $0x1e0] sm:$0xff] }
 0x1a2   :  { %v8835_v19 = vcvt.s32.f32 %v1074_v33  ;;  %vm1091_vm7 = vcmp.lt.s32.totalorder %v1090_v60, %v786_v11  ;;  %v66_v33 = vld [vmem:[%s14236_s2 + $0x68] sm:$0xff]  ;;  %7299 = vmatpush3.msra.mxu0 %v67_v45  ;;  %7378 = vmatprep.subr.mxu1 %v115_v38  ;;  %v80_v55 = vld [vmem:[%s14236_s2 + $0xd8] sm:$0xff]  ;;  %v97_v45 = vld [vmem:[%s14236_s2 + $0x160] sm:$0xff] }
 0x1a3   :  { %v8837_v31 = vsel %vm1091_vm7, %v1090_v60, %v786_v11  ;;  %v99_v11 = vld [vmem:[%s14236_s2 + $0x170] sm:$0xff]  ;;  %v114_v60 = vld [vmem:[%s14236_s2 + $0x1e8] sm:$0xff]  ;;  %7300 = vmatprep.subr.mxu0 %v82_v36  ;;  %v64_v14 = vld [vmem:[%s14236_s2 + $0x58] sm:$0xff] }
 0x1a4   :  { %1077 = vmin.xlane.f32.xlu0 %v8835_v19  ;;  %v1094_v32 = vshra.s32 %v8837_v31, 16  ;;  %7379 = vmatpush3.msra.mxu1 %v99_v11  ;;  %v112_v36 = vld [vmem:[%s14236_s2 + $0x1d8] sm:$0xff]  ;;  %v79_v38 = vld [vmem:[%s14236_s2 + $0xd0] sm:$0xff] }
 0x1a5   :  { %7301 = vmatpush3.msra.mxu0 %v66_v33  ;;  %7380 = vmatprep.subr.mxu1 %v114_v60  ;;  %v96_v33 = vld [vmem:[%s14236_s2 + $0x158] sm:$0xff]  ;;  %v63_v11 = vld [vmem:[%s14236_s2 + $0x50] sm:$0xff] }
 0x1a6   :  { %v8841_v21 = vcvt.s32.f32 %v1094_v32  ;;  %v81_v32 = vld [vmem:[%s14236_s2 + $0xe0] sm:$0xff]  ;;  %7381 = vmatpush3.msra.mxu1 %v98_v29  ;;  %v111_v60 = vld [vmem:[%s14236_s2 + $0x1d0] sm:$0xff] }
 0x1a7   :  { %7302 = vmatprep.subr.mxu0 %v81_v32  ;;  %7382 = vmatprep.subr.mxu1 %v113_v18  ;;  %v78_v32 = vld [vmem:[%s14236_s2 + $0xc8] sm:$0xff]  ;;  %v95_v29 = vld [vmem:[%s14236_s2 + $0x150] sm:$0xff] }
 0x1a8   :  { %1097 = vmin.xlane.f32.xlu1 %v8841_v21  ;;  %7303 = vmatpush3.msra.mxu0 %v65_v34  ;;  %v62_v34 = vld [vmem:[%s14236_s2 + $0x48] sm:$0xff] }
 0x1a9   :  { %7304 = vmatprep.subr.mxu0 %v80_v55  ;;  %7383 = vmatpush3.msra.mxu1 %v97_v45  ;;  %v110_v18 = vld [vmem:[%s14236_s2 + $0x1c8] sm:$0xff]  ;;  %v77_v55 = vld [vmem:[%s14236_s2 + $0xc0] sm:$0xff] }
 0x1aa   :  { %7305 = vmatpush3.msra.mxu0 %v64_v14  ;;  %7384 = vmatprep.subr.mxu1 %v112_v36  ;;  %v94_v45 = vld [vmem:[%s14236_s2 + $0x148] sm:$0xff]  ;;  %v61_v14 = vld [vmem:[%s14236_s2 + $0x40] sm:$0xff] }
 0x1ab   :  { %7306 = vmatprep.subr.mxu0 %v79_v38  ;;  %7385 = vmatpush3.msra.mxu1 %v96_v33  ;;  %v109_v36 = vld [vmem:[%s14236_s2 + $0x1c0] sm:$0xff]  ;;  %v76_v38 = vld [vmem:[%s14236_s2 + $0xb8] sm:$0xff] }
 0x1ac   :  { %7307 = vmatpush3.msra.mxu0 %v63_v11  ;;  %7386 = vmatprep.subr.mxu1 %v111_v60  ;;  %v93_v33 = vld [vmem:[%s14236_s2 + $0x140] sm:$0xff]  ;;  %v60_v11 = vld [vmem:[%s14236_s2 + $0x38] sm:$0xff] }
 0x1ad   :  { %7308 = vmatprep.subr.mxu0 %v78_v32  ;;  %7387 = vmatpush3.msra.mxu1 %v95_v29  ;;  %v108_v60 = vld [vmem:[%s14236_s2 + $0x1b8] sm:$0xff]  ;;  %v75_v32 = vld [vmem:[%s14236_s2 + $0xb0] sm:$0xff] }
 0x1ae   :  { %7309 = vmatpush3.msra.mxu0 %v62_v34  ;;  %7388 = vmatprep.subr.mxu1 %v110_v18  ;;  %v92_v29 = vld [vmem:[%s14236_s2 + $0x138] sm:$0xff]  ;;  %v59_v34 = vld [vmem:[%s14236_s2 + $0x30] sm:$0xff] }
 0x1af   :  { %7310 = vmatprep.subr.mxu0 %v77_v55  ;;  %7389 = vmatpush3.msra.mxu1 %v94_v45  ;;  %v107_v18 = vld [vmem:[%s14236_s2 + $0x1b0] sm:$0xff]  ;;  %v74_v55 = vld [vmem:[%s14236_s2 + $0xa8] sm:$0xff] }
 0x1b0   :  { %7311 = vmatpush3.msra.mxu0 %v61_v14  ;;  %7390 = vmatprep.subr.mxu1 %v109_v36  ;;  %v91_v45 = vld [vmem:[%s14236_s2 + $0x130] sm:$0xff]  ;;  %v58_v14 = vld [vmem:[%s14236_s2 + $0x28] sm:$0xff] }
 0x1b1   :  { %7312 = vmatprep.subr.mxu0 %v76_v38  ;;  %7391 = vmatpush3.msra.mxu1 %v93_v33  ;;  %v106_v36 = vld [vmem:[%s14236_s2 + $0x1a8] sm:$0xff]  ;;  %v73_v38 = vld [vmem:[%s14236_s2 + $0xa0] sm:$0xff] }
 0x1b2   :  { %7313 = vmatpush3.msra.mxu0 %v60_v11  ;;  %7392 = vmatprep.subr.mxu1 %v108_v60  ;;  %v90_v33 = vld [vmem:[%s14236_s2 + $0x128] sm:$0xff]  ;;  %v57_v11 = vld [vmem:[%s14236_s2 + $0x20] sm:$0xff] }
 0x1b3   :  { %7314 = vmatprep.subr.mxu0 %v75_v32  ;;  %7393 = vmatpush3.msra.mxu1 %v92_v29  ;;  %v105_v60 = vld [vmem:[%s14236_s2 + $0x1a0] sm:$0xff]  ;;  %v72_v32 = vld [vmem:[%s14236_s2 + $0x98] sm:$0xff] }
 0x1b4   :  { %7315 = vmatpush3.msra.mxu0 %v59_v34  ;;  %7394 = vmatprep.subr.mxu1 %v107_v18  ;;  %v89_v29 = vld [vmem:[%s14236_s2 + $0x120] sm:$0xff]  ;;  %v56_v34 = vld [vmem:[%s14236_s2 + $0x18] sm:$0xff] }
 0x1b5   :  { %7316 = vmatprep.subr.mxu0 %v74_v55  ;;  %7395 = vmatpush3.msra.mxu1 %v91_v45  ;;  %v104_v18 = vld [vmem:[%s14236_s2 + $0x198] sm:$0xff]  ;;  %v71_v55 = vld [vmem:[%s14236_s2 + $0x90] sm:$0xff] }
 0x1b6   :  { %7317 = vmatpush3.msra.mxu0 %v58_v14  ;;  %7396 = vmatprep.subr.mxu1 %v106_v36  ;;  %v88_v45 = vld [vmem:[%s14236_s2 + $0x118] sm:$0xff]  ;;  %v55_v14 = vld [vmem:[%s14236_s2 + $0x10] sm:$0xff] }
 0x1b7   :  { %7318 = vmatprep.subr.mxu0 %v73_v38  ;;  %7397 = vmatpush3.msra.mxu1 %v90_v33  ;;  %v103_v36 = vld [vmem:[%s14236_s2 + $0x190] sm:$0xff]  ;;  %v70_v38 = vld [vmem:[%s14236_s2 + $0x88] sm:$0xff] }
 0x1b8   :  { %7319 = vmatpush3.msra.mxu0 %v57_v11  ;;  %7398 = vmatprep.subr.mxu1 %v105_v60  ;;  %v87_v33 = vld [vmem:[%s14236_s2 + $0x110] sm:$0xff]  ;;  %v54_v11 = vld [vmem:[%s14236_s2 + $0x8] sm:$0xff]  ;;  %v793_v60 = vand.u32 65535, %v8549_v53 }
 0x1b9   :  { %7320 = vmatprep.subr.mxu0 %v72_v32  ;;  %7399 = vmatpush3.msra.mxu1 %v89_v29 }
 0x1ba   :  { %7321 = vmatpush3.msra.mxu0 %v56_v34  ;;  %7400 = vmatprep.subr.mxu1 %v104_v18  ;;  %v795_v29 = vcvt.s32.f32 %v793_v60  ;;  %v813_v34 = vand.u32 65535, %v8568_v47  ;;  %v853_v47 = vand.u32 65535, %v8609_v7  ;;  %v873_v60 = vand.u32 65535, %v8629_v16  ;;  %v102_v7 = vld [vmem:[%s14236_s2 + $0x188] sm:$0xff] }
 0x1bb   :  { %7322 = vmatprep.subr.mxu0 %v71_v55  ;;  %7401 = vmatpush3.msra.mxu1 %v88_v45  ;;  %v86_v16 = vld [vmem:[%s14236_s2 + $0x108] sm:$0xff] }
 0x1bc   :  { %7323 = vmatpush3.msra.mxu0 %v55_v14  ;;  %7402 = vmatprep.subr.mxu1 %v103_v36  ;;  %v815_v45 = vcvt.s32.f32 %v813_v34  ;;  %v833_v14 = vand.u32 65535, %v8590_v58  ;;  %v69_v58 = vld [vmem:[%s14236_s2 + $0x80] sm:$0xff]  ;;  %v893_v34 = vand.u32 65535, %v8649_v39 }
 0x1bd   :  { %7324 = vmatprep.subr.mxu0 %v70_v38  ;;  %7403 = vmatpush3.msra.mxu1 %v87_v33 }
 0x1be   :  { %7325 = vmatpush3.msra.mxu0 %v54_v11  ;;  %v835_v38 = vcvt.s32.f32 %v833_v14  ;;  %v855_v11 = vcvt.s32.f32 %v853_v47  ;;  %7404 = vmatprep.subr.mxu1 %v102_v7  ;;  %v85_v14 = vld [vmem:[%s14236_s2 + $0x100] sm:$0xff]  ;;  %v953_v7 = vand.u32 65535, %v8709_v22  ;;  %v993_v22 = vand.u32 65535, %v8749_v9 }
 0x1bf   :  { %7326 = vmatprep.subr.mxu0 %v69_v58  ;;  %7405 = vmatpush3.msra.mxu1 %v86_v16  ;;  %v1033_v9 = vand.u32 65535, %v8789_v2  ;;  %v1073_v2 = vand.u32 65535, %v8829_v50 }
 0x1f4   :  { %v9019_v32 = vpop.xlane.xlu0 %797 }
 0x1f5   :  { %vm799_vm8 = vcmp.eq.f32.partialorder %v8561_v46, %v9019_v32 }
 0x1f6   :  { %v800_v18 = vsel %vm799_vm8, %v795_v29, inf  ;;  %v875_v29 = vcvt.s32.f32 %v873_v60 }
 0x1f7   :  { %801 = vmin.xlane.f32.xlu0 %v800_v18 }
 0x1f8   :  { %v9024_v55 = vpop.xlane.xlu1 %817 }
 0x1f9   :  { %vm819_vm9 = vcmp.eq.f32.partialorder %v8581_v13, %v9024_v55 }
 0x1fa   :  { %v820_v36 = vsel %vm819_vm9, %v815_v45, inf  ;;  %v101_v45 = vld [vmem:[%s14236_s2 + $0x180] sm:$0xff] }
 0x1fb   :  { %821 = vmin.xlane.f32.xlu1 %v820_v36  ;;  %v1698_v36 = vld [vmem:[%s14235_s1 + $0x1a8] sm:$0xff]  ;;  %7406 = vmatprep.subr.mxu1 %v101_v45 }
 0x1fc   :  { %7407 = vmatpush3.msra.mxu1 %v85_v14  ;;  %v995_v14 = vcvt.s32.f32 %v993_v22 }
 0x1fd   :  { %v9029_v53 = vpop.xlane.xlu0 %837 }
 0x1fe   :  { %vm839_vm10 = vcmp.eq.f32.partialorder %v8606_v5, %v9029_v53  ;;  %v53_v5 = vld [vmem:[%s14236_s2] sm:$0xff] }
 0x1ff   :  { %v840_v46 = vsel %vm839_vm10, %v835_v38, inf  ;;  %7327 = vmatpush3.msra.mxu0 %v53_v5  ;;  %v895_v38 = vcvt.s32.f32 %v893_v34 }
 0x200   :  { %841 = vmin.xlane.f32.xlu0 %v840_v46  ;;  %1790 = vmatprep.subr.mxu0 %v1698_v36  ;;  %v1700_v46 = vld [vmem:[%s14235_s1 + $0x1b8] sm:$0xff] }
 0x201   :  { %v9034_v33 = vpop.xlane.xlu1 %857  ;;  %1951 = vmatprep.subr.mxu1 %v1700_v46 }
 0x202   :  { %vm859_vm11 = vcmp.eq.f32.partialorder %v8626_v52, %v9034_v33 }
 0x203   :  { %v860_v13 = vsel %vm859_vm11, %v855_v11, inf }
 0x204   :  { %861 = vmin.xlane.f32.xlu1 %v860_v13  ;;  %v933_v13 = vand.u32 65535, %v8689_v27  ;;  %v973_v27 = vand.u32 65535, %v8729_v25  ;;  %v1013_v25 = vand.u32 65535, %v8769_v3  ;;  %v1053_v3 = vand.u32 65535, %v8809_v63 }
 0x205   :  { %v9051_v52 = vpop.xlane.xlu0 %877  ;;  %v1093_v63 = vand.u32 65535, %v8837_v31 }
 0x206   :  { %vm879_vm12 = vcmp.eq.f32.partialorder %v8646_v8, %v9051_v52  ;;  %v913_v8 = vand.u32 65535, %v8669_v56 }
 0x207   :  { %v880_v18 = vsel %vm879_vm12, %v875_v29, inf  ;;  %v955_v29 = vcvt.s32.f32 %v953_v7  ;;  %v1095_v7 = vcvt.s32.f32 %v1093_v63 }
 0x208   :  { %881 = vmin.xlane.f32.xlu0 %v880_v18  ;;  %v915_v60 = vcvt.s32.f32 %v913_v8  ;;  %v975_v18 = vcvt.s32.f32 %v973_v27 }
 0x209   :  { %v9065_v39 = vpop.xlane.xlu1 %897 }
 0x20a   :  { %vm899_vm13 = vcmp.eq.f32.partialorder %v8666_v24, %v9065_v39  ;;  %v935_v24 = vcvt.s32.f32 %v933_v13 }
 0x20b   :  { %v900_v47 = vsel %vm899_vm13, %v895_v38, inf  ;;  %v1015_v38 = vcvt.s32.f32 %v1013_v25 }
 0x20c   :  { %901 = vmin.xlane.f32.xlu1 %v900_v47  ;;  %v1035_v47 = vcvt.s32.f32 %v1033_v9 }
 0x20d   :  { %v9073_v11 = vpop.xlane.xlu0 %917 }
 0x20e   :  { %vm919_vm14 = vcmp.eq.f32.partialorder %v8686_v59, %v9073_v11 }
 0x20f   :  { %v920_v56 = vsel %vm919_vm14, %v915_v60, inf  ;;  %v1055_v60 = vcvt.s32.f32 %v1053_v3  ;;  %v1690_v3 = vld [vmem:[%s14235_s1 + $0xa8] sm:$0xff] }
 0x210   :  { %921 = vmin.xlane.f32.xlu0 %v920_v56  ;;  %v1075_v56 = vcvt.s32.f32 %v1073_v2 }
 0x211   :  { %v9078_v58 = vpop.xlane.xlu1 %937 }
 0x212   :  { %vm939_vm15 = vcmp.eq.f32.partialorder %v8706_v20, %v9078_v58 }
 0x213   :  { %v940_v5 = vsel %vm939_vm15, %v935_v24, inf }
 0x214   :  { %941 = vmin.xlane.f32.xlu1 %v940_v5  ;;  %v824_v5 = vcvt.f32.s32 %v9024_v55  ;;  %v844_v55 = vcvt.f32.s32 %v9029_v53  ;;  %v864_v53 = vcvt.f32.s32 %v9034_v33  ;;  %v1693_v33 = vld [vmem:[%s14235_s1 + $0x120] sm:$0xff] }
 0x215   :  { %v9083_v16 = vpop.xlane.xlu0 %957 }
 0x216   :  { %vm959_vm1 = vcmp.eq.f32.partialorder %v8726_v1, %v9083_v16  ;;  %v845_v9 = vshll.u32 %v844_v55, 16 }
 0x217   :  { %v960_v59 = vsel %vm959_vm1, %v955_v29, inf }
 0x218   :  { %961 = vmin.xlane.f32.xlu0 %v960_v59 }
 0x219   :  { %v9088_v34 = vpop.xlane.xlu1 %977 }
 0x21a   :  { %vm979_vm2 = vcmp.eq.f32.partialorder %v8746_v42, %v9088_v34 }
 0x21b   :  { %v980_v20 = vsel %vm979_vm2, %v975_v18, inf }
 0x21c   :  { %981 = vmin.xlane.f32.xlu1 %v980_v20  ;;  %v14266_v20 = vmov 1.0  }
 0x21d   :  { %v9093_v45 = vpop.xlane.xlu0 %997 }
 0x21e   :  { %vm999_vm3 = vcmp.eq.f32.partialorder %v8766_v17, %v9093_v45 }
 0x21f   :  { %v1000_v1 = vsel %vm999_vm3, %v995_v14, inf  ;;  %v1694_v14 = vld [vmem:[%s14235_s1 + $0x128] sm:$0xff] }
 0x220   :  { %1001 = vmin.xlane.f32.xlu0 %v1000_v1 }
 0x221   :  { %v9098_v36 = vpop.xlane.xlu1 %1017 }
 0x222   :  { %vm1019_vm4 = vcmp.eq.f32.partialorder %v8786_v43, %v9098_v36 }
 0x223   :  { %v1020_v42 = vsel %vm1019_vm4, %v1015_v38, inf  ;;  %v1696_v38 = vld [vmem:[%s14235_s1 + $0x138] sm:$0xff] }
 0x224   :  { %1021 = vmin.xlane.f32.xlu1 %v1020_v42 }
 0x225   :  { %v9103_v8 = vpop.xlane.xlu0 %1037 }
 0x226   :  { %vm1039_vm5 = vcmp.eq.f32.partialorder %v8806_v48, %v9103_v8 }
 0x227   :  { %v1040_v17 = vsel %vm1039_vm5, %v1035_v47, inf  ;;  %v1695_v47 = vld [vmem:[%s14235_s1 + $0x130] sm:$0xff] }
 0x228   :  { %1041 = vmin.xlane.f32.xlu0 %v1040_v17  ;;  %v1689_v17 = vld [vmem:[%s14235_s1 + $0xa0] sm:$0xff] }
 0x229   :  { %v9108_v46 = vpop.xlane.xlu1 %1057 }
 0x22a   :  { %vm1059_vm6 = vcmp.eq.f32.partialorder %v8825_v61, %v9108_v46  ;;  %v804_v61 = vcvt.f32.s32 %v9019_v32  ;;  %v1699_v32 = vld [vmem:[%s14235_s1 + $0x1b0] sm:$0xff] }
 0x22b   :  { %v1060_v43 = vsel %vm1059_vm6, %v1055_v60, inf  ;;  %v1692_v60 = vld [vmem:[%s14235_s1 + $0xb8] sm:$0xff] }
 0x22c   :  { %1061 = vmin.xlane.f32.xlu1 %v1060_v43  ;;  %v805_v27 = vshll.u32 %v804_v61, 16  ;;  %v865_v43 = vshll.u32 %v864_v53, 16  ;;  %v1688_v61 = vld [vmem:[%s14235_s1 + $0x38] sm:$0xff]  ;;  %v944_v53 = vcvt.f32.s32 %v9078_v58 }
 0x22d   :  { %v9113_v13 = vpop.xlane.xlu0 %1077 }
 0x22e   :  { %vm1079_vm7 = vcmp.eq.f32.partialorder %v8835_v19, %v9113_v13  ;;  %v825_v19 = vshll.u32 %v824_v5, 16  ;;  %v945_v58 = vshll.u32 %v944_v53, 16  ;;  %v1084_v53 = vcvt.f32.s32 %v9113_v13 }
 0x22f   :  { %v1080_v48 = vsel %vm1079_vm7, %v1075_v56, inf  ;;  %v884_v56 = vcvt.f32.s32 %v9051_v52  ;;  %v1686_v52 = vld [vmem:[%s14235_s1 + $0x28] sm:$0xff] }
 0x230   :  { %1081 = vmin.xlane.f32.xlu0 %v1080_v48  ;;  %v1085_v13 = vshll.u32 %v1084_v53, 16 }
 0x231   :  { %v9118_v24 = vpop.xlane.xlu1 %1097 }
 0x232   :  { %vm1099_vm8 = vcmp.eq.f32.partialorder %v8841_v21, %v9118_v24  ;;  %v1697_v21 = vld [vmem:[%s14235_s1 + $0x1a0] sm:$0xff] }
 0x233   :  { %v1100_v50 = vsel %vm1099_vm8, %v1095_v7, inf  ;;  %v1691_v7 = vld [vmem:[%s14235_s1 + $0xb0] sm:$0xff] }
 0x234   :  { %1101 = vmin.xlane.f32.xlu1 %v1100_v50  ;;  %v1685_v50 = vld [vmem:[%s14235_s1 + $0x20] sm:$0xff] }
 0x280   :  { %v802_v29 = vpop.xlane.xlu0 %801 }
 0x281   :  { %v803_v31 = vcvt.f32.s32 %v802_v29  ;;  %v885_v29 = vshll.u32 %v884_v56, 16 }
 0x283   :  { %v9124_v59 = vadd.s32 %v805_v27, %v803_v31  ;;  %v904_v27 = vcvt.f32.s32 %v9065_v39 }
 0x284   :  { %v822_v18 = vpop.xlane.xlu1 %821 }
 0x285   :  { %14604 = vst [vmem:[#allocation13_spill] sm:$0xff] %v9124_v59  ;;  %v823_v22 = vcvt.f32.s32 %v822_v18  ;;  %vm1108_vm9 = vcmp.eq.s32.totalorder %v8513_v41, %v9124_v59  ;;  %vm1110_vm10 = vcmp.eq.s32.totalorder %v8527_v49, %v9124_v59  ;;  %vm1107_vm11 = vcmp.eq.s32.totalorder %v8510_v35, %v9124_v59  ;;  %v1687_v18 = vld [vmem:[%s14235_s1 + $0x30] sm:$0xff] }
 0x286   :  { %6752 = vmatprep.mubr.msk.f32.mxu0 %vm1108_vm9, %v14266_v20  ;;  %6784 = vmatprep.mubr.msk.f32.mxu1 %vm1110_vm10, %v14266_v20  ;;  %vm1109_vm12 = vcmp.eq.s32.totalorder %v8518_v37, %v9124_v59 }
 0x287   :  { %v9146_v25 = vadd.s32 %v825_v19, %v823_v22  ;;  %6753 = vmatmul.mubr.msk.f32.vlgmr.msra.gmra.mxu0 %vm1107_vm11, %v14266_v20  ;;  %6785 = vmatmul.mubr.msk.f32.vlgmr.msra.gmra.mxu1 %vm1109_vm12, %v14266_v20  ;;  %v905_v22 = vshll.u32 %v904_v27, 16 }
 0x288   :  { %1791 = vmatpush1.msra.mxu0 %v1697_v21  ;;  %1952 = vmatpush1.msra.mxu1 %v1699_v32  ;;  %v924_v21 = vcvt.f32.s32 %v9073_v11 }
 0x289   :  { %14605 = vst [vmem:[#allocation15_spill] sm:$0xff] %v9146_v25  ;;  %v842_v1 = vpop.xlane.xlu0 %841  ;;  %vm1112_vm13 = vcmp.eq.s32.totalorder %v8513_v41, %v9146_v25  ;;  %vm1114_vm14 = vcmp.eq.s32.totalorder %v8527_v49, %v9146_v25  ;;  %vm1111_vm15 = vcmp.eq.s32.totalorder %v8510_v35, %v9146_v25  ;;  %vm1113_vm1 = vcmp.eq.s32.totalorder %v8518_v37, %v9146_v25 }
 0x28a   :  { %1792 = vmatprep.subr.mxu0 %v1694_v14  ;;  %v843_v42 = vcvt.f32.s32 %v842_v1  ;;  %6754 = vmatprep.mubr.msk.f32.mxu0 %vm1112_vm13, %v14266_v20  ;;  %v925_v14 = vshll.u32 %v924_v21, 16  ;;  %v1064_v21 = vcvt.f32.s32 %v9108_v46 }
 0x28b   :  { %6786 = vmatprep.mubr.msk.f32.mxu1 %vm1114_vm14, %v14266_v20  ;;  %6755 = vmatmul.mubr.msk.f32.gmra.mxu0 %vm1111_vm15, %v14266_v20 }
 0x28c   :  { %6787 = vmatmul.mubr.msk.f32.gmra.mxu1 %vm1113_vm1, %v14266_v20  ;;  %v9181_v2 = vadd.s32 %v845_v9, %v843_v42  ;;  %1793 = vmatpush1.msra.mxu0 %v1693_v33  ;;  %v964_v9 = vcvt.f32.s32 %v9083_v16  ;;  %v1065_v46 = vshll.u32 %v1064_v21, 16  ;;  %v7951_v21 = vld [vmem:[%s14234_s0 + $0x60] sm:$0xff] }
 0x28d   :  { %1953 = vmatprep.subr.mxu1 %v1696_v38  ;;  %v862_v63 = vpop.xlane.xlu1 %861  ;;  %1794 = vmatprep.subr.mxu0 %v1690_v3 }
 0x28e   :  { %14606 = vst [vmem:[#allocation16_spill] sm:$0xff] %v9181_v2  ;;  %1954 = vmatpush1.msra.mxu1 %v1695_v47  ;;  %v863_v48 = vcvt.f32.s32 %v862_v63  ;;  %vm1116_vm2 = vcmp.eq.s32.totalorder %v8513_v41, %v9181_v2  ;;  %vm1118_vm3 = vcmp.eq.s32.totalorder %v8527_v49, %v9181_v2  ;;  %vm1115_vm4 = vcmp.eq.s32.totalorder %v8510_v35, %v9181_v2 }
 0x28f   :  { %1795 = vmatpush1.msra.mxu0 %v1689_v17  ;;  %1955 = vmatprep.subr.mxu1 %v1692_v60  ;;  %vm1117_vm5 = vcmp.eq.s32.totalorder %v8518_v37, %v9181_v2  ;;  %v965_v16 = vshll.u32 %v964_v9, 16  ;;  %v984_v17 = vcvt.f32.s32 %v9088_v34  ;;  %v1004_v63 = vcvt.f32.s32 %v9093_v45 }
 0x290   :  { %6756 = vmatprep.mubr.msk.f32.mxu0 %vm1116_vm2, %v14266_v20  ;;  %6788 = vmatprep.mubr.msk.f32.mxu1 %vm1118_vm3, %v14266_v20  ;;  %v9206_v5 = vadd.s32 %v865_v43, %v863_v48  ;;  %v1104_v9 = vcvt.f32.s32 %v9118_v24 }
 0x291   :  { %6757 = vmatmul.mubr.msk.f32.gmra.mxu0 %vm1115_vm4, %v14266_v20  ;;  %6789 = vmatmul.mubr.msk.f32.gmra.mxu1 %vm1117_vm5, %v14266_v20  ;;  %v882_v31 = vpop.xlane.xlu0 %881  ;;  %v985_v34 = vshll.u32 %v984_v17, 16  ;;  %v1005_v45 = vshll.u32 %v1004_v63, 16  ;;  %v7939_v63 = vld [vmem:[%s14234_s0] sm:$0xff] }
 0x292   :  { %14607 = vst [vmem:[#allocation18_spill] sm:$0xff] %v9206_v5  ;;  %1956 = vmatpush1.msra.mxu1 %v1691_v7  ;;  %1796 = vmatprep.subr.mxu0 %v1686_v52  ;;  %v883_v19 = vcvt.f32.s32 %v882_v31  ;;  %vm1120_vm6 = vcmp.eq.s32.totalorder %v8513_v41, %v9206_v5  ;;  %vm1122_vm7 = vcmp.eq.s32.totalorder %v8527_v49, %v9206_v5  ;;  %v1044_v31 = vcvt.f32.s32 %v9103_v8 }
 0x293   :  { %vm1119_vm8 = vcmp.eq.s32.totalorder %v8510_v35, %v9206_v5  ;;  %1797 = vmatpush1.msra.mxu0 %v1685_v50  ;;  %1957 = vmatprep.subr.mxu1 %v1688_v61  ;;  %vm1121_vm9 = vcmp.eq.s32.totalorder %v8518_v37, %v9206_v5  ;;  %v1024_v50 = vcvt.f32.s32 %v9098_v36  ;;  %v1105_v24 = vshll.u32 %v1104_v9, 16 }
 0x294   :  { %6758 = vmatprep.mubr.msk.f32.mxu0 %vm1120_vm6, %v14266_v20  ;;  %6790 = vmatprep.mubr.msk.f32.mxu1 %vm1122_vm7, %v14266_v20  ;;  %v9224_v39 = vadd.s32 %v885_v29, %v883_v19  ;;  %v1045_v8 = vshll.u32 %v1044_v31, 16  ;;  %v7947_v31 = vld [vmem:[%s14234_s0 + $0x40] sm:$0xff] }
 0x295   :  { %6759 = vmatmul.mubr.msk.f32.gmra.mxu0 %vm1119_vm8, %v14266_v20  ;;  %6791 = vmatmul.mubr.msk.f32.gmra.mxu1 %vm1121_vm9, %v14266_v20  ;;  %v902_v32 = vpop.xlane.xlu1 %901  ;;  %v1025_v36 = vshll.u32 %v1024_v50, 16  ;;  %v7943_v50 = vld [vmem:[%s14234_s0 + $0x20] sm:$0xff] }
 0x296   :  { %14608 = vst [vmem:[#allocation17_spill] sm:$0xff] %v9224_v39  ;;  %1958 = vmatpush1.msra.mxu1 %v1687_v18  ;;  %v903_v55 = vcvt.f32.s32 %v902_v32  ;;  %vm1124_vm10 = vcmp.eq.s32.totalorder %v8513_v41, %v9224_v39  ;;  %vm1126_vm11 = vcmp.eq.s32.totalorder %v8527_v49, %v9224_v39  ;;  %vm1123_vm12 = vcmp.eq.s32.totalorder %v8510_v35, %v9224_v39 }
 0x297   :  { %6760 = vmatprep.mubr.msk.f32.mxu0 %vm1124_vm10, %v14266_v20  ;;  %6792 = vmatprep.mubr.msk.f32.mxu1 %vm1126_vm11, %v14266_v20  ;;  %vm1125_vm13 = vcmp.eq.s32.totalorder %v8518_v37, %v9224_v39 }
 0x298   :  { %v9239_v11 = vadd.s32 %v905_v22, %v903_v55 }
 0x299   :  { %6761 = vmatmul.mubr.msk.f32.gmra.mxu0 %vm1123_vm12, %v14266_v20  ;;  %6793 = vmatmul.mubr.msk.f32.gmra.mxu1 %vm1125_vm13, %v14266_v20  ;;  %v922_v1 = vpop.xlane.xlu0 %921 }
 0x29a   :  { %14609 = vst [vmem:[#allocation19_spill] sm:$0xff] %v9239_v11  ;;  %v923_v33 = vcvt.f32.s32 %v922_v1  ;;  %vm1128_vm14 = vcmp.eq.s32.totalorder %v8513_v41, %v9239_v11  ;;  %vm1130_vm15 = vcmp.eq.s32.totalorder %v8527_v49, %v9239_v11  ;;  %vm1127_vm1 = vcmp.eq.s32.totalorder %v8510_v35, %v9239_v11 }
 0x29b   :  { %6762 = vmatprep.mubr.msk.f32.mxu0 %vm1128_vm14, %v14266_v20  ;;  %6794 = vmatprep.mubr.msk.f32.mxu1 %vm1130_vm15, %v14266_v20  ;;  %vm1129_vm2 = vcmp.eq.s32.totalorder %v8518_v37, %v9239_v11 }
 0x29c   :  { %v9254_v38 = vadd.s32 %v925_v14, %v923_v33 }
 0x29d   :  { %6763 = vmatmul.mubr.msk.f32.gmra.mxu0 %vm1127_vm1, %v14266_v20  ;;  %6795 = vmatmul.mubr.msk.f32.gmra.mxu1 %vm1129_vm2, %v14266_v20  ;;  %v942_v42 = vpop.xlane.xlu1 %941 }
 0x29e   :  { %14610 = vst [vmem:[#allocation20_spill] sm:$0xff] %v9254_v38  ;;  %v943_v47 = vcvt.f32.s32 %v942_v42  ;;  %vm1132_vm3 = vcmp.eq.s32.totalorder %v8513_v41, %v9254_v38  ;;  %vm1134_vm4 = vcmp.eq.s32.totalorder %v8527_v49, %v9254_v38  ;;  %vm1131_vm5 = vcmp.eq.s32.totalorder %v8510_v35, %v9254_v38 }
 0x29f   :  { %6764 = vmatprep.mubr.msk.f32.mxu0 %vm1132_vm3, %v14266_v20  ;;  %6796 = vmatprep.mubr.msk.f32.mxu1 %vm1134_vm4, %v14266_v20  ;;  %vm1133_vm6 = vcmp.eq.s32.totalorder %v8518_v37, %v9254_v38 }
 0x2a0   :  { %v9269_v3 = vadd.s32 %v945_v58, %v943_v47 }
 0x2a1   :  { %6765 = vmatmul.mubr.msk.f32.gmra.mxu0 %vm1131_vm5, %v14266_v20  ;;  %6797 = vmatmul.mubr.msk.f32.gmra.mxu1 %vm1133_vm6, %v14266_v20  ;;  %v962_v60 = vpop.xlane.xlu0 %961 }
 0x2a2   :  { %14611 = vst [vmem:[#allocation21_spill] sm:$0xff] %v9269_v3  ;;  %v963_v43 = vcvt.f32.s32 %v962_v60  ;;  %vm1136_vm7 = vcmp.eq.s32.totalorder %v8513_v41, %v9269_v3  ;;  %vm1138_vm8 = vcmp.eq.s32.totalorder %v8527_v49, %v9269_v3  ;;  %vm1135_vm9 = vcmp.eq.s32.totalorder %v8510_v35, %v9269_v3 }
 0x2a3   :  { %6766 = vmatprep.mubr.msk.f32.mxu0 %vm1136_vm7, %v14266_v20  ;;  %6798 = vmatprep.mubr.msk.f32.mxu1 %vm1138_vm8, %v14266_v20  ;;  %vm1137_vm10 = vcmp.eq.s32.totalorder %v8518_v37, %v9269_v3 }
 0x2a4   :  { %v9284_v56 = vadd.s32 %v965_v16, %v963_v43 }
 0x2a5   :  { %6767 = vmatmul.mubr.msk.f32.gmra.mxu0 %vm1135_vm9, %v14266_v20  ;;  %6799 = vmatmul.mubr.msk.f32.gmra.mxu1 %vm1137_vm10, %v14266_v20  ;;  %v982_v48 = vpop.xlane.xlu1 %981 }
 0x2a6   :  { %14612 = vst [vmem:[#allocation38_spill] sm:$0xff] %v9284_v56  ;;  %v983_v7 = vcvt.f32.s32 %v982_v48  ;;  %vm1140_vm11 = vcmp.eq.s32.totalorder %v8513_v41, %v9284_v56  ;;  %vm1142_vm12 = vcmp.eq.s32.totalorder %v8527_v49, %v9284_v56  ;;  %vm1139_vm13 = vcmp.eq.s32.totalorder %v8510_v35, %v9284_v56  ;;  %v7940_v48 = vld [vmem:[%s14234_s0 + $0x8] sm:$0xff] }
 0x2a7   :  { %6768 = vmatprep.mubr.msk.f32.mxu0 %vm1140_vm11, %v14266_v20  ;;  %6800 = vmatprep.mubr.msk.f32.mxu1 %vm1142_vm12, %v14266_v20  ;;  %vm1141_vm14 = vcmp.eq.s32.totalorder %v8518_v37, %v9284_v56 }
 0x2a8   :  { %v9299_v52 = vadd.s32 %v985_v34, %v983_v7  ;;  %v14620_v34 = vmov 0.0   ;;  %v7941_v7 = vld [vmem:[%s14234_s0 + $0x10] sm:$0xff] }
 0x2a9   :  { %6769 = vmatmul.mubr.msk.f32.gmra.mxu0 %vm1139_vm13, %v14266_v20  ;;  %6801 = vmatmul.mubr.msk.f32.gmra.mxu1 %vm1141_vm14, %v14266_v20  ;;  %v1002_v61 = vpop.xlane.xlu0 %1001 }
 0x2aa   :  { %14613 = vst [vmem:[#allocation39_spill] sm:$0xff] %v9299_v52  ;;  %v1003_v29 = vcvt.f32.s32 %v1002_v61  ;;  %vm1144_vm15 = vcmp.eq.s32.totalorder %v8513_v41, %v9299_v52  ;;  %vm1146_vm1 = vcmp.eq.s32.totalorder %v8527_v49, %v9299_v52  ;;  %vm1143_vm2 = vcmp.eq.s32.totalorder %v8510_v35, %v9299_v52  ;;  %v7944_v61 = vld [vmem:[%s14234_s0 + $0x28] sm:$0xff] }
 0x2ab   :  { %6770 = vmatprep.mubr.msk.f32.mxu0 %vm1144_vm15, %v14266_v20  ;;  %6802 = vmatprep.mubr.msk.f32.mxu1 %vm1146_vm1, %v14266_v20  ;;  %vm1145_vm3 = vcmp.eq.s32.totalorder %v8518_v37, %v9299_v52 }
 0x2ac   :  { %v9314_v27 = vadd.s32 %v1005_v45, %v1003_v29  ;;  %v7942_v45 = vld [vmem:[%s14234_s0 + $0x18] sm:$0xff]  ;;  %v7945_v29 = vld [vmem:[%s14234_s0 + $0x30] sm:$0xff] }
 0x2ad   :  { %6771 = vmatmul.mubr.msk.f32.gmra.mxu0 %vm1143_vm2, %v14266_v20  ;;  %6803 = vmatmul.mubr.msk.f32.gmra.mxu1 %vm1145_vm3, %v14266_v20  ;;  %v1022_v19 = vpop.xlane.xlu1 %1021 }
 0x2ae   :  { %14614 = vst [vmem:[#allocation40_spill] sm:$0xff] %v9314_v27  ;;  %v1023_v18 = vcvt.f32.s32 %v1022_v19  ;;  %vm1148_vm4 = vcmp.eq.s32.totalorder %v8513_v41, %v9314_v27  ;;  %vm1150_vm5 = vcmp.eq.s32.totalorder %v8527_v49, %v9314_v27  ;;  %vm1147_vm6 = vcmp.eq.s32.totalorder %v8510_v35, %v9314_v27  ;;  %v7948_v19 = vld [vmem:[%s14234_s0 + $0x48] sm:$0xff] }
 0x2af   :  { %6772 = vmatprep.mubr.msk.f32.mxu0 %vm1148_vm4, %v14266_v20  ;;  %6804 = vmatprep.mubr.msk.f32.mxu1 %vm1150_vm5, %v14266_v20  ;;  %vm1149_vm7 = vcmp.eq.s32.totalorder %v8518_v37, %v9314_v27 }
 0x2b0   :  { %v9329_v22 = vadd.s32 %v1025_v36, %v1023_v18  ;;  %v7946_v36 = vld [vmem:[%s14234_s0 + $0x38] sm:$0xff]  ;;  %v7949_v18 = vld [vmem:[%s14234_s0 + $0x50] sm:$0xff] }
 0x2b1   :  { %6773 = vmatmul.mubr.msk.f32.gmra.mxu0 %vm1147_vm6, %v14266_v20  ;;  %6805 = vmatmul.mubr.msk.f32.gmra.mxu1 %vm1149_vm7, %v14266_v20  ;;  %v1042_v32 = vpop.xlane.xlu0 %1041 }
 0x2b2   :  { %14615 = vst [vmem:[#allocation41_spill] sm:$0xff] %v9329_v22  ;;  %v1043_v55 = vcvt.f32.s32 %v1042_v32  ;;  %vm1152_vm8 = vcmp.eq.s32.totalorder %v8513_v41, %v9329_v22  ;;  %vm1154_vm9 = vcmp.eq.s32.totalorder %v8527_v49, %v9329_v22  ;;  %vm1151_vm10 = vcmp.eq.s32.totalorder %v8510_v35, %v9329_v22  ;;  %v7952_v32 = vld [vmem:[%s14234_s0 + $0x68] sm:$0xff] }
 0x2b3   :  { %6774 = vmatprep.mubr.msk.f32.mxu0 %vm1152_vm8, %v14266_v20  ;;  %6806 = vmatprep.mubr.msk.f32.mxu1 %vm1154_vm9, %v14266_v20  ;;  %vm1153_vm11 = vcmp.eq.s32.totalorder %v8518_v37, %v9329_v22 }
 0x2b4   :  { %v9344_v14 = vadd.s32 %v1045_v8, %v1043_v55  ;;  %v7950_v8 = vld [vmem:[%s14234_s0 + $0x58] sm:$0xff]  ;;  %v7953_v55 = vld [vmem:[%s14234_s0 + $0x70] sm:$0xff] }
 0x2b5   :  { %6775 = vmatmul.mubr.msk.f32.gmra.mxu0 %vm1151_vm10, %v14266_v20  ;;  %6807 = vmatmul.mubr.msk.f32.gmra.mxu1 %vm1153_vm11, %v14266_v20  ;;  %v1062_v1 = vpop.xlane.xlu1 %1061 }
 0x2b6   :  { %14616 = vst [vmem:[#allocation42_spill] sm:$0xff] %v9344_v14  ;;  %v1063_v33 = vcvt.f32.s32 %v1062_v1  ;;  %vm1156_vm12 = vcmp.eq.s32.totalorder %v8513_v41, %v9344_v14  ;;  %vm1158_vm13 = vcmp.eq.s32.totalorder %v8527_v49, %v9344_v14  ;;  %vm1155_vm14 = vcmp.eq.s32.totalorder %v8510_v35, %v9344_v14 }
 0x2b7   :  { %6776 = vmatprep.mubr.msk.f32.mxu0 %vm1156_vm12, %v14266_v20  ;;  %6808 = vmatprep.mubr.msk.f32.mxu1 %vm1158_vm13, %v14266_v20  ;;  %vm1157_vm15 = vcmp.eq.s32.totalorder %v8518_v37, %v9344_v14 }
 0x2b8   :  { %v9359_v58 = vadd.s32 %v1065_v46, %v1063_v33  ;;  %v7954_v46 = vld [vmem:[%s14234_s0 + $0x78] sm:$0xff] }
 0x2b9   :  { %6777 = vmatmul.mubr.msk.f32.gmra.mxu0 %vm1155_vm14, %v14266_v20  ;;  %6809 = vmatmul.mubr.msk.f32.gmra.mxu1 %vm1157_vm15, %v14266_v20  ;;  %v1082_v42 = vpop.xlane.xlu0 %1081 }
 0x2ba   :  { %14617 = vst [vmem:[#allocation43_spill] sm:$0xff] %v9359_v58  ;;  %v1083_v47 = vcvt.f32.s32 %v1082_v42  ;;  %vm1160_vm1 = vcmp.eq.s32.totalorder %v8513_v41, %v9359_v58  ;;  %vm1162_vm2 = vcmp.eq.s32.totalorder %v8527_v49, %v9359_v58  ;;  %vm1159_vm3 = vcmp.eq.s32.totalorder %v8510_v35, %v9359_v58 }
 0x2bb   :  { %6778 = vmatprep.mubr.msk.f32.mxu0 %vm1160_vm1, %v14266_v20  ;;  %6810 = vmatprep.mubr.msk.f32.mxu1 %vm1162_vm2, %v14266_v20  ;;  %vm1161_vm4 = vcmp.eq.s32.totalorder %v8518_v37, %v9359_v58 }
 0x2bc   :  { %v9374_v16 = vadd.s32 %v1085_v13, %v1083_v47 }
 0x2bd   :  { %6779 = vmatmul.mubr.msk.f32.gmra.mxu0 %vm1159_vm3, %v14266_v20  ;;  %6811 = vmatmul.mubr.msk.f32.gmra.mxu1 %vm1161_vm4, %v14266_v20  ;;  %v1102_v17 = vpop.xlane.xlu1 %1101 }
 0x2be   :  { %14618 = vst [vmem:[#allocation44_spill] sm:$0xff] %v9374_v16  ;;  %v1103_v60 = vcvt.f32.s32 %v1102_v17  ;;  %vm1164_vm5 = vcmp.eq.s32.totalorder %v8513_v41, %v9374_v16  ;;  %vm1166_vm6 = vcmp.eq.s32.totalorder %v8527_v49, %v9374_v16  ;;  %vm1163_vm7 = vcmp.eq.s32.totalorder %v8510_v35, %v9374_v16 }
 0x2bf   :  { %6780 = vmatprep.mubr.msk.f32.mxu0 %vm1164_vm5, %v14266_v20  ;;  %6812 = vmatprep.mubr.msk.f32.mxu1 %vm1166_vm6, %v14266_v20  ;;  %vm1165_vm8 = vcmp.eq.s32.totalorder %v8518_v37, %v9374_v16 }
 0x2c0   :  { %v9388_v43 = vadd.s32 %v1105_v24, %v1103_v60 }
 0x2c1   :  { %6781 = vmatmul.mubr.msk.f32.gmra.mxu0 %vm1163_vm7, %v14266_v20  ;;  %6813 = vmatmul.mubr.msk.f32.gmra.mxu1 %vm1165_vm8, %v14266_v20 }
 0x2c2   :  { %14619 = vst [vmem:[#allocation45_spill] sm:$0xff] %v9388_v43  ;;  %vm1168_vm9 = vcmp.eq.s32.totalorder %v8513_v41, %v9388_v43  ;;  %vm1170_vm10 = vcmp.eq.s32.totalorder %v8527_v49, %v9388_v43  ;;  %vm1167_vm11 = vcmp.eq.s32.totalorder %v8510_v35, %v9388_v43  ;;  %vm1169_vm12 = vcmp.eq.s32.totalorder %v8518_v37, %v9388_v43 }
 0x2c3   :  { %6782 = vmatprep.mubr.msk.f32.mxu0 %vm1168_vm9, %v14266_v20  ;;  %6814 = vmatprep.mubr.msk.f32.mxu1 %vm1170_vm10, %v14266_v20 }
 0x2c5   :  { %6783 = vmatmul.mubr.msk.f32.gmra.mxu0 %vm1167_vm11, %v14266_v20  ;;  %6815 = vmatmul.mubr.msk.f32.gmra.mxu1 %vm1169_vm12, %v14266_v20 }
 0x2c6   :  { %1830 = vmatprep.mubr.f32.mxu0 %v14620_v34  ;;  %1991 = vmatprep.mubr.f32.mxu1 %v14620_v34 }
 0x2c9   :  { %6816 = vmatmul.mubr.msk.f32.vlgmr.msra.gmra.mxu0 %vm14523_vm0, %v7939_v63  ;;  %6832 = vmatmul.mubr.msk.f32.vlgmr.msra.gmra.mxu1 %vm14523_vm0, %v7939_v63 }
 0x2ca   :  { %1836 = vmatprep.mubr.f32.mxu0 %v14620_v34  ;;  %1997 = vmatprep.mubr.f32.mxu1 %v14620_v34 }
 0x2cd   :  { %6817 = vmatmul.mubr.msk.f32.gmra.mxu0 %vm14523_vm0, %v7940_v48  ;;  %6833 = vmatmul.mubr.msk.f32.gmra.mxu1 %vm14523_vm0, %v7940_v48 }
 0x2ce   :  { %1842 = vmatprep.mubr.f32.mxu0 %v14620_v34  ;;  %2003 = vmatprep.mubr.f32.mxu1 %v14620_v34 }
 0x2d1   :  { %6818 = vmatmul.mubr.msk.f32.gmra.mxu0 %vm14523_vm0, %v7941_v7  ;;  %6834 = vmatmul.mubr.msk.f32.gmra.mxu1 %vm14523_vm0, %v7941_v7 }
 0x2d2   :  { %1848 = vmatprep.mubr.f32.mxu0 %v14620_v34  ;;  %2009 = vmatprep.mubr.f32.mxu1 %v14620_v34 }
 0x2d5   :  { %6819 = vmatmul.mubr.msk.f32.gmra.mxu0 %vm14523_vm0, %v7942_v45  ;;  %6835 = vmatmul.mubr.msk.f32.gmra.mxu1 %vm14523_vm0, %v7942_v45 }
 0x2d6   :  { %1854 = vmatprep.mubr.f32.mxu0 %v14620_v34  ;;  %2015 = vmatprep.mubr.f32.mxu1 %v14620_v34 }
 0x2d9   :  { %6820 = vmatmul.mubr.msk.f32.gmra.mxu0 %vm14523_vm0, %v7943_v50  ;;  %6836 = vmatmul.mubr.msk.f32.gmra.mxu1 %vm14523_vm0, %v7943_v50 }
 0x2da   :  { %1860 = vmatprep.mubr.f32.mxu0 %v14620_v34  ;;  %2021 = vmatprep.mubr.f32.mxu1 %v14620_v34 }
 0x2dd   :  { %6821 = vmatmul.mubr.msk.f32.gmra.mxu0 %vm14523_vm0, %v7944_v61  ;;  %6837 = vmatmul.mubr.msk.f32.gmra.mxu1 %vm14523_vm0, %v7944_v61 }
 0x2de   :  { %1866 = vmatprep.mubr.f32.mxu0 %v14620_v34  ;;  %2027 = vmatprep.mubr.f32.mxu1 %v14620_v34 }
 0x2e1   :  { %6822 = vmatmul.mubr.msk.f32.gmra.mxu0 %vm14523_vm0, %v7945_v29  ;;  %6838 = vmatmul.mubr.msk.f32.gmra.mxu1 %vm14523_vm0, %v7945_v29 }
 0x2e2   :  { %1872 = vmatprep.mubr.f32.mxu0 %v14620_v34  ;;  %2033 = vmatprep.mubr.f32.mxu1 %v14620_v34 }
 0x2e5   :  { %6823 = vmatmul.mubr.msk.f32.gmra.mxu0 %vm14523_vm0, %v7946_v36  ;;  %6839 = vmatmul.mubr.msk.f32.gmra.mxu1 %vm14523_vm0, %v7946_v36 }
 0x2e6   :  { %1878 = vmatprep.mubr.f32.mxu0 %v14620_v34  ;;  %2039 = vmatprep.mubr.f32.mxu1 %v14620_v34 }
 0x2e9   :  { %6824 = vmatmul.mubr.msk.f32.gmra.mxu0 %vm14523_vm0, %v7947_v31  ;;  %6840 = vmatmul.mubr.msk.f32.gmra.mxu1 %vm14523_vm0, %v7947_v31 }
 0x2ea   :  { %1884 = vmatprep.mubr.f32.mxu0 %v14620_v34  ;;  %2045 = vmatprep.mubr.f32.mxu1 %v14620_v34 }
 0x2ed   :  { %6825 = vmatmul.mubr.msk.f32.gmra.mxu0 %vm14523_vm0, %v7948_v19  ;;  %6841 = vmatmul.mubr.msk.f32.gmra.mxu1 %vm14523_vm0, %v7948_v19 }
 0x2ee   :  { %1890 = vmatprep.mubr.f32.mxu0 %v14620_v34  ;;  %2051 = vmatprep.mubr.f32.mxu1 %v14620_v34 }
 0x2f1   :  { %6826 = vmatmul.mubr.msk.f32.gmra.mxu0 %vm14523_vm0, %v7949_v18  ;;  %6842 = vmatmul.mubr.msk.f32.gmra.mxu1 %vm14523_vm0, %v7949_v18 }
 0x2f2   :  { %1896 = vmatprep.mubr.f32.mxu0 %v14620_v34  ;;  %2057 = vmatprep.mubr.f32.mxu1 %v14620_v34 }
 0x2f5   :  { %6827 = vmatmul.mubr.msk.f32.gmra.mxu0 %vm14523_vm0, %v7950_v8  ;;  %6843 = vmatmul.mubr.msk.f32.gmra.mxu1 %vm14523_vm0, %v7950_v8 }
 0x2f6   :  { %1902 = vmatprep.mubr.f32.mxu0 %v14620_v34  ;;  %2063 = vmatprep.mubr.f32.mxu1 %v14620_v34 }
 0x2f9   :  { %6828 = vmatmul.mubr.msk.f32.gmra.mxu0 %vm14523_vm0, %v7951_v21  ;;  %6844 = vmatmul.mubr.msk.f32.gmra.mxu1 %vm14523_vm0, %v7951_v21 }
 0x2fa   :  { %1908 = vmatprep.mubr.f32.mxu0 %v14620_v34  ;;  %2069 = vmatprep.mubr.f32.mxu1 %v14620_v34 }
 0x2fd   :  { %6829 = vmatmul.mubr.msk.f32.gmra.mxu0 %vm14523_vm0, %v7952_v32  ;;  %6845 = vmatmul.mubr.msk.f32.gmra.mxu1 %vm14523_vm0, %v7952_v32 }
 0x2fe   :  { %1914 = vmatprep.mubr.f32.mxu0 %v14620_v34  ;;  %2075 = vmatprep.mubr.f32.mxu1 %v14620_v34 }
 0x301   :  { %6830 = vmatmul.mubr.msk.f32.gmra.mxu0 %vm14523_vm0, %v7953_v55  ;;  %6846 = vmatmul.mubr.msk.f32.gmra.mxu1 %vm14523_vm0, %v7953_v55 }
 0x302   :  { %1920 = vmatprep.mubr.f32.mxu0 %v14620_v34  ;;  %2081 = vmatprep.mubr.f32.mxu1 %v14620_v34 }
 0x305   :  { %6831 = vmatmul.mubr.msk.f32.gmra.mxu0 %vm14523_vm0, %v7954_v46  ;;  %6847 = vmatmul.mubr.msk.f32.gmra.mxu1 %vm14523_vm0, %v7954_v46 }
 0x347   :  { %v7328_v53 = vpop.f32.mrf.mxu0  ;;  %v7408_v1 = vpop.f32.mrf.mxu1 }
 0x349   :  { %v7329_v33 = vpop.f32.mrf.mxu0  ;;  %v7409_v13 = vpop.f32.mrf.mxu1 }
 0x34a   :  { %v7330_v9 = vadd.f32 %v7329_v33, %v7328_v53  ;;  %v7410_v42 = vadd.f32 %v7409_v13, %v7408_v1 }
 0x34b   :  { %v7331_v47 = vpop.f32.mrf.mxu0 }
 0x34c   :  { %v7411_v24 = vpop.f32.mrf.mxu1  ;;  %v9516_v17 = vadd.f32 %v7410_v42, %v7330_v9 }
 0x34d   :  { %v7332_v60 = vpop.f32.mrf.mxu0 }
 0x34e   :  { %14621 = vst [vmem:[#allocation46_spill] sm:$0xff] %v9516_v17  ;;  %v7412_v63 = vpop.f32.mrf.mxu1  ;;  %v7333_v48 = vadd.f32 %v7332_v60, %v7331_v47 }
 0x34f   :  { %v7413_v7 = vadd.f32 %v7412_v63, %v7411_v24 }
 0x351   :  { %v9518_v45 = vadd.f32 %v7413_v7, %v7333_v48  ;;  %v7334_v50 = vpop.f32.mrf.mxu0  ;;  %v7414_v61 = vpop.f32.mrf.mxu1 }
 0x353   :  { %14622 = vst [vmem:[#allocation47_spill] sm:$0xff] %v9518_v45  ;;  %v7335_v29 = vpop.f32.mrf.mxu0  ;;  %v7415_v36 = vpop.f32.mrf.mxu1 }
 0x354   :  { %v7336_v31 = vadd.f32 %v7335_v29, %v7334_v50  ;;  %v7416_v19 = vadd.f32 %v7415_v36, %v7414_v61 }
 0x355   :  { %v7337_v18 = vpop.f32.mrf.mxu0  ;;  %v7417_v8 = vpop.f32.mrf.mxu1 }
 0x356   :  { %v9520_v21 = vadd.f32 %v7416_v19, %v7336_v31 }
 0x357   :  { %v7338_v32 = vpop.f32.mrf.mxu0  ;;  %v7418_v55 = vpop.f32.mrf.mxu1 }
 0x358   :  { %14623 = vst [vmem:[#allocation48_spill] sm:$0xff] %v9520_v21  ;;  %v7339_v46 = vadd.f32 %v7338_v32, %v7337_v18  ;;  %v7419_v53 = vadd.f32 %v7418_v55, %v7417_v8 }
 0x359   :  { %v7340_v1 = vpop.f32.mrf.mxu0  ;;  %v7420_v33 = vpop.f32.mrf.mxu1 }
 0x35a   :  { %v9522_v13 = vadd.f32 %v7419_v53, %v7339_v46 }
 0x35b   :  { %v7341_v9 = vpop.f32.mrf.mxu0  ;;  %v7421_v42 = vpop.f32.mrf.mxu1 }
 0x35c   :  { %14624 = vst [vmem:[#allocation49_spill] sm:$0xff] %v9522_v13  ;;  %v7342_v47 = vadd.f32 %v7341_v9, %v7340_v1  ;;  %v7422_v24 = vadd.f32 %v7421_v42, %v7420_v33 }
 0x35d   :  { %v7343_v60 = vpop.f32.mrf.mxu0  ;;  %v7423_v63 = vpop.f32.mrf.mxu1 }
 0x35e   :  { %v9524_v48 = vadd.f32 %v7422_v24, %v7342_v47 }
 0x35f   :  { %v7344_v7 = vpop.f32.mrf.mxu0  ;;  %v7424_v50 = vpop.f32.mrf.mxu1 }
 0x360   :  { %14625 = vst [vmem:[#allocation50_spill] sm:$0xff] %v9524_v48  ;;  %v7345_v61 = vadd.f32 %v7344_v7, %v7343_v60  ;;  %v7425_v29 = vadd.f32 %v7424_v50, %v7423_v63 }
 0x361   :  { %v7346_v36 = vpop.f32.mrf.mxu0  ;;  %v7426_v31 = vpop.f32.mrf.mxu1 }
 0x362   :  { %v9526_v19 = vadd.f32 %v7425_v29, %v7345_v61 }
 0x363   :  { %v7347_v18 = vpop.f32.mrf.mxu0  ;;  %v7427_v8 = vpop.f32.mrf.mxu1 }
 0x364   :  { %14626 = vst [vmem:[#allocation51_spill] sm:$0xff] %v9526_v19  ;;  %v7348_v32 = vadd.f32 %v7347_v18, %v7346_v36  ;;  %v7428_v55 = vadd.f32 %v7427_v8, %v7426_v31 }
 0x365   :  { %v7349_v46 = vpop.f32.mrf.mxu0  ;;  %v7429_v53 = vpop.f32.mrf.mxu1 }
 0x366   :  { %v9528_v1 = vadd.f32 %v7428_v55, %v7348_v32 }
 0x367   :  { %v7350_v33 = vpop.f32.mrf.mxu0  ;;  %v7430_v9 = vpop.f32.mrf.mxu1 }
 0x368   :  { %14627 = vst [vmem:[#allocation52_spill] sm:$0xff] %v9528_v1  ;;  %v7351_v42 = vadd.f32 %v7350_v33, %v7349_v46  ;;  %v7431_v47 = vadd.f32 %v7430_v9, %v7429_v53 }
 0x369   :  { %v7352_v24 = vpop.f32.mrf.mxu0  ;;  %v7432_v20 = vpop.f32.mrf.mxu1 }
 0x36a   :  { %v9530_v60 = vadd.f32 %v7431_v47, %v7351_v42 }
 0x36b   :  { %v7353_v63 = vpop.f32.mrf.mxu0  ;;  %v7433_v7 = vpop.f32.mrf.mxu1 }
 0x36c   :  { %14628 = vst [vmem:[#allocation53_spill] sm:$0xff] %v9530_v60  ;;  %v7354_v50 = vadd.f32 %v7353_v63, %v7352_v24  ;;  %v7434_v61 = vadd.f32 %v7433_v7, %v7432_v20 }
 0x36d   :  { %v7355_v29 = vpop.f32.mrf.mxu0  ;;  %v7435_v19 = vpop.f32.mrf.mxu1 }
 0x36e   :  { %v9532_v36 = vadd.f32 %v7434_v61, %v7354_v50 }
 0x36f   :  { %v7356_v31 = vpop.f32.mrf.mxu0  ;;  %v7436_v18 = vpop.f32.mrf.mxu1 }
 0x370   :  { %14629 = vst [vmem:[#allocation54_spill] sm:$0xff] %v9532_v36  ;;  %v7357_v8 = vadd.f32 %v7356_v31, %v7355_v29  ;;  %v7437_v32 = vadd.f32 %v7436_v18, %v7435_v19 }
 0x371   :  { %v7358_v55 = vpop.f32.mrf.mxu0  ;;  %v7438_v1 = vpop.f32.mrf.mxu1 }
 0x372   :  { %v9534_v46 = vadd.f32 %v7437_v32, %v7357_v8 }
 0x373   :  { %v7359_v53 = vpop.f32.mrf.mxu0  ;;  %v7439_v33 = vpop.f32.mrf.mxu1 }
 0x374   :  { %14630 = vst [vmem:[#allocation55_spill] sm:$0xff] %v9534_v46  ;;  %v7360_v9 = vadd.f32 %v7359_v53, %v7358_v55  ;;  %v7440_v42 = vadd.f32 %v7439_v33, %v7438_v1 }
 0x375   :  { %v7361_v47 = vpop.f32.mrf.mxu0  ;;  %v7441_v60 = vpop.f32.mrf.mxu1 }
 0x376   :  { %v9536_v24 = vadd.f32 %v7440_v42, %v7360_v9 }
 0x377   :  { %v7362_v20 = vpop.f32.mrf.mxu0  ;;  %v7442_v63 = vpop.f32.mrf.mxu1 }
 0x378   :  { %14631 = vst [vmem:[#allocation56_spill] sm:$0xff] %v9536_v24  ;;  %v7363_v7 = vadd.f32 %v7362_v20, %v7361_v47  ;;  %v7443_v50 = vadd.f32 %v7442_v63, %v7441_v60 }
 0x379   :  { %v7364_v61 = vpop.f32.mrf.mxu0  ;;  %v7444_v36 = vpop.f32.mrf.mxu1 }
 0x37a   :  { %v9538_v29 = vadd.f32 %v7443_v50, %v7363_v7 }
 0x37b   :  { %v7365_v19 = vpop.f32.mrf.mxu0  ;;  %v7445_v31 = vpop.f32.mrf.mxu1 }
 0x37c   :  { %14632 = vst [vmem:[#allocation57_spill] sm:$0xff] %v9538_v29  ;;  %v7366_v18 = vadd.f32 %v7365_v19, %v7364_v61  ;;  %v7446_v8 = vadd.f32 %v7445_v31, %v7444_v36  ;;  %v1765_v36 = vld [vmem:[%s14237_s3 + $0x4] sm:$0xf] }
 0x37d   :  { %v7367_v32 = vpop.f32.mrf.mxu0  ;;  %v7447_v46 = vpop.f32.mrf.mxu1 }
 0x37e   :  { %v9540_v55 = vadd.f32 %v7446_v8, %v7366_v18  ;;  %v14636_v8 = vld [vmem:[#allocation6_spill] sm:$0xff] }
 0x37f   :  { %v7368_v1 = vpop.f32.mrf.mxu0  ;;  %v7448_v53 = vpop.f32.mrf.mxu1 }
 0x380   :  { %14633 = vst [vmem:[#allocation58_spill] sm:$0xff] %v9540_v55  ;;  %v7369_v33 = vadd.f32 %v7368_v1, %v7367_v32  ;;  %v7449_v9 = vadd.f32 %v7448_v53, %v7447_v46  ;;  %v9550_v46 = vrot.slane %v1765_v36, %v14636_v8  ;;  %v14637_v53 = vld [vmem:[#allocation7_spill] sm:$0xff] }
 0x381   :  { %v7370_v42 = vpop.f32.mrf.mxu0  ;;  %v7450_v24 = vpop.f32.mrf.mxu1 }
 0x382   :  { %v9542_v47 = vadd.f32 %v7449_v9, %v7369_v33  ;;  %v9553_v33 = vrot.slane %v1765_v36, %v14637_v53  ;;  %v14638_v9 = vld [vmem:[#allocation8_spill] sm:$0xff] }
 0x383   :  { %v7371_v60 = vpop.f32.mrf.mxu0  ;;  %v7451_v20 = vpop.f32.mrf.mxu1 }
 0x384   :  { %14634 = vst [vmem:[#allocation59_spill] sm:$0xff] %v9542_v47  ;;  %v7372_v63 = vadd.f32 %v7371_v60, %v7370_v42  ;;  %v7452_v7 = vadd.f32 %v7451_v20, %v7450_v24  ;;  %v9556_v24 = vrot.slane %v1765_v36, %v14638_v9 }
 0x385   :  { %v7373_v50 = vpop.f32.mrf.mxu0  ;;  %v7453_v61 = vpop.f32.mrf.mxu1 }
 0x386   :  { %v9547_v19 = vadd.f32 %v7452_v7, %v7372_v63  ;;  %v14640_v7 = vld [vmem:[#allocation9_spill] sm:$0xff] }
 0x387   :  { %v7374_v31 = vpop.f32.mrf.mxu0  ;;  %v7454_v18 = vpop.f32.mrf.mxu1 }
 0x388   :  { %14635 = vst [vmem:[#allocation60_spill] sm:$0xff] %v9547_v19  ;;  %v7375_v32 = vadd.f32 %v7374_v31, %v7373_v50  ;;  %v7455_v1 = vadd.f32 %v7454_v18, %v7453_v61  ;;  %v9561_v19 = vrot.slane %v1765_v36, %v14640_v7 }
 0x389   :  { %v1832_v42 = vpop.f32.mrf.mxu0  ;;  %v1993_v60 = vpop.f32.mrf.mxu1 }
 0x38a   :  { %v9558_v20 = vadd.f32 %v7455_v1, %v7375_v32  ;;  %v9564_v8 = vsub.f32 %v9550_v46, %v1832_v42  ;;  %v9570_v61 = vsub.f32 %v9556_v24, %v1993_v60 }
 0x38b   :  { %v1834_v47 = vpop.f32.mrf.mxu0  ;;  %v1995_v63 = vpop.f32.mrf.mxu1 }
 0x38c   :  { %14639 = vst [vmem:[#allocation61_spill] sm:$0xff] %v9558_v20  ;;  %v9567_v50 = vsub.f32 %v9553_v33, %v1834_v47  ;;  %v9575_v1 = vsub.f32 %v9561_v19, %v1995_v63 }
 0x38d   :  { %v1838_v31 = vpop.f32.mrf.mxu0  ;;  %v1999_v18 = vpop.f32.mrf.mxu1 }
 0x38e   :  { %v2173_v32 = vmin.f32 %v9564_v8, %v9567_v50  ;;  %v9579_v42 = vsub.f32 %v9550_v46, %v1838_v31  ;;  %v9585_v60 = vsub.f32 %v9556_v24, %v1999_v18 }
 0x38f   :  { %v1840_v20 = vpop.f32.mrf.mxu0  ;;  %v2001_v36 = vpop.f32.mrf.mxu1 }
 0x390   :  { %v2174_v7 = vmin.f32 %v2173_v32, %v9570_v61  ;;  %v9582_v47 = vsub.f32 %v9553_v33, %v1840_v20  ;;  %v9591_v29 = vsub.f32 %v9561_v19, %v2001_v36 }
 0x391   :  { %v1844_v9 = vpop.f32.mrf.mxu0  ;;  %v2005_v53 = vpop.f32.mrf.mxu1 }
 0x392   :  { %v2178_v55 = vmin.f32 %v9579_v42, %v9582_v47  ;;  %v2175_v63 = vmin.f32 %v2174_v7, %v9575_v1  ;;  %v9595_v20 = vsub.f32 %v9550_v46, %v1844_v9  ;;  %v9601_v13 = vsub.f32 %v9556_v24, %v2005_v53 }
 0x393   :  { %v1846_v32 = vpop.f32.mrf.mxu0  ;;  %v2007_v48 = vpop.f32.mrf.mxu1 }
 0x394   :  { %v2179_v31 = vmin.f32 %v2178_v55, %v9585_v60  ;;  %v9598_v18 = vsub.f32 %v9553_v33, %v1846_v32  ;;  %2176 = vmin.xlane.f32.xlu0 %v2175_v63  ;;  %v9607_v17 = vsub.f32 %v9561_v19, %v2007_v48 }
 0x395   :  { %v1850_v21 = vpop.f32.mrf.mxu0  ;;  %v2011_v45 = vpop.f32.mrf.mxu1 }
 0x396   :  { %v2183_v7 = vmin.f32 %v9595_v20, %v9598_v18  ;;  %v2180_v36 = vmin.f32 %v2179_v31, %v9591_v29  ;;  %v9611_v32 = vsub.f32 %v9550_v46, %v1850_v21  ;;  %v9617_v63 = vsub.f32 %v9556_v24, %v2011_v45 }
 0x397   :  { %v1852_v55 = vpop.f32.mrf.mxu0  ;;  %v2013_v9 = vpop.f32.mrf.mxu1 }
 0x398   :  { %v2184_v34 = vmin.f32 %v2183_v7, %v9601_v13  ;;  %v9614_v53 = vsub.f32 %v9553_v33, %v1852_v55  ;;  %2181 = vmin.xlane.f32.xlu1 %v2180_v36  ;;  %v9623_v10 = vsub.f32 %v9561_v19, %v2013_v9 }
 0x399   :  { %v1856_v43 = vpop.f32.mrf.mxu0  ;;  %v2017_v16 = vpop.f32.mrf.mxu1 }
 0x39a   :  { %v2188_v48 = vmin.f32 %v9611_v32, %v9614_v53  ;;  %v2185_v31 = vmin.f32 %v2184_v34, %v9607_v17  ;;  %v9627_v55 = vsub.f32 %v9550_v46, %v1856_v43  ;;  %v9633_v36 = vsub.f32 %v9556_v24, %v2017_v16 }
 0x39b   :  { %v1858_v7 = vpop.f32.mrf.mxu0  ;;  %v2019_v21 = vpop.f32.mrf.mxu1 }
 0x39c   :  { %v2189_v58 = vmin.f32 %v2188_v48, %v9617_v63  ;;  %v9630_v45 = vsub.f32 %v9553_v33, %v1858_v7  ;;  %2186 = vmin.xlane.f32.xlu0 %v2185_v31  ;;  %v9639_v40 = vsub.f32 %v9561_v19, %v2019_v21 }
 0x39d   :  { %v1862_v44 = vpop.f32.mrf.mxu0  ;;  %v2023_v14 = vpop.f32.mrf.mxu1 }
 0x39e   :  { %v2193_v34 = vmin.f32 %v9627_v55, %v9630_v45  ;;  %v2190_v9 = vmin.f32 %v2189_v58, %v9623_v10  ;;  %v9643_v7 = vsub.f32 %v9550_v46, %v1862_v44  ;;  %v9649_v31 = vsub.f32 %v9556_v24, %v2023_v14 }
 0x39f   :  { %v1864_v48 = vpop.f32.mrf.mxu0  ;;  %v2025_v43 = vpop.f32.mrf.mxu1 }
 0x3a0   :  { %v2194_v22 = vmin.f32 %v2193_v34, %v9633_v36  ;;  %v9646_v16 = vsub.f32 %v9553_v33, %v1864_v48  ;;  %2191 = vmin.xlane.f32.xlu1 %v2190_v9  ;;  %v9655_v15 = vsub.f32 %v9561_v19, %v2025_v43 }
 0x3a1   :  { %v1868_v62 = vpop.f32.mrf.mxu0  ;;  %v2029_v27 = vpop.f32.mrf.mxu1 }
 0x3a2   :  { %v2198_v58 = vmin.f32 %v9643_v7, %v9646_v16  ;;  %v2195_v21 = vmin.f32 %v2194_v22, %v9639_v40  ;;  %v9659_v48 = vsub.f32 %v9550_v46, %v1868_v62  ;;  %v9665_v9 = vsub.f32 %v9556_v24, %v2029_v27 }
 0x3a3   :  { %v1870_v34 = vpop.f32.mrf.mxu0  ;;  %v2031_v44 = vpop.f32.mrf.mxu1 }
 0x3a4   :  { %v2199_v52 = vmin.f32 %v2198_v58, %v9649_v31  ;;  %v9662_v14 = vsub.f32 %v9553_v33, %v1870_v34  ;;  %2196 = vmin.xlane.f32.xlu0 %v2195_v21  ;;  %v9671_v54 = vsub.f32 %v9561_v19, %v2031_v44 }
 0x3a5   :  { %v1874_v28 = vpop.f32.mrf.mxu0  ;;  %v2035_v56 = vpop.f32.mrf.mxu1 }
 0x3a6   :  { %v2203_v22 = vmin.f32 %v9659_v48, %v9662_v14  ;;  %v2200_v43 = vmin.f32 %v2199_v52, %v9655_v15  ;;  %v9675_v34 = vsub.f32 %v9550_v46, %v1874_v28  ;;  %v9681_v21 = vsub.f32 %v9556_v24, %v2035_v56 }
 0x3a7   :  { %v1876_v58 = vpop.f32.mrf.mxu0  ;;  %v2037_v62 = vpop.f32.mrf.mxu1 }
 0x3a8   :  { %v2204_v3 = vmin.f32 %v2203_v22, %v9665_v9  ;;  %v9678_v27 = vsub.f32 %v9553_v33, %v1876_v58  ;;  %2201 = vmin.xlane.f32.xlu1 %v2200_v43  ;;  %v9687_v4 = vsub.f32 %v9561_v19, %v2037_v62 }
 0x3a9   :  { %v1880_v51 = vpop.f32.mrf.mxu0  ;;  %v2041_v38 = vpop.f32.mrf.mxu1 }
 0x3aa   :  { %v2208_v52 = vmin.f32 %v9675_v34, %v9678_v27  ;;  %v2205_v44 = vmin.f32 %v2204_v3, %v9671_v54  ;;  %v9691_v58 = vsub.f32 %v9550_v46, %v1880_v51  ;;  %v9697_v43 = vsub.f32 %v9556_v24, %v2041_v38 }
 0x3ab   :  { %v1882_v22 = vpop.f32.mrf.mxu0  ;;  %v2043_v28 = vpop.f32.mrf.mxu1 }
 0x3ac   :  { %v2209_v11 = vmin.f32 %v2208_v52, %v9681_v21  ;;  %v9694_v56 = vsub.f32 %v9553_v33, %v1882_v22  ;;  %2206 = vmin.xlane.f32.xlu0 %v2205_v44  ;;  %v9703_v23 = vsub.f32 %v9561_v19, %v2043_v28 }
 0x3ad   :  { %v1886_v57 = vpop.f32.mrf.mxu0  ;;  %v2047_v39 = vpop.f32.mrf.mxu1 }
 0x3ae   :  { %v2213_v3 = vmin.f32 %v9691_v58, %v9694_v56  ;;  %v2210_v62 = vmin.f32 %v2209_v11, %v9687_v4  ;;  %v9707_v22 = vsub.f32 %v9550_v46, %v1886_v57  ;;  %v9713_v44 = vsub.f32 %v9556_v24, %v2047_v39 }
 0x3af   :  { %v1888_v52 = vpop.f32.mrf.mxu0  ;;  %v2049_v51 = vpop.f32.mrf.mxu1 }
 0x3b0   :  { %v2214_v5 = vmin.f32 %v2213_v3, %v9697_v43  ;;  %v9710_v38 = vsub.f32 %v9553_v33, %v1888_v52  ;;  %2211 = vmin.xlane.f32.xlu1 %v2210_v62  ;;  %v9719_v0 = vsub.f32 %v9561_v19, %v2049_v51 }
 0x3b1   :  { %v1892_v12 = vpop.f32.mrf.mxu0  ;;  %v2053_v2 = vpop.f32.mrf.mxu1 }
 0x3b2   :  { %v2218_v11 = vmin.f32 %v9707_v22, %v9710_v38  ;;  %v2215_v28 = vmin.f32 %v2214_v5, %v9703_v23  ;;  %14641 = vst [vmem:[#allocation62_spill] sm:$0xff] %v9719_v0  ;;  %v9723_v52 = vsub.f32 %v9550_v46, %v1892_v12  ;;  %v9729_v62 = vsub.f32 %v9556_v24, %v2053_v2 }
 0x3b3   :  { %v1894_v3 = vpop.f32.mrf.mxu0  ;;  %v2055_v57 = vpop.f32.mrf.mxu1 }
 0x3b4   :  { %v2219_v6 = vmin.f32 %v2218_v11, %v9713_v44  ;;  %14642 = vst [vmem:[#allocation63_spill] sm:$0xff] %v9723_v52  ;;  %v9726_v39 = vsub.f32 %v9553_v33, %v1894_v3  ;;  %14644 = vst [vmem:[#allocation65_spill] sm:$0xff] %v9729_v62  ;;  %2216 = vmin.xlane.f32.xlu0 %v2215_v28  ;;  %v9735_v59 = vsub.f32 %v9561_v19, %v2055_v57 }
 0x3b5   :  { %v1898_v25 = vpop.f32.mrf.mxu0  ;;  %v2059_v26 = vpop.f32.mrf.mxu1 }
 0x3b6   :  { %14643 = vst [vmem:[#allocation64_spill] sm:$0xff] %v9726_v39  ;;  %v2223_v5 = vmin.f32 %v9723_v52, %v9726_v39  ;;  %v2220_v51 = vmin.f32 %v2219_v6, %v9719_v0  ;;  %14645 = vst [vmem:[#allocation66_spill] sm:$0xff] %v9735_v59  ;;  %v9739_v3 = vsub.f32 %v9550_v46, %v1898_v25 }
 0x3b7   :  { %v1900_v11 = vpop.f32.mrf.mxu0  ;;  %v2061_v12 = vpop.f32.mrf.mxu1  ;;  %v9745_v28 = vsub.f32 %v9556_v24, %v2059_v26 }
 0x3b8   :  { %v2224_v30 = vmin.f32 %v2223_v5, %v9729_v62  ;;  %14646 = vst [vmem:[#allocation67_spill] sm:$0xff] %v9739_v3  ;;  %v9742_v2 = vsub.f32 %v9553_v33, %v1900_v11  ;;  %2221 = vmin.xlane.f32.xlu1 %v2220_v51  ;;  %v9751_v0 = vsub.f32 %v9561_v19, %v2061_v12 }
 0x3b9   :  { %14648 = vst [vmem:[#allocation69_spill] sm:$0xff] %v9745_v28  ;;  %v1904_v39 = vpop.f32.mrf.mxu0  ;;  %v2065_v52 = vpop.f32.mrf.mxu1 }
 0x3ba   :  { %14647 = vst [vmem:[#allocation68_spill] sm:$0xff] %v9742_v2  ;;  %v2228_v6 = vmin.f32 %v9739_v3, %v9742_v2  ;;  %v2225_v57 = vmin.f32 %v2224_v30, %v9735_v59  ;;  %14649 = vst [vmem:[#allocation70_spill] sm:$0xff] %v9751_v0  ;;  %v9755_v11 = vsub.f32 %v9550_v46, %v1904_v39 }
 0x3bb   :  { %v1906_v5 = vpop.f32.mrf.mxu0  ;;  %v2067_v25 = vpop.f32.mrf.mxu1  ;;  %v9761_v51 = vsub.f32 %v9556_v24, %v2065_v52 }
 0x3bc   :  { %v2229_v62 = vmin.f32 %v2228_v6, %v9745_v28  ;;  %14650 = vst [vmem:[#allocation71_spill] sm:$0xff] %v9755_v11  ;;  %v9758_v26 = vsub.f32 %v9553_v33, %v1906_v5  ;;  %2226 = vmin.xlane.f32.xlu0 %v2225_v57  ;;  %v9767_v59 = vsub.f32 %v9561_v19, %v2067_v25 }
 0x3bd   :  { %14652 = vst [vmem:[#allocation73_spill] sm:$0xff] %v9761_v51  ;;  %v1910_v2 = vpop.f32.mrf.mxu0  ;;  %v2071_v3 = vpop.f32.mrf.mxu1 }
 0x3be   :  { %14651 = vst [vmem:[#allocation72_spill] sm:$0xff] %v9758_v26  ;;  %v2233_v30 = vmin.f32 %v9755_v11, %v9758_v26  ;;  %v2230_v12 = vmin.f32 %v2229_v62, %v9751_v0  ;;  %14653 = vst [vmem:[#allocation74_spill] sm:$0xff] %v9767_v59  ;;  %v9771_v5 = vsub.f32 %v9550_v46, %v1910_v2 }
 0x3bf   :  { %v1912_v6 = vpop.f32.mrf.mxu0  ;;  %v2073_v39 = vpop.f32.mrf.mxu1  ;;  %v9777_v57 = vsub.f32 %v9556_v24, %v2071_v3 }
 0x3c0   :  { %v2234_v28 = vmin.f32 %v2233_v30, %v9761_v51  ;;  %14654 = vst [vmem:[#allocation75_spill] sm:$0xff] %v9771_v5  ;;  %v9774_v52 = vsub.f32 %v9553_v33, %v1912_v6  ;;  %2231 = vmin.xlane.f32.xlu1 %v2230_v12  ;;  %v9783_v0 = vsub.f32 %v9561_v19, %v2073_v39 }
 0x3c1   :  { %14656 = vst [vmem:[#allocation77_spill] sm:$0xff] %v9777_v57  ;;  %v1916_v26 = vpop.f32.mrf.mxu0  ;;  %v2077_v11 = vpop.f32.mrf.mxu1 }
 0x3c2   :  { %14655 = vst [vmem:[#allocation76_spill] sm:$0xff] %v9774_v52  ;;  %v2238_v62 = vmin.f32 %v9771_v5, %v9774_v52  ;;  %v2235_v25 = vmin.f32 %v2234_v28, %v9767_v59  ;;  %v9787_v6 = vsub.f32 %v9550_v46, %v1916_v26  ;;  %v9793_v12 = vsub.f32 %v9556_v24, %v2077_v11 }
 0x3c3   :  { %v1918_v30 = vpop.f32.mrf.mxu0  ;;  %v2079_v2 = vpop.f32.mrf.mxu1 }
 0x3c4   :  { %v2239_v51 = vmin.f32 %v2238_v62, %v9777_v57  ;;  %v9790_v3 = vsub.f32 %v9553_v33, %v1918_v30  ;;  %2236 = vmin.xlane.f32.xlu0 %v2235_v25  ;;  %v9799_v59 = vsub.f32 %v9561_v19, %v2079_v2 }
 0x3c5   :  { %v1922_v52 = vpop.f32.mrf.mxu0  ;;  %v2083_v5 = vpop.f32.mrf.mxu1 }
 0x3c6   :  { %14657 = vst [vmem:[#allocation78_spill] sm:$0xff] %v9790_v3  ;;  %v2243_v28 = vmin.f32 %v9787_v6, %v9790_v3  ;;  %v2240_v39 = vmin.f32 %v2239_v51, %v9783_v0  ;;  %v9803_v30 = vsub.f32 %v9550_v46, %v1922_v52  ;;  %v9809_v25 = vsub.f32 %v9556_v24, %v2083_v5 }
 0x3c7   :  { %v1924_v62 = vpop.f32.mrf.mxu0  ;;  %v2085_v57 = vpop.f32.mrf.mxu1 }
 0x3c8   :  { %v2244_v26 = vmin.f32 %v2243_v28, %v9793_v12  ;;  %v9806_v11 = vsub.f32 %v9553_v33, %v1924_v62  ;;  %2241 = vmin.xlane.f32.xlu1 %v2240_v39  ;;  %v9816_v28 = vsub.f32 %v9561_v19, %v2085_v57 }
 0x3ca   :  { %v2248_v51 = vmin.f32 %v9803_v30, %v9806_v11  ;;  %v2245_v2 = vmin.f32 %v2244_v26, %v9799_v59 }
 0x3cc   :  { %v2249_v3 = vmin.f32 %v2248_v51, %v9809_v25  ;;  %2246 = vmin.xlane.f32.xlu0 %v2245_v2 }
 0x3ce   :  { %v2250_v46 = vmin.f32 %v2249_v3, %v9816_v28 }
 0x3d0   :  { %2251 = vmin.xlane.f32.xlu1 %v2250_v46 }
 0x41d   :  { %v9819_v33 = vpop.xlane.xlu0 %2176 }
 0x41e   :  { %14658 = vst [vmem:[#allocation79_spill] sm:$0xff] %v9819_v33  ;;  %vm2253_vm13 = vcmp.eq.f32.partialorder %v9564_v8, %v9819_v33  ;;  %vm2254_vm14 = vcmp.eq.f32.partialorder %v9567_v50, %v9819_v33  ;;  %vm2255_vm15 = vcmp.eq.f32.partialorder %v9570_v61, %v9819_v33  ;;  %vm2256_vm1 = vcmp.eq.f32.partialorder %v9575_v1, %v9819_v33 }
 0x41f   :  { %v2317_v24 = vsel %vm2253_vm13, %v8510_v35, 512  ;;  %v2318_v19 = vsel %vm2254_vm14, %v8513_v41, 512  ;;  %v2319_v52 = vsel %vm2255_vm15, %v8518_v37, 512  ;;  %v2320_v8 = vsel %vm2256_vm1, %v8527_v49, 512 }
 0x420   :  { %vm2381_vm2 = vcmp.lt.s32.totalorder %v2317_v24, %v2318_v19 }
 0x421   :  { %v9831_v5 = vpop.xlane.xlu1 %2181  ;;  %v2382_v57 = vsel %vm2381_vm2, %v2317_v24, %v2318_v19 }
 0x422   :  { %14659 = vst [vmem:[#allocation80_spill] sm:$0xff] %v9831_v5  ;;  %vm2383_vm3 = vcmp.lt.s32.totalorder %v2382_v57, %v2319_v52  ;;  %vm2257_vm4 = vcmp.eq.f32.partialorder %v9579_v42, %v9831_v5  ;;  %vm2258_vm5 = vcmp.eq.f32.partialorder %v9582_v47, %v9831_v5  ;;  %vm2259_vm6 = vcmp.eq.f32.partialorder %v9585_v60, %v9831_v5 }
 0x423   :  { %v2384_v50 = vsel %vm2383_vm3, %v2382_v57, %v2319_v52  ;;  %v2321_v61 = vsel %vm2257_vm4, %v8510_v35, 512  ;;  %v2322_v1 = vsel %vm2258_vm5, %v8513_v41, 512  ;;  %vm2260_vm8 = vcmp.eq.f32.partialorder %v9591_v29, %v9831_v5 }
 0x424   :  { %vm2385_vm7 = vcmp.lt.s32.totalorder %v2384_v50, %v2320_v8  ;;  %vm2401_vm9 = vcmp.lt.s32.totalorder %v2321_v61, %v2322_v1  ;;  %v2323_v47 = vsel %vm2259_vm6, %v8518_v37, 512  ;;  %v2324_v62 = vsel %vm2260_vm8, %v8527_v49, 512 }
 0x425   :  { %v9845_v3 = vpop.xlane.xlu0 %2186  ;;  %v9847_v42 = vsel %vm2385_vm7, %v2384_v50, %v2320_v8  ;;  %v2402_v39 = vsel %vm2401_vm9, %v2321_v61, %v2322_v1 }
 0x426   :  { %14660 = vst [vmem:[#allocation81_spill] sm:$0xff] %v9845_v3  ;;  %v2388_v60 = vshra.s32 %v9847_v42, 16  ;;  %vm2403_vm10 = vcmp.lt.s32.totalorder %v2402_v39, %v2323_v47  ;;  %vm2261_vm11 = vcmp.eq.f32.partialorder %v9595_v20, %v9845_v3  ;;  %vm2262_vm12 = vcmp.eq.f32.partialorder %v9598_v18, %v9845_v3 }
 0x427   :  { %v2404_v29 = vsel %vm2403_vm10, %v2402_v39, %v2323_v47  ;;  %vm2263_vm13 = vcmp.eq.f32.partialorder %v9601_v13, %v9845_v3  ;;  %v2325_v26 = vsel %vm2261_vm11, %v8510_v35, 512  ;;  %vm2264_vm15 = vcmp.eq.f32.partialorder %v9607_v17, %v9845_v3 }
 0x428   :  { %v9859_v51 = vcvt.s32.f32 %v2388_v60  ;;  %vm2405_vm14 = vcmp.lt.s32.totalorder %v2404_v29, %v2324_v62  ;;  %v2326_v2 = vsel %vm2262_vm12, %v8513_v41, 512  ;;  %v2327_v18 = vsel %vm2263_vm13, %v8518_v37, 512 }
 0x429   :  { %v9864_v20 = vpop.xlane.xlu1 %2191  ;;  %v9866_v46 = vsel %vm2405_vm14, %v2404_v29, %v2324_v62  ;;  %vm2421_vm1 = vcmp.lt.s32.totalorder %v2325_v26, %v2326_v2  ;;  %v2328_v17 = vsel %vm2264_vm15, %v8527_v49, 512 }
 0x42a   :  { %14661 = vst [vmem:[#allocation82_spill] sm:$0xff] %v9864_v20  ;;  %2391 = vmin.xlane.f32.xlu0 %v9859_v51  ;;  %v2408_v13 = vshra.s32 %v9866_v46, 16  ;;  %v2422_v24 = vsel %vm2421_vm1, %v2325_v26, %v2326_v2  ;;  %vm2265_vm2 = vcmp.eq.f32.partialorder %v9611_v32, %v9864_v20  ;;  %vm2266_vm3 = vcmp.eq.f32.partialorder %v9614_v53, %v9864_v20 }
 0x42b   :  { %vm2423_vm4 = vcmp.lt.s32.totalorder %v2422_v24, %v2327_v18  ;;  %vm2267_vm5 = vcmp.eq.f32.partialorder %v9617_v63, %v9864_v20  ;;  %v2329_v19 = vsel %vm2265_vm2, %v8510_v35, 512  ;;  %vm2268_vm6 = vcmp.eq.f32.partialorder %v9623_v10, %v9864_v20 }
 0x42c   :  { %v9879_v52 = vcvt.s32.f32 %v2408_v13  ;;  %v2424_v57 = vsel %vm2423_vm4, %v2422_v24, %v2327_v18  ;;  %v2330_v8 = vsel %vm2266_vm3, %v8513_v41, 512  ;;  %v2331_v53 = vsel %vm2267_vm5, %v8518_v37, 512 }
 0x42d   :  { %v9884_v32 = vpop.xlane.xlu0 %2196  ;;  %vm2425_vm7 = vcmp.lt.s32.totalorder %v2424_v57, %v2328_v17  ;;  %vm2441_vm8 = vcmp.lt.s32.totalorder %v2329_v19, %v2330_v8  ;;  %v2332_v61 = vsel %vm2268_vm6, %v8527_v49, 512 }
 0x42e   :  { %14662 = vst [vmem:[#allocation83_spill] sm:$0xff] %v9884_v32  ;;  %2411 = vmin.xlane.f32.xlu1 %v9879_v52  ;;  %v9888_v50 = vsel %vm2425_vm7, %v2424_v57, %v2328_v17  ;;  %v2442_v63 = vsel %vm2441_vm8, %v2329_v19, %v2330_v8  ;;  %vm2269_vm9 = vcmp.eq.f32.partialorder %v9627_v55, %v9884_v32 }
 0x42f   :  { %vm2270_vm10 = vcmp.eq.f32.partialorder %v9630_v45, %v9884_v32  ;;  %v2428_v10 = vshra.s32 %v9888_v50, 16  ;;  %vm2443_vm11 = vcmp.lt.s32.totalorder %v2442_v63, %v2331_v53  ;;  %vm2271_vm12 = vcmp.eq.f32.partialorder %v9633_v36, %v9884_v32 }
 0x430   :  { %v2444_v1 = vsel %vm2443_vm11, %v2442_v63, %v2331_v53  ;;  %vm2272_vm13 = vcmp.eq.f32.partialorder %v9639_v40, %v9884_v32  ;;  %v2333_v47 = vsel %vm2269_vm9, %v8510_v35, 512  ;;  %v2334_v39 = vsel %vm2270_vm10, %v8513_v41, 512 }
 0x431   :  { %v9902_v55 = vpop.xlane.xlu1 %2201  ;;  %v9904_v60 = vcvt.s32.f32 %v2428_v10  ;;  %vm2445_vm14 = vcmp.lt.s32.totalorder %v2444_v1, %v2332_v61  ;;  %v2335_v45 = vsel %vm2271_vm12, %v8518_v37, 512  ;;  %vm2461_vm15 = vcmp.lt.s32.totalorder %v2333_v47, %v2334_v39 }
 0x432   :  { %14663 = vst [vmem:[#allocation84_spill] sm:$0xff] %v9902_v55  ;;  %v9907_v62 = vsel %vm2445_vm14, %v2444_v1, %v2332_v61  ;;  %v2462_v29 = vsel %vm2461_vm15, %v2333_v47, %v2334_v39  ;;  %vm2273_vm1 = vcmp.eq.f32.partialorder %v9643_v7, %v9902_v55  ;;  %vm2274_vm2 = vcmp.eq.f32.partialorder %v9646_v16, %v9902_v55 }
 0x433   :  { %2431 = vmin.xlane.f32.xlu0 %v9904_v60  ;;  %v2448_v40 = vshra.s32 %v9907_v62, 16  ;;  %v2336_v36 = vsel %vm2272_vm13, %v8527_v49, 512  ;;  %vm2463_vm3 = vcmp.lt.s32.totalorder %v2462_v29, %v2335_v45  ;;  %vm2275_vm4 = vcmp.eq.f32.partialorder %v9649_v31, %v9902_v55 }
 0x434   :  { %v2464_v26 = vsel %vm2463_vm3, %v2462_v29, %v2335_v45  ;;  %vm2276_vm5 = vcmp.eq.f32.partialorder %v9655_v15, %v9902_v55  ;;  %v2337_v2 = vsel %vm2273_vm1, %v8510_v35, 512  ;;  %v2338_v7 = vsel %vm2274_vm2, %v8513_v41, 512 }
 0x435   :  { %v9922_v18 = vpop.xlane.xlu0 %2206  ;;  %v9924_v16 = vcvt.s32.f32 %v2448_v40  ;;  %vm2465_vm6 = vcmp.lt.s32.totalorder %v2464_v26, %v2336_v36  ;;  %v2339_v13 = vsel %vm2275_vm4, %v8518_v37, 512  ;;  %vm2481_vm7 = vcmp.lt.s32.totalorder %v2337_v2, %v2338_v7 }
 0x436   :  { %14664 = vst [vmem:[#allocation85_spill] sm:$0xff] %v9922_v18  ;;  %v9927_v24 = vsel %vm2465_vm6, %v2464_v26, %v2336_v36  ;;  %v2482_v17 = vsel %vm2481_vm7, %v2337_v2, %v2338_v7  ;;  %vm2277_vm8 = vcmp.eq.f32.partialorder %v9659_v48, %v9922_v18  ;;  %vm2278_vm9 = vcmp.eq.f32.partialorder %v9662_v14, %v9922_v18 }
 0x437   :  { %2451 = vmin.xlane.f32.xlu1 %v9924_v16  ;;  %v2468_v15 = vshra.s32 %v9927_v24, 16  ;;  %v2340_v31 = vsel %vm2276_vm5, %v8527_v49, 512  ;;  %vm2483_vm10 = vcmp.lt.s32.totalorder %v2482_v17, %v2339_v13  ;;  %vm2279_vm11 = vcmp.eq.f32.partialorder %v9665_v9, %v9922_v18 }
 0x438   :  { %v2484_v19 = vsel %vm2483_vm10, %v2482_v17, %v2339_v13  ;;  %vm2280_vm12 = vcmp.eq.f32.partialorder %v9671_v54, %v9922_v18  ;;  %v2341_v57 = vsel %vm2277_vm8, %v8510_v35, 512  ;;  %v2342_v48 = vsel %vm2278_vm9, %v8513_v41, 512 }
 0x439   :  { %v9942_v8 = vpop.xlane.xlu1 %2211  ;;  %v9944_v14 = vcvt.s32.f32 %v2468_v15  ;;  %vm2485_vm13 = vcmp.lt.s32.totalorder %v2484_v19, %v2340_v31  ;;  %v2343_v53 = vsel %vm2279_vm11, %v8518_v37, 512  ;;  %vm2501_vm14 = vcmp.lt.s32.totalorder %v2341_v57, %v2342_v48  ;;  %v14668_v15 = vld [vmem:[#allocation62_spill] sm:$0xff] }
 0x43a   :  { %14665 = vst [vmem:[#allocation86_spill] sm:$0xff] %v9942_v8  ;;  %v9947_v63 = vsel %vm2485_vm13, %v2484_v19, %v2340_v31  ;;  %v2502_v10 = vsel %vm2501_vm14, %v2341_v57, %v2342_v48  ;;  %vm2281_vm15 = vcmp.eq.f32.partialorder %v9675_v34, %v9942_v8  ;;  %vm2282_vm1 = vcmp.eq.f32.partialorder %v9678_v27, %v9942_v8 }
 0x43b   :  { %2471 = vmin.xlane.f32.xlu0 %v9944_v14  ;;  %v2488_v54 = vshra.s32 %v9947_v63, 16  ;;  %v2344_v9 = vsel %vm2280_vm12, %v8527_v49, 512  ;;  %vm2503_vm2 = vcmp.lt.s32.totalorder %v2502_v10, %v2343_v53  ;;  %vm2283_vm3 = vcmp.eq.f32.partialorder %v9681_v21, %v9942_v8 }
 0x43c   :  { %v2504_v61 = vsel %vm2503_vm2, %v2502_v10, %v2343_v53  ;;  %vm2284_vm4 = vcmp.eq.f32.partialorder %v9687_v4, %v9942_v8  ;;  %v2345_v1 = vsel %vm2281_vm15, %v8510_v35, 512  ;;  %v2346_v34 = vsel %vm2282_vm1, %v8513_v41, 512  ;;  %v14671_v10 = vld [vmem:[#allocation64_spill] sm:$0xff] }
 0x43d   :  { %v9962_v47 = vpop.xlane.xlu0 %2216  ;;  %v9964_v27 = vcvt.s32.f32 %v2488_v54  ;;  %vm2505_vm5 = vcmp.lt.s32.totalorder %v2504_v61, %v2344_v9  ;;  %v2347_v39 = vsel %vm2283_vm3, %v8518_v37, 512  ;;  %vm2521_vm6 = vcmp.lt.s32.totalorder %v2345_v1, %v2346_v34 }
 0x43e   :  { %14666 = vst [vmem:[#allocation87_spill] sm:$0xff] %v9962_v47  ;;  %v9967_v45 = vsel %vm2505_vm5, %v2504_v61, %v2344_v9  ;;  %v2522_v29 = vsel %vm2521_vm6, %v2345_v1, %v2346_v34  ;;  %vm2285_vm7 = vcmp.eq.f32.partialorder %v9691_v58, %v9962_v47  ;;  %vm2286_vm8 = vcmp.eq.f32.partialorder %v9694_v56, %v9962_v47  ;;  %v14672_v61 = vld [vmem:[#allocation65_spill] sm:$0xff]  ;;  %v14673_v34 = vld [vmem:[#allocation66_spill] sm:$0xff] }
 0x43f   :  { %2491 = vmin.xlane.f32.xlu1 %v9964_v27  ;;  %v2508_v4 = vshra.s32 %v9967_v45, 16  ;;  %v2348_v21 = vsel %vm2284_vm4, %v8527_v49, 512  ;;  %vm2523_vm9 = vcmp.lt.s32.totalorder %v2522_v29, %v2347_v39  ;;  %vm2287_vm10 = vcmp.eq.f32.partialorder %v9697_v43, %v9962_v47 }
 0x440   :  { %v2524_v40 = vsel %vm2523_vm9, %v2522_v29, %v2347_v39  ;;  %vm2288_vm11 = vcmp.eq.f32.partialorder %v9703_v23, %v9962_v47  ;;  %v2349_v36 = vsel %vm2285_vm7, %v8510_v35, 512  ;;  %v2350_v58 = vsel %vm2286_vm8, %v8513_v41, 512 }
 0x441   :  { %v9982_v26 = vpop.xlane.xlu1 %2221  ;;  %v9984_v56 = vcvt.s32.f32 %v2508_v4  ;;  %vm2525_vm12 = vcmp.lt.s32.totalorder %v2524_v40, %v2348_v21  ;;  %v2351_v2 = vsel %vm2287_vm10, %v8518_v37, 512  ;;  %vm2541_vm13 = vcmp.lt.s32.totalorder %v2349_v36, %v2350_v58 }
 0x442   :  { %14667 = vst [vmem:[#allocation88_spill] sm:$0xff] %v9982_v26  ;;  %v9987_v7 = vsel %vm2525_vm12, %v2524_v40, %v2348_v21  ;;  %v2542_v13 = vsel %vm2541_vm13, %v2349_v36, %v2350_v58  ;;  %vm2289_vm14 = vcmp.eq.f32.partialorder %v9707_v22, %v9982_v26  ;;  %vm2290_vm15 = vcmp.eq.f32.partialorder %v9710_v38, %v9982_v26 }
 0x443   :  { %2511 = vmin.xlane.f32.xlu0 %v9984_v56  ;;  %v2528_v23 = vshra.s32 %v9987_v7, 16  ;;  %v2352_v43 = vsel %vm2288_vm11, %v8527_v49, 512  ;;  %vm2543_vm1 = vcmp.lt.s32.totalorder %v2542_v13, %v2351_v2  ;;  %vm2291_vm2 = vcmp.eq.f32.partialorder %v9713_v44, %v9982_v26  ;;  %v14670_v44 = vld [vmem:[#allocation63_spill] sm:$0xff] }
 0x444   :  { %v2544_v17 = vsel %vm2543_vm1, %v2542_v13, %v2351_v2  ;;  %vm2292_vm3 = vcmp.eq.f32.partialorder %v14668_v15, %v9982_v26  ;;  %v2353_v31 = vsel %vm2289_vm14, %v8510_v35, 512  ;;  %v2354_v22 = vsel %vm2290_vm15, %v8513_v41, 512  ;;  %v14675_v2 = vld [vmem:[#allocation67_spill] sm:$0xff]  ;;  %v14676_v13 = vld [vmem:[#allocation68_spill] sm:$0xff] }
 0x445   :  { %v10002_v19 = vpop.xlane.xlu0 %2226  ;;  %v10004_v38 = vcvt.s32.f32 %v2528_v23  ;;  %vm2545_vm4 = vcmp.lt.s32.totalorder %v2544_v17, %v2352_v43  ;;  %v2355_v57 = vsel %vm2291_vm2, %v8518_v37, 512  ;;  %vm2561_vm5 = vcmp.lt.s32.totalorder %v2353_v31, %v2354_v22 }
 0x446   :  { %14669 = vst [vmem:[#allocation62_spill] sm:$0xff] %v10002_v19  ;;  %v10007_v48 = vsel %vm2545_vm4, %v2544_v17, %v2352_v43  ;;  %v2562_v53 = vsel %vm2561_vm5, %v2353_v31, %v2354_v22  ;;  %vm2293_vm6 = vcmp.eq.f32.partialorder %v14670_v44, %v10002_v19  ;;  %vm2294_vm7 = vcmp.eq.f32.partialorder %v14671_v10, %v10002_v19  ;;  %v14677_v17 = vld [vmem:[#allocation69_spill] sm:$0xff]  ;;  %v14678_v31 = vld [vmem:[#allocation70_spill] sm:$0xff] }
 0x447   :  { %2531 = vmin.xlane.f32.xlu1 %v10004_v38  ;;  %v2548_v54 = vshra.s32 %v10007_v48, 16  ;;  %v2356_v9 = vsel %vm2292_vm3, %v8527_v49, 512  ;;  %vm2563_vm8 = vcmp.lt.s32.totalorder %v2562_v53, %v2355_v57  ;;  %vm2295_vm9 = vcmp.eq.f32.partialorder %v14672_v61, %v10002_v19  ;;  %v14680_v61 = vld [vmem:[#allocation71_spill] sm:$0xff] }
 0x448   :  { %v2564_v1 = vsel %vm2563_vm8, %v2562_v53, %v2355_v57  ;;  %vm2296_vm10 = vcmp.eq.f32.partialorder %v14673_v34, %v10002_v19  ;;  %v2357_v39 = vsel %vm2293_vm6, %v8510_v35, 512  ;;  %v2358_v29 = vsel %vm2294_vm7, %v8513_v41, 512 }
 0x449   :  { %v10022_v4 = vpop.xlane.xlu1 %2231  ;;  %v10024_v21 = vcvt.s32.f32 %v2548_v54  ;;  %vm2565_vm11 = vcmp.lt.s32.totalorder %v2564_v1, %v2356_v9  ;;  %v2359_v40 = vsel %vm2295_vm9, %v8518_v37, 512  ;;  %vm2581_vm12 = vcmp.lt.s32.totalorder %v2357_v39, %v2358_v29 }
 0x44a   :  { %14674 = vst [vmem:[#allocation63_spill] sm:$0xff] %v10022_v4  ;;  %v10027_v36 = vsel %vm2565_vm11, %v2564_v1, %v2356_v9  ;;  %v2582_v58 = vsel %vm2581_vm12, %v2357_v39, %v2358_v29  ;;  %vm2297_vm13 = vcmp.eq.f32.partialorder %v14675_v2, %v10022_v4  ;;  %vm2298_vm14 = vcmp.eq.f32.partialorder %v14676_v13, %v10022_v4  ;;  %v14681_v1 = vld [vmem:[#allocation72_spill] sm:$0xff]  ;;  %v14682_v29 = vld [vmem:[#allocation73_spill] sm:$0xff] }
 0x44b   :  { %2551 = vmin.xlane.f32.xlu0 %v10024_v21  ;;  %v2568_v23 = vshra.s32 %v10027_v36, 16  ;;  %v2360_v43 = vsel %vm2296_vm10, %v8527_v49, 512  ;;  %vm2583_vm15 = vcmp.lt.s32.totalorder %v2582_v58, %v2359_v40  ;;  %vm2299_vm1 = vcmp.eq.f32.partialorder %v14677_v17, %v10022_v4 }
 0x44c   :  { %v2584_v15 = vsel %vm2583_vm15, %v2582_v58, %v2359_v40  ;;  %vm2300_vm2 = vcmp.eq.f32.partialorder %v14678_v31, %v10022_v4  ;;  %v2361_v22 = vsel %vm2297_vm13, %v8510_v35, 512  ;;  %v2362_v57 = vsel %vm2298_vm14, %v8513_v41, 512  ;;  %v14683_v58 = vld [vmem:[#allocation74_spill] sm:$0xff] }
 0x44d   :  { %v10042_v53 = vpop.xlane.xlu0 %2236  ;;  %v10044_v44 = vcvt.s32.f32 %v2568_v23  ;;  %vm2585_vm3 = vcmp.lt.s32.totalorder %v2584_v15, %v2360_v43  ;;  %v2363_v10 = vsel %vm2299_vm1, %v8518_v37, 512  ;;  %vm2601_vm4 = vcmp.lt.s32.totalorder %v2361_v22, %v2362_v57 }
 0x44e   :  { %14679 = vst [vmem:[#allocation64_spill] sm:$0xff] %v10042_v53  ;;  %v10047_v54 = vsel %vm2585_vm3, %v2584_v15, %v2360_v43  ;;  %v2602_v9 = vsel %vm2601_vm4, %v2361_v22, %v2362_v57  ;;  %vm2301_vm5 = vcmp.eq.f32.partialorder %v14680_v61, %v10042_v53  ;;  %vm2302_vm6 = vcmp.eq.f32.partialorder %v14681_v1, %v10042_v53  ;;  %v14685_v22 = vld [vmem:[#allocation75_spill] sm:$0xff]  ;;  %v14686_v57 = vld [vmem:[#allocation76_spill] sm:$0xff]  ;;  %v14687_v61 = vld [vmem:[#allocation77_spill] sm:$0xff] }
 0x44f   :  { %2571 = vmin.xlane.f32.xlu1 %v10044_v44  ;;  %v2588_v34 = vshra.s32 %v10047_v54, 16  ;;  %v2364_v39 = vsel %vm2300_vm2, %v8527_v49, 512  ;;  %vm2603_vm7 = vcmp.lt.s32.totalorder %v2602_v9, %v2363_v10  ;;  %vm2303_vm8 = vcmp.eq.f32.partialorder %v14682_v29, %v10042_v53 }
 0x450   :  { %v2604_v40 = vsel %vm2603_vm7, %v2602_v9, %v2363_v10  ;;  %vm2304_vm9 = vcmp.eq.f32.partialorder %v14683_v58, %v10042_v53  ;;  %v2365_v2 = vsel %vm2301_vm5, %v8510_v35, 512  ;;  %v2366_v13 = vsel %vm2302_vm6, %v8513_v41, 512 }
 0x451   :  { %v10062_v23 = vpop.xlane.xlu1 %2241  ;;  %v10064_v43 = vcvt.s32.f32 %v2588_v34  ;;  %vm2605_vm10 = vcmp.lt.s32.totalorder %v2604_v40, %v2364_v39  ;;  %v2367_v17 = vsel %vm2303_vm8, %v8518_v37, 512  ;;  %vm2621_vm11 = vcmp.lt.s32.totalorder %v2365_v2, %v2366_v13 }
 0x452   :  { %14684 = vst [vmem:[#allocation65_spill] sm:$0xff] %v10062_v23  ;;  %v10067_v15 = vsel %vm2605_vm10, %v2604_v40, %v2364_v39  ;;  %v2622_v31 = vsel %vm2621_vm11, %v2365_v2, %v2366_v13  ;;  %vm2305_vm12 = vcmp.eq.f32.partialorder %v14685_v22, %v10062_v23  ;;  %vm2306_vm13 = vcmp.eq.f32.partialorder %v14686_v57, %v10062_v23 }
 0x453   :  { %2591 = vmin.xlane.f32.xlu0 %v10064_v43  ;;  %v2608_v10 = vshra.s32 %v10067_v15, 16  ;;  %v2368_v9 = vsel %vm2304_vm9, %v8527_v49, 512  ;;  %vm2623_vm14 = vcmp.lt.s32.totalorder %v2622_v31, %v2367_v17  ;;  %vm2307_vm15 = vcmp.eq.f32.partialorder %v14687_v61, %v10062_v23 }
 0x454   :  { %v2624_v1 = vsel %vm2623_vm14, %v2622_v31, %v2367_v17  ;;  %vm2308_vm1 = vcmp.eq.f32.partialorder %v9783_v0, %v10062_v23  ;;  %v2369_v34 = vsel %vm2305_vm12, %v8510_v35, 512  ;;  %v2370_v39 = vsel %vm2306_vm13, %v8513_v41, 512  ;;  %v14689_v0 = vld [vmem:[#allocation78_spill] sm:$0xff] }
 0x455   :  { %v10082_v29 = vpop.xlane.xlu0 %2246  ;;  %v10084_v40 = vcvt.s32.f32 %v2608_v10  ;;  %vm2625_vm2 = vcmp.lt.s32.totalorder %v2624_v1, %v2368_v9  ;;  %v2371_v58 = vsel %vm2307_vm15, %v8518_v37, 512  ;;  %vm2641_vm3 = vcmp.lt.s32.totalorder %v2369_v34, %v2370_v39 }
 0x456   :  { %14688 = vst [vmem:[#allocation66_spill] sm:$0xff] %v10082_v29  ;;  %v10087_v2 = vsel %vm2625_vm2, %v2624_v1, %v2368_v9  ;;  %v2642_v13 = vsel %vm2641_vm3, %v2369_v34, %v2370_v39  ;;  %vm2309_vm4 = vcmp.eq.f32.partialorder %v9787_v6, %v10082_v29  ;;  %vm2310_vm5 = vcmp.eq.f32.partialorder %v14689_v0, %v10082_v29 }
 0x457   :  { %2611 = vmin.xlane.f32.xlu1 %v10084_v40  ;;  %v2628_v17 = vshra.s32 %v10087_v2, 16  ;;  %v2372_v31 = vsel %vm2308_vm1, %v8527_v49, 512  ;;  %vm2643_vm6 = vcmp.lt.s32.totalorder %v2642_v13, %v2371_v58  ;;  %vm2311_vm7 = vcmp.eq.f32.partialorder %v9793_v12, %v10082_v29 }
 0x458   :  { %v2644_v22 = vsel %vm2643_vm6, %v2642_v13, %v2371_v58  ;;  %vm2312_vm8 = vcmp.eq.f32.partialorder %v9799_v59, %v10082_v29  ;;  %v2373_v57 = vsel %vm2309_vm4, %v8510_v35, 512  ;;  %v2374_v6 = vsel %vm2310_vm5, %v8513_v41, 512 }
 0x459   :  { %v10102_v10 = vpop.xlane.xlu1 %2251  ;;  %v10104_v9 = vcvt.s32.f32 %v2628_v17  ;;  %vm2645_vm9 = vcmp.lt.s32.totalorder %v2644_v22, %v2372_v31  ;;  %v2375_v61 = vsel %vm2311_vm7, %v8518_v37, 512  ;;  %vm2661_vm10 = vcmp.lt.s32.totalorder %v2373_v57, %v2374_v6 }
 0x45a   :  { %14690 = vst [vmem:[#allocation67_spill] sm:$0xff] %v10102_v10  ;;  %v10107_v1 = vsel %vm2645_vm9, %v2644_v22, %v2372_v31  ;;  %v2662_v34 = vsel %vm2661_vm10, %v2373_v57, %v2374_v6  ;;  %vm2313_vm11 = vcmp.eq.f32.partialorder %v9803_v30, %v10102_v10  ;;  %vm2314_vm12 = vcmp.eq.f32.partialorder %v9806_v11, %v10102_v10 }
 0x45b   :  { %2631 = vmin.xlane.f32.xlu0 %v10104_v9  ;;  %v2648_v12 = vshra.s32 %v10107_v1, 16  ;;  %vm2663_vm13 = vcmp.lt.s32.totalorder %v2662_v34, %v2375_v61  ;;  %vm2315_vm14 = vcmp.eq.f32.partialorder %v9809_v25, %v10102_v10  ;;  %v2376_v39 = vsel %vm2312_vm8, %v8527_v49, 512 }
 0x45c   :  { %v2664_v58 = vsel %vm2663_vm13, %v2662_v34, %v2375_v61  ;;  %v2377_v13 = vsel %vm2313_vm11, %v8510_v35, 512  ;;  %v2378_v30 = vsel %vm2314_vm12, %v8513_v41, 512  ;;  %vm2316_vm1 = vcmp.eq.f32.partialorder %v9816_v28, %v10102_v10  ;;  %v1732_v34 = vld [vmem:[%s14236_s2 + $0x2f8] sm:$0xff] }
 0x45d   :  { %v10123_v0 = vcvt.s32.f32 %v2648_v12  ;;  %vm2665_vm15 = vcmp.lt.s32.totalorder %v2664_v58, %v2376_v39  ;;  %vm2681_vm2 = vcmp.lt.s32.totalorder %v2377_v13, %v2378_v30  ;;  %v2379_v25 = vsel %vm2315_vm14, %v8518_v37, 512  ;;  %v1716_v12 = vld [vmem:[%s14236_s2 + $0x278] sm:$0xff]  ;;  %7456 = vmatprep.subr.mxu0 %v1732_v34  ;;  %v1746_v34 = vld [vmem:[%s14236_s2 + $0x368] sm:$0xff] }
 0x45e   :  { %v10127_v11 = vsel %vm2665_vm15, %v2664_v58, %v2376_v39  ;;  %v2682_v17 = vsel %vm2681_vm2, %v2377_v13, %v2378_v30  ;;  %v2380_v31 = vsel %vm2316_vm1, %v8527_v49, 512  ;;  %v1731_v39 = vld [vmem:[%s14236_s2 + $0x2f0] sm:$0xff]  ;;  %v1764_v58 = vld [vmem:[%s14236_s2 + $0x3f8] sm:$0xff]  ;;  %7457 = vmatpush3.msra.mxu0 %v1716_v12  ;;  %v1713_v12 = vld [vmem:[%s14236_s2 + $0x260] sm:$0xff] }
 0x45f   :  { %2651 = vmin.xlane.f32.xlu1 %v10123_v0  ;;  %v2668_v59 = vshra.s32 %v10127_v11, 16  ;;  %vm2683_vm3 = vcmp.lt.s32.totalorder %v2682_v17, %v2379_v25  ;;  %v1715_v13 = vld [vmem:[%s14236_s2 + $0x270] sm:$0xff]  ;;  %v1748_v30 = vld [vmem:[%s14236_s2 + $0x378] sm:$0xff]  ;;  %7536 = vmatprep.subr.mxu1 %v1764_v58 }
 0x460   :  { %v2684_v22 = vsel %vm2683_vm3, %v2682_v17, %v2379_v25  ;;  %v1730_v25 = vld [vmem:[%s14236_s2 + $0x2e8] sm:$0xff]  ;;  %v1763_v17 = vld [vmem:[%s14236_s2 + $0x3f0] sm:$0xff]  ;;  %7458 = vmatprep.subr.mxu0 %v1731_v39  ;;  %7537 = vmatpush3.msra.mxu1 %v1748_v30  ;;  %v1761_v39 = vld [vmem:[%s14236_s2 + $0x3e0] sm:$0xff] }
 0x461   :  { %v10133_v57 = vcvt.s32.f32 %v2668_v59  ;;  %vm2685_vm4 = vcmp.lt.s32.totalorder %v2684_v22, %v2380_v31  ;;  %v1714_v59 = vld [vmem:[%s14236_s2 + $0x268] sm:$0xff]  ;;  %7459 = vmatpush3.msra.mxu0 %v1715_v13  ;;  %7538 = vmatprep.subr.mxu1 %v1763_v17  ;;  %v1728_v58 = vld [vmem:[%s14236_s2 + $0x2d8] sm:$0xff]  ;;  %v1745_v13 = vld [vmem:[%s14236_s2 + $0x360] sm:$0xff] }
 0x462   :  { %v10135_v6 = vsel %vm2685_vm4, %v2684_v22, %v2380_v31  ;;  %v1747_v31 = vld [vmem:[%s14236_s2 + $0x370] sm:$0xff]  ;;  %v1762_v22 = vld [vmem:[%s14236_s2 + $0x3e8] sm:$0xff]  ;;  %7460 = vmatprep.subr.mxu0 %v1730_v25  ;;  %v1712_v30 = vld [vmem:[%s14236_s2 + $0x258] sm:$0xff] }
 0x463   :  { %2671 = vmin.xlane.f32.xlu0 %v10133_v57  ;;  %v2688_v28 = vshra.s32 %v10135_v6, 16  ;;  %7539 = vmatpush3.msra.mxu1 %v1747_v31  ;;  %v1760_v25 = vld [vmem:[%s14236_s2 + $0x3d8] sm:$0xff]  ;;  %v1727_v17 = vld [vmem:[%s14236_s2 + $0x2d0] sm:$0xff] }
 0x464   :  { %7461 = vmatpush3.msra.mxu0 %v1714_v59  ;;  %7540 = vmatprep.subr.mxu1 %v1762_v22  ;;  %v1744_v59 = vld [vmem:[%s14236_s2 + $0x358] sm:$0xff]  ;;  %v1711_v31 = vld [vmem:[%s14236_s2 + $0x250] sm:$0xff] }
 0x465   :  { %v10139_v61 = vcvt.s32.f32 %v2688_v28  ;;  %v1729_v28 = vld [vmem:[%s14236_s2 + $0x2e0] sm:$0xff]  ;;  %7541 = vmatpush3.msra.mxu1 %v1746_v34  ;;  %v1759_v22 = vld [vmem:[%s14236_s2 + $0x3d0] sm:$0xff] }
 0x466   :  { %7462 = vmatprep.subr.mxu0 %v1729_v28  ;;  %7542 = vmatprep.subr.mxu1 %v1761_v39  ;;  %v1726_v28 = vld [vmem:[%s14236_s2 + $0x2c8] sm:$0xff]  ;;  %v1743_v34 = vld [vmem:[%s14236_s2 + $0x350] sm:$0xff] }
 0x467   :  { %2691 = vmin.xlane.f32.xlu1 %v10139_v61  ;;  %7463 = vmatpush3.msra.mxu0 %v1713_v12  ;;  %v1710_v12 = vld [vmem:[%s14236_s2 + $0x248] sm:$0xff] }
 0x468   :  { %7464 = vmatprep.subr.mxu0 %v1728_v58  ;;  %7543 = vmatpush3.msra.mxu1 %v1745_v13  ;;  %v1758_v39 = vld [vmem:[%s14236_s2 + $0x3c8] sm:$0xff]  ;;  %v1725_v58 = vld [vmem:[%s14236_s2 + $0x2c0] sm:$0xff] }
 0x469   :  { %7465 = vmatpush3.msra.mxu0 %v1712_v30  ;;  %7544 = vmatprep.subr.mxu1 %v1760_v25  ;;  %v1742_v13 = vld [vmem:[%s14236_s2 + $0x348] sm:$0xff]  ;;  %v1709_v30 = vld [vmem:[%s14236_s2 + $0x240] sm:$0xff] }
 0x46a   :  { %7466 = vmatprep.subr.mxu0 %v1727_v17  ;;  %7545 = vmatpush3.msra.mxu1 %v1744_v59  ;;  %v1757_v25 = vld [vmem:[%s14236_s2 + $0x3c0] sm:$0xff]  ;;  %v1724_v17 = vld [vmem:[%s14236_s2 + $0x2b8] sm:$0xff] }
 0x46b   :  { %7467 = vmatpush3.msra.mxu0 %v1711_v31  ;;  %7546 = vmatprep.subr.mxu1 %v1759_v22  ;;  %v1741_v59 = vld [vmem:[%s14236_s2 + $0x340] sm:$0xff]  ;;  %v1708_v31 = vld [vmem:[%s14236_s2 + $0x238] sm:$0xff] }
 0x46c   :  { %7468 = vmatprep.subr.mxu0 %v1726_v28  ;;  %7547 = vmatpush3.msra.mxu1 %v1743_v34  ;;  %v1756_v22 = vld [vmem:[%s14236_s2 + $0x3b8] sm:$0xff]  ;;  %v1723_v28 = vld [vmem:[%s14236_s2 + $0x2b0] sm:$0xff] }
 0x46d   :  { %7469 = vmatpush3.msra.mxu0 %v1710_v12  ;;  %7548 = vmatprep.subr.mxu1 %v1758_v39  ;;  %v1740_v34 = vld [vmem:[%s14236_s2 + $0x338] sm:$0xff]  ;;  %v1707_v12 = vld [vmem:[%s14236_s2 + $0x230] sm:$0xff] }
 0x46e   :  { %7470 = vmatprep.subr.mxu0 %v1725_v58  ;;  %7549 = vmatpush3.msra.mxu1 %v1742_v13  ;;  %v1755_v39 = vld [vmem:[%s14236_s2 + $0x3b0] sm:$0xff]  ;;  %v1722_v58 = vld [vmem:[%s14236_s2 + $0x2a8] sm:$0xff] }
 0x46f   :  { %7471 = vmatpush3.msra.mxu0 %v1709_v30  ;;  %7550 = vmatprep.subr.mxu1 %v1757_v25  ;;  %v1739_v13 = vld [vmem:[%s14236_s2 + $0x330] sm:$0xff]  ;;  %v1706_v30 = vld [vmem:[%s14236_s2 + $0x228] sm:$0xff] }
 0x470   :  { %7472 = vmatprep.subr.mxu0 %v1724_v17  ;;  %7551 = vmatpush3.msra.mxu1 %v1741_v59  ;;  %v1754_v25 = vld [vmem:[%s14236_s2 + $0x3a8] sm:$0xff]  ;;  %v1721_v17 = vld [vmem:[%s14236_s2 + $0x2a0] sm:$0xff] }
 0x471   :  { %7473 = vmatpush3.msra.mxu0 %v1708_v31  ;;  %7552 = vmatprep.subr.mxu1 %v1756_v22  ;;  %v1738_v59 = vld [vmem:[%s14236_s2 + $0x328] sm:$0xff]  ;;  %v1705_v31 = vld [vmem:[%s14236_s2 + $0x220] sm:$0xff] }
 0x472   :  { %7474 = vmatprep.subr.mxu0 %v1723_v28  ;;  %7553 = vmatpush3.msra.mxu1 %v1740_v34  ;;  %v1753_v22 = vld [vmem:[%s14236_s2 + $0x3a0] sm:$0xff]  ;;  %v1720_v28 = vld [vmem:[%s14236_s2 + $0x298] sm:$0xff] }
 0x473   :  { %7475 = vmatpush3.msra.mxu0 %v1707_v12  ;;  %7554 = vmatprep.subr.mxu1 %v1755_v39  ;;  %v1737_v34 = vld [vmem:[%s14236_s2 + $0x320] sm:$0xff]  ;;  %v1704_v12 = vld [vmem:[%s14236_s2 + $0x218] sm:$0xff] }
 0x474   :  { %7476 = vmatprep.subr.mxu0 %v1722_v58  ;;  %7555 = vmatpush3.msra.mxu1 %v1739_v13  ;;  %v1752_v39 = vld [vmem:[%s14236_s2 + $0x398] sm:$0xff]  ;;  %v1719_v58 = vld [vmem:[%s14236_s2 + $0x290] sm:$0xff] }
 0x475   :  { %7477 = vmatpush3.msra.mxu0 %v1706_v30  ;;  %7556 = vmatprep.subr.mxu1 %v1754_v25  ;;  %v1736_v13 = vld [vmem:[%s14236_s2 + $0x318] sm:$0xff]  ;;  %v1703_v30 = vld [vmem:[%s14236_s2 + $0x210] sm:$0xff] }
 0x476   :  { %7478 = vmatprep.subr.mxu0 %v1721_v17  ;;  %7557 = vmatpush3.msra.mxu1 %v1738_v59  ;;  %v1751_v25 = vld [vmem:[%s14236_s2 + $0x390] sm:$0xff]  ;;  %v1718_v17 = vld [vmem:[%s14236_s2 + $0x288] sm:$0xff] }
 0x477   :  { %7479 = vmatpush3.msra.mxu0 %v1705_v31  ;;  %7558 = vmatprep.subr.mxu1 %v1753_v22  ;;  %v1735_v59 = vld [vmem:[%s14236_s2 + $0x310] sm:$0xff]  ;;  %v1702_v31 = vld [vmem:[%s14236_s2 + $0x208] sm:$0xff]  ;;  %v2387_v22 = vand.u32 65535, %v9847_v42 }
 0x478   :  { %7480 = vmatprep.subr.mxu0 %v1720_v28  ;;  %7559 = vmatpush3.msra.mxu1 %v1737_v34 }
 0x479   :  { %7481 = vmatpush3.msra.mxu0 %v1704_v12  ;;  %7560 = vmatprep.subr.mxu1 %v1752_v39  ;;  %v2389_v34 = vcvt.s32.f32 %v2387_v22  ;;  %v2407_v12 = vand.u32 65535, %v9866_v46  ;;  %v2447_v46 = vand.u32 65535, %v9907_v62  ;;  %v2467_v22 = vand.u32 65535, %v9927_v24  ;;  %v1701_v24 = vld [vmem:[%s14236_s2 + $0x200] sm:$0xff] }
 0x47a   :  { %7482 = vmatprep.subr.mxu0 %v1719_v58  ;;  %7561 = vmatpush3.msra.mxu1 %v1736_v13  ;;  %v2487_v62 = vand.u32 65535, %v9947_v63 }
 0x47b   :  { %7483 = vmatpush3.msra.mxu0 %v1703_v30  ;;  %7562 = vmatprep.subr.mxu1 %v1751_v25  ;;  %v2409_v13 = vcvt.s32.f32 %v2407_v12  ;;  %v2427_v30 = vand.u32 65535, %v9888_v50  ;;  %v1750_v12 = vld [vmem:[%s14236_s2 + $0x388] sm:$0xff] }
 0x47c   :  { %7484 = vmatprep.subr.mxu0 %v1718_v17  ;;  %7563 = vmatpush3.msra.mxu1 %v1735_v59 }
 0x47d   :  { %7485 = vmatpush3.msra.mxu0 %v1702_v31  ;;  %v2429_v17 = vcvt.s32.f32 %v2427_v30  ;;  %v2449_v31 = vcvt.s32.f32 %v2447_v46  ;;  %7564 = vmatprep.subr.mxu1 %v1750_v12  ;;  %v2507_v30 = vand.u32 65535, %v9967_v45  ;;  %v2567_v12 = vand.u32 65535, %v10027_v36 }
 0x47e   :  { %v2607_v36 = vand.u32 65535, %v10067_v15  ;;  %v2647_v15 = vand.u32 65535, %v10107_v1  ;;  %v2687_v1 = vand.u32 65535, %v10135_v6 }
 0x4b3   :  { %v10317_v28 = vpop.xlane.xlu0 %2391 }
 0x4b4   :  { %vm2393_vm5 = vcmp.eq.f32.partialorder %v9859_v51, %v10317_v28 }
 0x4b5   :  { %v2394_v39 = vsel %vm2393_vm5, %v2389_v34, inf  ;;  %v2469_v34 = vcvt.s32.f32 %v2467_v22  ;;  %v3310_v22 = vld [vmem:[%s14235_s1 + $0x1d8] sm:$0xff] }
 0x4b6   :  { %2395 = vmin.xlane.f32.xlu0 %v2394_v39 }
 0x4b7   :  { %v10322_v58 = vpop.xlane.xlu1 %2411 }
 0x4b8   :  { %vm2413_vm6 = vcmp.eq.f32.partialorder %v9879_v52, %v10322_v58 }
 0x4b9   :  { %v2414_v25 = vsel %vm2413_vm6, %v2409_v13, inf  ;;  %v2489_v13 = vcvt.s32.f32 %v2487_v62  ;;  %v2547_v62 = vand.u32 65535, %v10007_v48  ;;  %v2587_v48 = vand.u32 65535, %v10047_v54 }
 0x4ba   :  { %2415 = vmin.xlane.f32.xlu1 %v2414_v25  ;;  %v1749_v25 = vld [vmem:[%s14236_s2 + $0x380] sm:$0xff]  ;;  %v2627_v54 = vand.u32 65535, %v10087_v2  ;;  %v2667_v2 = vand.u32 65535, %v10127_v11 }
 0x4bc   :  { %v10327_v42 = vpop.xlane.xlu0 %2431 }
 0x4bd   :  { %vm2433_vm7 = vcmp.eq.f32.partialorder %v9904_v60, %v10327_v42  ;;  %v1717_v60 = vld [vmem:[%s14236_s2 + $0x280] sm:$0xff] }
 0x4be   :  { %v2434_v51 = vsel %vm2433_vm7, %v2429_v17, inf  ;;  %7486 = vmatprep.subr.mxu0 %v1717_v60  ;;  %v3308_v17 = vld [vmem:[%s14235_s1 + $0x1c8] sm:$0xff] }
 0x4bf   :  { %2435 = vmin.xlane.f32.xlu0 %v2434_v51  ;;  %7487 = vmatpush3.msra.mxu0 %v1701_v24  ;;  %v2509_v51 = vcvt.s32.f32 %v2507_v30  ;;  %v2589_v30 = vcvt.s32.f32 %v2587_v48  ;;  %v14693_v48 = vld [vmem:[#allocation13_spill] sm:$0xff] }
 0x4c0   :  { %v10332_v59 = vpop.xlane.xlu1 %2451  ;;  %3400 = vmatprep.subr.mxu0 %v3308_v17 }
 0x4c1   :  { %vm2453_vm8 = vcmp.eq.f32.partialorder %v9924_v16, %v10332_v59  ;;  %v1734_v16 = vld [vmem:[%s14236_s2 + $0x308] sm:$0xff] }
 0x4c2   :  { %v2454_v52 = vsel %vm2453_vm8, %v2449_v31, inf  ;;  %7565 = vmatpush3.msra.mxu1 %v1734_v16  ;;  %v2527_v31 = vand.u32 65535, %v9987_v7 }
 0x4c3   :  { %2455 = vmin.xlane.f32.xlu1 %v2454_v52  ;;  %7566 = vmatprep.subr.mxu1 %v1749_v25 }
 0x4c4   :  { %v10337_v50 = vpop.xlane.xlu0 %2471 }
 0x4c5   :  { %vm2473_vm9 = vcmp.eq.f32.partialorder %v9944_v14, %v10337_v50  ;;  %v1733_v14 = vld [vmem:[%s14236_s2 + $0x300] sm:$0xff] }
 0x4c6   :  { %v2474_v63 = vsel %vm2473_vm9, %v2469_v34, inf  ;;  %7567 = vmatpush3.msra.mxu1 %v1733_v14  ;;  %v2529_v34 = vcvt.s32.f32 %v2527_v31  ;;  %v2609_v14 = vcvt.s32.f32 %v2607_v36  ;;  %v2649_v31 = vcvt.s32.f32 %v2647_v15  ;;  %v3306_v15 = vld [vmem:[%s14235_s1 + $0x158] sm:$0xff] }
 0x4c7   :  { %2475 = vmin.xlane.f32.xlu0 %v2474_v63  ;;  %3561 = vmatprep.subr.mxu1 %v3310_v22  ;;  %v2569_v63 = vcvt.s32.f32 %v2567_v12  ;;  %v14691_v12 = vld [vmem:[#allocation24_spill] sm:$0xff] }
 0x4c8   :  { %v10354_v39 = vpop.xlane.xlu1 %2491  ;;  %vm1589_vm6 = vcmp.lt.f32.partialorder %v14691_v12, inf }
 0x4c9   :  { %vm2493_vm10 = vcmp.eq.f32.partialorder %v9964_v27, %v10354_v39 }
 0x4ca   :  { %v2494_v46 = vsel %vm2493_vm10, %v2489_v13, inf }
 0x4cb   :  { %2495 = vmin.xlane.f32.xlu1 %v2494_v46  ;;  %v2629_v46 = vcvt.s32.f32 %v2627_v54  ;;  %v2438_v54 = vcvt.f32.s32 %v10327_v42 }
 0x4cc   :  { %v10368_v45 = vpop.xlane.xlu0 %2511 }
 0x4cd   :  { %vm2513_vm11 = vcmp.eq.f32.partialorder %v9984_v56, %v10368_v45  ;;  %v2549_v56 = vcvt.s32.f32 %v2547_v62  ;;  %v2689_v62 = vcvt.s32.f32 %v2687_v1  ;;  %v2458_v1 = vcvt.f32.s32 %v10332_v59  ;;  %v3305_v59 = vld [vmem:[%s14235_s1 + $0x150] sm:$0xff] }
 0x4ce   :  { %v2514_v52 = vsel %vm2513_vm11, %v2509_v51, inf }
 0x4cf   :  { %2515 = vmin.xlane.f32.xlu0 %v2514_v52  ;;  %v2669_v52 = vcvt.s32.f32 %v2667_v2  ;;  %v14698_v2 = vld [vmem:[#allocation15_spill] sm:$0xff] }
 0x4d0   :  { %v10376_v27 = vpop.xlane.xlu1 %2531 }
 0x4d1   :  { %vm2533_vm12 = vcmp.eq.f32.partialorder %v10004_v38, %v10376_v27 }
 0x4d2   :  { %v2534_v60 = vsel %vm2533_vm12, %v2529_v34, inf }
 0x4d3   :  { %2535 = vmin.xlane.f32.xlu1 %v2534_v60  ;;  %v2418_v60 = vcvt.f32.s32 %v10322_v58 }
 0x4d4   :  { %v10381_v7 = vpop.xlane.xlu0 %2551 }
 0x4d5   :  { %vm2553_vm13 = vcmp.eq.f32.partialorder %v10024_v21, %v10381_v7 }
 0x4d6   :  { %v2554_v24 = vsel %vm2553_vm13, %v2549_v56, inf }
 0x4d7   :  { %2555 = vmin.xlane.f32.xlu0 %v2554_v24 }
 0x4d8   :  { %v10386_v16 = vpop.xlane.xlu1 %2571 }
 0x4d9   :  { %vm2573_vm14 = vcmp.eq.f32.partialorder %v10044_v44, %v10386_v16 }
 0x4da   :  { %v2574_v38 = vsel %vm2573_vm14, %v2569_v63, inf  ;;  %v10426_v63 = vsel %vm1589_vm6, %v14691_v12, inf }
 0x4db   :  { %2575 = vmin.xlane.f32.xlu1 %v2574_v38  ;;  %14692 = vst [vmem:[#allocation68_spill] sm:$0xff] %v10426_v63  ;;  %v14694_v38 = vld [vmem:[#allocation27_spill] sm:$0xff]  ;;  %vm3183_vm12 = vcmp.lt.f32.partialorder %v9819_v33, %v10426_v63 }
 0x4dc   :  { %v10391_v13 = vpop.xlane.xlu0 %2591  ;;  %vm1590_vm7 = vcmp.lt.f32.partialorder %v14694_v38, inf }
 0x4dd   :  { %vm2593_vm15 = vcmp.eq.f32.partialorder %v10064_v43, %v10391_v13 }
 0x4de   :  { %v2594_v21 = vsel %vm2593_vm15, %v2589_v30, inf }
 0x4df   :  { %2595 = vmin.xlane.f32.xlu0 %v2594_v21  ;;  %v3307_v21 = vld [vmem:[%s14235_s1 + $0x1c0] sm:$0xff] }
 0x4e0   :  { %v10396_v25 = vpop.xlane.xlu1 %2611 }
 0x4e1   :  { %vm2613_vm1 = vcmp.eq.f32.partialorder %v10084_v40, %v10396_v25 }
 0x4e2   :  { %v2614_v44 = vsel %vm2613_vm1, %v2609_v14, inf  ;;  %v3309_v14 = vld [vmem:[%s14235_s1 + $0x1d0] sm:$0xff] }
 0x4e3   :  { %2615 = vmin.xlane.f32.xlu1 %v2614_v44  ;;  %v14695_v44 = vmov 1.0  }
 0x4e4   :  { %v10401_v17 = vpop.xlane.xlu0 %2631 }
 0x4e5   :  { %vm2633_vm2 = vcmp.eq.f32.partialorder %v10104_v9, %v10401_v17 }
 0x4e6   :  { %v2634_v43 = vsel %vm2633_vm2, %v2629_v46, inf  ;;  %v3304_v46 = vld [vmem:[%s14235_s1 + $0x148] sm:$0xff] }
 0x4e7   :  { %2635 = vmin.xlane.f32.xlu0 %v2634_v43 }
 0x4e8   :  { %v10406_v51 = vpop.xlane.xlu1 %2651 }
 0x4e9   :  { %vm2653_vm3 = vcmp.eq.f32.partialorder %v10123_v0, %v10406_v51  ;;  %v2398_v0 = vcvt.f32.s32 %v10317_v28  ;;  %v2419_v28 = vshll.u32 %v2418_v60, 16 }
 0x4ea   :  { %v2654_v40 = vsel %vm2653_vm3, %v2649_v31, inf  ;;  %v10463_v31 = vsel %vm1590_vm7, %v14694_v38, inf }
 0x4eb   :  { %2655 = vmin.xlane.f32.xlu1 %v2654_v40  ;;  %v2399_v6 = vshll.u32 %v2398_v0, 16  ;;  %14697 = vst [vmem:[#allocation70_spill] sm:$0xff] %v10463_v31  ;;  %v1622_v40 = vsel %vm1590_vm7, %v14698_v2, 0  ;;  %v2439_v0 = vshll.u32 %v2438_v54, 16  ;;  %vm3184_vm3 = vcmp.lt.f32.partialorder %v9831_v5, %v10463_v31  ;;  %v3295_v2 = vld [vmem:[%s14235_s1 + $0x40] sm:$0xff] }
 0x4ec   :  { %v10411_v22 = vpop.xlane.xlu0 %2671 }
 0x4ed   :  { %vm2673_vm4 = vcmp.eq.f32.partialorder %v10133_v57, %v10411_v22 }
 0x4ee   :  { %v2674_v9 = vsel %vm2673_vm4, %v2669_v52, inf  ;;  %v14699_v52 = vld [vmem:[#allocation28_spill] sm:$0xff] }
 0x4ef   :  { %2675 = vmin.xlane.f32.xlu0 %v2674_v9  ;;  %vm1591_vm13 = vcmp.lt.f32.partialorder %v14699_v52, inf }
 0x4f0   :  { %v10416_v34 = vpop.xlane.xlu1 %2691 }
 0x4f1   :  { %vm2693_vm5 = vcmp.eq.f32.partialorder %v10139_v61, %v10416_v34  ;;  %v1621_v61 = vsel %vm1589_vm6, %v14693_v48, 0 }
 0x4f2   :  { %v2694_v11 = vsel %vm2693_vm5, %v2689_v62, inf }
 0x4f3   :  { %2695 = vmin.xlane.f32.xlu1 %v2694_v11  ;;  %v3303_v11 = vld [vmem:[%s14235_s1 + $0x140] sm:$0xff] }
 0x53f   :  { %v2396_v56 = vpop.xlane.xlu0 %2395 }
 0x540   :  { %v2397_v24 = vcvt.f32.s32 %v2396_v56  ;;  %v3300_v56 = vld [vmem:[%s14235_s1 + $0xc8] sm:$0xff] }
 0x542   :  { %v2400_v57 = vadd.s32 %v2399_v6, %v2397_v24  ;;  %v3302_v6 = vld [vmem:[%s14235_s1 + $0xd8] sm:$0xff]  ;;  %v3299_v24 = vld [vmem:[%s14235_s1 + $0xc0] sm:$0xff] }
 0x543   :  { %v2416_v30 = vpop.xlane.xlu1 %2415 }
 0x544   :  { %v3215_v58 = vadd.s32 512, %v2400_v57  ;;  %v2417_v36 = vcvt.f32.s32 %v2416_v30  ;;  %vm2702_vm8 = vcmp.eq.s32.totalorder %v8513_v41, %v2400_v57  ;;  %vm2704_vm9 = vcmp.eq.s32.totalorder %v8527_v49, %v2400_v57  ;;  %v14702_v30 = vld [vmem:[#allocation29_spill] sm:$0xff] }
 0x545   :  { %6912 = vmatprep.mubr.msk.f32.mxu0 %vm2702_vm8, %v14695_v44  ;;  %6944 = vmatprep.mubr.msk.f32.mxu1 %vm2704_vm9, %v14695_v44  ;;  %vm2701_vm10 = vcmp.eq.s32.totalorder %v8510_v35, %v2400_v57  ;;  %vm2703_vm11 = vcmp.eq.s32.totalorder %v8518_v37, %v2400_v57  ;;  %v3301_v57 = vld [vmem:[%s14235_s1 + $0xd0] sm:$0xff]  ;;  %vm1592_vm4 = vcmp.lt.f32.partialorder %v14702_v30, inf }
 0x546   :  { %v2420_v42 = vadd.s32 %v2419_v28, %v2417_v36  ;;  %6913 = vmatmul.mubr.msk.f32.vlgmr.msra.gmra.mxu0 %vm2701_vm10, %v14695_v44  ;;  %6945 = vmatmul.mubr.msk.f32.vlgmr.msra.gmra.mxu1 %vm2703_vm11, %v14695_v44  ;;  %v10458_v43 = vsel %vm3183_vm12, %v3215_v58, %v1621_v61  ;;  %v10506_v28 = vsel %vm1591_vm13, %v14699_v52, inf  ;;  %v2459_v58 = vshll.u32 %v2458_v1, 16 }
 0x547   :  { %14696 = vst [vmem:[#allocation69_spill] sm:$0xff] %v10458_v43  ;;  %3401 = vmatpush1.msra.mxu0 %v3307_v21  ;;  %3562 = vmatpush1.msra.mxu1 %v3309_v14  ;;  %14701 = vst [vmem:[#allocation72_spill] sm:$0xff] %v10506_v28  ;;  %v2478_v36 = vcvt.f32.s32 %v10337_v50  ;;  %v14703_v50 = vld [vmem:[#allocation16_spill] sm:$0xff]  ;;  %vm3185_vm11 = vcmp.lt.f32.partialorder %v9845_v3, %v10506_v28 }
 0x548   :  { %v3216_v9 = vadd.s32 512, %v2420_v42  ;;  %v2436_v62 = vpop.xlane.xlu0 %2435  ;;  %vm2706_vm14 = vcmp.eq.s32.totalorder %v8513_v41, %v2420_v42  ;;  %vm2708_vm15 = vcmp.eq.s32.totalorder %v8527_v49, %v2420_v42  ;;  %vm2705_vm1 = vcmp.eq.s32.totalorder %v8510_v35, %v2420_v42  ;;  %3402 = vmatprep.subr.mxu0 %v3304_v46  ;;  %3563 = vmatprep.subr.mxu1 %v3306_v15  ;;  %v3296_v46 = vld [vmem:[%s14235_s1 + $0x48] sm:$0xff]  ;;  %v3298_v15 = vld [vmem:[%s14235_s1 + $0x58] sm:$0xff] }
 0x549   :  { %v2437_v60 = vcvt.f32.s32 %v2436_v62  ;;  %6914 = vmatprep.mubr.msk.f32.mxu0 %vm2706_vm14, %v14695_v44  ;;  %6946 = vmatprep.mubr.msk.f32.mxu1 %vm2708_vm15, %v14695_v44  ;;  %vm2707_vm2 = vcmp.eq.s32.totalorder %v8518_v37, %v2420_v42  ;;  %v1623_v42 = vsel %vm1591_vm13, %v14703_v50, 0  ;;  %v10543_v62 = vsel %vm1592_vm4, %v14702_v30, inf  ;;  %v14711_v50 = vld [vmem:[#allocation17_spill] sm:$0xff] }
 0x54a   :  { %6915 = vmatmul.mubr.msk.f32.gmra.mxu0 %vm2705_vm1, %v14695_v44  ;;  %6947 = vmatmul.mubr.msk.f32.gmra.mxu1 %vm2707_vm2, %v14695_v44  ;;  %v10501_v48 = vsel %vm3184_vm3, %v3216_v9, %v1622_v40  ;;  %v3297_v40 = vld [vmem:[%s14235_s1 + $0x50] sm:$0xff]  ;;  %14705 = vst [vmem:[#allocation74_spill] sm:$0xff] %v10543_v62 }
 0x54b   :  { %14700 = vst [vmem:[#allocation71_spill] sm:$0xff] %v10501_v48  ;;  %v2440_v61 = vadd.s32 %v2439_v0, %v2437_v60  ;;  %3403 = vmatpush1.msra.mxu0 %v3303_v11  ;;  %3564 = vmatpush1.msra.mxu1 %v3305_v59  ;;  %v14706_v11 = vld [vmem:[#allocation30_spill] sm:$0xff]  ;;  %v2479_v59 = vshll.u32 %v2478_v36, 16  ;;  %v2498_v0 = vcvt.f32.s32 %v10354_v39  ;;  %v14710_v36 = vld [vmem:[#allocation31_spill] sm:$0xff] }
 0x54c   :  { %v2456_v21 = vpop.xlane.xlu1 %2455  ;;  %3404 = vmatprep.subr.mxu0 %v3300_v56  ;;  %3565 = vmatprep.subr.mxu1 %v3302_v6  ;;  %vm14335_vm14 = vcmp.lt.f32.partialorder %v14706_v11, inf }
 0x54d   :  { %v3217_v14 = vadd.s32 512, %v2440_v61  ;;  %v2457_v54 = vcvt.f32.s32 %v2456_v21  ;;  %vm2710_vm5 = vcmp.eq.s32.totalorder %v8513_v41, %v2440_v61  ;;  %vm2712_vm8 = vcmp.eq.s32.totalorder %v8527_v49, %v2440_v61  ;;  %3405 = vmatpush1.msra.mxu0 %v3299_v24  ;;  %3566 = vmatpush1.msra.mxu1 %v3301_v57  ;;  %v14707_v24 = vld [vmem:[#allocation18_spill] sm:$0xff] }
 0x54e   :  { %6916 = vmatprep.mubr.msk.f32.mxu0 %vm2710_vm5, %v14695_v44  ;;  %6948 = vmatprep.mubr.msk.f32.mxu1 %vm2712_vm8, %v14695_v44  ;;  %vm2709_vm9 = vcmp.eq.s32.totalorder %v8510_v35, %v2440_v61  ;;  %vm2711_vm10 = vcmp.eq.s32.totalorder %v8518_v37, %v2440_v61  ;;  %v1624_v57 = vsel %vm1592_vm4, %v14707_v24, 0  ;;  %vm3186_vm8 = vcmp.lt.f32.partialorder %v9864_v20, %v10543_v62  ;;  %v14715_v24 = vld [vmem:[#allocation19_spill] sm:$0xff] }
 0x54f   :  { %v2460_v1 = vadd.s32 %v2459_v58, %v2457_v54  ;;  %6917 = vmatmul.mubr.msk.f32.gmra.mxu0 %vm2709_vm9, %v14695_v44  ;;  %6949 = vmatmul.mubr.msk.f32.gmra.mxu1 %vm2711_vm10, %v14695_v44  ;;  %v10538_v9 = vsel %vm3185_vm11, %v3217_v14, %v1623_v42  ;;  %v10568_v58 = vsel %vm14335_vm14, %v14706_v11, inf  ;;  %vm14337_vm9 = vcmp.lt.f32.partialorder %v14710_v36, inf }
 0x550   :  { %14704 = vst [vmem:[#allocation73_spill] sm:$0xff] %v10538_v9  ;;  %v2476_v60 = vpop.xlane.xlu0 %2475  ;;  %3406 = vmatprep.subr.mxu0 %v3296_v46  ;;  %3567 = vmatprep.subr.mxu1 %v3298_v15  ;;  %14709 = vst [vmem:[#allocation76_spill] sm:$0xff] %v10568_v58  ;;  %v2499_v21 = vshll.u32 %v2498_v0, 16  ;;  %v2518_v14 = vcvt.f32.s32 %v10368_v45  ;;  %v1625_v42 = vsel %vm14335_vm14, %v14711_v50, 0  ;;  %v2538_v0 = vcvt.f32.s32 %v10376_v27  ;;  %v14747_v9 = vld [vmem:[#allocation43_spill] sm:$0xff] }
 0x551   :  { %v3218_v56 = vadd.s32 512, %v2460_v1  ;;  %v2477_v6 = vcvt.f32.s32 %v2476_v60  ;;  %vm2714_vm15 = vcmp.eq.s32.totalorder %v8513_v41, %v2460_v1  ;;  %vm2716_vm1 = vcmp.eq.s32.totalorder %v8527_v49, %v2460_v1  ;;  %3407 = vmatpush1.msra.mxu0 %v3295_v2  ;;  %3568 = vmatpush1.msra.mxu1 %v3297_v40 }
 0x552   :  { %6918 = vmatprep.mubr.msk.f32.mxu0 %vm2714_vm15, %v14695_v44  ;;  %6950 = vmatprep.mubr.msk.f32.mxu1 %vm2716_vm1, %v14695_v44  ;;  %vm2713_vm2 = vcmp.eq.s32.totalorder %v8510_v35, %v2460_v1  ;;  %vm2715_vm5 = vcmp.eq.s32.totalorder %v8518_v37, %v2460_v1  ;;  %v10593_v40 = vsel %vm14337_vm9, %v14710_v36, inf  ;;  %v14714_v1 = vld [vmem:[#allocation32_spill] sm:$0xff] }
 0x553   :  { %v2480_v39 = vadd.s32 %v2479_v59, %v2477_v6  ;;  %6919 = vmatmul.mubr.msk.f32.gmra.mxu0 %vm2713_vm2, %v14695_v44  ;;  %6951 = vmatmul.mubr.msk.f32.gmra.mxu1 %vm2715_vm5, %v14695_v44  ;;  %v10563_v61 = vsel %vm3186_vm8, %v3218_v56, %v1624_v57  ;;  %vm14334_vm5 = vcmp.lt.f32.partialorder %v9884_v32, %v10568_v58  ;;  %v2519_v59 = vshll.u32 %v2518_v14, 16  ;;  %v14718_v14 = vld [vmem:[#allocation33_spill] sm:$0xff] }
 0x554   :  { %14708 = vst [vmem:[#allocation75_spill] sm:$0xff] %v10563_v61  ;;  %v2496_v54 = vpop.xlane.xlu1 %2495  ;;  %14713 = vst [vmem:[#allocation78_spill] sm:$0xff] %v10593_v40  ;;  %v1626_v57 = vsel %vm14337_vm9, %v14715_v24, 0  ;;  %vm14336_vm14 = vcmp.lt.f32.partialorder %v9902_v55, %v10593_v40  ;;  %v2578_v24 = vcvt.f32.s32 %v10386_v16  ;;  %v14743_v61 = vld [vmem:[#allocation42_spill] sm:$0xff] }
 0x555   :  { %v3219_v46 = vadd.s32 512, %v2480_v39  ;;  %v2497_v15 = vcvt.f32.s32 %v2496_v54  ;;  %vm2718_vm10 = vcmp.eq.s32.totalorder %v8513_v41, %v2480_v39  ;;  %vm2720_vm15 = vcmp.eq.s32.totalorder %v8527_v49, %v2480_v39 }
 0x556   :  { %6920 = vmatprep.mubr.msk.f32.mxu0 %vm2718_vm10, %v14695_v44  ;;  %6952 = vmatprep.mubr.msk.f32.mxu1 %vm2720_vm15, %v14695_v44  ;;  %vm2717_vm1 = vcmp.eq.s32.totalorder %v8510_v35, %v2480_v39  ;;  %vm2719_vm2 = vcmp.eq.s32.totalorder %v8518_v37, %v2480_v39  ;;  %vm14339_vm10 = vcmp.lt.f32.partialorder %v14714_v1, inf  ;;  %v2539_v54 = vshll.u32 %v2538_v0, 16 }
 0x557   :  { %v2500_v45 = vadd.s32 %v2499_v21, %v2497_v15  ;;  %6921 = vmatmul.mubr.msk.f32.gmra.mxu0 %vm2717_vm1, %v14695_v44  ;;  %6953 = vmatmul.mubr.msk.f32.gmra.mxu1 %vm2719_vm2, %v14695_v44  ;;  %v10588_v2 = vsel %vm14334_vm5, %v3219_v46, %v1625_v42  ;;  %v10618_v21 = vsel %vm14339_vm10, %v14714_v1, inf  ;;  %v2558_v46 = vcvt.f32.s32 %v10381_v7 }
 0x558   :  { %14712 = vst [vmem:[#allocation77_spill] sm:$0xff] %v10588_v2  ;;  %v2516_v60 = vpop.xlane.xlu0 %2515  ;;  %14717 = vst [vmem:[#allocation13_spill] sm:$0xff] %v10618_v21  ;;  %vm14338_vm9 = vcmp.lt.f32.partialorder %v9922_v18, %v10618_v21  ;;  %v14739_v2 = vld [vmem:[#allocation41_spill] sm:$0xff] }
 0x559   :  { %v3220_v56 = vadd.s32 512, %v2500_v45  ;;  %v2517_v6 = vcvt.f32.s32 %v2516_v60  ;;  %vm2722_vm15 = vcmp.eq.s32.totalorder %v8513_v41, %v2500_v45  ;;  %vm2724_vm1 = vcmp.eq.s32.totalorder %v8527_v49, %v2500_v45 }
 0x55a   :  { %6922 = vmatprep.mubr.msk.f32.mxu0 %vm2722_vm15, %v14695_v44  ;;  %6954 = vmatprep.mubr.msk.f32.mxu1 %vm2724_vm1, %v14695_v44  ;;  %vm2721_vm2 = vcmp.eq.s32.totalorder %v8510_v35, %v2500_v45  ;;  %vm2723_vm5 = vcmp.eq.s32.totalorder %v8518_v37, %v2500_v45  ;;  %vm14341_vm15 = vcmp.lt.f32.partialorder %v14718_v14, inf  ;;  %v14719_v45 = vld [vmem:[#allocation20_spill] sm:$0xff] }
 0x55b   :  { %v2520_v27 = vadd.s32 %v2519_v59, %v2517_v6  ;;  %6923 = vmatmul.mubr.msk.f32.gmra.mxu0 %vm2721_vm2, %v14695_v44  ;;  %6955 = vmatmul.mubr.msk.f32.gmra.mxu1 %vm2723_vm5, %v14695_v44  ;;  %v10613_v39 = vsel %vm14336_vm14, %v3220_v56, %v1626_v57  ;;  %v1627_v59 = vsel %vm14339_vm10, %v14719_v45, 0  ;;  %v10643_v60 = vsel %vm14341_vm15, %v14718_v14, inf  ;;  %v14722_v56 = vld [vmem:[#allocation34_spill] sm:$0xff]  ;;  %v14726_v45 = vld [vmem:[#allocation35_spill] sm:$0xff] }
 0x55c   :  { %14716 = vst [vmem:[#allocation24_spill] sm:$0xff] %v10613_v39  ;;  %v2536_v15 = vpop.xlane.xlu1 %2535  ;;  %14721 = vst [vmem:[#allocation15_spill] sm:$0xff] %v10643_v60  ;;  %v2559_v6 = vshll.u32 %v2558_v46, 16  ;;  %vm14340_vm10 = vcmp.lt.f32.partialorder %v9942_v8, %v10643_v60  ;;  %v14735_v39 = vld [vmem:[#allocation40_spill] sm:$0xff] }
 0x55d   :  { %v3221_v50 = vadd.s32 512, %v2520_v27  ;;  %v2537_v42 = vcvt.f32.s32 %v2536_v15  ;;  %vm2726_vm5 = vcmp.eq.s32.totalorder %v8513_v41, %v2520_v27  ;;  %vm2728_vm1 = vcmp.eq.s32.totalorder %v8527_v49, %v2520_v27  ;;  %v14723_v15 = vld [vmem:[#allocation21_spill] sm:$0xff] }
 0x55e   :  { %6924 = vmatprep.mubr.msk.f32.mxu0 %vm2726_vm5, %v14695_v44  ;;  %6956 = vmatprep.mubr.msk.f32.mxu1 %vm2728_vm1, %v14695_v44  ;;  %vm2725_vm2 = vcmp.eq.s32.totalorder %v8510_v35, %v2520_v27  ;;  %vm2727_vm14 = vcmp.eq.s32.totalorder %v8518_v37, %v2520_v27  ;;  %vm14343_vm5 = vcmp.lt.f32.partialorder %v14722_v56, inf }
 0x55f   :  { %v2540_v7 = vadd.s32 %v2539_v54, %v2537_v42  ;;  %6925 = vmatmul.mubr.msk.f32.gmra.mxu0 %vm2725_vm2, %v14695_v44  ;;  %6957 = vmatmul.mubr.msk.f32.gmra.mxu1 %vm2727_vm14, %v14695_v44  ;;  %v10638_v0 = vsel %vm14338_vm9, %v3221_v50, %v1627_v59  ;;  %v1628_v50 = vsel %vm14341_vm15, %v14723_v15, 0  ;;  %v10668_v42 = vsel %vm14343_vm5, %v14722_v56, inf  ;;  %v14727_v15 = vld [vmem:[#allocation38_spill] sm:$0xff] }
 0x560   :  { %14720 = vst [vmem:[#allocation27_spill] sm:$0xff] %v10638_v0  ;;  %v2556_v57 = vpop.xlane.xlu0 %2555  ;;  %14725 = vst [vmem:[#allocation29_spill] sm:$0xff] %v10668_v42  ;;  %v2579_v59 = vshll.u32 %v2578_v24, 16  ;;  %vm14342_vm15 = vcmp.lt.f32.partialorder %v9962_v47, %v10668_v42  ;;  %v14731_v0 = vld [vmem:[#allocation39_spill] sm:$0xff] }
 0x561   :  { %v3222_v27 = vadd.s32 512, %v2540_v7  ;;  %v2557_v54 = vcvt.f32.s32 %v2556_v57  ;;  %vm2730_vm14 = vcmp.eq.s32.totalorder %v8513_v41, %v2540_v7  ;;  %vm2732_vm1 = vcmp.eq.s32.totalorder %v8527_v49, %v2540_v7 }
 0x562   :  { %6926 = vmatprep.mubr.msk.f32.mxu0 %vm2730_vm14, %v14695_v44  ;;  %6958 = vmatprep.mubr.msk.f32.mxu1 %vm2732_vm1, %v14695_v44  ;;  %vm2729_vm2 = vcmp.eq.s32.totalorder %v8510_v35, %v2540_v7  ;;  %vm2731_vm9 = vcmp.eq.s32.totalorder %v8518_v37, %v2540_v7  ;;  %vm14345_vm14 = vcmp.lt.f32.partialorder %v14726_v45, inf  ;;  %v2598_v7 = vcvt.f32.s32 %v10391_v13 }
 0x563   :  { %v2560_v16 = vadd.s32 %v2559_v6, %v2557_v54  ;;  %6927 = vmatmul.mubr.msk.f32.gmra.mxu0 %vm2729_vm2, %v14695_v44  ;;  %6959 = vmatmul.mubr.msk.f32.gmra.mxu1 %vm2731_vm9, %v14695_v44  ;;  %v10663_v46 = vsel %vm14340_vm10, %v3222_v27, %v1628_v50  ;;  %v1629_v27 = vsel %vm14343_vm5, %v14727_v15, 0  ;;  %v10693_v50 = vsel %vm14345_vm14, %v14726_v45, inf }
 0x564   :  { %14724 = vst [vmem:[#allocation28_spill] sm:$0xff] %v10663_v46  ;;  %v2576_v6 = vpop.xlane.xlu1 %2575  ;;  %14729 = vst [vmem:[#allocation30_spill] sm:$0xff] %v10693_v50  ;;  %v2618_v15 = vcvt.f32.s32 %v10396_v25  ;;  %vm14344_vm5 = vcmp.lt.f32.partialorder %v9982_v26, %v10693_v50 }
 0x565   :  { %v3223_v57 = vadd.s32 512, %v2560_v16  ;;  %v2577_v54 = vcvt.f32.s32 %v2576_v6  ;;  %vm2734_vm9 = vcmp.eq.s32.totalorder %v8513_v41, %v2560_v16  ;;  %vm2736_vm1 = vcmp.eq.s32.totalorder %v8527_v49, %v2560_v16  ;;  %v14730_v6 = vld [vmem:[#allocation36_spill] sm:$0xff] }
 0x566   :  { %6928 = vmatprep.mubr.msk.f32.mxu0 %vm2734_vm9, %v14695_v44  ;;  %6960 = vmatprep.mubr.msk.f32.mxu1 %vm2736_vm1, %v14695_v44  ;;  %vm2733_vm2 = vcmp.eq.s32.totalorder %v8510_v35, %v2560_v16  ;;  %vm2735_vm10 = vcmp.eq.s32.totalorder %v8518_v37, %v2560_v16  ;;  %vm14347_vm9 = vcmp.lt.f32.partialorder %v14730_v6, inf  ;;  %v2599_v16 = vshll.u32 %v2598_v7, 16 }
 0x567   :  { %v2580_v13 = vadd.s32 %v2579_v59, %v2577_v54  ;;  %6929 = vmatmul.mubr.msk.f32.gmra.mxu0 %vm2733_vm2, %v14695_v44  ;;  %6961 = vmatmul.mubr.msk.f32.gmra.mxu1 %vm2735_vm10, %v14695_v44  ;;  %v10688_v24 = vsel %vm14342_vm15, %v3223_v57, %v1629_v27  ;;  %v1630_v57 = vsel %vm14345_vm14, %v14731_v0, 0  ;;  %v10718_v7 = vsel %vm14347_vm9, %v14730_v6, inf  ;;  %v14734_v27 = vld [vmem:[#allocation37_spill] sm:$0xff] }
 0x568   :  { %14728 = vst [vmem:[#allocation16_spill] sm:$0xff] %v10688_v24  ;;  %v2596_v59 = vpop.xlane.xlu0 %2595  ;;  %14733 = vst [vmem:[#allocation31_spill] sm:$0xff] %v10718_v7  ;;  %vm14346_vm14 = vcmp.lt.f32.partialorder %v10002_v19, %v10718_v7 }
 0x569   :  { %v3224_v54 = vadd.s32 512, %v2580_v13  ;;  %v2597_v46 = vcvt.f32.s32 %v2596_v59  ;;  %vm2738_vm10 = vcmp.eq.s32.totalorder %v8513_v41, %v2580_v13  ;;  %vm2740_vm1 = vcmp.eq.s32.totalorder %v8527_v49, %v2580_v13 }
 0x56a   :  { %6930 = vmatprep.mubr.msk.f32.mxu0 %vm2738_vm10, %v14695_v44  ;;  %6962 = vmatprep.mubr.msk.f32.mxu1 %vm2740_vm1, %v14695_v44  ;;  %vm2737_vm2 = vcmp.eq.s32.totalorder %v8510_v35, %v2580_v13  ;;  %vm2739_vm15 = vcmp.eq.s32.totalorder %v8518_v37, %v2580_v13  ;;  %vm14349_vm10 = vcmp.lt.f32.partialorder %v14734_v27, inf  ;;  %v2619_v13 = vshll.u32 %v2618_v15, 16 }
 0x56b   :  { %v2600_v25 = vadd.s32 %v2599_v16, %v2597_v46  ;;  %6931 = vmatmul.mubr.msk.f32.gmra.mxu0 %vm2737_vm2, %v14695_v44  ;;  %6963 = vmatmul.mubr.msk.f32.gmra.mxu1 %vm2739_vm15, %v14695_v44  ;;  %v10713_v0 = vsel %vm14344_vm5, %v3224_v54, %v1630_v57  ;;  %v2638_v59 = vcvt.f32.s32 %v10401_v17  ;;  %v1631_v54 = vsel %vm14347_vm9, %v14735_v39, 0  ;;  %v14738_v57 = vld [vmem:[#allocation10_spill] sm:$0xff] }
 0x56c   :  { %14732 = vst [vmem:[#allocation18_spill] sm:$0xff] %v10713_v0  ;;  %v2616_v46 = vpop.xlane.xlu1 %2615  ;;  %v10743_v15 = vsel %vm14349_vm10, %v14734_v27, inf }
 0x56d   :  { %v3225_v16 = vadd.s32 512, %v2600_v25  ;;  %v2617_v24 = vcvt.f32.s32 %v2616_v46  ;;  %vm2742_vm15 = vcmp.eq.s32.totalorder %v8513_v41, %v2600_v25  ;;  %vm2744_vm1 = vcmp.eq.s32.totalorder %v8527_v49, %v2600_v25  ;;  %14737 = vst [vmem:[#allocation32_spill] sm:$0xff] %v10743_v15 }
 0x56e   :  { %6932 = vmatprep.mubr.msk.f32.mxu0 %vm2742_vm15, %v14695_v44  ;;  %6964 = vmatprep.mubr.msk.f32.mxu1 %vm2744_vm1, %v14695_v44  ;;  %vm2741_vm2 = vcmp.eq.s32.totalorder %v8510_v35, %v2600_v25  ;;  %vm2743_vm5 = vcmp.eq.s32.totalorder %v8518_v37, %v2600_v25  ;;  %vm14351_vm15 = vcmp.lt.f32.partialorder %v14738_v57, inf  ;;  %v2639_v25 = vshll.u32 %v2638_v59, 16 }
 0x56f   :  { %v2620_v17 = vadd.s32 %v2619_v13, %v2617_v24  ;;  %6933 = vmatmul.mubr.msk.f32.gmra.mxu0 %vm2741_vm2, %v14695_v44  ;;  %6965 = vmatmul.mubr.msk.f32.gmra.mxu1 %vm2743_vm5, %v14695_v44  ;;  %v10738_v39 = vsel %vm14346_vm14, %v3225_v16, %v1631_v54  ;;  %v2658_v46 = vcvt.f32.s32 %v10406_v51  ;;  %v1632_v16 = vsel %vm14349_vm10, %v14739_v2, 0  ;;  %v14742_v54 = vld [vmem:[#allocation11_spill] sm:$0xff] }
 0x570   :  { %14736 = vst [vmem:[#allocation17_spill] sm:$0xff] %v10738_v39  ;;  %v2636_v24 = vpop.xlane.xlu0 %2635  ;;  %vm14348_vm9 = vcmp.lt.f32.partialorder %v10022_v4, %v10743_v15  ;;  %v10768_v59 = vsel %vm14351_vm15, %v14738_v57, inf }
 0x571   :  { %v3226_v13 = vadd.s32 512, %v2620_v17  ;;  %v2637_v0 = vcvt.f32.s32 %v2636_v24  ;;  %vm2746_vm5 = vcmp.eq.s32.totalorder %v8513_v41, %v2620_v17  ;;  %vm2748_vm1 = vcmp.eq.s32.totalorder %v8527_v49, %v2620_v17  ;;  %14741 = vst [vmem:[#allocation33_spill] sm:$0xff] %v10768_v59 }
 0x572   :  { %6934 = vmatprep.mubr.msk.f32.mxu0 %vm2746_vm5, %v14695_v44  ;;  %6966 = vmatprep.mubr.msk.f32.mxu1 %vm2748_vm1, %v14695_v44  ;;  %vm2745_vm2 = vcmp.eq.s32.totalorder %v8510_v35, %v2620_v17  ;;  %vm2747_vm14 = vcmp.eq.s32.totalorder %v8518_v37, %v2620_v17  ;;  %vm14353_vm5 = vcmp.lt.f32.partialorder %v14742_v54, inf  ;;  %v2659_v17 = vshll.u32 %v2658_v46, 16 }
 0x573   :  { %v2640_v51 = vadd.s32 %v2639_v25, %v2637_v0  ;;  %6935 = vmatmul.mubr.msk.f32.gmra.mxu0 %vm2745_vm2, %v14695_v44  ;;  %6967 = vmatmul.mubr.msk.f32.gmra.mxu1 %vm2747_vm14, %v14695_v44  ;;  %v10763_v2 = vsel %vm14348_vm9, %v3226_v13, %v1632_v16  ;;  %v2678_v24 = vcvt.f32.s32 %v10411_v22  ;;  %v1633_v13 = vsel %vm14351_vm15, %v14743_v61, 0  ;;  %v14746_v16 = vld [vmem:[#allocation12_spill] sm:$0xff] }
 0x574   :  { %14740 = vst [vmem:[#allocation19_spill] sm:$0xff] %v10763_v2  ;;  %v2656_v0 = vpop.xlane.xlu1 %2655  ;;  %vm14350_vm10 = vcmp.lt.f32.partialorder %v10042_v53, %v10768_v59  ;;  %v10793_v46 = vsel %vm14353_vm5, %v14742_v54, inf }
 0x575   :  { %v3227_v25 = vadd.s32 512, %v2640_v51  ;;  %v2657_v39 = vcvt.f32.s32 %v2656_v0  ;;  %vm2750_vm14 = vcmp.eq.s32.totalorder %v8513_v41, %v2640_v51  ;;  %vm2752_vm1 = vcmp.eq.s32.totalorder %v8527_v49, %v2640_v51  ;;  %14745 = vst [vmem:[#allocation34_spill] sm:$0xff] %v10793_v46 }
 0x576   :  { %6936 = vmatprep.mubr.msk.f32.mxu0 %vm2750_vm14, %v14695_v44  ;;  %6968 = vmatprep.mubr.msk.f32.mxu1 %vm2752_vm1, %v14695_v44  ;;  %vm2749_vm2 = vcmp.eq.s32.totalorder %v8510_v35, %v2640_v51  ;;  %vm2751_vm9 = vcmp.eq.s32.totalorder %v8518_v37, %v2640_v51  ;;  %vm14354_vm14 = vcmp.lt.f32.partialorder %v14746_v16, inf  ;;  %v2679_v51 = vshll.u32 %v2678_v24, 16 }
 0x577   :  { %v2660_v22 = vadd.s32 %v2659_v17, %v2657_v39  ;;  %6937 = vmatmul.mubr.msk.f32.gmra.mxu0 %vm2749_vm2, %v14695_v44  ;;  %6969 = vmatmul.mubr.msk.f32.gmra.mxu1 %vm2751_vm9, %v14695_v44  ;;  %v10788_v61 = vsel %vm14350_vm10, %v3227_v25, %v1633_v13  ;;  %v2698_v0 = vcvt.f32.s32 %v10416_v34  ;;  %v1634_v25 = vsel %vm14353_vm5, %v14747_v9, 0  ;;  %v14750_v13 = vld [vmem:[#allocation14_spill] sm:$0xff] }
 0x578   :  { %14744 = vst [vmem:[#allocation20_spill] sm:$0xff] %v10788_v61  ;;  %v2676_v39 = vpop.xlane.xlu0 %2675  ;;  %vm14352_vm15 = vcmp.lt.f32.partialorder %v10062_v23, %v10793_v46  ;;  %v10818_v24 = vsel %vm14354_vm14, %v14746_v16, inf }
 0x579   :  { %v3228_v17 = vadd.s32 512, %v2660_v22  ;;  %v2677_v2 = vcvt.f32.s32 %v2676_v39  ;;  %vm2754_vm9 = vcmp.eq.s32.totalorder %v8513_v41, %v2660_v22  ;;  %vm2756_vm1 = vcmp.eq.s32.totalorder %v8527_v49, %v2660_v22  ;;  %14749 = vst [vmem:[#allocation35_spill] sm:$0xff] %v10818_v24 }
 0x57a   :  { %6938 = vmatprep.mubr.msk.f32.mxu0 %vm2754_vm9, %v14695_v44  ;;  %6970 = vmatprep.mubr.msk.f32.mxu1 %vm2756_vm1, %v14695_v44  ;;  %vm2753_vm2 = vcmp.eq.s32.totalorder %v8510_v35, %v2660_v22  ;;  %vm2755_vm10 = vcmp.eq.s32.totalorder %v8518_v37, %v2660_v22  ;;  %vm1604_vm9 = vcmp.lt.f32.partialorder %v14750_v13, inf  ;;  %v2699_v22 = vshll.u32 %v2698_v0, 16 }
 0x57b   :  { %v2680_v34 = vadd.s32 %v2679_v51, %v2677_v2  ;;  %6939 = vmatmul.mubr.msk.f32.gmra.mxu0 %vm2753_vm2, %v14695_v44  ;;  %6971 = vmatmul.mubr.msk.f32.gmra.mxu1 %vm2755_vm10, %v14695_v44  ;;  %v10813_v9 = vsel %vm14352_vm15, %v3228_v17, %v1634_v25  ;;  %v14751_v51 = vld [vmem:[#allocation44_spill] sm:$0xff]  ;;  %vm3197_vm5 = vcmp.lt.f32.partialorder %v10082_v29, %v10818_v24 }
 0x57c   :  { %14748 = vst [vmem:[#allocation21_spill] sm:$0xff] %v10813_v9  ;;  %v2696_v39 = vpop.xlane.xlu1 %2695  ;;  %v1635_v17 = vsel %vm14354_vm14, %v14751_v51, 0 }
 0x57d   :  { %v3229_v61 = vadd.s32 512, %v2680_v34  ;;  %v2697_v2 = vcvt.f32.s32 %v2696_v39  ;;  %vm2758_vm1 = vcmp.eq.s32.totalorder %v8513_v41, %v2680_v34  ;;  %vm2760_vm10 = vcmp.eq.s32.totalorder %v8527_v49, %v2680_v34 }
 0x57e   :  { %6940 = vmatprep.mubr.msk.f32.mxu0 %vm2758_vm1, %v14695_v44  ;;  %6972 = vmatprep.mubr.msk.f32.mxu1 %vm2760_vm10, %v14695_v44  ;;  %vm2757_vm2 = vcmp.eq.s32.totalorder %v8510_v35, %v2680_v34  ;;  %vm2759_vm15 = vcmp.eq.s32.totalorder %v8518_v37, %v2680_v34  ;;  %v10842_v39 = vsel %vm1604_vm9, %v14750_v13, inf  ;;  %v14754_v34 = vld [vmem:[#allocation45_spill] sm:$0xff] }
 0x57f   :  { %v2700_v0 = vadd.s32 %v2699_v22, %v2697_v2  ;;  %6941 = vmatmul.mubr.msk.f32.gmra.mxu0 %vm2757_vm2, %v14695_v44  ;;  %6973 = vmatmul.mubr.msk.f32.gmra.mxu1 %vm2759_vm15, %v14695_v44  ;;  %v10837_v25 = vsel %vm3197_vm5, %v3229_v61, %v1635_v17  ;;  %14753 = vst [vmem:[#allocation36_spill] sm:$0xff] %v10842_v39  ;;  %v1636_v22 = vsel %vm1604_vm9, %v14754_v34, 0  ;;  %v14756_v2 = vmov 0.0   ;;  %v7955_v17 = vld [vmem:[%s14234_s0] sm:$0xff]  ;;  %v7958_v34 = vld [vmem:[%s14234_s0 + $0x18] sm:$0xff] }
 0x580   :  { %14752 = vst [vmem:[#allocation38_spill] sm:$0xff] %v10837_v25  ;;  %vm3198_vm2 = vcmp.lt.f32.partialorder %v10102_v10, %v10842_v39 }
 0x581   :  { %v3230_v51 = vadd.s32 512, %v2700_v0  ;;  %vm2762_vm1 = vcmp.eq.s32.totalorder %v8513_v41, %v2700_v0  ;;  %vm2764_vm10 = vcmp.eq.s32.totalorder %v8527_v49, %v2700_v0  ;;  %vm2761_vm14 = vcmp.eq.s32.totalorder %v8510_v35, %v2700_v0 }
 0x582   :  { %6942 = vmatprep.mubr.msk.f32.mxu0 %vm2762_vm1, %v14695_v44  ;;  %6974 = vmatprep.mubr.msk.f32.mxu1 %vm2764_vm10, %v14695_v44  ;;  %vm2763_vm15 = vcmp.eq.s32.totalorder %v8518_v37, %v2700_v0  ;;  %v7956_v0 = vld [vmem:[%s14234_s0 + $0x8] sm:$0xff]  ;;  %vm14775_vm1 = vcmp.lt.f32.partialorder %v9922_v18, %v10618_v21  ;;  %vm14778_vm10 = vcmp.lt.f32.partialorder %v14718_v14, inf }
 0x583   :  { %6943 = vmatmul.mubr.msk.f32.gmra.mxu0 %vm2761_vm14, %v14695_v44  ;;  %6975 = vmatmul.mubr.msk.f32.gmra.mxu1 %vm2763_vm15, %v14695_v44  ;;  %v10860_v61 = vsel %vm3198_vm2, %v3230_v51, %v1636_v22  ;;  %v7957_v51 = vld [vmem:[%s14234_s0 + $0x10] sm:$0xff]  ;;  %v7959_v22 = vld [vmem:[%s14234_s0 + $0x20] sm:$0xff]  ;;  %vm14774_vm14 = vcmp.lt.f32.partialorder %v14714_v1, inf  ;;  %vm14779_vm15 = vcmp.lt.f32.partialorder %v9942_v8, %v10643_v60 }
 0x584   :  { %14755 = vst [vmem:[#allocation39_spill] sm:$0xff] %v10860_v61  ;;  %3440 = vmatprep.mubr.f32.mxu0 %v14756_v2  ;;  %3601 = vmatprep.mubr.f32.mxu1 %v14756_v2  ;;  %v14757_v44 = vld [vmem:[#allocation46_spill] sm:$0xff] }
 0x587   :  { %6976 = vmatmul.mubr.msk.f32.vlgmr.msra.gmra.mxu0 %vm14523_vm0, %v7955_v17  ;;  %6992 = vmatmul.mubr.msk.f32.vlgmr.msra.gmra.mxu1 %vm14523_vm0, %v7955_v17  ;;  %v7960_v17 = vld [vmem:[%s14234_s0 + $0x28] sm:$0xff] }
 0x588   :  { %3446 = vmatprep.mubr.f32.mxu0 %v14756_v2  ;;  %3607 = vmatprep.mubr.f32.mxu1 %v14756_v2 }
 0x58b   :  { %6977 = vmatmul.mubr.msk.f32.gmra.mxu0 %vm14523_vm0, %v7956_v0  ;;  %6993 = vmatmul.mubr.msk.f32.gmra.mxu1 %vm14523_vm0, %v7956_v0  ;;  %v7961_v0 = vld [vmem:[%s14234_s0 + $0x30] sm:$0xff] }
 0x58c   :  { %3452 = vmatprep.mubr.f32.mxu0 %v14756_v2  ;;  %3613 = vmatprep.mubr.f32.mxu1 %v14756_v2 }
 0x58f   :  { %6978 = vmatmul.mubr.msk.f32.gmra.mxu0 %vm14523_vm0, %v7957_v51  ;;  %6994 = vmatmul.mubr.msk.f32.gmra.mxu1 %vm14523_vm0, %v7957_v51  ;;  %v7962_v51 = vld [vmem:[%s14234_s0 + $0x38] sm:$0xff] }
 0x590   :  { %3458 = vmatprep.mubr.f32.mxu0 %v14756_v2  ;;  %3619 = vmatprep.mubr.f32.mxu1 %v14756_v2 }
 0x593   :  { %6979 = vmatmul.mubr.msk.f32.gmra.mxu0 %vm14523_vm0, %v7958_v34  ;;  %6995 = vmatmul.mubr.msk.f32.gmra.mxu1 %vm14523_vm0, %v7958_v34  ;;  %v7963_v34 = vld [vmem:[%s14234_s0 + $0x40] sm:$0xff] }
 0x594   :  { %3464 = vmatprep.mubr.f32.mxu0 %v14756_v2  ;;  %3625 = vmatprep.mubr.f32.mxu1 %v14756_v2 }
 0x597   :  { %6980 = vmatmul.mubr.msk.f32.gmra.mxu0 %vm14523_vm0, %v7959_v22  ;;  %6996 = vmatmul.mubr.msk.f32.gmra.mxu1 %vm14523_vm0, %v7959_v22  ;;  %v7964_v22 = vld [vmem:[%s14234_s0 + $0x48] sm:$0xff] }
 0x598   :  { %3470 = vmatprep.mubr.f32.mxu0 %v14756_v2  ;;  %3631 = vmatprep.mubr.f32.mxu1 %v14756_v2 }
 0x59b   :  { %6981 = vmatmul.mubr.msk.f32.gmra.mxu0 %vm14523_vm0, %v7960_v17  ;;  %6997 = vmatmul.mubr.msk.f32.gmra.mxu1 %vm14523_vm0, %v7960_v17  ;;  %v7965_v17 = vld [vmem:[%s14234_s0 + $0x50] sm:$0xff] }
 0x59c   :  { %3476 = vmatprep.mubr.f32.mxu0 %v14756_v2  ;;  %3637 = vmatprep.mubr.f32.mxu1 %v14756_v2 }
 0x59f   :  { %6982 = vmatmul.mubr.msk.f32.gmra.mxu0 %vm14523_vm0, %v7961_v0  ;;  %6998 = vmatmul.mubr.msk.f32.gmra.mxu1 %vm14523_vm0, %v7961_v0  ;;  %v7966_v0 = vld [vmem:[%s14234_s0 + $0x58] sm:$0xff] }
 0x5a0   :  { %3482 = vmatprep.mubr.f32.mxu0 %v14756_v2  ;;  %3643 = vmatprep.mubr.f32.mxu1 %v14756_v2 }
 0x5a3   :  { %6983 = vmatmul.mubr.msk.f32.gmra.mxu0 %vm14523_vm0, %v7962_v51  ;;  %6999 = vmatmul.mubr.msk.f32.gmra.mxu1 %vm14523_vm0, %v7962_v51  ;;  %v7967_v51 = vld [vmem:[%s14234_s0 + $0x60] sm:$0xff] }
 0x5a4   :  { %3488 = vmatprep.mubr.f32.mxu0 %v14756_v2  ;;  %3649 = vmatprep.mubr.f32.mxu1 %v14756_v2 }
 0x5a7   :  { %6984 = vmatmul.mubr.msk.f32.gmra.mxu0 %vm14523_vm0, %v7963_v34  ;;  %7000 = vmatmul.mubr.msk.f32.gmra.mxu1 %vm14523_vm0, %v7963_v34  ;;  %v7968_v34 = vld [vmem:[%s14234_s0 + $0x68] sm:$0xff] }
 0x5a8   :  { %3494 = vmatprep.mubr.f32.mxu0 %v14756_v2  ;;  %3655 = vmatprep.mubr.f32.mxu1 %v14756_v2 }
 0x5ab   :  { %6985 = vmatmul.mubr.msk.f32.gmra.mxu0 %vm14523_vm0, %v7964_v22  ;;  %7001 = vmatmul.mubr.msk.f32.gmra.mxu1 %vm14523_vm0, %v7964_v22  ;;  %v7969_v22 = vld [vmem:[%s14234_s0 + $0x70] sm:$0xff] }
 0x5ac   :  { %3500 = vmatprep.mubr.f32.mxu0 %v14756_v2  ;;  %3661 = vmatprep.mubr.f32.mxu1 %v14756_v2 }
 0x5af   :  { %6986 = vmatmul.mubr.msk.f32.gmra.mxu0 %vm14523_vm0, %v7965_v17  ;;  %7002 = vmatmul.mubr.msk.f32.gmra.mxu1 %vm14523_vm0, %v7965_v17  ;;  %v7970_v17 = vld [vmem:[%s14234_s0 + $0x78] sm:$0xff] }
 0x5b0   :  { %3506 = vmatprep.mubr.f32.mxu0 %v14756_v2  ;;  %3667 = vmatprep.mubr.f32.mxu1 %v14756_v2 }
 0x5b3   :  { %6987 = vmatmul.mubr.msk.f32.gmra.mxu0 %vm14523_vm0, %v7966_v0  ;;  %7003 = vmatmul.mubr.msk.f32.gmra.mxu1 %vm14523_vm0, %v7966_v0 }
 0x5b4   :  { %3512 = vmatprep.mubr.f32.mxu0 %v14756_v2  ;;  %3673 = vmatprep.mubr.f32.mxu1 %v14756_v2 }
 0x5b7   :  { %6988 = vmatmul.mubr.msk.f32.gmra.mxu0 %vm14523_vm0, %v7967_v51  ;;  %7004 = vmatmul.mubr.msk.f32.gmra.mxu1 %vm14523_vm0, %v7967_v51 }
 0x5b8   :  { %3518 = vmatprep.mubr.f32.mxu0 %v14756_v2  ;;  %3679 = vmatprep.mubr.f32.mxu1 %v14756_v2 }
 0x5bb   :  { %6989 = vmatmul.mubr.msk.f32.gmra.mxu0 %vm14523_vm0, %v7968_v34  ;;  %7005 = vmatmul.mubr.msk.f32.gmra.mxu1 %vm14523_vm0, %v7968_v34 }
 0x5bc   :  { %3524 = vmatprep.mubr.f32.mxu0 %v14756_v2  ;;  %3685 = vmatprep.mubr.f32.mxu1 %v14756_v2 }
 0x5bf   :  { %6990 = vmatmul.mubr.msk.f32.gmra.mxu0 %vm14523_vm0, %v7969_v22  ;;  %7006 = vmatmul.mubr.msk.f32.gmra.mxu1 %vm14523_vm0, %v7969_v22 }
 0x5c0   :  { %3530 = vmatprep.mubr.f32.mxu0 %v14756_v2  ;;  %3691 = vmatprep.mubr.f32.mxu1 %v14756_v2  ;;  %v1669_v2 = vsel %vm1589_vm6, %v14757_v44, 0.0  ;;  %vm14766_vm6 = vcmp.lt.f32.partialorder %v14706_v11, inf }
 0x5c3   :  { %6991 = vmatmul.mubr.msk.f32.gmra.mxu0 %vm14523_vm0, %v7970_v17  ;;  %7007 = vmatmul.mubr.msk.f32.gmra.mxu1 %vm14523_vm0, %v7970_v17 }
 0x606   :  { %v7488_v0 = vpop.f32.mrf.mxu0  ;;  %v7568_v51 = vpop.f32.mrf.mxu1 }
 0x608   :  { %v7489_v34 = vpop.f32.mrf.mxu0  ;;  %v7569_v61 = vpop.f32.mrf.mxu1 }
 0x609   :  { %v7490_v25 = vadd.f32 %v7489_v34, %v7488_v0  ;;  %v7570_v9 = vadd.f32 %v7569_v61, %v7568_v51  ;;  %v14759_v61 = vld [vmem:[#allocation47_spill] sm:$0xff] }
 0x60a   :  { %v7491_v48 = vpop.f32.mrf.mxu0  ;;  %v7571_v22 = vpop.f32.mrf.mxu1 }
 0x60b   :  { %v3105_v43 = vadd.f32 %v7570_v9, %v7490_v25  ;;  %v1670_v9 = vsel %vm1590_vm7, %v14759_v61, 0.0  ;;  %vm14767_vm7 = vcmp.lt.f32.partialorder %v9884_v32, %v10568_v58 }
 0x60c   :  { %v7492_v49 = vpop.f32.mrf.mxu0  ;;  %v7572_v37 = vpop.f32.mrf.mxu1 }
 0x60d   :  { %v10980_v41 = vsel %vm3183_vm12, %v3105_v43, %v1669_v2  ;;  %v7493_v17 = vadd.f32 %v7492_v49, %v7491_v48  ;;  %v7573_v35 = vadd.f32 %v7572_v37, %v7571_v22  ;;  %v14761_v37 = vld [vmem:[#allocation48_spill] sm:$0xff] }
 0x60e   :  { %14758 = vst [vmem:[#allocation37_spill] sm:$0xff] %v10980_v41 }
 0x60f   :  { %v3110_v39 = vadd.f32 %v7573_v35, %v7493_v17  ;;  %v7494_v10 = vpop.f32.mrf.mxu0  ;;  %v7574_v0 = vpop.f32.mrf.mxu1  ;;  %v1671_v35 = vsel %vm1591_vm13, %v14761_v37, 0.0  ;;  %vm14770_vm13 = vcmp.lt.f32.partialorder %v14710_v36, inf }
 0x611   :  { %v10988_v12 = vsel %vm3184_vm3, %v3110_v39, %v1670_v9  ;;  %v7495_v44 = vpop.f32.mrf.mxu0  ;;  %v7575_v25 = vpop.f32.mrf.mxu1 }
 0x612   :  { %14760 = vst [vmem:[#allocation40_spill] sm:$0xff] %v10988_v12  ;;  %v7496_v51 = vadd.f32 %v7495_v44, %v7494_v10  ;;  %v7576_v34 = vadd.f32 %v7575_v25, %v7574_v0  ;;  %v14763_v0 = vld [vmem:[#allocation49_spill] sm:$0xff] }
 0x613   :  { %v7497_v43 = vpop.f32.mrf.mxu0  ;;  %v7577_v2 = vpop.f32.mrf.mxu1  ;;  %v1672_v44 = vsel %vm1592_vm4, %v14763_v0, 0.0  ;;  %vm14771_vm4 = vcmp.lt.f32.partialorder %v9902_v55, %v10593_v40 }
 0x614   :  { %v3115_v49 = vadd.f32 %v7576_v34, %v7496_v51 }
 0x615   :  { %v7498_v48 = vpop.f32.mrf.mxu0  ;;  %v7578_v22 = vpop.f32.mrf.mxu1 }
 0x616   :  { %v10996_v38 = vsel %vm3185_vm11, %v3115_v49, %v1671_v35  ;;  %v7499_v39 = vadd.f32 %v7498_v48, %v7497_v43  ;;  %v7579_v17 = vadd.f32 %v7578_v22, %v7577_v2  ;;  %v14765_v2 = vld [vmem:[#allocation50_spill] sm:$0xff] }
 0x617   :  { %14762 = vst [vmem:[#allocation10_spill] sm:$0xff] %v10996_v38  ;;  %v7500_v61 = vpop.f32.mrf.mxu0  ;;  %v7580_v9 = vpop.f32.mrf.mxu1  ;;  %v1673_v48 = vsel %vm14766_vm6, %v14765_v2, 0.0  ;;  %vm14782_vm6 = vcmp.lt.f32.partialorder %v14722_v56, inf }
 0x618   :  { %v3120_v10 = vadd.f32 %v7579_v17, %v7499_v39 }
 0x619   :  { %v7501_v25 = vpop.f32.mrf.mxu0  ;;  %v7581_v51 = vpop.f32.mrf.mxu1 }
 0x61a   :  { %v11004_v52 = vsel %vm3186_vm8, %v3120_v10, %v1672_v44  ;;  %v7502_v34 = vadd.f32 %v7501_v25, %v7500_v61  ;;  %v7582_v37 = vadd.f32 %v7581_v51, %v7580_v9  ;;  %v14769_v9 = vld [vmem:[#allocation51_spill] sm:$0xff] }
 0x61b   :  { %14764 = vst [vmem:[#allocation41_spill] sm:$0xff] %v11004_v52  ;;  %v7503_v49 = vpop.f32.mrf.mxu0  ;;  %v7583_v35 = vpop.f32.mrf.mxu1  ;;  %v1674_v25 = vsel %vm14770_vm13, %v14769_v9, 0.0  ;;  %vm14786_vm13 = vcmp.lt.f32.partialorder %v14726_v45, inf }
 0x61c   :  { %v3125_v43 = vadd.f32 %v7582_v37, %v7502_v34 }
 0x61d   :  { %v7504_v22 = vpop.f32.mrf.mxu0  ;;  %v7584_v39 = vpop.f32.mrf.mxu1 }
 0x61e   :  { %v11012_v30 = vsel %vm14767_vm7, %v3125_v43, %v1673_v48  ;;  %v7505_v17 = vadd.f32 %v7504_v22, %v7503_v49  ;;  %v7585_v0 = vadd.f32 %v7584_v39, %v7583_v35  ;;  %v14773_v35 = vld [vmem:[#allocation52_spill] sm:$0xff]  ;;  %vm14783_vm7 = vcmp.lt.f32.partialorder %v9962_v47, %v10668_v42 }
 0x61f   :  { %14768 = vst [vmem:[#allocation11_spill] sm:$0xff] %v11012_v30  ;;  %v7506_v10 = vpop.f32.mrf.mxu0  ;;  %v7586_v44 = vpop.f32.mrf.mxu1  ;;  %v1675_v22 = vsel %vm14774_vm14, %v14773_v35, 0.0  ;;  %vm14790_vm14 = vcmp.lt.f32.partialorder %v14730_v6, inf }
 0x620   :  { %v3130_v61 = vadd.f32 %v7585_v0, %v7505_v17 }
 0x621   :  { %v7507_v51 = vpop.f32.mrf.mxu0  ;;  %v7587_v34 = vpop.f32.mrf.mxu1 }
 0x622   :  { %v11020_v11 = vsel %vm14771_vm4, %v3130_v61, %v1674_v25  ;;  %v7508_v37 = vadd.f32 %v7507_v51, %v7506_v10  ;;  %v7588_v2 = vadd.f32 %v7587_v34, %v7586_v44  ;;  %v14777_v44 = vld [vmem:[#allocation53_spill] sm:$0xff]  ;;  %vm14787_vm4 = vcmp.lt.f32.partialorder %v9982_v26, %v10693_v50 }
 0x623   :  { %14772 = vst [vmem:[#allocation42_spill] sm:$0xff] %v11020_v11  ;;  %v7509_v43 = vpop.f32.mrf.mxu0  ;;  %v7589_v48 = vpop.f32.mrf.mxu1  ;;  %v1676_v51 = vsel %vm14778_vm10, %v14777_v44, 0.0  ;;  %vm14794_vm10 = vcmp.lt.f32.partialorder %v14734_v27, inf }
 0x624   :  { %v3135_v49 = vadd.f32 %v7588_v2, %v7508_v37 }
 0x625   :  { %v7510_v39 = vpop.f32.mrf.mxu0  ;;  %v7590_v17 = vpop.f32.mrf.mxu1 }
 0x626   :  { %v11028_v36 = vsel %vm14775_vm1, %v3135_v49, %v1675_v22  ;;  %v7511_v0 = vadd.f32 %v7510_v39, %v7509_v43  ;;  %v7591_v9 = vadd.f32 %v7590_v17, %v7589_v48  ;;  %v14781_v48 = vld [vmem:[#allocation54_spill] sm:$0xff]  ;;  %vm14791_vm1 = vcmp.lt.f32.partialorder %v10002_v19, %v10718_v7 }
 0x627   :  { %14776 = vst [vmem:[#allocation12_spill] sm:$0xff] %v11028_v36  ;;  %v7512_v61 = vpop.f32.mrf.mxu0  ;;  %v7592_v25 = vpop.f32.mrf.mxu1  ;;  %v1677_v39 = vsel %vm14782_vm6, %v14781_v48, 0.0  ;;  %vm14798_vm6 = vcmp.lt.f32.partialorder %v14738_v57, inf }
 0x628   :  { %v3140_v10 = vadd.f32 %v7591_v9, %v7511_v0 }
 0x629   :  { %v7513_v34 = vpop.f32.mrf.mxu0  ;;  %v7593_v37 = vpop.f32.mrf.mxu1 }
 0x62a   :  { %v11036_v1 = vsel %vm14779_vm15, %v3140_v10, %v1676_v51  ;;  %v7514_v2 = vadd.f32 %v7513_v34, %v7512_v61  ;;  %v7594_v35 = vadd.f32 %v7593_v37, %v7592_v25  ;;  %v14785_v25 = vld [vmem:[#allocation55_spill] sm:$0xff]  ;;  %vm14795_vm15 = vcmp.lt.f32.partialorder %v10022_v4, %v10743_v15 }
 0x62b   :  { %14780 = vst [vmem:[#allocation43_spill] sm:$0xff] %v11036_v1  ;;  %v7515_v49 = vpop.f32.mrf.mxu0  ;;  %v7595_v22 = vpop.f32.mrf.mxu1  ;;  %v1678_v34 = vsel %vm14786_vm13, %v14785_v25, 0.0  ;;  %vm14802_vm13 = vcmp.lt.f32.partialorder %v14742_v54, inf }
 0x62c   :  { %v3145_v43 = vadd.f32 %v7594_v35, %v7514_v2 }
 0x62d   :  { %v7516_v17 = vpop.f32.mrf.mxu0  ;;  %v7596_v0 = vpop.f32.mrf.mxu1 }
 0x62e   :  { %v11044_v14 = vsel %vm14783_vm7, %v3145_v43, %v1677_v39  ;;  %v7517_v9 = vadd.f32 %v7516_v17, %v7515_v49  ;;  %v7597_v44 = vadd.f32 %v7596_v0, %v7595_v22  ;;  %v14789_v22 = vld [vmem:[#allocation56_spill] sm:$0xff]  ;;  %vm14799_vm7 = vcmp.lt.f32.partialorder %v10042_v53, %v10768_v59 }
 0x62f   :  { %14784 = vst [vmem:[#allocation14_spill] sm:$0xff] %v11044_v14  ;;  %v7518_v10 = vpop.f32.mrf.mxu0  ;;  %v7598_v51 = vpop.f32.mrf.mxu1  ;;  %v1679_v17 = vsel %vm14790_vm14, %v14789_v22, 0.0  ;;  %vm14806_vm14 = vcmp.lt.f32.partialorder %v14746_v16, inf }
 0x630   :  { %v3150_v61 = vadd.f32 %v7597_v44, %v7517_v9 }
 0x631   :  { %v7519_v37 = vpop.f32.mrf.mxu0  ;;  %v7599_v2 = vpop.f32.mrf.mxu1 }
 0x632   :  { %v11052_v56 = vsel %vm14787_vm4, %v3150_v61, %v1678_v34  ;;  %v7520_v35 = vadd.f32 %v7519_v37, %v7518_v10  ;;  %v7600_v48 = vadd.f32 %v7599_v2, %v7598_v51  ;;  %v14793_v51 = vld [vmem:[#allocation57_spill] sm:$0xff]  ;;  %vm14803_vm4 = vcmp.lt.f32.partialorder %v10062_v23, %v10793_v46 }
 0x633   :  { %14788 = vst [vmem:[#allocation44_spill] sm:$0xff] %v11052_v56  ;;  %v7521_v43 = vpop.f32.mrf.mxu0  ;;  %v7601_v39 = vpop.f32.mrf.mxu1  ;;  %v1680_v37 = vsel %vm14794_vm10, %v14793_v51, 0.0 }
 0x634   :  { %v3155_v49 = vadd.f32 %v7600_v48, %v7520_v35 }
 0x635   :  { %v7522_v0 = vpop.f32.mrf.mxu0  ;;  %v7602_v9 = vpop.f32.mrf.mxu1 }
 0x636   :  { %v11060_v45 = vsel %vm14791_vm1, %v3155_v49, %v1679_v17  ;;  %v7523_v44 = vadd.f32 %v7522_v0, %v7521_v43  ;;  %v7603_v25 = vadd.f32 %v7602_v9, %v7601_v39  ;;  %v14797_v39 = vld [vmem:[#allocation58_spill] sm:$0xff] }
 0x637   :  { %14792 = vst [vmem:[#allocation45_spill] sm:$0xff] %v11060_v45  ;;  %v7524_v61 = vpop.f32.mrf.mxu0  ;;  %v7604_v34 = vpop.f32.mrf.mxu1  ;;  %v1681_v0 = vsel %vm14798_vm6, %v14797_v39, 0.0 }
 0x638   :  { %v3160_v10 = vadd.f32 %v7603_v25, %v7523_v44 }
 0x639   :  { %v7525_v2 = vpop.f32.mrf.mxu0  ;;  %v7605_v35 = vpop.f32.mrf.mxu1 }
 0x63a   :  { %v11068_v6 = vsel %vm14795_vm15, %v3160_v10, %v1680_v37  ;;  %v7526_v48 = vadd.f32 %v7525_v2, %v7524_v61  ;;  %v7606_v22 = vadd.f32 %v7605_v35, %v7604_v34  ;;  %v14801_v34 = vld [vmem:[#allocation59_spill] sm:$0xff] }
 0x63b   :  { %14796 = vst [vmem:[#allocation46_spill] sm:$0xff] %v11068_v6  ;;  %v7527_v49 = vpop.f32.mrf.mxu0  ;;  %v7607_v17 = vpop.f32.mrf.mxu1  ;;  %v1682_v2 = vsel %vm14802_vm13, %v14801_v34, 0.0  ;;  %v14812_v6 = vld [vmem:[#allocation9_spill] sm:$0xff] }
 0x63c   :  { %v3165_v43 = vadd.f32 %v7606_v22, %v7526_v48 }
 0x63d   :  { %v7528_v9 = vpop.f32.mrf.mxu0  ;;  %v7608_v44 = vpop.f32.mrf.mxu1 }
 0x63e   :  { %v11076_v27 = vsel %vm14799_vm7, %v3165_v43, %v1681_v0  ;;  %v7529_v25 = vadd.f32 %v7528_v9, %v7527_v49  ;;  %v7609_v51 = vadd.f32 %v7608_v44, %v7607_v17  ;;  %v3375_v49 = vld [vmem:[%s14237_s3 + $0x8] sm:$0xf]  ;;  %v14805_v9 = vld [vmem:[#allocation60_spill] sm:$0xff] }
 0x63f   :  { %14800 = vst [vmem:[#allocation47_spill] sm:$0xff] %v11076_v27  ;;  %v7530_v10 = vpop.f32.mrf.mxu0  ;;  %v7610_v37 = vpop.f32.mrf.mxu1  ;;  %v1683_v54 = vsel %vm14806_vm14, %v14805_v9, 0.0  ;;  %v11110_v45 = vrot.slane %v3375_v49, %v14812_v6 }
 0x640   :  { %v3170_v61 = vadd.f32 %v7609_v51, %v7529_v25  ;;  %v14807_v51 = vld [vmem:[#allocation6_spill] sm:$0xff] }
 0x641   :  { %v7531_v35 = vpop.f32.mrf.mxu0  ;;  %v7611_v48 = vpop.f32.mrf.mxu1  ;;  %v11093_v34 = vrot.slane %v3375_v49, %v14807_v51 }
 0x642   :  { %v11084_v57 = vsel %vm14803_vm4, %v3170_v61, %v1682_v2  ;;  %v7532_v22 = vadd.f32 %v7531_v35, %v7530_v10  ;;  %v7612_v39 = vadd.f32 %v7611_v48, %v7610_v37  ;;  %v14808_v61 = vld [vmem:[#allocation7_spill] sm:$0xff]  ;;  %v14810_v48 = vld [vmem:[#allocation8_spill] sm:$0xff] }
 0x643   :  { %14804 = vst [vmem:[#allocation48_spill] sm:$0xff] %v11084_v57  ;;  %v7533_v17 = vpop.f32.mrf.mxu0  ;;  %v7613_v43 = vpop.f32.mrf.mxu1  ;;  %v11096_v2 = vrot.slane %v3375_v49, %v14808_v61  ;;  %v14811_v57 = vld [vmem:[#allocation61_spill] sm:$0xff] }
 0x644   :  { %v3175_v0 = vadd.f32 %v7612_v39, %v7532_v22  ;;  %v11104_v22 = vrot.slane %v3375_v49, %v14810_v48  ;;  %v1684_v51 = vsel %vm1604_vm9, %v14811_v57, 0.0 }
 0x645   :  { %v7534_v44 = vpop.f32.mrf.mxu0  ;;  %v7614_v25 = vpop.f32.mrf.mxu1 }
 0x646   :  { %v11101_v10 = vsel %vm3197_vm5, %v3175_v0, %v1683_v54  ;;  %v7535_v37 = vadd.f32 %v7534_v44, %v7533_v17  ;;  %v7615_v35 = vadd.f32 %v7614_v25, %v7613_v43 }
 0x647   :  { %14809 = vst [vmem:[#allocation49_spill] sm:$0xff] %v11101_v10  ;;  %v3442_v16 = vpop.f32.mrf.mxu0  ;;  %v3603_v39 = vpop.f32.mrf.mxu1 }
 0x648   :  { %v3180_v9 = vadd.f32 %v7615_v35, %v7535_v37  ;;  %v11118_v43 = vsub.f32 %v11093_v34, %v3442_v16  ;;  %v11124_v44 = vsub.f32 %v11104_v22, %v3603_v39 }
 0x649   :  { %v3444_v27 = vpop.f32.mrf.mxu0  ;;  %v3605_v61 = vpop.f32.mrf.mxu1 }
 0x64a   :  { %v11115_v17 = vsel %vm3198_vm2, %v3180_v9, %v1684_v51  ;;  %v11121_v54 = vsub.f32 %v11096_v2, %v3444_v27  ;;  %v11129_v25 = vsub.f32 %v11110_v45, %v3605_v61 }
 0x64b   :  { %14815 = vst [vmem:[#allocation50_spill] sm:$0xff] %v11115_v17  ;;  %v3448_v13 = vpop.f32.mrf.mxu0  ;;  %v3609_v57 = vpop.f32.mrf.mxu1 }
 0x64c   :  { %v3783_v49 = vmin.f32 %v11118_v43, %v11121_v54  ;;  %v11133_v16 = vsub.f32 %v11093_v34, %v3448_v13  ;;  %v11139_v39 = vsub.f32 %v11104_v22, %v3609_v57 }
 0x64d   :  { %v3450_v37 = vpop.f32.mrf.mxu0  ;;  %v3611_v51 = vpop.f32.mrf.mxu1 }
 0x64e   :  { %v3784_v35 = vmin.f32 %v3783_v49, %v11124_v44  ;;  %v11136_v27 = vsub.f32 %v11096_v2, %v3450_v37  ;;  %v11145_v48 = vsub.f32 %v11110_v45, %v3611_v51 }
 0x64f   :  { %v3454_v9 = vpop.f32.mrf.mxu0  ;;  %v3615_v17 = vpop.f32.mrf.mxu1 }
 0x650   :  { %v3788_v6 = vmin.f32 %v11133_v16, %v11136_v27  ;;  %v3785_v61 = vmin.f32 %v3784_v35, %v11129_v25  ;;  %v11149_v37 = vsub.f32 %v11093_v34, %v3454_v9  ;;  %v11155_v14 = vsub.f32 %v11104_v22, %v3615_v17 }
 0x651   :  { %v3456_v49 = vpop.f32.mrf.mxu0  ;;  %v3617_v10 = vpop.f32.mrf.mxu1 }
 0x652   :  { %v3789_v13 = vmin.f32 %v3788_v6, %v11139_v39  ;;  %v11152_v57 = vsub.f32 %v11096_v2, %v3456_v49  ;;  %3786 = vmin.xlane.f32.xlu0 %v3785_v61  ;;  %v11161_v11 = vsub.f32 %v11110_v45, %v3617_v10 }
 0x653   :  { %v3460_v1 = vpop.f32.mrf.mxu0  ;;  %v3621_v36 = vpop.f32.mrf.mxu1 }
 0x654   :  { %v3793_v51 = vmin.f32 %v11149_v37, %v11152_v57  ;;  %v3790_v35 = vmin.f32 %v3789_v13, %v11145_v48  ;;  %v11165_v49 = vsub.f32 %v11093_v34, %v3460_v1  ;;  %v11171_v61 = vsub.f32 %v11104_v22, %v3621_v36 }
 0x655   :  { %v3462_v6 = vpop.f32.mrf.mxu0  ;;  %v3623_v9 = vpop.f32.mrf.mxu1 }
 0x656   :  { %v3794_v30 = vmin.f32 %v3793_v51, %v11155_v14  ;;  %v11168_v17 = vsub.f32 %v11096_v2, %v3462_v6  ;;  %3791 = vmin.xlane.f32.xlu1 %v3790_v35  ;;  %v11177_v12 = vsub.f32 %v11110_v45, %v3623_v9 }
 0x657   :  { %v3466_v52 = vpop.f32.mrf.mxu0  ;;  %v3627_v38 = vpop.f32.mrf.mxu1 }
 0x658   :  { %v3795_v13 = vmin.f32 %v3794_v30, %v11161_v11  ;;  %v3798_v10 = vmin.f32 %v11165_v49, %v11168_v17  ;;  %v11181_v6 = vsub.f32 %v11093_v34, %v3466_v52  ;;  %v11187_v35 = vsub.f32 %v11104_v22, %v3627_v38 }
 0x659   :  { %v3468_v51 = vpop.f32.mrf.mxu0  ;;  %v3629_v1 = vpop.f32.mrf.mxu1 }
 0x65a   :  { %v3799_v41 = vmin.f32 %v3798_v10, %v11171_v61  ;;  %v11184_v36 = vsub.f32 %v11096_v2, %v3468_v51  ;;  %3796 = vmin.xlane.f32.xlu0 %v3795_v13  ;;  %v11193_v29 = vsub.f32 %v11110_v45, %v3629_v1 }
 0x65b   :  { %v3472_v30 = vpop.f32.mrf.mxu0  ;;  %v3633_v56 = vpop.f32.mrf.mxu1 }
 0x65c   :  { %v3800_v0 = vmin.f32 %v3799_v41, %v11177_v12  ;;  %v3803_v9 = vmin.f32 %v11181_v6, %v11184_v36  ;;  %v11197_v51 = vsub.f32 %v11093_v34, %v3472_v30  ;;  %v11203_v13 = vsub.f32 %v11104_v22, %v3633_v56 }
 0x65d   :  { %v3474_v10 = vpop.f32.mrf.mxu0  ;;  %v3635_v52 = vpop.f32.mrf.mxu1 }
 0x65e   :  { %v3804_v24 = vmin.f32 %v3803_v9, %v11187_v35  ;;  %v11200_v38 = vsub.f32 %v11096_v2, %v3474_v10  ;;  %3801 = vmin.xlane.f32.xlu1 %v3800_v0  ;;  %v11209_v53 = vsub.f32 %v11110_v45, %v3635_v52 }
 0x65f   :  { %v3478_v41 = vpop.f32.mrf.mxu0  ;;  %v3639_v23 = vpop.f32.mrf.mxu1 }
 0x660   :  { %v3805_v46 = vmin.f32 %v3804_v24, %v11193_v29  ;;  %v3808_v1 = vmin.f32 %v11197_v51, %v11200_v38  ;;  %v11213_v10 = vsub.f32 %v11093_v34, %v3478_v41  ;;  %v11219_v0 = vsub.f32 %v11104_v22, %v3639_v23 }
 0x661   :  { %v3480_v9 = vpop.f32.mrf.mxu0  ;;  %v3641_v30 = vpop.f32.mrf.mxu1 }
 0x662   :  { %v3809_v59 = vmin.f32 %v3808_v1, %v11203_v13  ;;  %v11216_v56 = vsub.f32 %v11096_v2, %v3480_v9  ;;  %3806 = vmin.xlane.f32.xlu0 %v3805_v46  ;;  %v11225_v19 = vsub.f32 %v11110_v45, %v3641_v30 }
 0x663   :  { %v3484_v24 = vpop.f32.mrf.mxu0  ;;  %v3645_v4 = vpop.f32.mrf.mxu1 }
 0x664   :  { %v3810_v15 = vmin.f32 %v3809_v59, %v11209_v53  ;;  %v3813_v52 = vmin.f32 %v11213_v10, %v11216_v56  ;;  %v11229_v9 = vsub.f32 %v11093_v34, %v3484_v24  ;;  %v11235_v46 = vsub.f32 %v11104_v22, %v3645_v4 }
 0x665   :  { %v3486_v1 = vpop.f32.mrf.mxu0  ;;  %v3647_v41 = vpop.f32.mrf.mxu1 }
 0x666   :  { %v3814_v7 = vmin.f32 %v3813_v52, %v11219_v0  ;;  %v11232_v23 = vsub.f32 %v11096_v2, %v3486_v1  ;;  %3811 = vmin.xlane.f32.xlu1 %v3810_v15  ;;  %v11241_v47 = vsub.f32 %v11110_v45, %v3647_v41 }
 0x667   :  { %v3490_v59 = vpop.f32.mrf.mxu0  ;;  %v3651_v26 = vpop.f32.mrf.mxu1 }
 0x668   :  { %v3815_v50 = vmin.f32 %v3814_v7, %v11225_v19  ;;  %v3818_v30 = vmin.f32 %v11229_v9, %v11232_v23  ;;  %v11245_v1 = vsub.f32 %v11093_v34, %v3490_v59  ;;  %v11251_v15 = vsub.f32 %v11104_v22, %v3651_v26 }
 0x669   :  { %v3492_v52 = vpop.f32.mrf.mxu0  ;;  %v3653_v24 = vpop.f32.mrf.mxu1 }
 0x66a   :  { %v3819_v42 = vmin.f32 %v3818_v30, %v11235_v46  ;;  %v11248_v4 = vsub.f32 %v11096_v2, %v3492_v52  ;;  %3816 = vmin.xlane.f32.xlu0 %v3815_v50  ;;  %v11257_v18 = vsub.f32 %v11110_v45, %v3653_v24 }
 0x66b   :  { %v3496_v7 = vpop.f32.mrf.mxu0  ;;  %v3657_v8 = vpop.f32.mrf.mxu1 }
 0x66c   :  { %v3820_v60 = vmin.f32 %v3819_v42, %v11241_v47  ;;  %v3823_v41 = vmin.f32 %v11245_v1, %v11248_v4  ;;  %v11261_v52 = vsub.f32 %v11093_v34, %v3496_v7  ;;  %v11267_v50 = vsub.f32 %v11104_v22, %v3657_v8 }
 0x66d   :  { %v3498_v30 = vpop.f32.mrf.mxu0  ;;  %v3659_v59 = vpop.f32.mrf.mxu1 }
 0x66e   :  { %v3824_v21 = vmin.f32 %v3823_v41, %v11251_v15  ;;  %v11264_v26 = vsub.f32 %v11096_v2, %v3498_v30  ;;  %3821 = vmin.xlane.f32.xlu1 %v3820_v60  ;;  %v11273_v32 = vsub.f32 %v11110_v45, %v3659_v59 }
 0x66f   :  { %v3502_v42 = vpop.f32.mrf.mxu0  ;;  %v3663_v55 = vpop.f32.mrf.mxu1 }
 0x670   :  { %v3825_v40 = vmin.f32 %v3824_v21, %v11257_v18  ;;  %v3828_v24 = vmin.f32 %v11261_v52, %v11264_v26  ;;  %v11277_v30 = vsub.f32 %v11093_v34, %v3502_v42  ;;  %v11283_v60 = vsub.f32 %v11104_v22, %v3663_v55 }
 0x671   :  { %v3504_v41 = vpop.f32.mrf.mxu0  ;;  %v3665_v7 = vpop.f32.mrf.mxu1 }
 0x672   :  { %v3829_v58 = vmin.f32 %v3828_v24, %v11267_v50  ;;  %v11280_v8 = vsub.f32 %v11096_v2, %v3504_v41  ;;  %3826 = vmin.xlane.f32.xlu0 %v3825_v40  ;;  %v11289_v3 = vsub.f32 %v11110_v45, %v3665_v7 }
 0x673   :  { %v3508_v21 = vpop.f32.mrf.mxu0  ;;  %v3669_v20 = vpop.f32.mrf.mxu1 }
 0x674   :  { %v3830_v62 = vmin.f32 %v3829_v58, %v11273_v32  ;;  %v3833_v59 = vmin.f32 %v11277_v30, %v11280_v8  ;;  %14816 = vst [vmem:[#allocation51_spill] sm:$0xff] %v11289_v3  ;;  %v11293_v41 = vsub.f32 %v11093_v34, %v3508_v21  ;;  %v11299_v40 = vsub.f32 %v11104_v22, %v3669_v20 }
 0x675   :  { %v3510_v24 = vpop.f32.mrf.mxu0  ;;  %v3671_v42 = vpop.f32.mrf.mxu1 }
 0x676   :  { %v3834_v28 = vmin.f32 %v3833_v59, %v11283_v60  ;;  %14817 = vst [vmem:[#allocation52_spill] sm:$0xff] %v11293_v41  ;;  %v11296_v55 = vsub.f32 %v11096_v2, %v3510_v24  ;;  %14819 = vst [vmem:[#allocation54_spill] sm:$0xff] %v11299_v40  ;;  %3831 = vmin.xlane.f32.xlu1 %v3830_v62  ;;  %v11305_v33 = vsub.f32 %v11110_v45, %v3671_v42 }
 0x677   :  { %v3514_v58 = vpop.f32.mrf.mxu0  ;;  %v3675_v5 = vpop.f32.mrf.mxu1 }
 0x678   :  { %14818 = vst [vmem:[#allocation53_spill] sm:$0xff] %v11296_v55  ;;  %v3835_v31 = vmin.f32 %v3834_v28, %v11289_v3  ;;  %v3838_v7 = vmin.f32 %v11293_v41, %v11296_v55  ;;  %14820 = vst [vmem:[#allocation55_spill] sm:$0xff] %v11305_v33  ;;  %v11309_v24 = vsub.f32 %v11093_v34, %v3514_v58 }
 0x679   :  { %v3516_v59 = vpop.f32.mrf.mxu0  ;;  %v3677_v21 = vpop.f32.mrf.mxu1  ;;  %v11315_v62 = vsub.f32 %v11104_v22, %v3675_v5 }
 0x67a   :  { %v3839_v63 = vmin.f32 %v3838_v7, %v11299_v40  ;;  %14821 = vst [vmem:[#allocation56_spill] sm:$0xff] %v11309_v24  ;;  %v11312_v20 = vsub.f32 %v11096_v2, %v3516_v59  ;;  %3836 = vmin.xlane.f32.xlu0 %v3835_v31  ;;  %v11321_v41 = vsub.f32 %v11110_v45, %v3677_v21 }
 0x67b   :  { %14823 = vst [vmem:[#allocation58_spill] sm:$0xff] %v11315_v62  ;;  %v3520_v28 = vpop.f32.mrf.mxu0  ;;  %v3681_v3 = vpop.f32.mrf.mxu1 }
 0x67c   :  { %14822 = vst [vmem:[#allocation57_spill] sm:$0xff] %v11312_v20  ;;  %v3840_v55 = vmin.f32 %v3839_v63, %v11305_v33  ;;  %v3843_v42 = vmin.f32 %v11309_v24, %v11312_v20  ;;  %14824 = vst [vmem:[#allocation59_spill] sm:$0xff] %v11321_v41  ;;  %v11325_v59 = vsub.f32 %v11093_v34, %v3520_v28 }
 0x67d   :  { %v3522_v7 = vpop.f32.mrf.mxu0  ;;  %v3683_v58 = vpop.f32.mrf.mxu1  ;;  %v11331_v31 = vsub.f32 %v11104_v22, %v3681_v3 }
 0x67e   :  { %v3844_v40 = vmin.f32 %v3843_v42, %v11315_v62  ;;  %14825 = vst [vmem:[#allocation60_spill] sm:$0xff] %v11325_v59  ;;  %v11328_v5 = vsub.f32 %v11096_v2, %v3522_v7  ;;  %3841 = vmin.xlane.f32.xlu1 %v3840_v55  ;;  %v11337_v24 = vsub.f32 %v11110_v45, %v3683_v58 }
 0x67f   :  { %v3526_v63 = vpop.f32.mrf.mxu0  ;;  %v3687_v33 = vpop.f32.mrf.mxu1 }
 0x680   :  { %14826 = vst [vmem:[#allocation61_spill] sm:$0xff] %v11328_v5  ;;  %v3845_v20 = vmin.f32 %v3844_v40, %v11321_v41  ;;  %v3848_v21 = vmin.f32 %v11325_v59, %v11328_v5  ;;  %14827 = vst [vmem:[#allocation89_spill] sm:$0xff] %v11337_v24  ;;  %v11341_v7 = vsub.f32 %v11093_v34, %v3526_v63 }
 0x681   :  { %v3528_v42 = vpop.f32.mrf.mxu0  ;;  %v3689_v28 = vpop.f32.mrf.mxu1  ;;  %v11347_v55 = vsub.f32 %v11104_v22, %v3687_v33 }
 0x682   :  { %v3849_v62 = vmin.f32 %v3848_v21, %v11331_v31  ;;  %v11344_v3 = vsub.f32 %v11096_v2, %v3528_v42  ;;  %3846 = vmin.xlane.f32.xlu0 %v3845_v20  ;;  %v11353_v59 = vsub.f32 %v11110_v45, %v3689_v28 }
 0x683   :  { %v3532_v40 = vpop.f32.mrf.mxu0  ;;  %v3693_v41 = vpop.f32.mrf.mxu1 }
 0x684   :  { %14828 = vst [vmem:[#allocation90_spill] sm:$0xff] %v11344_v3  ;;  %v3850_v5 = vmin.f32 %v3849_v62, %v11337_v24  ;;  %v3853_v58 = vmin.f32 %v11341_v7, %v11344_v3  ;;  %v11357_v42 = vsub.f32 %v11093_v34, %v3532_v40  ;;  %v11363_v20 = vsub.f32 %v11104_v22, %v3693_v41  ;;  %v14829_v22 = vld [vmem:[#allocation22_spill] sm:$0xff] }
 0x685   :  { %v3534_v21 = vpop.f32.mrf.mxu0  ;;  %v3695_v62 = vpop.f32.mrf.mxu1 }
 0x686   :  { %v3854_v63 = vmin.f32 %v3853_v58, %v11347_v55  ;;  %v11360_v33 = vsub.f32 %v11096_v2, %v3534_v21  ;;  %3851 = vmin.xlane.f32.xlu1 %v3850_v5  ;;  %v11370_v58 = vsub.f32 %v11110_v45, %v3695_v62  ;;  %v14830_v5 = vld [vmem:[#allocation23_spill] sm:$0xff] }
 0x688   :  { %v3855_v24 = vmin.f32 %v3854_v63, %v11353_v59  ;;  %v3858_v28 = vmin.f32 %v11357_v42, %v11360_v33 }
 0x68a   :  { %v3859_v3 = vmin.f32 %v3858_v28, %v11363_v20  ;;  %3856 = vmin.xlane.f32.xlu0 %v3855_v24 }
 0x68c   :  { %v3860_v34 = vmin.f32 %v3859_v3, %v11370_v58  ;;  %v14832_v3 = vld [vmem:[#allocation25_spill] sm:$0xff] }
 0x68e   :  { %3861 = vmin.xlane.f32.xlu1 %v3860_v34 }
 0x6db   :  { %v11373_v2 = vpop.xlane.xlu0 %3786 }
 0x6dc   :  { %vm3863_vm9 = vcmp.eq.f32.partialorder %v11118_v43, %v11373_v2  ;;  %vm3864_vm1 = vcmp.eq.f32.partialorder %v11121_v54, %v11373_v2  ;;  %vm3865_vm10 = vcmp.eq.f32.partialorder %v11124_v44, %v11373_v2  ;;  %vm3866_vm15 = vcmp.eq.f32.partialorder %v11129_v25, %v11373_v2  ;;  %v14833_v43 = vld [vmem:[#allocation26_spill] sm:$0xff] }
 0x6dd   :  { %v3927_v41 = vsel %vm3863_vm9, %v14829_v22, 512  ;;  %v3928_v45 = vsel %vm3864_vm1, %v14830_v5, 512  ;;  %v3929_v40 = vsel %vm3865_vm10, %v14832_v3, 512  ;;  %v3930_v54 = vsel %vm3866_vm15, %v14833_v43, 512 }
 0x6de   :  { %vm3991_vm6 = vcmp.lt.s32.totalorder %v3927_v41, %v3928_v45 }
 0x6df   :  { %v11385_v24 = vpop.xlane.xlu1 %3791  ;;  %v3992_v21 = vsel %vm3991_vm6, %v3927_v41, %v3928_v45 }
 0x6e0   :  { %14831 = vst [vmem:[#allocation22_spill] sm:$0xff] %v11385_v24  ;;  %vm3867_vm7 = vcmp.eq.f32.partialorder %v11133_v16, %v11385_v24  ;;  %vm3868_vm13 = vcmp.eq.f32.partialorder %v11136_v27, %v11385_v24  ;;  %vm3993_vm4 = vcmp.lt.s32.totalorder %v3992_v21, %v3929_v40  ;;  %vm3869_vm14 = vcmp.eq.f32.partialorder %v11139_v39, %v11385_v24 }
 0x6e1   :  { %v3994_v44 = vsel %vm3993_vm4, %v3992_v21, %v3929_v40  ;;  %v3931_v25 = vsel %vm3867_vm7, %v14829_v22, 512  ;;  %v3932_v63 = vsel %vm3868_vm13, %v14830_v5, 512  ;;  %vm3870_vm1 = vcmp.eq.f32.partialorder %v11145_v48, %v11385_v24 }
 0x6e2   :  { %vm3995_vm9 = vcmp.lt.s32.totalorder %v3994_v44, %v3930_v54  ;;  %vm4011_vm10 = vcmp.lt.s32.totalorder %v3931_v25, %v3932_v63  ;;  %v3933_v27 = vsel %vm3869_vm14, %v14832_v3, 512  ;;  %v3934_v34 = vsel %vm3870_vm1, %v14833_v43, 512 }
 0x6e3   :  { %v11399_v16 = vpop.xlane.xlu0 %3796  ;;  %v11401_v62 = vsel %vm3995_vm9, %v3994_v44, %v3930_v54  ;;  %v4012_v28 = vsel %vm4011_vm10, %v3931_v25, %v3932_v63 }
 0x6e4   :  { %14834 = vst [vmem:[#allocation23_spill] sm:$0xff] %v11399_v16  ;;  %vm3871_vm15 = vcmp.eq.f32.partialorder %v11149_v37, %v11399_v16  ;;  %vm3872_vm6 = vcmp.eq.f32.partialorder %v11152_v57, %v11399_v16  ;;  %v3998_v39 = vshra.s32 %v11401_v62, 16  ;;  %vm4013_vm7 = vcmp.lt.s32.totalorder %v4012_v28, %v3933_v27 }
 0x6e5   :  { %v4014_v48 = vsel %vm4013_vm7, %v4012_v28, %v3933_v27  ;;  %vm3873_vm13 = vcmp.eq.f32.partialorder %v11155_v14, %v11399_v16  ;;  %v3935_v41 = vsel %vm3871_vm15, %v14829_v22, 512  ;;  %vm3874_vm14 = vcmp.eq.f32.partialorder %v11161_v11, %v11399_v16 }
 0x6e6   :  { %v11413_v45 = vcvt.s32.f32 %v3998_v39  ;;  %vm4015_vm4 = vcmp.lt.s32.totalorder %v4014_v48, %v3934_v34  ;;  %v3936_v37 = vsel %vm3872_vm6, %v14830_v5, 512  ;;  %v3937_v21 = vsel %vm3873_vm13, %v14832_v3, 512 }
 0x6e7   :  { %v11418_v57 = vpop.xlane.xlu1 %3801  ;;  %v11420_v40 = vsel %vm4015_vm4, %v4014_v48, %v3934_v34  ;;  %vm4031_vm9 = vcmp.lt.s32.totalorder %v3935_v41, %v3936_v37  ;;  %v3938_v54 = vsel %vm3874_vm14, %v14833_v43, 512 }
 0x6e8   :  { %14835 = vst [vmem:[#allocation25_spill] sm:$0xff] %v11418_v57  ;;  %vm3875_vm1 = vcmp.eq.f32.partialorder %v11165_v49, %v11418_v57  ;;  %vm3876_vm10 = vcmp.eq.f32.partialorder %v11168_v17, %v11418_v57  ;;  %4001 = vmin.xlane.f32.xlu0 %v11413_v45  ;;  %v4018_v14 = vshra.s32 %v11420_v40, 16  ;;  %v4032_v11 = vsel %vm4031_vm9, %v3935_v41, %v3936_v37 }
 0x6e9   :  { %vm4033_vm15 = vcmp.lt.s32.totalorder %v4032_v11, %v3937_v21  ;;  %vm3877_vm6 = vcmp.eq.f32.partialorder %v11171_v61, %v11418_v57  ;;  %v3939_v44 = vsel %vm3875_vm1, %v14829_v22, 512  ;;  %vm3878_vm7 = vcmp.eq.f32.partialorder %v11177_v12, %v11418_v57 }
 0x6ea   :  { %v11433_v25 = vcvt.s32.f32 %v4018_v14  ;;  %v4034_v63 = vsel %vm4033_vm15, %v4032_v11, %v3937_v21  ;;  %v3940_v49 = vsel %vm3876_vm10, %v14830_v5, 512  ;;  %v3941_v27 = vsel %vm3877_vm6, %v14832_v3, 512 }
 0x6eb   :  { %v11438_v17 = vpop.xlane.xlu0 %3806  ;;  %vm4035_vm13 = vcmp.lt.s32.totalorder %v4034_v63, %v3938_v54  ;;  %vm4051_vm4 = vcmp.lt.s32.totalorder %v3939_v44, %v3940_v49  ;;  %v3942_v39 = vsel %vm3878_vm7, %v14833_v43, 512 }
 0x6ec   :  { %vm3879_vm14 = vcmp.eq.f32.partialorder %v11181_v6, %v11438_v17  ;;  %vm3880_vm9 = vcmp.eq.f32.partialorder %v11184_v36, %v11438_v17  ;;  %4021 = vmin.xlane.f32.xlu1 %v11433_v25  ;;  %v11446_v61 = vsel %vm4035_vm13, %v4034_v63, %v3938_v54  ;;  %v4052_v28 = vsel %vm4051_vm4, %v3939_v44, %v3940_v49 }
 0x6ed   :  { %v4038_v12 = vshra.s32 %v11446_v61, 16  ;;  %vm4053_vm1 = vcmp.lt.s32.totalorder %v4052_v28, %v3941_v27  ;;  %vm3881_vm10 = vcmp.eq.f32.partialorder %v11187_v35, %v11438_v17  ;;  %vm3882_vm15 = vcmp.eq.f32.partialorder %v11193_v29, %v11438_v17 }
 0x6ee   :  { %v4054_v34 = vsel %vm4053_vm1, %v4052_v28, %v3941_v27  ;;  %v3943_v6 = vsel %vm3879_vm14, %v14829_v22, 512  ;;  %v3944_v36 = vsel %vm3880_vm9, %v14830_v5, 512  ;;  %v3945_v37 = vsel %vm3881_vm10, %v14832_v3, 512 }
 0x6ef   :  { %v11456_v48 = vpop.xlane.xlu1 %3811  ;;  %v11458_v41 = vcvt.s32.f32 %v4038_v12  ;;  %vm4055_vm6 = vcmp.lt.s32.totalorder %v4054_v34, %v3942_v39  ;;  %vm4071_vm7 = vcmp.lt.s32.totalorder %v3943_v6, %v3944_v36  ;;  %v3946_v14 = vsel %vm3882_vm15, %v14833_v43, 512 }
 0x6f0   :  { %vm3883_vm13 = vcmp.eq.f32.partialorder %v11197_v51, %v11456_v48  ;;  %vm3884_vm4 = vcmp.eq.f32.partialorder %v11200_v38, %v11456_v48  ;;  %v11465_v35 = vsel %vm4055_vm6, %v4054_v34, %v3942_v39  ;;  %v4072_v29 = vsel %vm4071_vm7, %v3943_v6, %v3944_v36 }
 0x6f1   :  { %4041 = vmin.xlane.f32.xlu0 %v11458_v41  ;;  %v4058_v21 = vshra.s32 %v11465_v35, 16  ;;  %vm4073_vm14 = vcmp.lt.s32.totalorder %v4072_v29, %v3945_v37  ;;  %vm3885_vm9 = vcmp.eq.f32.partialorder %v11203_v13, %v11456_v48  ;;  %vm3886_vm1 = vcmp.eq.f32.partialorder %v11209_v53, %v11456_v48 }
 0x6f2   :  { %v4074_v11 = vsel %vm4073_vm14, %v4072_v29, %v3945_v37  ;;  %v3947_v51 = vsel %vm3883_vm13, %v14829_v22, 512  ;;  %v3948_v38 = vsel %vm3884_vm4, %v14830_v5, 512  ;;  %v3949_v63 = vsel %vm3885_vm9, %v14832_v3, 512 }
 0x6f3   :  { %v11476_v54 = vpop.xlane.xlu0 %3816  ;;  %v11478_v44 = vcvt.s32.f32 %v4058_v21  ;;  %vm4075_vm10 = vcmp.lt.s32.totalorder %v4074_v11, %v3946_v14  ;;  %vm4091_vm15 = vcmp.lt.s32.totalorder %v3947_v51, %v3948_v38  ;;  %v3950_v27 = vsel %vm3886_vm1, %v14833_v43, 512 }
 0x6f4   :  { %vm3887_vm6 = vcmp.eq.f32.partialorder %v11213_v10, %v11476_v54  ;;  %vm3888_vm7 = vcmp.eq.f32.partialorder %v11216_v56, %v11476_v54  ;;  %v11485_v13 = vsel %vm4075_vm10, %v4074_v11, %v3946_v14  ;;  %v4092_v53 = vsel %vm4091_vm15, %v3947_v51, %v3948_v38 }
 0x6f5   :  { %4061 = vmin.xlane.f32.xlu1 %v11478_v44  ;;  %v4078_v49 = vshra.s32 %v11485_v13, 16  ;;  %vm4093_vm13 = vcmp.lt.s32.totalorder %v4092_v53, %v3949_v63  ;;  %vm3889_vm4 = vcmp.eq.f32.partialorder %v11219_v0, %v11476_v54  ;;  %vm3890_vm14 = vcmp.eq.f32.partialorder %v11225_v19, %v11476_v54 }
 0x6f6   :  { %v4094_v28 = vsel %vm4093_vm13, %v4092_v53, %v3949_v63  ;;  %v3951_v10 = vsel %vm3887_vm6, %v14829_v22, 512  ;;  %v3952_v56 = vsel %vm3888_vm7, %v14830_v5, 512  ;;  %v3953_v34 = vsel %vm3889_vm4, %v14832_v3, 512 }
 0x6f7   :  { %v11496_v12 = vpop.xlane.xlu1 %3821  ;;  %v11498_v39 = vcvt.s32.f32 %v4078_v49  ;;  %vm4095_vm9 = vcmp.lt.s32.totalorder %v4094_v28, %v3950_v27  ;;  %vm4111_vm1 = vcmp.lt.s32.totalorder %v3951_v10, %v3952_v56  ;;  %v3954_v36 = vsel %vm3890_vm14, %v14833_v43, 512 }
 0x6f8   :  { %vm3891_vm10 = vcmp.eq.f32.partialorder %v11229_v9, %v11496_v12  ;;  %vm3892_vm15 = vcmp.eq.f32.partialorder %v11232_v23, %v11496_v12  ;;  %v11505_v0 = vsel %vm4095_vm9, %v4094_v28, %v3950_v27  ;;  %v4112_v19 = vsel %vm4111_vm1, %v3951_v10, %v3952_v56 }
 0x6f9   :  { %4081 = vmin.xlane.f32.xlu0 %v11498_v39  ;;  %v4098_v6 = vshra.s32 %v11505_v0, 16  ;;  %vm4113_vm6 = vcmp.lt.s32.totalorder %v4112_v19, %v3953_v34  ;;  %vm3893_vm7 = vcmp.eq.f32.partialorder %v11235_v46, %v11496_v12  ;;  %vm3894_vm13 = vcmp.eq.f32.partialorder %v11241_v47, %v11496_v12 }
 0x6fa   :  { %v4114_v37 = vsel %vm4113_vm6, %v4112_v19, %v3953_v34  ;;  %v3955_v9 = vsel %vm3891_vm10, %v14829_v22, 512  ;;  %v3956_v23 = vsel %vm3892_vm15, %v14830_v5, 512  ;;  %v3957_v14 = vsel %vm3893_vm7, %v14832_v3, 512 }
 0x6fb   :  { %v11516_v29 = vpop.xlane.xlu0 %3826  ;;  %v11518_v21 = vcvt.s32.f32 %v4098_v6  ;;  %vm4115_vm4 = vcmp.lt.s32.totalorder %v4114_v37, %v3954_v36  ;;  %vm4131_vm14 = vcmp.lt.s32.totalorder %v3955_v9, %v3956_v23  ;;  %v3958_v51 = vsel %vm3894_vm13, %v14833_v43, 512 }
 0x6fc   :  { %vm3895_vm9 = vcmp.eq.f32.partialorder %v11245_v1, %v11516_v29  ;;  %vm3896_vm1 = vcmp.eq.f32.partialorder %v11248_v4, %v11516_v29  ;;  %v11525_v46 = vsel %vm4115_vm4, %v4114_v37, %v3954_v36  ;;  %v4132_v47 = vsel %vm4131_vm14, %v3955_v9, %v3956_v23  ;;  %v14836_v9 = vld [vmem:[#allocation51_spill] sm:$0xff] }
 0x6fd   :  { %4101 = vmin.xlane.f32.xlu1 %v11518_v21  ;;  %v4118_v11 = vshra.s32 %v11525_v46, 16  ;;  %vm4133_vm10 = vcmp.lt.s32.totalorder %v4132_v47, %v3957_v14  ;;  %vm3897_vm15 = vcmp.eq.f32.partialorder %v11251_v15, %v11516_v29  ;;  %vm3898_vm6 = vcmp.eq.f32.partialorder %v11257_v18, %v11516_v29 }
 0x6fe   :  { %v4134_v38 = vsel %vm4133_vm10, %v4132_v47, %v3957_v14  ;;  %v3959_v1 = vsel %vm3895_vm9, %v14829_v22, 512  ;;  %v3960_v4 = vsel %vm3896_vm1, %v14830_v5, 512  ;;  %v3961_v49 = vsel %vm3897_vm15, %v14832_v3, 512 }
 0x6ff   :  { %v11536_v63 = vpop.xlane.xlu1 %3831  ;;  %v11538_v53 = vcvt.s32.f32 %v4118_v11  ;;  %vm4135_vm7 = vcmp.lt.s32.totalorder %v4134_v38, %v3958_v51  ;;  %vm4151_vm13 = vcmp.lt.s32.totalorder %v3959_v1, %v3960_v4  ;;  %v3962_v28 = vsel %vm3898_vm6, %v14833_v43, 512  ;;  %v14837_v11 = vld [vmem:[#allocation52_spill] sm:$0xff] }
 0x700   :  { %vm3899_vm4 = vcmp.eq.f32.partialorder %v11261_v52, %v11536_v63  ;;  %vm3900_vm14 = vcmp.eq.f32.partialorder %v11264_v26, %v11536_v63  ;;  %v11545_v15 = vsel %vm4135_vm7, %v4134_v38, %v3958_v51  ;;  %v4152_v18 = vsel %vm4151_vm13, %v3959_v1, %v3960_v4 }
 0x701   :  { %4121 = vmin.xlane.f32.xlu0 %v11538_v53  ;;  %v4138_v27 = vshra.s32 %v11545_v15, 16  ;;  %vm4153_vm9 = vcmp.lt.s32.totalorder %v4152_v18, %v3961_v49  ;;  %vm3901_vm1 = vcmp.eq.f32.partialorder %v11267_v50, %v11536_v63  ;;  %vm3902_vm10 = vcmp.eq.f32.partialorder %v11273_v32, %v11536_v63 }
 0x702   :  { %v4154_v10 = vsel %vm4153_vm9, %v4152_v18, %v3961_v49  ;;  %v3963_v52 = vsel %vm3899_vm4, %v14829_v22, 512  ;;  %v3964_v26 = vsel %vm3900_vm14, %v14830_v5, 512  ;;  %v3965_v19 = vsel %vm3901_vm1, %v14832_v3, 512  ;;  %v14839_v49 = vld [vmem:[#allocation54_spill] sm:$0xff] }
 0x703   :  { %v11556_v56 = vpop.xlane.xlu0 %3836  ;;  %v11558_v34 = vcvt.s32.f32 %v4138_v27  ;;  %vm4155_vm15 = vcmp.lt.s32.totalorder %v4154_v10, %v3962_v28  ;;  %vm4171_vm6 = vcmp.lt.s32.totalorder %v3963_v52, %v3964_v26  ;;  %v3966_v36 = vsel %vm3902_vm10, %v14833_v43, 512  ;;  %v14840_v27 = vld [vmem:[#allocation55_spill] sm:$0xff] }
 0x704   :  { %vm3903_vm7 = vcmp.eq.f32.partialorder %v11277_v30, %v11556_v56  ;;  %vm3904_vm13 = vcmp.eq.f32.partialorder %v11280_v8, %v11556_v56  ;;  %v11565_v50 = vsel %vm4155_vm15, %v4154_v10, %v3962_v28  ;;  %v4172_v32 = vsel %vm4171_vm6, %v3963_v52, %v3964_v26 }
 0x705   :  { %4141 = vmin.xlane.f32.xlu1 %v11558_v34  ;;  %v4158_v6 = vshra.s32 %v11565_v50, 16  ;;  %vm4173_vm4 = vcmp.lt.s32.totalorder %v4172_v32, %v3965_v19  ;;  %vm3905_vm14 = vcmp.eq.f32.partialorder %v11283_v60, %v11556_v56  ;;  %vm3906_vm9 = vcmp.eq.f32.partialorder %v14836_v9, %v11556_v56  ;;  %v14838_v60 = vld [vmem:[#allocation53_spill] sm:$0xff] }
 0x706   :  { %v4174_v37 = vsel %vm4173_vm4, %v4172_v32, %v3965_v19  ;;  %v3967_v30 = vsel %vm3903_vm7, %v14829_v22, 512  ;;  %v3968_v8 = vsel %vm3904_vm13, %v14830_v5, 512  ;;  %v3969_v47 = vsel %vm3905_vm14, %v14832_v3, 512  ;;  %v14841_v32 = vld [vmem:[#allocation56_spill] sm:$0xff] }
 0x707   :  { %v11576_v23 = vpop.xlane.xlu1 %3841  ;;  %v11578_v14 = vcvt.s32.f32 %v4158_v6  ;;  %vm4175_vm1 = vcmp.lt.s32.totalorder %v4174_v37, %v3966_v36  ;;  %vm4191_vm10 = vcmp.lt.s32.totalorder %v3967_v30, %v3968_v8  ;;  %v3970_v4 = vsel %vm3906_vm9, %v14833_v43, 512  ;;  %v14842_v6 = vld [vmem:[#allocation57_spill] sm:$0xff] }
 0x708   :  { %vm3907_vm15 = vcmp.eq.f32.partialorder %v14837_v11, %v11576_v23  ;;  %vm3908_vm6 = vcmp.eq.f32.partialorder %v14838_v60, %v11576_v23  ;;  %v11585_v51 = vsel %vm4175_vm1, %v4174_v37, %v3966_v36  ;;  %v4192_v38 = vsel %vm4191_vm10, %v3967_v30, %v3968_v8  ;;  %v14843_v8 = vld [vmem:[#allocation58_spill] sm:$0xff]  ;;  %v14844_v11 = vld [vmem:[#allocation59_spill] sm:$0xff] }
 0x709   :  { %4161 = vmin.xlane.f32.xlu0 %v11578_v14  ;;  %v4178_v1 = vshra.s32 %v11585_v51, 16  ;;  %vm4193_vm7 = vcmp.lt.s32.totalorder %v4192_v38, %v3969_v47  ;;  %vm3909_vm13 = vcmp.eq.f32.partialorder %v14839_v49, %v11576_v23  ;;  %vm3910_vm4 = vcmp.eq.f32.partialorder %v14840_v27, %v11576_v23  ;;  %v14846_v27 = vld [vmem:[#allocation61_spill] sm:$0xff] }
 0x70a   :  { %v4194_v18 = vsel %vm4193_vm7, %v4192_v38, %v3969_v47  ;;  %v3971_v28 = vsel %vm3907_vm15, %v14829_v22, 512  ;;  %v3972_v10 = vsel %vm3908_vm6, %v14830_v5, 512  ;;  %v3973_v19 = vsel %vm3909_vm13, %v14832_v3, 512 }
 0x70b   :  { %v11596_v52 = vpop.xlane.xlu0 %3846  ;;  %v11598_v26 = vcvt.s32.f32 %v4178_v1  ;;  %vm4195_vm14 = vcmp.lt.s32.totalorder %v4194_v18, %v3970_v4  ;;  %vm4211_vm9 = vcmp.lt.s32.totalorder %v3971_v28, %v3972_v10  ;;  %v3974_v30 = vsel %vm3910_vm4, %v14833_v43, 512 }
 0x70c   :  { %vm3911_vm1 = vcmp.eq.f32.partialorder %v14841_v32, %v11596_v52  ;;  %vm3912_vm10 = vcmp.eq.f32.partialorder %v14842_v6, %v11596_v52  ;;  %v11605_v36 = vsel %vm4195_vm14, %v4194_v18, %v3970_v4  ;;  %v4212_v37 = vsel %vm4211_vm9, %v3971_v28, %v3972_v10  ;;  %v14845_v18 = vld [vmem:[#allocation60_spill] sm:$0xff] }
 0x70d   :  { %4181 = vmin.xlane.f32.xlu1 %v11598_v26  ;;  %v4198_v9 = vshra.s32 %v11605_v36, 16  ;;  %vm4213_vm15 = vcmp.lt.s32.totalorder %v4212_v37, %v3973_v19  ;;  %vm3913_vm6 = vcmp.eq.f32.partialorder %v14843_v8, %v11596_v52  ;;  %vm3914_vm7 = vcmp.eq.f32.partialorder %v14844_v11, %v11596_v52 }
 0x70e   :  { %v4214_v47 = vsel %vm4213_vm15, %v4212_v37, %v3973_v19  ;;  %v3975_v60 = vsel %vm3911_vm1, %v14829_v22, 512  ;;  %v3976_v38 = vsel %vm3912_vm10, %v14830_v5, 512  ;;  %v3977_v49 = vsel %vm3913_vm6, %v14832_v3, 512  ;;  %v14847_v37 = vld [vmem:[#allocation89_spill] sm:$0xff] }
 0x70f   :  { %v11616_v1 = vpop.xlane.xlu1 %3851  ;;  %v11618_v4 = vcvt.s32.f32 %v4198_v9  ;;  %vm4215_vm13 = vcmp.lt.s32.totalorder %v4214_v47, %v3974_v30  ;;  %vm4231_vm4 = vcmp.lt.s32.totalorder %v3975_v60, %v3976_v38  ;;  %v3978_v32 = vsel %vm3914_vm7, %v14833_v43, 512 }
 0x710   :  { %vm3915_vm14 = vcmp.eq.f32.partialorder %v14845_v18, %v11616_v1  ;;  %vm3916_vm9 = vcmp.eq.f32.partialorder %v14846_v27, %v11616_v1  ;;  %v11625_v28 = vsel %vm4215_vm13, %v4214_v47, %v3974_v30  ;;  %v4232_v10 = vsel %vm4231_vm4, %v3975_v60, %v3976_v38 }
 0x711   :  { %4201 = vmin.xlane.f32.xlu0 %v11618_v4  ;;  %v4218_v19 = vshra.s32 %v11625_v28, 16  ;;  %vm4233_vm1 = vcmp.lt.s32.totalorder %v4232_v10, %v3977_v49  ;;  %vm3917_vm10 = vcmp.eq.f32.partialorder %v11331_v31, %v11616_v1  ;;  %vm3918_vm15 = vcmp.eq.f32.partialorder %v14847_v37, %v11616_v1  ;;  %v14849_v31 = vld [vmem:[#allocation90_spill] sm:$0xff] }
 0x712   :  { %v4234_v6 = vsel %vm4233_vm1, %v4232_v10, %v3977_v49  ;;  %v3979_v9 = vsel %vm3915_vm14, %v14829_v22, 512  ;;  %v3980_v30 = vsel %vm3916_vm9, %v14830_v5, 512  ;;  %v3981_v11 = vsel %vm3917_vm10, %v14832_v3, 512 }
 0x713   :  { %v11636_v8 = vpop.xlane.xlu0 %3856  ;;  %v11638_v47 = vcvt.s32.f32 %v4218_v19  ;;  %vm4235_vm6 = vcmp.lt.s32.totalorder %v4234_v6, %v3978_v32  ;;  %vm4251_vm7 = vcmp.lt.s32.totalorder %v3979_v9, %v3980_v30  ;;  %v3982_v18 = vsel %vm3918_vm15, %v14833_v43, 512 }
 0x714   :  { %14848 = vst [vmem:[#allocation26_spill] sm:$0xff] %v11636_v8  ;;  %vm3919_vm13 = vcmp.eq.f32.partialorder %v11341_v7, %v11636_v8  ;;  %vm3920_vm4 = vcmp.eq.f32.partialorder %v14849_v31, %v11636_v8  ;;  %v11645_v60 = vsel %vm4235_vm6, %v4234_v6, %v3978_v32  ;;  %v4252_v38 = vsel %vm4251_vm7, %v3979_v9, %v3980_v30 }
 0x715   :  { %4221 = vmin.xlane.f32.xlu1 %v11638_v47  ;;  %v4238_v49 = vshra.s32 %v11645_v60, 16  ;;  %vm4253_vm14 = vcmp.lt.s32.totalorder %v4252_v38, %v3981_v11  ;;  %vm3921_vm9 = vcmp.eq.f32.partialorder %v11347_v55, %v11636_v8  ;;  %vm3922_vm1 = vcmp.eq.f32.partialorder %v11353_v59, %v11636_v8 }
 0x716   :  { %v4254_v27 = vsel %vm4253_vm14, %v4252_v38, %v3981_v11  ;;  %v3983_v7 = vsel %vm3919_vm13, %v14829_v22, 512  ;;  %v3984_v10 = vsel %vm3920_vm4, %v14830_v5, 512  ;;  %v3985_v6 = vsel %vm3921_vm9, %v14832_v3, 512 }
 0x717   :  { %v11656_v19 = vpop.xlane.xlu1 %3861  ;;  %v11658_v32 = vcvt.s32.f32 %v4238_v49  ;;  %vm4255_vm10 = vcmp.lt.s32.totalorder %v4254_v27, %v3982_v18  ;;  %vm4271_vm15 = vcmp.lt.s32.totalorder %v3983_v7, %v3984_v10  ;;  %v3986_v30 = vsel %vm3922_vm1, %v14833_v43, 512 }
 0x718   :  { %14850 = vst [vmem:[#allocation51_spill] sm:$0xff] %v11656_v19  ;;  %vm3923_vm6 = vcmp.eq.f32.partialorder %v11357_v42, %v11656_v19  ;;  %vm3924_vm7 = vcmp.eq.f32.partialorder %v11360_v33, %v11656_v19  ;;  %v11665_v55 = vsel %vm4255_vm10, %v4254_v27, %v3982_v18  ;;  %v4272_v37 = vsel %vm4271_vm15, %v3983_v7, %v3984_v10 }
 0x719   :  { %4241 = vmin.xlane.f32.xlu0 %v11658_v32  ;;  %v4258_v9 = vshra.s32 %v11665_v55, 16  ;;  %vm4273_vm13 = vcmp.lt.s32.totalorder %v4272_v37, %v3985_v6  ;;  %vm3925_vm4 = vcmp.eq.f32.partialorder %v11363_v20, %v11656_v19  ;;  %v3987_v11 = vsel %vm3923_vm6, %v14829_v22, 512 }
 0x71a   :  { %v4274_v42 = vsel %vm4273_vm13, %v4272_v37, %v3985_v6  ;;  %v3988_v33 = vsel %vm3924_vm7, %v14830_v5, 512  ;;  %vm3926_vm9 = vcmp.eq.f32.partialorder %v11370_v58, %v11656_v19  ;;  %v3989_v20 = vsel %vm3925_vm4, %v14832_v3, 512  ;;  %v3342_v37 = vld [vmem:[%s14236_s2 + $0x4f8] sm:$0xff] }
 0x71b   :  { %v11677_v31 = vcvt.s32.f32 %v4258_v9  ;;  %vm4275_vm14 = vcmp.lt.s32.totalorder %v4274_v42, %v3986_v30  ;;  %vm4291_vm10 = vcmp.lt.s32.totalorder %v3987_v11, %v3988_v33  ;;  %v3990_v18 = vsel %vm3926_vm9, %v14833_v43, 512  ;;  %v3326_v9 = vld [vmem:[%s14236_s2 + $0x478] sm:$0xff]  ;;  %7616 = vmatprep.subr.mxu0 %v3342_v37  ;;  %v3356_v37 = vld [vmem:[%s14236_s2 + $0x568] sm:$0xff] }
 0x71c   :  { %v11681_v38 = vsel %vm4275_vm14, %v4274_v42, %v3986_v30  ;;  %v4292_v49 = vsel %vm4291_vm10, %v3987_v11, %v3988_v33  ;;  %v3341_v30 = vld [vmem:[%s14236_s2 + $0x4f0] sm:$0xff]  ;;  %v3374_v42 = vld [vmem:[%s14236_s2 + $0x5f8] sm:$0xff]  ;;  %7617 = vmatpush3.msra.mxu0 %v3326_v9  ;;  %v3323_v9 = vld [vmem:[%s14236_s2 + $0x460] sm:$0xff] }
 0x71d   :  { %4261 = vmin.xlane.f32.xlu1 %v11677_v31  ;;  %v4278_v59 = vshra.s32 %v11681_v38, 16  ;;  %vm4293_vm1 = vcmp.lt.s32.totalorder %v4292_v49, %v3989_v20  ;;  %v3325_v11 = vld [vmem:[%s14236_s2 + $0x470] sm:$0xff]  ;;  %v3358_v33 = vld [vmem:[%s14236_s2 + $0x578] sm:$0xff]  ;;  %7696 = vmatprep.subr.mxu1 %v3374_v42 }
 0x71e   :  { %v4294_v27 = vsel %vm4293_vm1, %v4292_v49, %v3989_v20  ;;  %v3340_v20 = vld [vmem:[%s14236_s2 + $0x4e8] sm:$0xff]  ;;  %v3373_v49 = vld [vmem:[%s14236_s2 + $0x5f0] sm:$0xff]  ;;  %7618 = vmatprep.subr.mxu0 %v3341_v30  ;;  %7697 = vmatpush3.msra.mxu1 %v3358_v33  ;;  %v3371_v30 = vld [vmem:[%s14236_s2 + $0x5e0] sm:$0xff] }
 0x71f   :  { %v11687_v7 = vcvt.s32.f32 %v4278_v59  ;;  %vm4295_vm15 = vcmp.lt.s32.totalorder %v4294_v27, %v3990_v18  ;;  %v3324_v59 = vld [vmem:[%s14236_s2 + $0x468] sm:$0xff]  ;;  %7619 = vmatpush3.msra.mxu0 %v3325_v11  ;;  %7698 = vmatprep.subr.mxu1 %v3373_v49  ;;  %v3338_v42 = vld [vmem:[%s14236_s2 + $0x4d8] sm:$0xff]  ;;  %v3355_v11 = vld [vmem:[%s14236_s2 + $0x560] sm:$0xff] }
 0x720   :  { %v11689_v10 = vsel %vm4295_vm15, %v4294_v27, %v3990_v18  ;;  %v3357_v18 = vld [vmem:[%s14236_s2 + $0x570] sm:$0xff]  ;;  %v3372_v27 = vld [vmem:[%s14236_s2 + $0x5e8] sm:$0xff]  ;;  %7620 = vmatprep.subr.mxu0 %v3340_v20  ;;  %v3322_v33 = vld [vmem:[%s14236_s2 + $0x458] sm:$0xff] }
 0x721   :  { %4281 = vmin.xlane.f32.xlu0 %v11687_v7  ;;  %v4298_v58 = vshra.s32 %v11689_v10, 16  ;;  %7699 = vmatpush3.msra.mxu1 %v3357_v18  ;;  %v3370_v20 = vld [vmem:[%s14236_s2 + $0x5d8] sm:$0xff]  ;;  %v3337_v49 = vld [vmem:[%s14236_s2 + $0x4d0] sm:$0xff] }
 0x722   :  { %7621 = vmatpush3.msra.mxu0 %v3324_v59  ;;  %7700 = vmatprep.subr.mxu1 %v3372_v27  ;;  %v3354_v59 = vld [vmem:[%s14236_s2 + $0x558] sm:$0xff]  ;;  %v3321_v18 = vld [vmem:[%s14236_s2 + $0x450] sm:$0xff] }
 0x723   :  { %v11693_v6 = vcvt.s32.f32 %v4298_v58  ;;  %v3339_v58 = vld [vmem:[%s14236_s2 + $0x4e0] sm:$0xff]  ;;  %7701 = vmatpush3.msra.mxu1 %v3356_v37  ;;  %v3369_v27 = vld [vmem:[%s14236_s2 + $0x5d0] sm:$0xff] }
 0x724   :  { %7622 = vmatprep.subr.mxu0 %v3339_v58  ;;  %7702 = vmatprep.subr.mxu1 %v3371_v30  ;;  %v3336_v58 = vld [vmem:[%s14236_s2 + $0x4c8] sm:$0xff]  ;;  %v3353_v37 = vld [vmem:[%s14236_s2 + $0x550] sm:$0xff] }
 0x725   :  { %4301 = vmin.xlane.f32.xlu1 %v11693_v6  ;;  %7623 = vmatpush3.msra.mxu0 %v3323_v9  ;;  %v3320_v9 = vld [vmem:[%s14236_s2 + $0x448] sm:$0xff] }
 0x726   :  { %7624 = vmatprep.subr.mxu0 %v3338_v42  ;;  %7703 = vmatpush3.msra.mxu1 %v3355_v11  ;;  %v3368_v30 = vld [vmem:[%s14236_s2 + $0x5c8] sm:$0xff]  ;;  %v3335_v42 = vld [vmem:[%s14236_s2 + $0x4c0] sm:$0xff] }
 0x727   :  { %7625 = vmatpush3.msra.mxu0 %v3322_v33  ;;  %7704 = vmatprep.subr.mxu1 %v3370_v20  ;;  %v3352_v11 = vld [vmem:[%s14236_s2 + $0x548] sm:$0xff]  ;;  %v3319_v33 = vld [vmem:[%s14236_s2 + $0x440] sm:$0xff] }
 0x728   :  { %7626 = vmatprep.subr.mxu0 %v3337_v49  ;;  %7705 = vmatpush3.msra.mxu1 %v3354_v59  ;;  %v3367_v20 = vld [vmem:[%s14236_s2 + $0x5c0] sm:$0xff]  ;;  %v3334_v49 = vld [vmem:[%s14236_s2 + $0x4b8] sm:$0xff] }
 0x729   :  { %7627 = vmatpush3.msra.mxu0 %v3321_v18  ;;  %7706 = vmatprep.subr.mxu1 %v3369_v27  ;;  %v3351_v59 = vld [vmem:[%s14236_s2 + $0x540] sm:$0xff]  ;;  %v3318_v18 = vld [vmem:[%s14236_s2 + $0x438] sm:$0xff] }
 0x72a   :  { %7628 = vmatprep.subr.mxu0 %v3336_v58  ;;  %7707 = vmatpush3.msra.mxu1 %v3353_v37  ;;  %v3366_v27 = vld [vmem:[%s14236_s2 + $0x5b8] sm:$0xff]  ;;  %v3333_v58 = vld [vmem:[%s14236_s2 + $0x4b0] sm:$0xff] }
 0x72b   :  { %7629 = vmatpush3.msra.mxu0 %v3320_v9  ;;  %7708 = vmatprep.subr.mxu1 %v3368_v30  ;;  %v3350_v37 = vld [vmem:[%s14236_s2 + $0x538] sm:$0xff]  ;;  %v3317_v9 = vld [vmem:[%s14236_s2 + $0x430] sm:$0xff] }
 0x72c   :  { %7630 = vmatprep.subr.mxu0 %v3335_v42  ;;  %7709 = vmatpush3.msra.mxu1 %v3352_v11  ;;  %v3365_v30 = vld [vmem:[%s14236_s2 + $0x5b0] sm:$0xff]  ;;  %v3332_v42 = vld [vmem:[%s14236_s2 + $0x4a8] sm:$0xff] }
 0x72d   :  { %7631 = vmatpush3.msra.mxu0 %v3319_v33  ;;  %7710 = vmatprep.subr.mxu1 %v3367_v20  ;;  %v3349_v11 = vld [vmem:[%s14236_s2 + $0x530] sm:$0xff]  ;;  %v3316_v33 = vld [vmem:[%s14236_s2 + $0x428] sm:$0xff] }
 0x72e   :  { %7632 = vmatprep.subr.mxu0 %v3334_v49  ;;  %7711 = vmatpush3.msra.mxu1 %v3351_v59  ;;  %v3364_v20 = vld [vmem:[%s14236_s2 + $0x5a8] sm:$0xff]  ;;  %v3331_v49 = vld [vmem:[%s14236_s2 + $0x4a0] sm:$0xff] }
 0x72f   :  { %7633 = vmatpush3.msra.mxu0 %v3318_v18  ;;  %7712 = vmatprep.subr.mxu1 %v3366_v27  ;;  %v3348_v59 = vld [vmem:[%s14236_s2 + $0x528] sm:$0xff]  ;;  %v3315_v18 = vld [vmem:[%s14236_s2 + $0x420] sm:$0xff] }
 0x730   :  { %7634 = vmatprep.subr.mxu0 %v3333_v58  ;;  %7713 = vmatpush3.msra.mxu1 %v3350_v37  ;;  %v3363_v27 = vld [vmem:[%s14236_s2 + $0x5a0] sm:$0xff]  ;;  %v3330_v58 = vld [vmem:[%s14236_s2 + $0x498] sm:$0xff] }
 0x731   :  { %7635 = vmatpush3.msra.mxu0 %v3317_v9  ;;  %7714 = vmatprep.subr.mxu1 %v3365_v30  ;;  %v3347_v37 = vld [vmem:[%s14236_s2 + $0x520] sm:$0xff]  ;;  %v3314_v9 = vld [vmem:[%s14236_s2 + $0x418] sm:$0xff] }
 0x732   :  { %7636 = vmatprep.subr.mxu0 %v3332_v42  ;;  %7715 = vmatpush3.msra.mxu1 %v3349_v11  ;;  %v3362_v30 = vld [vmem:[%s14236_s2 + $0x598] sm:$0xff]  ;;  %v3329_v42 = vld [vmem:[%s14236_s2 + $0x490] sm:$0xff] }
 0x733   :  { %7637 = vmatpush3.msra.mxu0 %v3316_v33  ;;  %7716 = vmatprep.subr.mxu1 %v3364_v20  ;;  %v3346_v11 = vld [vmem:[%s14236_s2 + $0x518] sm:$0xff]  ;;  %v3313_v33 = vld [vmem:[%s14236_s2 + $0x410] sm:$0xff] }
 0x734   :  { %7638 = vmatprep.subr.mxu0 %v3331_v49  ;;  %7717 = vmatpush3.msra.mxu1 %v3348_v59  ;;  %v3361_v20 = vld [vmem:[%s14236_s2 + $0x590] sm:$0xff]  ;;  %v3328_v49 = vld [vmem:[%s14236_s2 + $0x488] sm:$0xff] }
 0x735   :  { %7639 = vmatpush3.msra.mxu0 %v3315_v18  ;;  %7718 = vmatprep.subr.mxu1 %v3363_v27  ;;  %v3345_v59 = vld [vmem:[%s14236_s2 + $0x510] sm:$0xff]  ;;  %v3312_v18 = vld [vmem:[%s14236_s2 + $0x408] sm:$0xff]  ;;  %v3997_v27 = vand.u32 65535, %v11401_v62 }
 0x736   :  { %7640 = vmatprep.subr.mxu0 %v3330_v58  ;;  %7719 = vmatpush3.msra.mxu1 %v3347_v37 }
 0x737   :  { %7641 = vmatpush3.msra.mxu0 %v3314_v9  ;;  %7720 = vmatprep.subr.mxu1 %v3362_v30  ;;  %v3999_v37 = vcvt.s32.f32 %v3997_v27  ;;  %v4017_v9 = vand.u32 65535, %v11420_v40  ;;  %v4057_v40 = vand.u32 65535, %v11465_v35  ;;  %v4077_v27 = vand.u32 65535, %v11485_v13  ;;  %v3311_v13 = vld [vmem:[%s14236_s2 + $0x400] sm:$0xff] }
 0x738   :  { %7642 = vmatprep.subr.mxu0 %v3329_v42  ;;  %7721 = vmatpush3.msra.mxu1 %v3346_v11  ;;  %v4097_v35 = vand.u32 65535, %v11505_v0 }
 0x739   :  { %7643 = vmatpush3.msra.mxu0 %v3313_v33  ;;  %7722 = vmatprep.subr.mxu1 %v3361_v20  ;;  %v4019_v11 = vcvt.s32.f32 %v4017_v9  ;;  %v4037_v33 = vand.u32 65535, %v11446_v61  ;;  %v3360_v9 = vld [vmem:[%s14236_s2 + $0x588] sm:$0xff] }
 0x73a   :  { %7644 = vmatprep.subr.mxu0 %v3328_v49  ;;  %7723 = vmatpush3.msra.mxu1 %v3345_v59 }
 0x73b   :  { %7645 = vmatpush3.msra.mxu0 %v3312_v18  ;;  %v4039_v49 = vcvt.s32.f32 %v4037_v33  ;;  %v4059_v18 = vcvt.s32.f32 %v4057_v40  ;;  %7724 = vmatprep.subr.mxu1 %v3360_v9  ;;  %v4117_v33 = vand.u32 65535, %v11525_v46  ;;  %v4177_v9 = vand.u32 65535, %v11585_v51 }
 0x73c   :  { %v4217_v51 = vand.u32 65535, %v11625_v28  ;;  %v4257_v28 = vand.u32 65535, %v11665_v55  ;;  %v4297_v55 = vand.u32 65535, %v11689_v10 }
 0x771   :  { %v11871_v58 = vpop.xlane.xlu0 %4001 }
 0x772   :  { %vm4003_vm6 = vcmp.eq.f32.partialorder %v11413_v45, %v11871_v58 }
 0x773   :  { %v4004_v30 = vsel %vm4003_vm6, %v3999_v37, inf  ;;  %v4079_v37 = vcvt.s32.f32 %v4077_v27  ;;  %v4920_v27 = vld [vmem:[%s14235_s1 + $0x1f8] sm:$0xff] }
 0x774   :  { %4005 = vmin.xlane.f32.xlu0 %v4004_v30 }
 0x775   :  { %v11876_v42 = vpop.xlane.xlu1 %4021 }
 0x776   :  { %vm4023_vm7 = vcmp.eq.f32.partialorder %v11433_v25, %v11876_v42 }
 0x777   :  { %v4024_v20 = vsel %vm4023_vm7, %v4019_v11, inf  ;;  %v4099_v11 = vcvt.s32.f32 %v4097_v35  ;;  %v4157_v35 = vand.u32 65535, %v11565_v50  ;;  %v4197_v50 = vand.u32 65535, %v11605_v36 }
 0x778   :  { %4025 = vmin.xlane.f32.xlu1 %v4024_v20  ;;  %v3359_v20 = vld [vmem:[%s14236_s2 + $0x580] sm:$0xff]  ;;  %v4237_v36 = vand.u32 65535, %v11645_v60  ;;  %v4277_v60 = vand.u32 65535, %v11681_v38 }
 0x77a   :  { %v11881_v62 = vpop.xlane.xlu0 %4041 }
 0x77b   :  { %vm4043_vm13 = vcmp.eq.f32.partialorder %v11458_v41, %v11881_v62  ;;  %v3327_v41 = vld [vmem:[%s14236_s2 + $0x480] sm:$0xff] }
 0x77c   :  { %v4044_v45 = vsel %vm4043_vm13, %v4039_v49, inf  ;;  %7646 = vmatprep.subr.mxu0 %v3327_v41  ;;  %v4918_v49 = vld [vmem:[%s14235_s1 + $0x1e8] sm:$0xff] }
 0x77d   :  { %4045 = vmin.xlane.f32.xlu0 %v4044_v45  ;;  %7647 = vmatpush3.msra.mxu0 %v3311_v13  ;;  %v4119_v45 = vcvt.s32.f32 %v4117_v33  ;;  %v4199_v33 = vcvt.s32.f32 %v4197_v50  ;;  %v14851_v50 = vld [vmem:[#allocation68_spill] sm:$0xff] }
 0x77e   :  { %v11886_v59 = vpop.xlane.xlu1 %4061  ;;  %5010 = vmatprep.subr.mxu0 %v4918_v49 }
 0x77f   :  { %vm4063_vm4 = vcmp.eq.f32.partialorder %v11478_v44, %v11886_v59  ;;  %v3344_v44 = vld [vmem:[%s14236_s2 + $0x508] sm:$0xff] }
 0x780   :  { %v4064_v25 = vsel %vm4063_vm4, %v4059_v18, inf  ;;  %7725 = vmatpush3.msra.mxu1 %v3344_v44  ;;  %v4137_v18 = vand.u32 65535, %v11545_v15 }
 0x781   :  { %4065 = vmin.xlane.f32.xlu1 %v4064_v25  ;;  %7726 = vmatprep.subr.mxu1 %v3359_v20 }
 0x782   :  { %v11891_v61 = vpop.xlane.xlu0 %4081 }
 0x783   :  { %vm4083_vm14 = vcmp.eq.f32.partialorder %v11498_v39, %v11891_v61  ;;  %v3343_v39 = vld [vmem:[%s14236_s2 + $0x500] sm:$0xff] }
 0x784   :  { %v4084_v0 = vsel %vm4083_vm14, %v4079_v37, inf  ;;  %7727 = vmatpush3.msra.mxu1 %v3343_v39  ;;  %v4139_v37 = vcvt.s32.f32 %v4137_v18  ;;  %v4219_v39 = vcvt.s32.f32 %v4217_v51  ;;  %v4259_v18 = vcvt.s32.f32 %v4257_v28 }
 0x785   :  { %4085 = vmin.xlane.f32.xlu0 %v4084_v0  ;;  %5171 = vmatprep.subr.mxu1 %v4920_v27  ;;  %v4179_v0 = vcvt.s32.f32 %v4177_v9 }
 0x786   :  { %v11908_v30 = vpop.xlane.xlu1 %4101 }
 0x787   :  { %vm4103_vm9 = vcmp.eq.f32.partialorder %v11518_v21, %v11908_v30 }
 0x788   :  { %v4104_v40 = vsel %vm4103_vm9, %v4099_v11, inf }
 0x789   :  { %4105 = vmin.xlane.f32.xlu1 %v4104_v40  ;;  %v4239_v40 = vcvt.s32.f32 %v4237_v36  ;;  %v4914_v36 = vld [vmem:[%s14235_s1 + $0x168] sm:$0xff] }
 0x78a   :  { %v11922_v46 = vpop.xlane.xlu0 %4121 }
 0x78b   :  { %vm4123_vm10 = vcmp.eq.f32.partialorder %v11538_v53, %v11922_v46  ;;  %v4159_v53 = vcvt.s32.f32 %v4157_v35  ;;  %v4299_v35 = vcvt.s32.f32 %v4297_v55 }
 0x78c   :  { %v4124_v25 = vsel %vm4123_vm10, %v4119_v45, inf }
 0x78d   :  { %4125 = vmin.xlane.f32.xlu0 %v4124_v25  ;;  %v4279_v25 = vcvt.s32.f32 %v4277_v60  ;;  %v14857_v60 = vld [vmem:[#allocation80_spill] sm:$0xff] }
 0x78e   :  { %v11930_v21 = vpop.xlane.xlu1 %4141 }
 0x78f   :  { %vm4143_vm1 = vcmp.eq.f32.partialorder %v11558_v34, %v11930_v21 }
 0x790   :  { %v4144_v41 = vsel %vm4143_vm1, %v4139_v37, inf }
 0x791   :  { %4145 = vmin.xlane.f32.xlu1 %v4144_v41  ;;  %v4028_v41 = vcvt.f32.s32 %v11876_v42  ;;  %v4919_v42 = vld [vmem:[%s14235_s1 + $0x1f0] sm:$0xff] }
 0x792   :  { %v11935_v15 = vpop.xlane.xlu0 %4161 }
 0x793   :  { %vm4163_vm15 = vcmp.eq.f32.partialorder %v11578_v14, %v11935_v15 }
 0x794   :  { %v4164_v13 = vsel %vm4163_vm15, %v4159_v53, inf }
 0x795   :  { %4165 = vmin.xlane.f32.xlu0 %v4164_v13 }
 0x796   :  { %v11940_v44 = vpop.xlane.xlu1 %4181 }
 0x797   :  { %vm4183_vm6 = vcmp.eq.f32.partialorder %v11598_v26, %v11940_v44 }
 0x798   :  { %v4184_v34 = vsel %vm4183_vm6, %v4179_v0, inf  ;;  %v4029_v0 = vshll.u32 %v4028_v41, 16  ;;  %v4912_v41 = vld [vmem:[%s14235_s1 + $0xf8] sm:$0xff] }
 0x799   :  { %4185 = vmin.xlane.f32.xlu1 %v4184_v34  ;;  %v14852_v34 = vld [vmem:[#allocation79_spill] sm:$0xff] }
 0x79a   :  { %v11945_v11 = vpop.xlane.xlu0 %4201 }
 0x79b   :  { %vm4203_vm7 = vcmp.eq.f32.partialorder %v11618_v4, %v11945_v11 }
 0x79c   :  { %v4204_v14 = vsel %vm4203_vm7, %v4199_v33, inf  ;;  %v11981_v33 = vsel %vm3183_vm12, %v14852_v34, %v14851_v50  ;;  %v4088_v50 = vcvt.f32.s32 %v11891_v61  ;;  %v4906_v61 = vld [vmem:[%s14235_s1 + $0x68] sm:$0xff] }
 0x79d   :  { %4205 = vmin.xlane.f32.xlu0 %v4204_v14  ;;  %v4048_v14 = vcvt.f32.s32 %v11881_v62  ;;  %vm4793_vm7 = vcmp.lt.f32.partialorder %v11373_v2, %v11981_v33 }
 0x79e   :  { %v11950_v20 = vpop.xlane.xlu1 %4221 }
 0x79f   :  { %vm4223_vm13 = vcmp.eq.f32.partialorder %v11638_v47, %v11950_v20 }
 0x7a0   :  { %v4224_v26 = vsel %vm4223_vm13, %v4219_v39, inf  ;;  %v14853_v39 = vmov 1.0  }
 0x7a1   :  { %4225 = vmin.xlane.f32.xlu1 %v4224_v26  ;;  %v4916_v26 = vld [vmem:[%s14235_s1 + $0x178] sm:$0xff] }
 0x7a2   :  { %v11955_v49 = vpop.xlane.xlu0 %4241 }
 0x7a3   :  { %vm4243_vm4 = vcmp.eq.f32.partialorder %v11658_v32, %v11955_v49 }
 0x7a4   :  { %v4244_v4 = vsel %vm4243_vm4, %v4239_v40, inf  ;;  %v14854_v40 = vld [vmem:[#allocation69_spill] sm:$0xff] }
 0x7a5   :  { %4245 = vmin.xlane.f32.xlu0 %v4244_v4  ;;  %v4068_v4 = vcvt.f32.s32 %v11886_v59  ;;  %v4913_v59 = vld [vmem:[%s14235_s1 + $0x160] sm:$0xff] }
 0x7a6   :  { %v11960_v45 = vpop.xlane.xlu1 %4261 }
 0x7a7   :  { %vm4263_vm14 = vcmp.eq.f32.partialorder %v11677_v31, %v11960_v45  ;;  %v4008_v31 = vcvt.f32.s32 %v11871_v58  ;;  %v4917_v58 = vld [vmem:[%s14235_s1 + $0x1e0] sm:$0xff] }
 0x7a8   :  { %v4264_v47 = vsel %vm4263_vm14, %v4259_v18, inf  ;;  %v14856_v18 = vld [vmem:[#allocation70_spill] sm:$0xff] }
 0x7a9   :  { %4265 = vmin.xlane.f32.xlu1 %v4264_v47  ;;  %v4009_v9 = vshll.u32 %v4008_v31, 16  ;;  %v12018_v47 = vsel %vm3184_vm3, %v14857_v60, %v14856_v18  ;;  %v4910_v31 = vld [vmem:[%s14235_s1 + $0xe8] sm:$0xff]  ;;  %v4089_v60 = vshll.u32 %v4088_v50, 16  ;;  %v14872_v50 = vld [vmem:[#allocation83_spill] sm:$0xff] }
 0x7aa   :  { %v11965_v27 = vpop.xlane.xlu0 %4281  ;;  %14858 = vst [vmem:[#allocation53_spill] sm:$0xff] %v12018_v47 }
 0x7ab   :  { %vm4283_vm9 = vcmp.eq.f32.partialorder %v11687_v7, %v11965_v27 }
 0x7ac   :  { %v4284_v32 = vsel %vm4283_vm9, %v4279_v25, inf  ;;  %vm4794_vm9 = vcmp.lt.f32.partialorder %v11385_v24, %v12018_v47 }
 0x7ad   :  { %4285 = vmin.xlane.f32.xlu0 %v4284_v32  ;;  %v4915_v32 = vld [vmem:[%s14235_s1 + $0x170] sm:$0xff] }
 0x7ae   :  { %v11970_v37 = vpop.xlane.xlu1 %4301 }
 0x7af   :  { %vm4303_vm10 = vcmp.eq.f32.partialorder %v11693_v6, %v11970_v37 }
 0x7b0   :  { %v4304_v38 = vsel %vm4303_vm10, %v4299_v35, inf  ;;  %v4049_v35 = vshll.u32 %v4048_v14, 16 }
 0x7b1   :  { %4305 = vmin.xlane.f32.xlu1 %v4304_v38 }
 0x7fd   :  { %v4006_v53 = vpop.xlane.xlu0 %4005 }
 0x7fe   :  { %v4007_v10 = vcvt.f32.s32 %v4006_v53  ;;  %v4909_v53 = vld [vmem:[%s14235_s1 + $0xe0] sm:$0xff] }
 0x800   :  { %v4010_v13 = vadd.s32 %v4009_v9, %v4007_v10  ;;  %v4911_v9 = vld [vmem:[%s14235_s1 + $0xf0] sm:$0xff] }
 0x801   :  { %v4026_v7 = vpop.xlane.xlu1 %4025  ;;  %v14859_v10 = vld [vmem:[#allocation71_spill] sm:$0xff] }
 0x802   :  { %v4825_v6 = vadd.s32 1024, %v4010_v13  ;;  %v4027_v51 = vcvt.f32.s32 %v4026_v7  ;;  %vm4312_vm1 = vcmp.eq.s32.totalorder %v14830_v5, %v4010_v13  ;;  %vm4314_vm15 = vcmp.eq.s32.totalorder %v14833_v43, %v4010_v13 }
 0x803   :  { %7072 = vmatprep.mubr.msk.f32.mxu0 %vm4312_vm1, %v14853_v39  ;;  %7104 = vmatprep.mubr.msk.f32.mxu1 %vm4314_vm15, %v14853_v39  ;;  %vm4311_vm12 = vcmp.eq.s32.totalorder %v14829_v22, %v4010_v13  ;;  %vm4313_vm6 = vcmp.eq.s32.totalorder %v14832_v3, %v4010_v13  ;;  %v4069_v7 = vshll.u32 %v4068_v4, 16  ;;  %v14864_v4 = vld [vmem:[#allocation73_spill] sm:$0xff] }
 0x804   :  { %v4030_v62 = vadd.s32 %v4029_v0, %v4027_v51  ;;  %7073 = vmatmul.mubr.msk.f32.vlgmr.msra.gmra.mxu0 %vm4311_vm12, %v14853_v39  ;;  %7105 = vmatmul.mubr.msk.f32.vlgmr.msra.gmra.mxu1 %vm4313_vm6, %v14853_v39  ;;  %v12010_v28 = vsel %vm4793_vm7, %v4825_v6, %v14854_v40  ;;  %v14861_v6 = vld [vmem:[#allocation72_spill] sm:$0xff]  ;;  %v14862_v51 = vld [vmem:[#allocation81_spill] sm:$0xff] }
 0x805   :  { %14855 = vst [vmem:[#allocation52_spill] sm:$0xff] %v12010_v28  ;;  %5011 = vmatpush1.msra.mxu0 %v4917_v58  ;;  %5172 = vmatpush1.msra.mxu1 %v4919_v42  ;;  %v12060_v58 = vsel %vm3185_vm11, %v14862_v51, %v14861_v6 }
 0x806   :  { %v4826_v25 = vadd.s32 1024, %v4030_v62  ;;  %v4046_v55 = vpop.xlane.xlu0 %4045  ;;  %vm4316_vm13 = vcmp.eq.s32.totalorder %v14830_v5, %v4030_v62  ;;  %vm4318_vm4 = vcmp.eq.s32.totalorder %v14833_v43, %v4030_v62  ;;  %vm4315_vm14 = vcmp.eq.s32.totalorder %v14829_v22, %v4030_v62  ;;  %5012 = vmatprep.subr.mxu0 %v4914_v36  ;;  %5173 = vmatprep.subr.mxu1 %v4916_v26  ;;  %v4908_v36 = vld [vmem:[%s14235_s1 + $0x78] sm:$0xff]  ;;  %v4905_v26 = vld [vmem:[%s14235_s1 + $0x60] sm:$0xff] }
 0x807   :  { %v4047_v38 = vcvt.f32.s32 %v4046_v55  ;;  %7074 = vmatprep.mubr.msk.f32.mxu0 %vm4316_vm13, %v14853_v39  ;;  %7106 = vmatprep.mubr.msk.f32.mxu1 %vm4318_vm4, %v14853_v39  ;;  %vm4317_vm3 = vcmp.eq.s32.totalorder %v14832_v3, %v4030_v62  ;;  %14863 = vst [vmem:[#allocation55_spill] sm:$0xff] %v12060_v58  ;;  %v4907_v62 = vld [vmem:[%s14235_s1 + $0x70] sm:$0xff]  ;;  %vm4795_vm12 = vcmp.lt.f32.partialorder %v11399_v16, %v12060_v58 }
 0x808   :  { %7075 = vmatmul.mubr.msk.f32.gmra.mxu0 %vm4315_vm14, %v14853_v39  ;;  %7107 = vmatmul.mubr.msk.f32.gmra.mxu1 %vm4317_vm3, %v14853_v39  ;;  %v12052_v13 = vsel %vm4794_vm9, %v4826_v25, %v14859_v10  ;;  %v4108_v25 = vcvt.f32.s32 %v11908_v30  ;;  %v4128_v10 = vcvt.f32.s32 %v11922_v46 }
 0x809   :  { %14860 = vst [vmem:[#allocation54_spill] sm:$0xff] %v12052_v13  ;;  %v4050_v0 = vadd.s32 %v4049_v35, %v4047_v38  ;;  %5013 = vmatpush1.msra.mxu0 %v4913_v59  ;;  %5174 = vmatpush1.msra.mxu1 %v4915_v32  ;;  %v14866_v59 = vld [vmem:[#allocation74_spill] sm:$0xff] }
 0x80a   :  { %v4066_v34 = vpop.xlane.xlu1 %4065  ;;  %5014 = vmatprep.subr.mxu0 %v4910_v31  ;;  %5175 = vmatprep.subr.mxu1 %v4912_v41  ;;  %v14867_v32 = vld [vmem:[#allocation82_spill] sm:$0xff]  ;;  %v14869_v41 = vld [vmem:[#allocation75_spill] sm:$0xff] }
 0x80b   :  { %v4827_v42 = vadd.s32 1024, %v4050_v0  ;;  %v4067_v14 = vcvt.f32.s32 %v4066_v34  ;;  %vm4320_vm10 = vcmp.eq.s32.totalorder %v14830_v5, %v4050_v0  ;;  %vm4322_vm1 = vcmp.eq.s32.totalorder %v14833_v43, %v4050_v0  ;;  %5015 = vmatpush1.msra.mxu0 %v4909_v53  ;;  %5176 = vmatpush1.msra.mxu1 %v4911_v9 }
 0x80c   :  { %7076 = vmatprep.mubr.msk.f32.mxu0 %vm4320_vm10, %v14853_v39  ;;  %7108 = vmatprep.mubr.msk.f32.mxu1 %vm4322_vm1, %v14853_v39  ;;  %vm4319_vm11 = vcmp.eq.s32.totalorder %v14829_v22, %v4050_v0  ;;  %vm4321_vm15 = vcmp.eq.s32.totalorder %v14832_v3, %v4050_v0  ;;  %v12096_v35 = vsel %vm3186_vm8, %v14867_v32, %v14866_v59  ;;  %v4109_v9 = vshll.u32 %v4108_v25, 16 }
 0x80d   :  { %v4070_v40 = vadd.s32 %v4069_v7, %v4067_v14  ;;  %7077 = vmatmul.mubr.msk.f32.gmra.mxu0 %vm4319_vm11, %v14853_v39  ;;  %7109 = vmatmul.mubr.msk.f32.gmra.mxu1 %vm4321_vm15, %v14853_v39  ;;  %v12088_v18 = vsel %vm4795_vm12, %v4827_v42, %v14864_v4  ;;  %14868 = vst [vmem:[#allocation57_spill] sm:$0xff] %v12096_v35  ;;  %v14871_v7 = vld [vmem:[#allocation76_spill] sm:$0xff]  ;;  %v14874_v42 = vld [vmem:[#allocation77_spill] sm:$0xff] }
 0x80e   :  { %14865 = vst [vmem:[#allocation56_spill] sm:$0xff] %v12088_v18  ;;  %v4086_v55 = vpop.xlane.xlu0 %4085  ;;  %5016 = vmatprep.subr.mxu0 %v4906_v61  ;;  %5177 = vmatprep.subr.mxu1 %v4908_v36  ;;  %vm4796_vm8 = vcmp.lt.f32.partialorder %v11418_v57, %v12096_v35  ;;  %vm14873_vm3 = vcmp.lt.f32.partialorder %v14872_v50, %v14871_v7  ;;  %v4129_v61 = vshll.u32 %v4128_v10, 16  ;;  %v4148_v36 = vcvt.f32.s32 %v11930_v21 }
 0x80f   :  { %v4828_v38 = vadd.s32 1024, %v4070_v40  ;;  %v4087_v31 = vcvt.f32.s32 %v4086_v55  ;;  %vm4324_vm6 = vcmp.eq.s32.totalorder %v14830_v5, %v4070_v40  ;;  %vm4326_vm13 = vcmp.eq.s32.totalorder %v14833_v43, %v4070_v40  ;;  %5017 = vmatpush1.msra.mxu0 %v4905_v26  ;;  %5178 = vmatpush1.msra.mxu1 %v4907_v62  ;;  %v14876_v62 = vld [vmem:[#allocation78_spill] sm:$0xff]  ;;  %v14879_v55 = vld [vmem:[#allocation24_spill] sm:$0xff] }
 0x810   :  { %7078 = vmatprep.mubr.msk.f32.mxu0 %vm4324_vm6, %v14853_v39  ;;  %7110 = vmatprep.mubr.msk.f32.mxu1 %vm4326_vm13, %v14853_v39  ;;  %vm4323_vm4 = vcmp.eq.s32.totalorder %v14829_v22, %v4070_v40  ;;  %vm4325_vm14 = vcmp.eq.s32.totalorder %v14832_v3, %v4070_v40  ;;  %v12120_v34 = vsel %vm14873_vm3, %v14872_v50, %v14871_v7  ;;  %v14877_v40 = vld [vmem:[#allocation84_spill] sm:$0xff]  ;;  %v4149_v32 = vshll.u32 %v4148_v36, 16  ;;  %v14884_v7 = vld [vmem:[#allocation27_spill] sm:$0xff] }
 0x811   :  { %v4090_v30 = vadd.s32 %v4089_v60, %v4087_v31  ;;  %7079 = vmatmul.mubr.msk.f32.gmra.mxu0 %vm4323_vm4, %v14853_v39  ;;  %7111 = vmatmul.mubr.msk.f32.gmra.mxu1 %vm4325_vm14, %v14853_v39  ;;  %v12112_v53 = vsel %vm4796_vm8, %v4828_v38, %v14869_v41  ;;  %vm4797_vm6 = vcmp.lt.f32.partialorder %v11438_v17, %v12120_v34  ;;  %v4168_v38 = vcvt.f32.s32 %v11935_v15  ;;  %v14882_v41 = vld [vmem:[#allocation85_spill] sm:$0xff] }
 0x812   :  { %14870 = vst [vmem:[#allocation58_spill] sm:$0xff] %v12112_v53  ;;  %v4106_v0 = vpop.xlane.xlu1 %4105  ;;  %vm14878_vm13 = vcmp.lt.f32.partialorder %v14877_v40, %v14876_v62 }
 0x813   :  { %v4829_v6 = vadd.s32 1024, %v4090_v30  ;;  %v4107_v51 = vcvt.f32.s32 %v4106_v0  ;;  %vm4328_vm10 = vcmp.eq.s32.totalorder %v14830_v5, %v4090_v30  ;;  %vm4330_vm1 = vcmp.eq.s32.totalorder %v14833_v43, %v4090_v30 }
 0x814   :  { %7080 = vmatprep.mubr.msk.f32.mxu0 %vm4328_vm10, %v14853_v39  ;;  %7112 = vmatprep.mubr.msk.f32.mxu1 %vm4330_vm1, %v14853_v39  ;;  %vm4327_vm11 = vcmp.eq.s32.totalorder %v14829_v22, %v4090_v30  ;;  %vm4329_vm15 = vcmp.eq.s32.totalorder %v14832_v3, %v4090_v30  ;;  %v12144_v4 = vsel %vm14878_vm13, %v14877_v40, %v14876_v62  ;;  %v14881_v30 = vld [vmem:[#allocation13_spill] sm:$0xff]  ;;  %v14889_v40 = vld [vmem:[#allocation28_spill] sm:$0xff] }
 0x815   :  { %v4110_v46 = vadd.s32 %v4109_v9, %v4107_v51  ;;  %7081 = vmatmul.mubr.msk.f32.gmra.mxu0 %vm4327_vm11, %v14853_v39  ;;  %7113 = vmatmul.mubr.msk.f32.gmra.mxu1 %vm4329_vm15, %v14853_v39  ;;  %v12136_v14 = vsel %vm4797_vm6, %v4829_v6, %v14874_v42  ;;  %vm4798_vm1 = vcmp.lt.f32.partialorder %v11456_v48, %v12144_v4  ;;  %v4169_v6 = vshll.u32 %v4168_v38, 16  ;;  %v14886_v42 = vld [vmem:[#allocation15_spill] sm:$0xff] }
 0x816   :  { %14875 = vst [vmem:[#allocation59_spill] sm:$0xff] %v12136_v14  ;;  %v4126_v26 = vpop.xlane.xlu0 %4125  ;;  %vm14883_vm11 = vcmp.lt.f32.partialorder %v14882_v41, %v14881_v30  ;;  %v4188_v51 = vcvt.f32.s32 %v11940_v44  ;;  %v14892_v38 = vld [vmem:[#allocation87_spill] sm:$0xff] }
 0x817   :  { %v4830_v60 = vadd.s32 1024, %v4110_v46  ;;  %v4127_v25 = vcvt.f32.s32 %v4126_v26  ;;  %vm4332_vm4 = vcmp.eq.s32.totalorder %v14830_v5, %v4110_v46  ;;  %vm4334_vm14 = vcmp.eq.s32.totalorder %v14833_v43, %v4110_v46 }
 0x818   :  { %7082 = vmatprep.mubr.msk.f32.mxu0 %vm4332_vm4, %v14853_v39  ;;  %7114 = vmatprep.mubr.msk.f32.mxu1 %vm4334_vm14, %v14853_v39  ;;  %vm4331_vm3 = vcmp.eq.s32.totalorder %v14829_v22, %v4110_v46  ;;  %vm4333_vm10 = vcmp.eq.s32.totalorder %v14832_v3, %v4110_v46  ;;  %v12168_v9 = vsel %vm14883_vm11, %v14882_v41, %v14881_v30 }
 0x819   :  { %v4130_v21 = vadd.s32 %v4129_v61, %v4127_v25  ;;  %7083 = vmatmul.mubr.msk.f32.gmra.mxu0 %vm4331_vm3, %v14853_v39  ;;  %7115 = vmatmul.mubr.msk.f32.gmra.mxu1 %vm4333_vm10, %v14853_v39  ;;  %v12160_v59 = vsel %vm4798_vm1, %v4830_v60, %v14879_v55  ;;  %vm4799_vm3 = vcmp.lt.f32.partialorder %v11476_v54, %v12168_v9  ;;  %v14887_v61 = vld [vmem:[#allocation86_spill] sm:$0xff]  ;;  %v4189_v25 = vshll.u32 %v4188_v51, 16 }
 0x81a   :  { %14880 = vst [vmem:[#allocation60_spill] sm:$0xff] %v12160_v59  ;;  %v4146_v31 = vpop.xlane.xlu1 %4145  ;;  %vm14888_vm10 = vcmp.lt.f32.partialorder %v14887_v61, %v14886_v42  ;;  %v14896_v51 = vld [vmem:[#allocation30_spill] sm:$0xff] }
 0x81b   :  { %v4831_v10 = vadd.s32 1024, %v4130_v21  ;;  %v4147_v0 = vcvt.f32.s32 %v4146_v31  ;;  %vm4336_vm15 = vcmp.eq.s32.totalorder %v14830_v5, %v4130_v21  ;;  %vm4338_vm13 = vcmp.eq.s32.totalorder %v14833_v43, %v4130_v21 }
 0x81c   :  { %7084 = vmatprep.mubr.msk.f32.mxu0 %vm4336_vm15, %v14853_v39  ;;  %7116 = vmatprep.mubr.msk.f32.mxu1 %vm4338_vm13, %v14853_v39  ;;  %vm4335_vm4 = vcmp.eq.s32.totalorder %v14829_v22, %v4130_v21  ;;  %vm4337_vm14 = vcmp.eq.s32.totalorder %v14832_v3, %v4130_v21  ;;  %v12192_v36 = vsel %vm14888_vm10, %v14887_v61, %v14886_v42  ;;  %v4208_v21 = vcvt.f32.s32 %v11945_v11 }
 0x81d   :  { %v4150_v15 = vadd.s32 %v4149_v32, %v4147_v0  ;;  %7085 = vmatmul.mubr.msk.f32.gmra.mxu0 %vm4335_vm4, %v14853_v39  ;;  %7117 = vmatmul.mubr.msk.f32.gmra.mxu1 %vm4337_vm14, %v14853_v39  ;;  %v12184_v50 = vsel %vm4799_vm3, %v4831_v10, %v14884_v7  ;;  %vm14442_vm14 = vcmp.lt.f32.partialorder %v11496_v12, %v12192_v36  ;;  %v14891_v32 = vld [vmem:[#allocation29_spill] sm:$0xff]  ;;  %v14894_v10 = vld [vmem:[#allocation16_spill] sm:$0xff]  ;;  %v4228_v7 = vcvt.f32.s32 %v11950_v20 }
 0x81e   :  { %14885 = vst [vmem:[#allocation61_spill] sm:$0xff] %v12184_v50  ;;  %v4166_v46 = vpop.xlane.xlu0 %4165  ;;  %vm14893_vm10 = vcmp.lt.f32.partialorder %v14892_v38, %v14891_v32 }
 0x81f   :  { %v4832_v26 = vadd.s32 1024, %v4150_v15  ;;  %v4167_v62 = vcvt.f32.s32 %v4166_v46  ;;  %vm4340_vm11 = vcmp.eq.s32.totalorder %v14830_v5, %v4150_v15  ;;  %vm4342_vm15 = vcmp.eq.s32.totalorder %v14833_v43, %v4150_v15  ;;  %v14897_v46 = vld [vmem:[#allocation88_spill] sm:$0xff] }
 0x820   :  { %7086 = vmatprep.mubr.msk.f32.mxu0 %vm4340_vm11, %v14853_v39  ;;  %7118 = vmatprep.mubr.msk.f32.mxu1 %vm4342_vm15, %v14853_v39  ;;  %vm4339_vm13 = vcmp.eq.s32.totalorder %v14829_v22, %v4150_v15  ;;  %vm4341_vm4 = vcmp.eq.s32.totalorder %v14832_v3, %v4150_v15  ;;  %v12216_v31 = vsel %vm14893_vm10, %v14892_v38, %v14891_v32  ;;  %v4209_v15 = vshll.u32 %v4208_v21, 16  ;;  %v14902_v32 = vld [vmem:[#allocation62_spill] sm:$0xff] }
 0x821   :  { %v4170_v44 = vadd.s32 %v4169_v6, %v4167_v62  ;;  %7087 = vmatmul.mubr.msk.f32.gmra.mxu0 %vm4339_vm13, %v14853_v39  ;;  %7119 = vmatmul.mubr.msk.f32.gmra.mxu1 %vm4341_vm4, %v14853_v39  ;;  %v12208_v60 = vsel %vm14442_vm14, %v4832_v26, %v14889_v40  ;;  %vm14443_vm14 = vcmp.lt.f32.partialorder %v11516_v29, %v12216_v31  ;;  %v14899_v62 = vld [vmem:[#allocation18_spill] sm:$0xff]  ;;  %v4229_v40 = vshll.u32 %v4228_v7, 16 }
 0x822   :  { %14890 = vst [vmem:[#allocation89_spill] sm:$0xff] %v12208_v60  ;;  %v4186_v55 = vpop.xlane.xlu1 %4185  ;;  %vm14898_vm10 = vcmp.lt.f32.partialorder %v14897_v46, %v14896_v51  ;;  %v4268_v7 = vcvt.f32.s32 %v11960_v45 }
 0x823   :  { %v4833_v30 = vadd.s32 1024, %v4170_v44  ;;  %v4187_v41 = vcvt.f32.s32 %v4186_v55  ;;  %vm4344_vm11 = vcmp.eq.s32.totalorder %v14830_v5, %v4170_v44  ;;  %vm4346_vm15 = vcmp.eq.s32.totalorder %v14833_v43, %v4170_v44  ;;  %v14901_v55 = vld [vmem:[#allocation31_spill] sm:$0xff] }
 0x824   :  { %7088 = vmatprep.mubr.msk.f32.mxu0 %vm4344_vm11, %v14853_v39  ;;  %7120 = vmatprep.mubr.msk.f32.mxu1 %vm4346_vm15, %v14853_v39  ;;  %vm4343_vm13 = vcmp.eq.s32.totalorder %v14829_v22, %v4170_v44  ;;  %vm4345_vm4 = vcmp.eq.s32.totalorder %v14832_v3, %v4170_v44  ;;  %v12240_v42 = vsel %vm14898_vm10, %v14897_v46, %v14896_v51  ;;  %v14906_v51 = vld [vmem:[#allocation32_spill] sm:$0xff]  ;;  %v14907_v46 = vld [vmem:[#allocation63_spill] sm:$0xff] }
 0x825   :  { %v4190_v11 = vadd.s32 %v4189_v25, %v4187_v41  ;;  %7089 = vmatmul.mubr.msk.f32.gmra.mxu0 %vm4343_vm13, %v14853_v39  ;;  %7121 = vmatmul.mubr.msk.f32.gmra.mxu1 %vm4345_vm4, %v14853_v39  ;;  %v12232_v0 = vsel %vm14443_vm14, %v4833_v30, %v14894_v10  ;;  %vm14444_vm14 = vcmp.lt.f32.partialorder %v11536_v63, %v12240_v42  ;;  %v4248_v25 = vcvt.f32.s32 %v11955_v49 }
 0x826   :  { %14895 = vst [vmem:[#allocation90_spill] sm:$0xff] %v12232_v0  ;;  %v4206_v6 = vpop.xlane.xlu0 %4205  ;;  %vm14903_vm10 = vcmp.lt.f32.partialorder %v14902_v32, %v14901_v55  ;;  %v14934_v0 = vld [vmem:[#allocation40_spill] sm:$0xff] }
 0x827   :  { %v4834_v61 = vadd.s32 1024, %v4190_v11  ;;  %v4207_v26 = vcvt.f32.s32 %v4206_v6  ;;  %vm4348_vm11 = vcmp.eq.s32.totalorder %v14830_v5, %v4190_v11  ;;  %vm4350_vm15 = vcmp.eq.s32.totalorder %v14833_v43, %v4190_v11 }
 0x828   :  { %7090 = vmatprep.mubr.msk.f32.mxu0 %vm4348_vm11, %v14853_v39  ;;  %7122 = vmatprep.mubr.msk.f32.mxu1 %vm4350_vm15, %v14853_v39  ;;  %vm4347_vm13 = vcmp.eq.s32.totalorder %v14829_v22, %v4190_v11  ;;  %vm4349_vm4 = vcmp.eq.s32.totalorder %v14832_v3, %v4190_v11  ;;  %v12264_v38 = vsel %vm14903_vm10, %v14902_v32, %v14901_v55  ;;  %v14904_v11 = vld [vmem:[#allocation17_spill] sm:$0xff] }
 0x829   :  { %v4210_v20 = vadd.s32 %v4209_v15, %v4207_v26  ;;  %7091 = vmatmul.mubr.msk.f32.gmra.mxu0 %vm4347_vm13, %v14853_v39  ;;  %7123 = vmatmul.mubr.msk.f32.gmra.mxu1 %vm4349_vm4, %v14853_v39  ;;  %v12256_v44 = vsel %vm14444_vm14, %v4834_v61, %v14899_v62  ;;  %vm14445_vm14 = vcmp.lt.f32.partialorder %v11556_v56, %v12264_v38  ;;  %v4249_v15 = vshll.u32 %v4248_v25, 16  ;;  %v14909_v62 = vld [vmem:[#allocation19_spill] sm:$0xff]  ;;  %v14911_v32 = vld [vmem:[#allocation33_spill] sm:$0xff] }
 0x82a   :  { %14900 = vst [vmem:[#allocation68_spill] sm:$0xff] %v12256_v44  ;;  %v4226_v21 = vpop.xlane.xlu1 %4225  ;;  %vm14908_vm10 = vcmp.lt.f32.partialorder %v14907_v46, %v14906_v51  ;;  %v4269_v25 = vshll.u32 %v4268_v7, 16 }
 0x82b   :  { %v4835_v30 = vadd.s32 1024, %v4210_v20  ;;  %v4227_v41 = vcvt.f32.s32 %v4226_v21  ;;  %vm4352_vm11 = vcmp.eq.s32.totalorder %v14830_v5, %v4210_v20  ;;  %vm4354_vm15 = vcmp.eq.s32.totalorder %v14833_v43, %v4210_v20 }
 0x82c   :  { %7092 = vmatprep.mubr.msk.f32.mxu0 %vm4352_vm11, %v14853_v39  ;;  %7124 = vmatprep.mubr.msk.f32.mxu1 %vm4354_vm15, %v14853_v39  ;;  %vm4351_vm13 = vcmp.eq.s32.totalorder %v14829_v22, %v4210_v20  ;;  %vm4353_vm4 = vcmp.eq.s32.totalorder %v14832_v3, %v4210_v20  ;;  %v12288_v61 = vsel %vm14908_vm10, %v14907_v46, %v14906_v51  ;;  %v4288_v21 = vcvt.f32.s32 %v11965_v27 }
 0x82d   :  { %v4230_v49 = vadd.s32 %v4229_v40, %v4227_v41  ;;  %7093 = vmatmul.mubr.msk.f32.gmra.mxu0 %vm4351_vm13, %v14853_v39  ;;  %7125 = vmatmul.mubr.msk.f32.gmra.mxu1 %vm4353_vm4, %v14853_v39  ;;  %v12280_v10 = vsel %vm14445_vm14, %v4835_v30, %v14904_v11  ;;  %vm14446_vm14 = vcmp.lt.f32.partialorder %v11576_v23, %v12288_v61  ;;  %v14912_v30 = vld [vmem:[#allocation64_spill] sm:$0xff]  ;;  %v4308_v51 = vcvt.f32.s32 %v11970_v37 }
 0x82e   :  { %14905 = vst [vmem:[#allocation79_spill] sm:$0xff] %v12280_v10  ;;  %v4246_v6 = vpop.xlane.xlu0 %4245  ;;  %vm14913_vm10 = vcmp.lt.f32.partialorder %v14912_v30, %v14911_v32 }
 0x82f   :  { %v4836_v26 = vadd.s32 1024, %v4230_v49  ;;  %v4247_v20 = vcvt.f32.s32 %v4246_v6  ;;  %vm4356_vm11 = vcmp.eq.s32.totalorder %v14830_v5, %v4230_v49  ;;  %vm4358_vm15 = vcmp.eq.s32.totalorder %v14833_v43, %v4230_v49 }
 0x830   :  { %7094 = vmatprep.mubr.msk.f32.mxu0 %vm4356_vm11, %v14853_v39  ;;  %7126 = vmatprep.mubr.msk.f32.mxu1 %vm4358_vm15, %v14853_v39  ;;  %vm4355_vm13 = vcmp.eq.s32.totalorder %v14829_v22, %v4230_v49  ;;  %vm4357_vm4 = vcmp.eq.s32.totalorder %v14832_v3, %v4230_v49  ;;  %v12312_v41 = vsel %vm14913_vm10, %v14912_v30, %v14911_v32  ;;  %v4289_v6 = vshll.u32 %v4288_v21, 16  ;;  %v14919_v21 = vld [vmem:[#allocation21_spill] sm:$0xff] }
 0x831   :  { %v4250_v45 = vadd.s32 %v4249_v15, %v4247_v20  ;;  %7095 = vmatmul.mubr.msk.f32.gmra.mxu0 %vm4355_vm13, %v14853_v39  ;;  %7127 = vmatmul.mubr.msk.f32.gmra.mxu1 %vm4357_vm4, %v14853_v39  ;;  %v12304_v40 = vsel %vm14446_vm14, %v4836_v26, %v14909_v62  ;;  %vm14447_vm14 = vcmp.lt.f32.partialorder %v11596_v52, %v12312_v41  ;;  %v14914_v15 = vld [vmem:[#allocation20_spill] sm:$0xff]  ;;  %v14916_v26 = vld [vmem:[#allocation34_spill] sm:$0xff]  ;;  %v14917_v20 = vld [vmem:[#allocation65_spill] sm:$0xff]  ;;  %v4309_v32 = vshll.u32 %v4308_v51, 16 }
 0x832   :  { %14910 = vst [vmem:[#allocation69_spill] sm:$0xff] %v12304_v40  ;;  %v4266_v55 = vpop.xlane.xlu1 %4265  ;;  %vm14918_vm10 = vcmp.lt.f32.partialorder %v14917_v20, %v14916_v26 }
 0x833   :  { %v4837_v49 = vadd.s32 1024, %v4250_v45  ;;  %v4267_v11 = vcvt.f32.s32 %v4266_v55  ;;  %vm4360_vm11 = vcmp.eq.s32.totalorder %v14830_v5, %v4250_v45  ;;  %vm4362_vm15 = vcmp.eq.s32.totalorder %v14833_v43, %v4250_v45 }
 0x834   :  { %7096 = vmatprep.mubr.msk.f32.mxu0 %vm4360_vm11, %v14853_v39  ;;  %7128 = vmatprep.mubr.msk.f32.mxu1 %vm4362_vm15, %v14853_v39  ;;  %vm4359_vm13 = vcmp.eq.s32.totalorder %v14829_v22, %v4250_v45  ;;  %vm4361_vm4 = vcmp.eq.s32.totalorder %v14832_v3, %v4250_v45  ;;  %v12336_v45 = vsel %vm14918_vm10, %v14917_v20, %v14916_v26  ;;  %v14926_v20 = vld [vmem:[#allocation36_spill] sm:$0xff] }
 0x835   :  { %v4270_v27 = vadd.s32 %v4269_v25, %v4267_v11  ;;  %7097 = vmatmul.mubr.msk.f32.gmra.mxu0 %vm4359_vm13, %v14853_v39  ;;  %7129 = vmatmul.mubr.msk.f32.gmra.mxu1 %vm4361_vm4, %v14853_v39  ;;  %v12328_v7 = vsel %vm14447_vm14, %v4837_v49, %v14914_v15  ;;  %vm4806_vm14 = vcmp.lt.f32.partialorder %v11616_v1, %v12336_v45  ;;  %v14921_v49 = vld [vmem:[#allocation35_spill] sm:$0xff]  ;;  %v14922_v11 = vld [vmem:[#allocation66_spill] sm:$0xff] }
 0x836   :  { %14915 = vst [vmem:[#allocation70_spill] sm:$0xff] %v12328_v7  ;;  %v4286_v46 = vpop.xlane.xlu0 %4285 }
 0x837   :  { %v4838_v62 = vadd.s32 1024, %v4270_v27  ;;  %v4287_v25 = vcvt.f32.s32 %v4286_v46  ;;  %vm4364_vm11 = vcmp.eq.s32.totalorder %v14830_v5, %v4270_v27  ;;  %vm4366_vm15 = vcmp.eq.s32.totalorder %v14833_v43, %v4270_v27  ;;  %v14924_v46 = vld [vmem:[#allocation38_spill] sm:$0xff] }
 0x838   :  { %7098 = vmatprep.mubr.msk.f32.mxu0 %vm4364_vm11, %v14853_v39  ;;  %7130 = vmatprep.mubr.msk.f32.mxu1 %vm4366_vm15, %v14853_v39  ;;  %vm4363_vm13 = vcmp.eq.s32.totalorder %v14829_v22, %v4270_v27  ;;  %vm4365_vm4 = vcmp.eq.s32.totalorder %v14832_v3, %v4270_v27  ;;  %v12359_v27 = vsel %vm3197_vm5, %v14922_v11, %v14921_v49  ;;  %v7971_v49 = vld [vmem:[%s14234_s0] sm:$0xff]  ;;  %v7972_v11 = vld [vmem:[%s14234_s0 + $0x8] sm:$0xff] }
 0x839   :  { %v4290_v37 = vadd.s32 %v4289_v6, %v4287_v25  ;;  %7099 = vmatmul.mubr.msk.f32.gmra.mxu0 %vm4363_vm13, %v14853_v39  ;;  %7131 = vmatmul.mubr.msk.f32.gmra.mxu1 %vm4365_vm4, %v14853_v39  ;;  %v12352_v55 = vsel %vm4806_vm14, %v4838_v62, %v14919_v21  ;;  %14923 = vst [vmem:[#allocation71_spill] sm:$0xff] %v12359_v27  ;;  %v14927_v62 = vld [vmem:[#allocation67_spill] sm:$0xff] }
 0x83a   :  { %14920 = vst [vmem:[#allocation80_spill] sm:$0xff] %v12352_v55  ;;  %v4306_v30 = vpop.xlane.xlu1 %4305  ;;  %vm14525_vm4 = vcmp.lt.f32.partialorder %v11636_v8, %v12359_v27  ;;  %v12382_v25 = vsel %vm3198_vm2, %v14927_v62, %v14926_v20  ;;  %v14929_v21 = vld [vmem:[#allocation39_spill] sm:$0xff]  ;;  %vm14947_vm2 = vcmp.lt.f32.partialorder %v11496_v12, %v12192_v36 }
 0x83b   :  { %v4839_v15 = vadd.s32 1024, %v4290_v37  ;;  %v4307_v6 = vcvt.f32.s32 %v4306_v30  ;;  %vm4368_vm10 = vcmp.eq.s32.totalorder %v14830_v5, %v4290_v37  ;;  %vm4370_vm11 = vcmp.eq.s32.totalorder %v14833_v43, %v4290_v37  ;;  %14928 = vst [vmem:[#allocation81_spill] sm:$0xff] %v12382_v25  ;;  %v7977_v20 = vld [vmem:[%s14234_s0 + $0x30] sm:$0xff]  ;;  %v7978_v62 = vld [vmem:[%s14234_s0 + $0x38] sm:$0xff] }
 0x83c   :  { %7100 = vmatprep.mubr.msk.f32.mxu0 %vm4368_vm10, %v14853_v39  ;;  %7132 = vmatprep.mubr.msk.f32.mxu1 %vm4370_vm11, %v14853_v39  ;;  %vm4367_vm15 = vcmp.eq.s32.totalorder %v14829_v22, %v4290_v37  ;;  %vm4369_vm13 = vcmp.eq.s32.totalorder %v14832_v3, %v4290_v37  ;;  %v14931_v30 = vmov 0.0  }
 0x83d   :  { %v4310_v51 = vadd.s32 %v4309_v32, %v4307_v6  ;;  %7101 = vmatmul.mubr.msk.f32.gmra.mxu0 %vm4367_vm15, %v14853_v39  ;;  %7133 = vmatmul.mubr.msk.f32.gmra.mxu1 %vm4369_vm13, %v14853_v39  ;;  %v12375_v26 = vsel %vm14525_vm4, %v4839_v15, %v14924_v46  ;;  %vm14524_vm13 = vcmp.lt.f32.partialorder %v11656_v19, %v12382_v25  ;;  %v7973_v15 = vld [vmem:[%s14234_s0 + $0x10] sm:$0xff]  ;;  %v7974_v6 = vld [vmem:[%s14234_s0 + $0x18] sm:$0xff]  ;;  %v7976_v46 = vld [vmem:[%s14234_s0 + $0x28] sm:$0xff] }
 0x83e   :  { %14925 = vst [vmem:[#allocation72_spill] sm:$0xff] %v12375_v26 }
 0x83f   :  { %v4840_v37 = vadd.s32 1024, %v4310_v51  ;;  %vm4372_vm5 = vcmp.eq.s32.totalorder %v14830_v5, %v4310_v51  ;;  %vm4374_vm10 = vcmp.eq.s32.totalorder %v14833_v43, %v4310_v51  ;;  %vm4371_vm11 = vcmp.eq.s32.totalorder %v14829_v22, %v4310_v51 }
 0x840   :  { %7102 = vmatprep.mubr.msk.f32.mxu0 %vm4372_vm5, %v14853_v39  ;;  %7134 = vmatprep.mubr.msk.f32.mxu1 %vm4374_vm10, %v14853_v39  ;;  %vm4373_vm15 = vcmp.eq.s32.totalorder %v14832_v3, %v4310_v51  ;;  %v7975_v51 = vld [vmem:[%s14234_s0 + $0x20] sm:$0xff]  ;;  %vm14950_vm5 = vcmp.lt.f32.partialorder %v11516_v29, %v12216_v31  ;;  %vm14953_vm10 = vcmp.lt.f32.partialorder %v11536_v63, %v12240_v42 }
 0x841   :  { %7103 = vmatmul.mubr.msk.f32.gmra.mxu0 %vm4371_vm11, %v14853_v39  ;;  %7135 = vmatmul.mubr.msk.f32.gmra.mxu1 %vm4373_vm15, %v14853_v39  ;;  %v12398_v32 = vsel %vm14524_vm13, %v4840_v37, %v14929_v21  ;;  %v7979_v37 = vld [vmem:[%s14234_s0 + $0x40] sm:$0xff]  ;;  %v7980_v21 = vld [vmem:[%s14234_s0 + $0x48] sm:$0xff]  ;;  %vm14956_vm11 = vcmp.lt.f32.partialorder %v11556_v56, %v12264_v38  ;;  %vm14959_vm15 = vcmp.lt.f32.partialorder %v11576_v23, %v12288_v61 }
 0x842   :  { %14930 = vst [vmem:[#allocation73_spill] sm:$0xff] %v12398_v32  ;;  %5050 = vmatprep.mubr.f32.mxu0 %v14931_v30  ;;  %5211 = vmatprep.mubr.f32.mxu1 %v14931_v30 }
 0x845   :  { %7136 = vmatmul.mubr.msk.f32.vlgmr.msra.gmra.mxu0 %vm14523_vm0, %v7971_v49  ;;  %7152 = vmatmul.mubr.msk.f32.vlgmr.msra.gmra.mxu1 %vm14523_vm0, %v7971_v49  ;;  %v7981_v49 = vld [vmem:[%s14234_s0 + $0x50] sm:$0xff] }
 0x846   :  { %5056 = vmatprep.mubr.f32.mxu0 %v14931_v30  ;;  %5217 = vmatprep.mubr.f32.mxu1 %v14931_v30 }
 0x849   :  { %7137 = vmatmul.mubr.msk.f32.gmra.mxu0 %vm14523_vm0, %v7972_v11  ;;  %7153 = vmatmul.mubr.msk.f32.gmra.mxu1 %vm14523_vm0, %v7972_v11  ;;  %v7982_v11 = vld [vmem:[%s14234_s0 + $0x58] sm:$0xff] }
 0x84a   :  { %5062 = vmatprep.mubr.f32.mxu0 %v14931_v30  ;;  %5223 = vmatprep.mubr.f32.mxu1 %v14931_v30 }
 0x84d   :  { %7138 = vmatmul.mubr.msk.f32.gmra.mxu0 %vm14523_vm0, %v7973_v15  ;;  %7154 = vmatmul.mubr.msk.f32.gmra.mxu1 %vm14523_vm0, %v7973_v15  ;;  %v7983_v15 = vld [vmem:[%s14234_s0 + $0x60] sm:$0xff] }
 0x84e   :  { %5068 = vmatprep.mubr.f32.mxu0 %v14931_v30  ;;  %5229 = vmatprep.mubr.f32.mxu1 %v14931_v30 }
 0x851   :  { %7139 = vmatmul.mubr.msk.f32.gmra.mxu0 %vm14523_vm0, %v7974_v6  ;;  %7155 = vmatmul.mubr.msk.f32.gmra.mxu1 %vm14523_vm0, %v7974_v6  ;;  %v7984_v6 = vld [vmem:[%s14234_s0 + $0x68] sm:$0xff] }
 0x852   :  { %5074 = vmatprep.mubr.f32.mxu0 %v14931_v30  ;;  %5235 = vmatprep.mubr.f32.mxu1 %v14931_v30 }
 0x855   :  { %7140 = vmatmul.mubr.msk.f32.gmra.mxu0 %vm14523_vm0, %v7975_v51  ;;  %7156 = vmatmul.mubr.msk.f32.gmra.mxu1 %vm14523_vm0, %v7975_v51  ;;  %v7985_v51 = vld [vmem:[%s14234_s0 + $0x70] sm:$0xff] }
 0x856   :  { %5080 = vmatprep.mubr.f32.mxu0 %v14931_v30  ;;  %5241 = vmatprep.mubr.f32.mxu1 %v14931_v30 }
 0x859   :  { %7141 = vmatmul.mubr.msk.f32.gmra.mxu0 %vm14523_vm0, %v7976_v46  ;;  %7157 = vmatmul.mubr.msk.f32.gmra.mxu1 %vm14523_vm0, %v7976_v46  ;;  %v7986_v46 = vld [vmem:[%s14234_s0 + $0x78] sm:$0xff] }
 0x85a   :  { %5086 = vmatprep.mubr.f32.mxu0 %v14931_v30  ;;  %5247 = vmatprep.mubr.f32.mxu1 %v14931_v30 }
 0x85d   :  { %7142 = vmatmul.mubr.msk.f32.gmra.mxu0 %vm14523_vm0, %v7977_v20  ;;  %7158 = vmatmul.mubr.msk.f32.gmra.mxu1 %vm14523_vm0, %v7977_v20 }
 0x85e   :  { %5092 = vmatprep.mubr.f32.mxu0 %v14931_v30  ;;  %5253 = vmatprep.mubr.f32.mxu1 %v14931_v30 }
 0x861   :  { %7143 = vmatmul.mubr.msk.f32.gmra.mxu0 %vm14523_vm0, %v7978_v62  ;;  %7159 = vmatmul.mubr.msk.f32.gmra.mxu1 %vm14523_vm0, %v7978_v62 }
 0x862   :  { %5098 = vmatprep.mubr.f32.mxu0 %v14931_v30  ;;  %5259 = vmatprep.mubr.f32.mxu1 %v14931_v30 }
 0x865   :  { %7144 = vmatmul.mubr.msk.f32.gmra.mxu0 %vm14523_vm0, %v7979_v37  ;;  %7160 = vmatmul.mubr.msk.f32.gmra.mxu1 %vm14523_vm0, %v7979_v37 }
 0x866   :  { %5104 = vmatprep.mubr.f32.mxu0 %v14931_v30  ;;  %5265 = vmatprep.mubr.f32.mxu1 %v14931_v30 }
 0x869   :  { %7145 = vmatmul.mubr.msk.f32.gmra.mxu0 %vm14523_vm0, %v7980_v21  ;;  %7161 = vmatmul.mubr.msk.f32.gmra.mxu1 %vm14523_vm0, %v7980_v21 }
 0x86a   :  { %5110 = vmatprep.mubr.f32.mxu0 %v14931_v30  ;;  %5271 = vmatprep.mubr.f32.mxu1 %v14931_v30 }
 0x86d   :  { %7146 = vmatmul.mubr.msk.f32.gmra.mxu0 %vm14523_vm0, %v7981_v49  ;;  %7162 = vmatmul.mubr.msk.f32.gmra.mxu1 %vm14523_vm0, %v7981_v49 }
 0x86e   :  { %5116 = vmatprep.mubr.f32.mxu0 %v14931_v30  ;;  %5277 = vmatprep.mubr.f32.mxu1 %v14931_v30 }
 0x871   :  { %7147 = vmatmul.mubr.msk.f32.gmra.mxu0 %vm14523_vm0, %v7982_v11  ;;  %7163 = vmatmul.mubr.msk.f32.gmra.mxu1 %vm14523_vm0, %v7982_v11 }
 0x872   :  { %5122 = vmatprep.mubr.f32.mxu0 %v14931_v30  ;;  %5283 = vmatprep.mubr.f32.mxu1 %v14931_v30 }
 0x875   :  { %7148 = vmatmul.mubr.msk.f32.gmra.mxu0 %vm14523_vm0, %v7983_v15  ;;  %7164 = vmatmul.mubr.msk.f32.gmra.mxu1 %vm14523_vm0, %v7983_v15 }
 0x876   :  { %5128 = vmatprep.mubr.f32.mxu0 %v14931_v30  ;;  %5289 = vmatprep.mubr.f32.mxu1 %v14931_v30 }
 0x879   :  { %7149 = vmatmul.mubr.msk.f32.gmra.mxu0 %vm14523_vm0, %v7984_v6  ;;  %7165 = vmatmul.mubr.msk.f32.gmra.mxu1 %vm14523_vm0, %v7984_v6 }
 0x87a   :  { %5134 = vmatprep.mubr.f32.mxu0 %v14931_v30  ;;  %5295 = vmatprep.mubr.f32.mxu1 %v14931_v30 }
 0x87d   :  { %7150 = vmatmul.mubr.msk.f32.gmra.mxu0 %vm14523_vm0, %v7985_v51  ;;  %7166 = vmatmul.mubr.msk.f32.gmra.mxu1 %vm14523_vm0, %v7985_v51 }
 0x87e   :  { %5140 = vmatprep.mubr.f32.mxu0 %v14931_v30  ;;  %5301 = vmatprep.mubr.f32.mxu1 %v14931_v30  ;;  %v14932_v30 = vld [vmem:[#allocation37_spill] sm:$0xff] }
 0x881   :  { %7151 = vmatmul.mubr.msk.f32.gmra.mxu0 %vm14523_vm0, %v7986_v46  ;;  %7167 = vmatmul.mubr.msk.f32.gmra.mxu1 %vm14523_vm0, %v7986_v46 }
 0x8c4   :  { %v7648_v20 = vpop.f32.mrf.mxu0  ;;  %v7728_v62 = vpop.f32.mrf.mxu1 }
 0x8c6   :  { %v7649_v37 = vpop.f32.mrf.mxu0  ;;  %v7729_v21 = vpop.f32.mrf.mxu1 }
 0x8c7   :  { %v7650_v49 = vadd.f32 %v7649_v37, %v7648_v20  ;;  %v7730_v11 = vadd.f32 %v7729_v21, %v7728_v62 }
 0x8c8   :  { %v7651_v15 = vpop.f32.mrf.mxu0  ;;  %v7731_v6 = vpop.f32.mrf.mxu1 }
 0x8c9   :  { %v4715_v51 = vadd.f32 %v7730_v11, %v7650_v49 }
 0x8ca   :  { %v7652_v32 = vpop.f32.mrf.mxu0  ;;  %v7732_v26 = vpop.f32.mrf.mxu1 }
 0x8cb   :  { %v12516_v55 = vsel %vm4793_vm7, %v4715_v51, %v14932_v30  ;;  %v7653_v7 = vadd.f32 %v7652_v32, %v7651_v15  ;;  %v7733_v40 = vadd.f32 %v7732_v26, %v7731_v6  ;;  %v14936_v32 = vld [vmem:[#allocation10_spill] sm:$0xff] }
 0x8cc   :  { %14933 = vst [vmem:[#allocation74_spill] sm:$0xff] %v12516_v55 }
 0x8cd   :  { %v4720_v46 = vadd.f32 %v7733_v40, %v7653_v7  ;;  %v7654_v10 = vpop.f32.mrf.mxu0  ;;  %v7734_v44 = vpop.f32.mrf.mxu1 }
 0x8cf   :  { %v12522_v20 = vsel %vm4794_vm9, %v4720_v46, %v14934_v0  ;;  %v7655_v62 = vpop.f32.mrf.mxu0  ;;  %v7735_v37 = vpop.f32.mrf.mxu1 }
 0x8d0   :  { %14935 = vst [vmem:[#allocation82_spill] sm:$0xff] %v12522_v20  ;;  %v7656_v21 = vadd.f32 %v7655_v62, %v7654_v10  ;;  %v7736_v49 = vadd.f32 %v7735_v37, %v7734_v44  ;;  %v14938_v10 = vld [vmem:[#allocation41_spill] sm:$0xff] }
 0x8d1   :  { %v7657_v11 = vpop.f32.mrf.mxu0  ;;  %v7737_v60 = vpop.f32.mrf.mxu1 }
 0x8d2   :  { %v4725_v50 = vadd.f32 %v7736_v49, %v7656_v21 }
 0x8d3   :  { %v7658_v51 = vpop.f32.mrf.mxu0  ;;  %v7738_v30 = vpop.f32.mrf.mxu1 }
 0x8d4   :  { %v12528_v40 = vsel %vm4795_vm12, %v4725_v50, %v14936_v32  ;;  %v7659_v7 = vadd.f32 %v7658_v51, %v7657_v11  ;;  %v7739_v26 = vadd.f32 %v7738_v30, %v7737_v60  ;;  %v14940_v11 = vld [vmem:[#allocation11_spill] sm:$0xff] }
 0x8d5   :  { %14937 = vst [vmem:[#allocation75_spill] sm:$0xff] %v12528_v40  ;;  %v7660_v15 = vpop.f32.mrf.mxu0  ;;  %v7740_v0 = vpop.f32.mrf.mxu1 }
 0x8d6   :  { %v4730_v6 = vadd.f32 %v7739_v26, %v7659_v7 }
 0x8d7   :  { %v7661_v46 = vpop.f32.mrf.mxu0  ;;  %v7741_v20 = vpop.f32.mrf.mxu1 }
 0x8d8   :  { %v12534_v44 = vsel %vm4796_vm8, %v4730_v6, %v14938_v10  ;;  %v7662_v62 = vadd.f32 %v7661_v46, %v7660_v15  ;;  %v7742_v37 = vadd.f32 %v7741_v20, %v7740_v0  ;;  %v14942_v15 = vld [vmem:[#allocation42_spill] sm:$0xff] }
 0x8d9   :  { %14939 = vst [vmem:[#allocation76_spill] sm:$0xff] %v12534_v44  ;;  %v7663_v21 = vpop.f32.mrf.mxu0  ;;  %v7743_v49 = vpop.f32.mrf.mxu1 }
 0x8da   :  { %v4735_v55 = vadd.f32 %v7742_v37, %v7662_v62 }
 0x8db   :  { %v7664_v50 = vpop.f32.mrf.mxu0  ;;  %v7744_v32 = vpop.f32.mrf.mxu1 }
 0x8dc   :  { %v12540_v60 = vsel %vm4797_vm6, %v4735_v55, %v14940_v11  ;;  %v7665_v51 = vadd.f32 %v7664_v50, %v7663_v21  ;;  %v7745_v30 = vadd.f32 %v7744_v32, %v7743_v49  ;;  %v14944_v21 = vld [vmem:[#allocation12_spill] sm:$0xff] }
 0x8dd   :  { %14941 = vst [vmem:[#allocation83_spill] sm:$0xff] %v12540_v60  ;;  %v7666_v7 = vpop.f32.mrf.mxu0  ;;  %v7746_v26 = vpop.f32.mrf.mxu1 }
 0x8de   :  { %v4740_v40 = vadd.f32 %v7745_v30, %v7665_v51 }
 0x8df   :  { %v7667_v6 = vpop.f32.mrf.mxu0  ;;  %v7747_v10 = vpop.f32.mrf.mxu1 }
 0x8e0   :  { %v12546_v20 = vsel %vm4798_vm1, %v4740_v40, %v14942_v15  ;;  %v7668_v0 = vadd.f32 %v7667_v6, %v7666_v7  ;;  %v7748_v46 = vadd.f32 %v7747_v10, %v7746_v26  ;;  %v14946_v7 = vld [vmem:[#allocation43_spill] sm:$0xff] }
 0x8e1   :  { %14943 = vst [vmem:[#allocation77_spill] sm:$0xff] %v12546_v20  ;;  %v7669_v62 = vpop.f32.mrf.mxu0  ;;  %v7749_v37 = vpop.f32.mrf.mxu1 }
 0x8e2   :  { %v4745_v44 = vadd.f32 %v7748_v46, %v7668_v0 }
 0x8e3   :  { %v7670_v55 = vpop.f32.mrf.mxu0  ;;  %v7750_v11 = vpop.f32.mrf.mxu1 }
 0x8e4   :  { %v12552_v49 = vsel %vm4799_vm3, %v4745_v44, %v14944_v21  ;;  %v7671_v50 = vadd.f32 %v7670_v55, %v7669_v62  ;;  %v7751_v32 = vadd.f32 %v7750_v11, %v7749_v37  ;;  %v14949_v62 = vld [vmem:[#allocation14_spill] sm:$0xff] }
 0x8e5   :  { %14945 = vst [vmem:[#allocation78_spill] sm:$0xff] %v12552_v49  ;;  %v7672_v51 = vpop.f32.mrf.mxu0  ;;  %v7752_v30 = vpop.f32.mrf.mxu1 }
 0x8e6   :  { %v4750_v60 = vadd.f32 %v7751_v32, %v7671_v50 }
 0x8e7   :  { %v7673_v40 = vpop.f32.mrf.mxu0  ;;  %v7753_v15 = vpop.f32.mrf.mxu1 }
 0x8e8   :  { %v12558_v26 = vsel %vm14947_vm2, %v4750_v60, %v14946_v7  ;;  %v7674_v6 = vadd.f32 %v7673_v40, %v7672_v51  ;;  %v7754_v10 = vadd.f32 %v7753_v15, %v7752_v30  ;;  %v14952_v51 = vld [vmem:[#allocation44_spill] sm:$0xff]  ;;  %vm14962_vm2 = vcmp.lt.f32.partialorder %v11596_v52, %v12312_v41 }
 0x8e9   :  { %14948 = vst [vmem:[#allocation84_spill] sm:$0xff] %v12558_v26  ;;  %v7675_v0 = vpop.f32.mrf.mxu0  ;;  %v7755_v46 = vpop.f32.mrf.mxu1 }
 0x8ea   :  { %v4755_v20 = vadd.f32 %v7754_v10, %v7674_v6 }
 0x8eb   :  { %v7676_v44 = vpop.f32.mrf.mxu0  ;;  %v7756_v21 = vpop.f32.mrf.mxu1 }
 0x8ec   :  { %v12564_v37 = vsel %vm14950_vm5, %v4755_v20, %v14949_v62  ;;  %v7677_v55 = vadd.f32 %v7676_v44, %v7675_v0  ;;  %v7757_v11 = vadd.f32 %v7756_v21, %v7755_v46  ;;  %v14955_v0 = vld [vmem:[#allocation45_spill] sm:$0xff] }
 0x8ed   :  { %14951 = vst [vmem:[#allocation24_spill] sm:$0xff] %v12564_v37  ;;  %v7678_v50 = vpop.f32.mrf.mxu0  ;;  %v7758_v32 = vpop.f32.mrf.mxu1 }
 0x8ee   :  { %v4760_v49 = vadd.f32 %v7757_v11, %v7677_v55 }
 0x8ef   :  { %v7679_v60 = vpop.f32.mrf.mxu0  ;;  %v7759_v7 = vpop.f32.mrf.mxu1 }
 0x8f0   :  { %v12570_v30 = vsel %vm14953_vm10, %v4760_v49, %v14952_v51  ;;  %v7680_v40 = vadd.f32 %v7679_v60, %v7678_v50  ;;  %v7760_v15 = vadd.f32 %v7759_v7, %v7758_v32  ;;  %v14958_v50 = vld [vmem:[#allocation46_spill] sm:$0xff] }
 0x8f1   :  { %14954 = vst [vmem:[#allocation13_spill] sm:$0xff] %v12570_v30  ;;  %v7681_v6 = vpop.f32.mrf.mxu0  ;;  %v7761_v10 = vpop.f32.mrf.mxu1 }
 0x8f2   :  { %v4765_v26 = vadd.f32 %v7760_v15, %v7680_v40 }
 0x8f3   :  { %v7682_v20 = vpop.f32.mrf.mxu0  ;;  %v7762_v62 = vpop.f32.mrf.mxu1 }
 0x8f4   :  { %v12576_v46 = vsel %vm14956_vm11, %v4765_v26, %v14955_v0  ;;  %v7683_v44 = vadd.f32 %v7682_v20, %v7681_v6  ;;  %v7763_v21 = vadd.f32 %v7762_v62, %v7761_v10  ;;  %v14961_v6 = vld [vmem:[#allocation47_spill] sm:$0xff] }
 0x8f5   :  { %14957 = vst [vmem:[#allocation85_spill] sm:$0xff] %v12576_v46  ;;  %v7684_v55 = vpop.f32.mrf.mxu0  ;;  %v7764_v11 = vpop.f32.mrf.mxu1 }
 0x8f6   :  { %v4770_v37 = vadd.f32 %v7763_v21, %v7683_v44 }
 0x8f7   :  { %v7685_v49 = vpop.f32.mrf.mxu0  ;;  %v7765_v51 = vpop.f32.mrf.mxu1 }
 0x8f8   :  { %v12582_v32 = vsel %vm14959_vm15, %v4770_v37, %v14958_v50  ;;  %v7686_v60 = vadd.f32 %v7685_v49, %v7684_v55  ;;  %v7766_v7 = vadd.f32 %v7765_v51, %v7764_v11  ;;  %v14964_v55 = vld [vmem:[#allocation48_spill] sm:$0xff] }
 0x8f9   :  { %14960 = vst [vmem:[#allocation27_spill] sm:$0xff] %v12582_v32  ;;  %v7687_v40 = vpop.f32.mrf.mxu0  ;;  %v7767_v15 = vpop.f32.mrf.mxu1  ;;  %v14971_v32 = vld [vmem:[#allocation9_spill] sm:$0xff] }
 0x8fa   :  { %v4775_v30 = vadd.f32 %v7766_v7, %v7686_v60 }
 0x8fb   :  { %v7688_v26 = vpop.f32.mrf.mxu0  ;;  %v7768_v0 = vpop.f32.mrf.mxu1 }
 0x8fc   :  { %v12588_v10 = vsel %vm14962_vm2, %v4775_v30, %v14961_v6  ;;  %v7689_v20 = vadd.f32 %v7688_v26, %v7687_v40  ;;  %v7769_v62 = vadd.f32 %v7768_v0, %v7767_v15  ;;  %v4985_v30 = vld [vmem:[%s14237_s3 + $0xc] sm:$0xf] }
 0x8fd   :  { %14963 = vst [vmem:[#allocation15_spill] sm:$0xff] %v12588_v10  ;;  %v7690_v44 = vpop.f32.mrf.mxu0  ;;  %v7770_v21 = vpop.f32.mrf.mxu1  ;;  %v14966_v0 = vld [vmem:[#allocation6_spill] sm:$0xff]  ;;  %v14968_v10 = vld [vmem:[#allocation49_spill] sm:$0xff]  ;;  %v12615_v59 = vrot.slane %v4985_v30, %v14971_v32 }
 0x8fe   :  { %v4780_v46 = vadd.f32 %v7769_v62, %v7689_v20  ;;  %v12600_v6 = vrot.slane %v4985_v30, %v14966_v0  ;;  %v14967_v20 = vld [vmem:[#allocation7_spill] sm:$0xff] }
 0x8ff   :  { %v7691_v37 = vpop.f32.mrf.mxu0  ;;  %v7771_v50 = vpop.f32.mrf.mxu1  ;;  %v12603_v62 = vrot.slane %v4985_v30, %v14967_v20  ;;  %v14972_v20 = vld [vmem:[#allocation50_spill] sm:$0xff] }
 0x900   :  { %v12594_v11 = vsel %vm4806_vm14, %v4780_v46, %v14964_v55  ;;  %v7692_v49 = vadd.f32 %v7691_v37, %v7690_v44  ;;  %v7772_v51 = vadd.f32 %v7771_v50, %v7770_v21  ;;  %v14970_v37 = vld [vmem:[#allocation8_spill] sm:$0xff] }
 0x901   :  { %14965 = vst [vmem:[#allocation86_spill] sm:$0xff] %v12594_v11  ;;  %v7693_v60 = vpop.f32.mrf.mxu0  ;;  %v7773_v7 = vpop.f32.mrf.mxu1  ;;  %v12612_v50 = vrot.slane %v4985_v30, %v14970_v37 }
 0x902   :  { %v4785_v40 = vadd.f32 %v7772_v51, %v7692_v49 }
 0x903   :  { %v7694_v15 = vpop.f32.mrf.mxu0  ;;  %v7774_v26 = vpop.f32.mrf.mxu1 }
 0x904   :  { %v12609_v46 = vsel %vm14525_vm4, %v4785_v40, %v14968_v10  ;;  %v7695_v44 = vadd.f32 %v7694_v15, %v7693_v60  ;;  %v7775_v21 = vadd.f32 %v7774_v26, %v7773_v7 }
 0x905   :  { %14969 = vst [vmem:[#allocation28_spill] sm:$0xff] %v12609_v46  ;;  %v5052_v55 = vpop.f32.mrf.mxu0  ;;  %v5213_v49 = vpop.f32.mrf.mxu1 }
 0x906   :  { %v4790_v51 = vadd.f32 %v7775_v21, %v7695_v44  ;;  %v12624_v10 = vsub.f32 %v12600_v6, %v5052_v55  ;;  %v12630_v7 = vsub.f32 %v12612_v50, %v5213_v49 }
 0x907   :  { %v5054_v11 = vpop.f32.mrf.mxu0  ;;  %v5215_v0 = vpop.f32.mrf.mxu1 }
 0x908   :  { %v12621_v8 = vsel %vm14524_vm13, %v4790_v51, %v14972_v20  ;;  %v12627_v60 = vsub.f32 %v12603_v62, %v5054_v11  ;;  %v12635_v30 = vsub.f32 %v12615_v59, %v5215_v0 }
 0x909   :  { %14973 = vst [vmem:[#allocation29_spill] sm:$0xff] %v12621_v8  ;;  %v5058_v40 = vpop.f32.mrf.mxu0  ;;  %v5219_v15 = vpop.f32.mrf.mxu1 }
 0x90a   :  { %v5393_v32 = vmin.f32 %v12624_v10, %v12627_v60  ;;  %v12639_v37 = vsub.f32 %v12600_v6, %v5058_v40  ;;  %v12645_v55 = vsub.f32 %v12612_v50, %v5219_v15 }
 0x90b   :  { %v5060_v26 = vpop.f32.mrf.mxu0  ;;  %v5221_v44 = vpop.f32.mrf.mxu1 }
 0x90c   :  { %v5394_v21 = vmin.f32 %v5393_v32, %v12630_v7  ;;  %v12642_v11 = vsub.f32 %v12603_v62, %v5060_v26  ;;  %v12651_v8 = vsub.f32 %v12615_v59, %v5221_v44 }
 0x90d   :  { %v5064_v49 = vpop.f32.mrf.mxu0  ;;  %v5225_v51 = vpop.f32.mrf.mxu1 }
 0x90e   :  { %v5395_v20 = vmin.f32 %v5394_v21, %v12635_v30  ;;  %v5398_v0 = vmin.f32 %v12639_v37, %v12642_v11  ;;  %v12655_v26 = vsub.f32 %v12600_v6, %v5064_v49  ;;  %v12661_v19 = vsub.f32 %v12612_v50, %v5225_v51 }
 0x90f   :  { %v5066_v32 = vpop.f32.mrf.mxu0  ;;  %v5227_v46 = vpop.f32.mrf.mxu1 }
 0x910   :  { %v5399_v40 = vmin.f32 %v5398_v0, %v12645_v55  ;;  %v12658_v15 = vsub.f32 %v12603_v62, %v5066_v32  ;;  %5396 = vmin.xlane.f32.xlu0 %v5395_v20  ;;  %v12667_v14 = vsub.f32 %v12615_v59, %v5227_v46 }
 0x911   :  { %v5070_v21 = vpop.f32.mrf.mxu0  ;;  %v5231_v25 = vpop.f32.mrf.mxu1 }
 0x912   :  { %v5400_v27 = vmin.f32 %v5399_v40, %v12651_v8  ;;  %v5403_v44 = vmin.f32 %v12655_v26, %v12658_v15  ;;  %v12671_v32 = vsub.f32 %v12600_v6, %v5070_v21  ;;  %v12677_v20 = vsub.f32 %v12612_v50, %v5231_v25 }
 0x913   :  { %v5072_v0 = vpop.f32.mrf.mxu0  ;;  %v5233_v49 = vpop.f32.mrf.mxu1 }
 0x914   :  { %v5404_v53 = vmin.f32 %v5403_v44, %v12661_v19  ;;  %v12674_v51 = vsub.f32 %v12603_v62, %v5072_v0  ;;  %5401 = vmin.xlane.f32.xlu1 %v5400_v27  ;;  %v12683_v18 = vsub.f32 %v12615_v59, %v5233_v49 }
 0x915   :  { %v5076_v40 = vpop.f32.mrf.mxu0  ;;  %v5237_v57 = vpop.f32.mrf.mxu1 }
 0x916   :  { %v5405_v35 = vmin.f32 %v5404_v53, %v12667_v14  ;;  %v5408_v46 = vmin.f32 %v12671_v32, %v12674_v51  ;;  %v12687_v0 = vsub.f32 %v12600_v6, %v5076_v40  ;;  %v12693_v27 = vsub.f32 %v12612_v50, %v5237_v57 }
 0x917   :  { %v5078_v44 = vpop.f32.mrf.mxu0  ;;  %v5239_v21 = vpop.f32.mrf.mxu1 }
 0x918   :  { %v5409_v16 = vmin.f32 %v5408_v46, %v12677_v20  ;;  %v12690_v25 = vsub.f32 %v12603_v62, %v5078_v44  ;;  %14975 = vst [vmem:[#allocation16_spill] sm:$0xff] %v12693_v27  ;;  %5406 = vmin.xlane.f32.xlu0 %v5405_v35  ;;  %v12699_v24 = vsub.f32 %v12615_v59, %v5239_v21 }
 0x919   :  { %v5082_v53 = vpop.f32.mrf.mxu0  ;;  %v5243_v58 = vpop.f32.mrf.mxu1 }
 0x91a   :  { %14974 = vst [vmem:[#allocation87_spill] sm:$0xff] %v12690_v25  ;;  %v5410_v13 = vmin.f32 %v5409_v16, %v12683_v18  ;;  %v5413_v49 = vmin.f32 %v12687_v0, %v12690_v25  ;;  %14976 = vst [vmem:[#allocation30_spill] sm:$0xff] %v12699_v24  ;;  %v12703_v44 = vsub.f32 %v12600_v6, %v5082_v53 }
 0x91b   :  { %v5084_v46 = vpop.f32.mrf.mxu0  ;;  %v5245_v40 = vpop.f32.mrf.mxu1  ;;  %v12709_v35 = vsub.f32 %v12612_v50, %v5243_v58 }
 0x91c   :  { %v5414_v47 = vmin.f32 %v5413_v49, %v12693_v27  ;;  %14977 = vst [vmem:[#allocation88_spill] sm:$0xff] %v12703_v44  ;;  %v12706_v57 = vsub.f32 %v12603_v62, %v5084_v46  ;;  %5411 = vmin.xlane.f32.xlu1 %v5410_v13  ;;  %v12715_v25 = vsub.f32 %v12615_v59, %v5245_v40 }
 0x91d   :  { %14979 = vst [vmem:[#allocation31_spill] sm:$0xff] %v12709_v35  ;;  %v5088_v16 = vpop.f32.mrf.mxu0  ;;  %v5249_v28 = vpop.f32.mrf.mxu1 }
 0x91e   :  { %14978 = vst [vmem:[#allocation18_spill] sm:$0xff] %v12706_v57  ;;  %v5415_v39 = vmin.f32 %v5414_v47, %v12699_v24  ;;  %v5418_v21 = vmin.f32 %v12703_v44, %v12706_v57  ;;  %14980 = vst [vmem:[#allocation62_spill] sm:$0xff] %v12715_v25  ;;  %v12719_v46 = vsub.f32 %v12600_v6, %v5088_v16 }
 0x91f   :  { %v5090_v49 = vpop.f32.mrf.mxu0  ;;  %v5251_v53 = vpop.f32.mrf.mxu1  ;;  %v12725_v13 = vsub.f32 %v12612_v50, %v5249_v28 }
 0x920   :  { %v5419_v27 = vmin.f32 %v5418_v21, %v12709_v35  ;;  %14981 = vst [vmem:[#allocation17_spill] sm:$0xff] %v12719_v46  ;;  %v12722_v58 = vsub.f32 %v12603_v62, %v5090_v49  ;;  %5416 = vmin.xlane.f32.xlu0 %v5415_v39  ;;  %v12731_v44 = vsub.f32 %v12615_v59, %v5251_v53 }
 0x921   :  { %14983 = vst [vmem:[#allocation63_spill] sm:$0xff] %v12725_v13  ;;  %v5094_v47 = vpop.f32.mrf.mxu0  ;;  %v5255_v24 = vpop.f32.mrf.mxu1 }
 0x922   :  { %14982 = vst [vmem:[#allocation32_spill] sm:$0xff] %v12722_v58  ;;  %v5420_v57 = vmin.f32 %v5419_v27, %v12715_v25  ;;  %v5423_v40 = vmin.f32 %v12719_v46, %v12722_v58  ;;  %14984 = vst [vmem:[#allocation19_spill] sm:$0xff] %v12731_v44  ;;  %v12735_v49 = vsub.f32 %v12600_v6, %v5094_v47 }
 0x923   :  { %v5096_v21 = vpop.f32.mrf.mxu0  ;;  %v5257_v16 = vpop.f32.mrf.mxu1  ;;  %v12741_v39 = vsub.f32 %v12612_v50, %v5255_v24 }
 0x924   :  { %v5424_v35 = vmin.f32 %v5423_v40, %v12725_v13  ;;  %14985 = vst [vmem:[#allocation33_spill] sm:$0xff] %v12735_v49  ;;  %v12738_v28 = vsub.f32 %v12603_v62, %v5096_v21  ;;  %5421 = vmin.xlane.f32.xlu1 %v5420_v57  ;;  %v12747_v46 = vsub.f32 %v12615_v59, %v5257_v16 }
 0x925   :  { %14987 = vst [vmem:[#allocation20_spill] sm:$0xff] %v12741_v39  ;;  %v5100_v27 = vpop.f32.mrf.mxu0  ;;  %v5261_v25 = vpop.f32.mrf.mxu1 }
 0x926   :  { %14986 = vst [vmem:[#allocation64_spill] sm:$0xff] %v12738_v28  ;;  %v5425_v58 = vmin.f32 %v5424_v35, %v12731_v44  ;;  %v5428_v53 = vmin.f32 %v12735_v49, %v12738_v28  ;;  %14988 = vst [vmem:[#allocation34_spill] sm:$0xff] %v12747_v46  ;;  %v12751_v21 = vsub.f32 %v12600_v6, %v5100_v27 }
 0x927   :  { %v5102_v40 = vpop.f32.mrf.mxu0  ;;  %v5263_v47 = vpop.f32.mrf.mxu1  ;;  %v12757_v57 = vsub.f32 %v12612_v50, %v5261_v25 }
 0x928   :  { %v5429_v13 = vmin.f32 %v5428_v53, %v12741_v39  ;;  %14989 = vst [vmem:[#allocation65_spill] sm:$0xff] %v12751_v21  ;;  %v12754_v24 = vsub.f32 %v12603_v62, %v5102_v40  ;;  %5426 = vmin.xlane.f32.xlu0 %v5425_v58  ;;  %v12763_v49 = vsub.f32 %v12615_v59, %v5263_v47 }
 0x929   :  { %14991 = vst [vmem:[#allocation35_spill] sm:$0xff] %v12757_v57  ;;  %v5106_v35 = vpop.f32.mrf.mxu0  ;;  %v5267_v44 = vpop.f32.mrf.mxu1 }
 0x92a   :  { %14990 = vst [vmem:[#allocation21_spill] sm:$0xff] %v12754_v24  ;;  %v5430_v28 = vmin.f32 %v5429_v13, %v12747_v46  ;;  %v5433_v16 = vmin.f32 %v12751_v21, %v12754_v24  ;;  %14992 = vst [vmem:[#allocation66_spill] sm:$0xff] %v12763_v49  ;;  %v12767_v40 = vsub.f32 %v12600_v6, %v5106_v35 }
 0x92b   :  { %v5108_v53 = vpop.f32.mrf.mxu0  ;;  %v5269_v27 = vpop.f32.mrf.mxu1  ;;  %v12773_v58 = vsub.f32 %v12612_v50, %v5267_v44 }
 0x92c   :  { %v5434_v39 = vmin.f32 %v5433_v16, %v12757_v57  ;;  %14993 = vst [vmem:[#allocation38_spill] sm:$0xff] %v12767_v40  ;;  %v12770_v25 = vsub.f32 %v12603_v62, %v5108_v53  ;;  %5431 = vmin.xlane.f32.xlu1 %v5430_v28  ;;  %v12779_v21 = vsub.f32 %v12615_v59, %v5269_v27 }
 0x92d   :  { %14995 = vst [vmem:[#allocation67_spill] sm:$0xff] %v12773_v58  ;;  %v5112_v13 = vpop.f32.mrf.mxu0  ;;  %v5273_v46 = vpop.f32.mrf.mxu1 }
 0x92e   :  { %14994 = vst [vmem:[#allocation36_spill] sm:$0xff] %v12770_v25  ;;  %v5435_v24 = vmin.f32 %v5434_v39, %v12763_v49  ;;  %v5438_v47 = vmin.f32 %v12767_v40, %v12770_v25  ;;  %14996 = vst [vmem:[#allocation39_spill] sm:$0xff] %v12779_v21  ;;  %v12783_v53 = vsub.f32 %v12600_v6, %v5112_v13 }
 0x92f   :  { %v5114_v16 = vpop.f32.mrf.mxu0  ;;  %v5275_v35 = vpop.f32.mrf.mxu1  ;;  %v12789_v28 = vsub.f32 %v12612_v50, %v5273_v46 }
 0x930   :  { %v5439_v57 = vmin.f32 %v5438_v47, %v12773_v58  ;;  %14997 = vst [vmem:[#allocation37_spill] sm:$0xff] %v12783_v53  ;;  %v12786_v44 = vsub.f32 %v12603_v62, %v5114_v16  ;;  %5436 = vmin.xlane.f32.xlu0 %v5435_v24  ;;  %v12795_v40 = vsub.f32 %v12615_v59, %v5275_v35 }
 0x931   :  { %14999 = vst [vmem:[#allocation10_spill] sm:$0xff] %v12789_v28  ;;  %v5118_v39 = vpop.f32.mrf.mxu0  ;;  %v5279_v49 = vpop.f32.mrf.mxu1 }
 0x932   :  { %14998 = vst [vmem:[#allocation40_spill] sm:$0xff] %v12786_v44  ;;  %v5440_v25 = vmin.f32 %v5439_v57, %v12779_v21  ;;  %v5443_v27 = vmin.f32 %v12783_v53, %v12786_v44  ;;  %15000 = vst [vmem:[#allocation41_spill] sm:$0xff] %v12795_v40  ;;  %v12799_v16 = vsub.f32 %v12600_v6, %v5118_v39 }
 0x933   :  { %v5120_v47 = vpop.f32.mrf.mxu0  ;;  %v5281_v13 = vpop.f32.mrf.mxu1  ;;  %v12805_v24 = vsub.f32 %v12612_v50, %v5279_v49 }
 0x934   :  { %v5444_v58 = vmin.f32 %v5443_v27, %v12789_v28  ;;  %15001 = vst [vmem:[#allocation11_spill] sm:$0xff] %v12799_v16  ;;  %v12802_v46 = vsub.f32 %v12603_v62, %v5120_v47  ;;  %5441 = vmin.xlane.f32.xlu1 %v5440_v25  ;;  %v12811_v53 = vsub.f32 %v12615_v59, %v5281_v13 }
 0x935   :  { %15003 = vst [vmem:[#allocation12_spill] sm:$0xff] %v12805_v24  ;;  %v5124_v57 = vpop.f32.mrf.mxu0  ;;  %v5285_v21 = vpop.f32.mrf.mxu1 }
 0x936   :  { %15002 = vst [vmem:[#allocation42_spill] sm:$0xff] %v12802_v46  ;;  %v5445_v44 = vmin.f32 %v5444_v58, %v12795_v40  ;;  %v5448_v35 = vmin.f32 %v12799_v16, %v12802_v46  ;;  %15004 = vst [vmem:[#allocation43_spill] sm:$0xff] %v12811_v53  ;;  %v12815_v47 = vsub.f32 %v12600_v6, %v5124_v57 }
 0x937   :  { %v5126_v27 = vpop.f32.mrf.mxu0  ;;  %v5287_v39 = vpop.f32.mrf.mxu1  ;;  %v12821_v25 = vsub.f32 %v12612_v50, %v5285_v21 }
 0x938   :  { %v5449_v28 = vmin.f32 %v5448_v35, %v12805_v24  ;;  %15005 = vst [vmem:[#allocation14_spill] sm:$0xff] %v12815_v47  ;;  %v12818_v49 = vsub.f32 %v12603_v62, %v5126_v27  ;;  %5446 = vmin.xlane.f32.xlu0 %v5445_v44  ;;  %v12827_v16 = vsub.f32 %v12615_v59, %v5287_v39 }
 0x939   :  { %15007 = vst [vmem:[#allocation45_spill] sm:$0xff] %v12821_v25  ;;  %v5130_v58 = vpop.f32.mrf.mxu0  ;;  %v5291_v40 = vpop.f32.mrf.mxu1 }
 0x93a   :  { %15006 = vst [vmem:[#allocation44_spill] sm:$0xff] %v12818_v49  ;;  %v5450_v46 = vmin.f32 %v5449_v28, %v12811_v53  ;;  %v5453_v13 = vmin.f32 %v12815_v47, %v12818_v49  ;;  %15008 = vst [vmem:[#allocation46_spill] sm:$0xff] %v12827_v16  ;;  %v12831_v27 = vsub.f32 %v12600_v6, %v5130_v58 }
 0x93b   :  { %v5132_v35 = vpop.f32.mrf.mxu0  ;;  %v5293_v57 = vpop.f32.mrf.mxu1  ;;  %v12837_v44 = vsub.f32 %v12612_v50, %v5291_v40 }
 0x93c   :  { %v5454_v24 = vmin.f32 %v5453_v13, %v12821_v25  ;;  %15009 = vst [vmem:[#allocation47_spill] sm:$0xff] %v12831_v27  ;;  %v12834_v21 = vsub.f32 %v12603_v62, %v5132_v35  ;;  %5451 = vmin.xlane.f32.xlu1 %v5450_v46  ;;  %v12843_v47 = vsub.f32 %v12615_v59, %v5293_v57 }
 0x93d   :  { %v5136_v28 = vpop.f32.mrf.mxu0  ;;  %v5297_v53 = vpop.f32.mrf.mxu1 }
 0x93e   :  { %15010 = vst [vmem:[#allocation48_spill] sm:$0xff] %v12834_v21  ;;  %v5455_v49 = vmin.f32 %v5454_v24, %v12827_v16  ;;  %v5458_v39 = vmin.f32 %v12831_v27, %v12834_v21  ;;  %15011 = vst [vmem:[#allocation6_spill] sm:$0xff] %v12843_v47  ;;  %v12847_v35 = vsub.f32 %v12600_v6, %v5136_v28 }
 0x93f   :  { %v5138_v13 = vpop.f32.mrf.mxu0  ;;  %v5299_v58 = vpop.f32.mrf.mxu1  ;;  %v12853_v46 = vsub.f32 %v12612_v50, %v5297_v53 }
 0x940   :  { %v5459_v25 = vmin.f32 %v5458_v39, %v12837_v44  ;;  %v12850_v40 = vsub.f32 %v12603_v62, %v5138_v13  ;;  %5456 = vmin.xlane.f32.xlu0 %v5455_v49  ;;  %v12859_v27 = vsub.f32 %v12615_v59, %v5299_v58 }
 0x941   :  { %v5142_v24 = vpop.f32.mrf.mxu0  ;;  %v5303_v16 = vpop.f32.mrf.mxu1 }
 0x942   :  { %15012 = vst [vmem:[#allocation7_spill] sm:$0xff] %v12850_v40  ;;  %v5460_v21 = vmin.f32 %v5459_v25, %v12843_v47  ;;  %v5463_v57 = vmin.f32 %v12847_v35, %v12850_v40  ;;  %v12863_v13 = vsub.f32 %v12600_v6, %v5142_v24  ;;  %v12869_v49 = vsub.f32 %v12612_v50, %v5303_v16  ;;  %v15028_v24 = vld [vmem:[#allocation16_spill] sm:$0xff] }
 0x943   :  { %v5144_v39 = vpop.f32.mrf.mxu0  ;;  %v5305_v25 = vpop.f32.mrf.mxu1  ;;  %v12886_v50 = vsel %vm4793_vm7, %v11373_v2, %v11981_v33  ;;  %v12905_v33 = vsel %vm4797_vm6, %v11438_v17, %v12120_v34 }
 0x944   :  { %v5464_v28 = vmin.f32 %v5463_v57, %v12853_v46  ;;  %v12866_v53 = vsub.f32 %v12603_v62, %v5144_v39  ;;  %5461 = vmin.xlane.f32.xlu1 %v5460_v21  ;;  %v12876_v57 = vsub.f32 %v12615_v59, %v5305_v25  ;;  %v15029_v25 = vld [vmem:[#allocation30_spill] sm:$0xff] }
 0x946   :  { %v5465_v47 = vmin.f32 %v5464_v28, %v12859_v27  ;;  %v5468_v58 = vmin.f32 %v12863_v13, %v12866_v53 }
 0x948   :  { %v5469_v40 = vmin.f32 %v5468_v58, %v12869_v49  ;;  %5466 = vmin.xlane.f32.xlu0 %v5465_v47 }
 0x94a   :  { %v5470_v6 = vmin.f32 %v5469_v40, %v12876_v57 }
 0x94c   :  { %5471 = vmin.xlane.f32.xlu1 %v5470_v6 }
 0x999   :  { %v12879_v62 = vpop.xlane.xlu0 %5396 }
 0x99a   :  { %vm5473_vm5 = vcmp.eq.f32.partialorder %v12624_v10, %v12879_v62  ;;  %vm5474_vm10 = vcmp.eq.f32.partialorder %v12627_v60, %v12879_v62  ;;  %vm6403_vm11 = vcmp.lt.f32.partialorder %v12879_v62, %v12886_v50  ;;  %vm5475_vm15 = vcmp.eq.f32.partialorder %v12630_v7, %v12879_v62 }
 0x99b   :  { %v5537_v59 = vsel %vm5473_vm5, %v14829_v22, 512  ;;  %v5538_v16 = vsel %vm5474_vm10, %v14830_v5, 512  ;;  %v12912_v10 = vsel %vm4798_vm1, %v11456_v48, %v12144_v4  ;;  %v12919_v60 = vsel %vm4799_vm3, %v11476_v54, %v12168_v9 }
 0x99c   :  { %vm5601_vm2 = vcmp.lt.s32.totalorder %v5537_v59, %v5538_v16  ;;  %15013 = vst [vmem:[#allocation49_spill] sm:$0xff] %v12919_v60  ;;  %vm15014_vm5 = vcmp.lt.f32.partialorder %v11496_v12, %v12192_v36  ;;  %vm15016_vm1 = vcmp.lt.f32.partialorder %v11516_v29, %v12216_v31  ;;  %vm5476_vm3 = vcmp.eq.f32.partialorder %v12635_v30, %v12879_v62 }
 0x99d   :  { %v12898_v47 = vpop.xlane.xlu1 %5401  ;;  %v5602_v2 = vsel %vm5601_vm2, %v5537_v59, %v5538_v16  ;;  %v12930_v17 = vsel %vm15014_vm5, %v11496_v12, %v12192_v36  ;;  %v12937_v48 = vsel %vm15016_vm1, %v11516_v29, %v12216_v31  ;;  %v5539_v54 = vsel %vm5475_vm15, %v14832_v3, 512  ;;  %v15030_v16 = vld [vmem:[#allocation88_spill] sm:$0xff] }
 0x99e   :  { %vm5477_vm7 = vcmp.eq.f32.partialorder %v12639_v37, %v12898_v47  ;;  %vm5478_vm6 = vcmp.eq.f32.partialorder %v12642_v11, %v12898_v47  ;;  %15015 = vst [vmem:[#allocation8_spill] sm:$0xff] %v12930_v17  ;;  %15017 = vst [vmem:[#allocation9_spill] sm:$0xff] %v12937_v48  ;;  %vm5479_vm10 = vcmp.eq.f32.partialorder %v12645_v55, %v12898_v47  ;;  %v15063_v17 = vld [vmem:[#allocation14_spill] sm:$0xff] }
 0x99f   :  { %v5541_v34 = vsel %vm5477_vm7, %v14829_v22, 512  ;;  %v5542_v4 = vsel %vm5478_vm6, %v14830_v5, 512  ;;  %vm5603_vm5 = vcmp.lt.s32.totalorder %v5602_v2, %v5539_v54  ;;  %vm15018_vm1 = vcmp.lt.f32.partialorder %v11536_v63, %v12240_v42 }
 0x9a0   :  { %vm5621_vm2 = vcmp.lt.s32.totalorder %v5541_v34, %v5542_v4  ;;  %v12951_v12 = vsel %vm15018_vm1, %v11536_v63, %v12240_v42  ;;  %v5604_v9 = vsel %vm5603_vm5, %v5602_v2, %v5539_v54  ;;  %vm15020_vm15 = vcmp.lt.f32.partialorder %v11556_v56, %v12264_v38  ;;  %v15031_v2 = vld [vmem:[#allocation18_spill] sm:$0xff] }
 0x9a1   :  { %15019 = vst [vmem:[#allocation50_spill] sm:$0xff] %v12951_v12  ;;  %v12953_v29 = vpop.xlane.xlu0 %5406  ;;  %v5622_v36 = vsel %vm5621_vm2, %v5541_v34, %v5542_v4  ;;  %v12960_v31 = vsel %vm15020_vm15, %v11556_v56, %v12264_v38  ;;  %vm15022_vm7 = vcmp.lt.f32.partialorder %v11576_v23, %v12288_v61  ;;  %v5540_v63 = vsel %vm5476_vm3, %v14833_v43, 512  ;;  %v15032_v4 = vld [vmem:[#allocation31_spill] sm:$0xff]  ;;  %v15055_v12 = vld [vmem:[#allocation40_spill] sm:$0xff] }
 0x9a2   :  { %15021 = vst [vmem:[#allocation91_spill] sm:$0xff] %v12960_v31  ;;  %v12967_v7 = vsel %vm15022_vm7, %v11576_v23, %v12288_v61  ;;  %vm5481_vm6 = vcmp.eq.f32.partialorder %v12655_v26, %v12953_v29  ;;  %vm5482_vm2 = vcmp.eq.f32.partialorder %v12658_v15, %v12953_v29  ;;  %vm15024_vm5 = vcmp.lt.f32.partialorder %v11596_v52, %v12312_v41  ;;  %v15060_v31 = vld [vmem:[#allocation42_spill] sm:$0xff] }
 0x9a3   :  { %15023 = vst [vmem:[#allocation92_spill] sm:$0xff] %v12967_v7  ;;  %v12979_v56 = vsel %vm15024_vm5, %v11596_v52, %v12312_v41  ;;  %vm5480_vm1 = vcmp.eq.f32.partialorder %v12651_v8, %v12898_v47  ;;  %v5543_v23 = vsel %vm5479_vm10, %v14832_v3, 512  ;;  %v5545_v42 = vsel %vm5481_vm6, %v14829_v22, 512 }
 0x9a4   :  { %15025 = vst [vmem:[#allocation93_spill] sm:$0xff] %v12979_v56  ;;  %v5546_v38 = vsel %vm5482_vm2, %v14830_v5, 512  ;;  %vm5483_vm15 = vcmp.eq.f32.partialorder %v12661_v19, %v12953_v29  ;;  %vm5605_vm7 = vcmp.lt.s32.totalorder %v5604_v9, %v5540_v63  ;;  %vm5623_vm0 = vcmp.lt.s32.totalorder %v5622_v36, %v5543_v23 }
 0x9a5   :  { %vm5641_vm3 = vcmp.lt.s32.totalorder %v5545_v42, %v5546_v38  ;;  %v12988_v61 = vpop.xlane.xlu1 %5411  ;;  %v12990_v30 = vsel %vm5605_vm7, %v5604_v9, %v5540_v63  ;;  %v5624_v52 = vsel %vm5623_vm0, %v5622_v36, %v5543_v23  ;;  %v12997_v37 = vsel %vm4806_vm14, %v11616_v1, %v12336_v45  ;;  %v15033_v23 = vld [vmem:[#allocation62_spill] sm:$0xff] }
 0x9a6   :  { %v5642_v41 = vsel %vm5641_vm3, %v5545_v42, %v5546_v38  ;;  %15026 = vst [vmem:[#allocation94_spill] sm:$0xff] %v12997_v37  ;;  %vm5484_vm10 = vcmp.eq.f32.partialorder %v12667_v14, %v12953_v29  ;;  %vm5485_vm6 = vcmp.eq.f32.partialorder %v12671_v32, %v12988_v61  ;;  %vm5486_vm2 = vcmp.eq.f32.partialorder %v12674_v51, %v12988_v61  ;;  %v15027_v51 = vld [vmem:[#allocation87_spill] sm:$0xff] }
 0x9a7   :  { %v5544_v19 = vsel %vm5480_vm1, %v14833_v43, 512  ;;  %v5547_v11 = vsel %vm5483_vm15, %v14832_v3, 512  ;;  %vm5487_vm0 = vcmp.eq.f32.partialorder %v12677_v20, %v12988_v61  ;;  %v5549_v1 = vsel %vm5485_vm6, %v14829_v22, 512 }
 0x9a8   :  { %v5550_v14 = vsel %vm5486_vm2, %v14830_v5, 512  ;;  %v5608_v45 = vshra.s32 %v12990_v30, 16  ;;  %vm5625_vm5 = vcmp.lt.s32.totalorder %v5624_v52, %v5544_v19  ;;  %vm5643_vm3 = vcmp.lt.s32.totalorder %v5642_v41, %v5547_v11 }
 0x9a9   :  { %vm5661_vm14 = vcmp.lt.s32.totalorder %v5549_v1, %v5550_v14  ;;  %vm5488_vm7 = vcmp.eq.f32.partialorder %v12683_v18, %v12988_v61  ;;  %v13017_v55 = vpop.xlane.xlu0 %5416  ;;  %v13019_v8 = vsel %vm5625_vm5, %v5624_v52, %v5544_v19  ;;  %v5548_v26 = vsel %vm5484_vm10, %v14833_v43, 512  ;;  %v15035_v19 = vld [vmem:[#allocation32_spill] sm:$0xff] }
 0x9aa   :  { %v5644_v15 = vsel %vm5643_vm3, %v5642_v41, %v5547_v11  ;;  %v13022_v32 = vcvt.s32.f32 %v5608_v45  ;;  %vm5489_vm1 = vcmp.eq.f32.partialorder %v12687_v0, %v13017_v55  ;;  %vm5490_vm15 = vcmp.eq.f32.partialorder %v15027_v51, %v13017_v55  ;;  %v15034_v41 = vld [vmem:[#allocation17_spill] sm:$0xff] }
 0x9ab   :  { %v5662_v21 = vsel %vm5661_vm14, %v5549_v1, %v5550_v14  ;;  %v5551_v40 = vsel %vm5487_vm0, %v14832_v3, 512  ;;  %vm5491_vm6 = vcmp.eq.f32.partialorder %v15028_v24, %v13017_v55  ;;  %v5553_v39 = vsel %vm5489_vm1, %v14829_v22, 512  ;;  %v15036_v14 = vld [vmem:[#allocation63_spill] sm:$0xff] }
 0x9ac   :  { %v5554_v28 = vsel %vm5490_vm15, %v14830_v5, 512  ;;  %5611 = vmin.xlane.f32.xlu0 %v13022_v32  ;;  %vm6407_vm2 = vcmp.lt.f32.partialorder %v13017_v55, %v12905_v33  ;;  %v5628_v0 = vshra.s32 %v13019_v8, 16  ;;  %vm5645_vm14 = vcmp.lt.s32.totalorder %v5644_v15, %v5548_v26 }
 0x9ad   :  { %vm5681_vm10 = vcmp.lt.s32.totalorder %v5553_v39, %v5554_v28  ;;  %vm5492_vm5 = vcmp.eq.f32.partialorder %v15029_v25, %v13017_v55  ;;  %v13042_v20 = vpop.xlane.xlu1 %5421  ;;  %v13044_v58 = vsel %vm5645_vm14, %v5644_v15, %v5548_v26  ;;  %v5552_v6 = vsel %vm5488_vm7, %v14833_v43, 512  ;;  %v15040_v25 = vld [vmem:[#allocation64_spill] sm:$0xff] }
 0x9ae   :  { %vm5663_vm0 = vcmp.lt.s32.totalorder %v5662_v21, %v5551_v40  ;;  %v13050_v59 = vcvt.s32.f32 %v5628_v0  ;;  %vm5493_vm3 = vcmp.eq.f32.partialorder %v15030_v16, %v13042_v20  ;;  %vm5494_vm1 = vcmp.eq.f32.partialorder %v15031_v2, %v13042_v20  ;;  %v15039_v0 = vld [vmem:[#allocation33_spill] sm:$0xff]  ;;  %v15041_v16 = vld [vmem:[#allocation20_spill] sm:$0xff] }
 0x9af   :  { %v5682_v54 = vsel %vm5681_vm10, %v5553_v39, %v5554_v28  ;;  %v5555_v34 = vsel %vm5491_vm6, %v14832_v3, 512  ;;  %vm5495_vm15 = vcmp.eq.f32.partialorder %v15032_v4, %v13042_v20  ;;  %v5557_v18 = vsel %vm5493_vm3, %v14829_v22, 512 }
 0x9b0   :  { %v5558_v9 = vsel %vm5494_vm1, %v14830_v5, 512  ;;  %5631 = vmin.xlane.f32.xlu1 %v13050_v59  ;;  %v5648_v36 = vshra.s32 %v13044_v58, 16  ;;  %v5664_v63 = vsel %vm5663_vm0, %v5662_v21, %v5551_v40  ;;  %vm5496_vm10 = vcmp.eq.f32.partialorder %v15033_v23, %v13042_v20  ;;  %v15037_v40 = vld [vmem:[#allocation19_spill] sm:$0xff] }
 0x9b1   :  { %vm5701_vm7 = vcmp.lt.s32.totalorder %v5557_v18, %v5558_v9  ;;  %v13070_v42 = vpop.xlane.xlu0 %5426  ;;  %vm5665_vm6 = vcmp.lt.s32.totalorder %v5664_v63, %v5552_v6  ;;  %v5556_v38 = vsel %vm5492_vm5, %v14833_v43, 512  ;;  %vm5683_vm3 = vcmp.lt.s32.totalorder %v5682_v54, %v5555_v34 }
 0x9b2   :  { %v13076_v52 = vcvt.s32.f32 %v5648_v36  ;;  %vm5497_vm1 = vcmp.eq.f32.partialorder %v15034_v41, %v13070_v42  ;;  %vm5498_vm0 = vcmp.eq.f32.partialorder %v15035_v19, %v13070_v42  ;;  %v5702_v11 = vsel %vm5701_vm7, %v5557_v18, %v5558_v9  ;;  %v15042_v9 = vld [vmem:[#allocation34_spill] sm:$0xff]  ;;  %v15044_v41 = vld [vmem:[#allocation65_spill] sm:$0xff] }
 0x9b3   :  { %v5559_v1 = vsel %vm5495_vm15, %v14832_v3, 512  ;;  %vm5499_vm13 = vcmp.eq.f32.partialorder %v15036_v14, %v13070_v42  ;;  %v5561_v45 = vsel %vm5497_vm1, %v14829_v22, 512  ;;  %v5562_v26 = vsel %vm5498_vm0, %v14830_v5, 512  ;;  %v15045_v19 = vld [vmem:[#allocation21_spill] sm:$0xff] }
 0x9b4   :  { %5651 = vmin.xlane.f32.xlu0 %v13076_v52  ;;  %v13093_v15 = vsel %vm5665_vm6, %v5664_v63, %v5552_v6  ;;  %v5684_v51 = vsel %vm5683_vm3, %v5682_v54, %v5555_v34  ;;  %v5560_v21 = vsel %vm5496_vm10, %v14833_v43, 512  ;;  %vm5500_vm15 = vcmp.eq.f32.partialorder %v15037_v40, %v13070_v42  ;;  %v15047_v40 = vld [vmem:[#allocation66_spill] sm:$0xff] }
 0x9b5   :  { %v5668_v24 = vshra.s32 %v13093_v15, 16  ;;  %v13102_v39 = vpop.xlane.xlu1 %5431  ;;  %vm5685_vm7 = vcmp.lt.s32.totalorder %v5684_v51, %v5556_v38  ;;  %vm5703_vm1 = vcmp.lt.s32.totalorder %v5702_v11, %v5559_v1  ;;  %v5563_v28 = vsel %vm5499_vm13, %v14832_v3, 512 }
 0x9b6   :  { %15038 = vst [vmem:[#allocation87_spill] sm:$0xff] %v13102_v39  ;;  %vm5721_vm0 = vcmp.lt.s32.totalorder %v5561_v45, %v5562_v26  ;;  %vm5501_vm6 = vcmp.eq.f32.partialorder %v15039_v0, %v13102_v39  ;;  %vm5502_vm3 = vcmp.eq.f32.partialorder %v15040_v25, %v13102_v39  ;;  %vm5503_vm10 = vcmp.eq.f32.partialorder %v15041_v16, %v13102_v39 }
 0x9b7   :  { %v13109_v6 = vcvt.s32.f32 %v5668_v24  ;;  %v5565_v2 = vsel %vm5501_vm6, %v14829_v22, 512  ;;  %v5566_v54 = vsel %vm5502_vm3, %v14830_v5, 512  ;;  %v13117_v34 = vsel %vm5685_vm7, %v5684_v51, %v5556_v38 }
 0x9b8   :  { %v5704_v4 = vsel %vm5703_vm1, %v5702_v11, %v5559_v1  ;;  %v5564_v18 = vsel %vm5500_vm15, %v14833_v43, 512  ;;  %vm5504_vm13 = vcmp.eq.f32.partialorder %v15042_v9, %v13102_v39  ;;  %v5688_v36 = vshra.s32 %v13117_v34, 16  ;;  %v15046_v1 = vld [vmem:[#allocation35_spill] sm:$0xff]  ;;  %v15050_v9 = vld [vmem:[#allocation36_spill] sm:$0xff]  ;;  %v15065_v39 = vld [vmem:[#allocation45_spill] sm:$0xff] }
 0x9b9   :  { %5671 = vmin.xlane.f32.xlu1 %v13109_v6  ;;  %v13127_v63 = vpop.xlane.xlu0 %5436  ;;  %vm5705_vm6 = vcmp.lt.s32.totalorder %v5704_v4, %v5560_v21  ;;  %v5722_v23 = vsel %vm5721_vm0, %v5561_v45, %v5562_v26  ;;  %v5567_v38 = vsel %vm5503_vm10, %v14832_v3, 512  ;;  %vm5741_vm7 = vcmp.lt.s32.totalorder %v5565_v2, %v5566_v54 }
 0x9ba   :  { %15043 = vst [vmem:[#allocation16_spill] sm:$0xff] %v13127_v63  ;;  %vm5505_vm1 = vcmp.eq.f32.partialorder %v15044_v41, %v13127_v63  ;;  %vm5506_vm15 = vcmp.eq.f32.partialorder %v15045_v19, %v13127_v63  ;;  %v13135_v11 = vcvt.s32.f32 %v5688_v36  ;;  %vm5507_vm3 = vcmp.eq.f32.partialorder %v15046_v1, %v13127_v63  ;;  %v15051_v41 = vld [vmem:[#allocation67_spill] sm:$0xff] }
 0x9bb   :  { %v5569_v14 = vsel %vm5505_vm1, %v14829_v22, 512  ;;  %v5570_v51 = vsel %vm5506_vm15, %v14830_v5, 512  ;;  %v13143_v45 = vsel %vm5705_vm6, %v5704_v4, %v5560_v21  ;;  %vm5723_vm10 = vcmp.lt.s32.totalorder %v5722_v23, %v5563_v28  ;;  %v15049_v4 = vld [vmem:[#allocation38_spill] sm:$0xff] }
 0x9bc   :  { %v5568_v26 = vsel %vm5504_vm13, %v14833_v43, 512  ;;  %5691 = vmin.xlane.f32.xlu0 %v13135_v11  ;;  %vm5508_vm4 = vcmp.eq.f32.partialorder %v15047_v40, %v13127_v63  ;;  %v5708_v24 = vshra.s32 %v13143_v45, 16  ;;  %v5724_v25 = vsel %vm5723_vm10, %v5722_v23, %v5563_v28 }
 0x9bd   :  { %v13153_v0 = vpop.xlane.xlu1 %5441  ;;  %v5742_v16 = vsel %vm5741_vm7, %v5565_v2, %v5566_v54  ;;  %v5571_v21 = vsel %vm5507_vm3, %v14832_v3, 512  ;;  %vm5761_vm6 = vcmp.lt.s32.totalorder %v5569_v14, %v5570_v51  ;;  %v15052_v2 = vld [vmem:[#allocation39_spill] sm:$0xff]  ;;  %vm5725_vm10 = vcmp.lt.s32.totalorder %v5724_v25, %v5564_v18 }
 0x9be   :  { %15048 = vst [vmem:[#allocation30_spill] sm:$0xff] %v13153_v0  ;;  %vm5509_vm1 = vcmp.eq.f32.partialorder %v15049_v4, %v13153_v0  ;;  %vm5510_vm13 = vcmp.eq.f32.partialorder %v15050_v9, %v13153_v0  ;;  %v13161_v36 = vcvt.s32.f32 %v5708_v24  ;;  %vm5511_vm15 = vcmp.eq.f32.partialorder %v15051_v41, %v13153_v0  ;;  %v15054_v9 = vld [vmem:[#allocation37_spill] sm:$0xff] }
 0x9bf   :  { %v5573_v19 = vsel %vm5509_vm1, %v14829_v22, 512  ;;  %v5574_v28 = vsel %vm5510_vm13, %v14830_v5, 512  ;;  %vm5512_vm7 = vcmp.eq.f32.partialorder %v15052_v2, %v13153_v0  ;;  %vm5743_vm0 = vcmp.lt.s32.totalorder %v5742_v16, %v5567_v38  ;;  %v15061_v0 = vld [vmem:[#allocation12_spill] sm:$0xff] }
 0x9c0   :  { %5711 = vmin.xlane.f32.xlu1 %v13161_v36  ;;  %vm5781_vm5 = vcmp.lt.s32.totalorder %v5573_v19, %v5574_v28  ;;  %v13172_v54 = vsel %vm5725_vm10, %v5724_v25, %v5564_v18  ;;  %v5744_v1 = vsel %vm5743_vm0, %v5742_v16, %v5567_v38  ;;  %v5572_v24 = vsel %vm5508_vm4, %v14833_v43, 512  ;;  %v15056_v38 = vld [vmem:[#allocation10_spill] sm:$0xff] }
 0x9c1   :  { %v13174_v23 = vpop.xlane.xlu0 %5446  ;;  %v5728_v4 = vshra.s32 %v13172_v54, 16  ;;  %v5762_v48 = vsel %vm5761_vm6, %v5569_v14, %v5570_v51  ;;  %v5575_v18 = vsel %vm5511_vm15, %v14832_v3, 512  ;;  %v5576_v25 = vsel %vm5512_vm7, %v14833_v43, 512  ;;  %v15057_v14 = vld [vmem:[#allocation41_spill] sm:$0xff] }
 0x9c2   :  { %15053 = vst [vmem:[#allocation88_spill] sm:$0xff] %v13174_v23  ;;  %vm5513_vm1 = vcmp.eq.f32.partialorder %v15054_v9, %v13174_v23  ;;  %vm5514_vm13 = vcmp.eq.f32.partialorder %v15055_v12, %v13174_v23  ;;  %vm5515_vm0 = vcmp.eq.f32.partialorder %v15056_v38, %v13174_v23  ;;  %vm5745_vm6 = vcmp.lt.s32.totalorder %v5744_v1, %v5568_v26 }
 0x9c3   :  { %v5577_v40 = vsel %vm5513_vm1, %v14829_v22, 512  ;;  %v13197_v16 = vcvt.s32.f32 %v5728_v4  ;;  %v5578_v12 = vsel %vm5514_vm13, %v14830_v5, 512  ;;  %vm5516_vm15 = vcmp.eq.f32.partialorder %v15057_v14, %v13174_v23  ;;  %v15059_v4 = vld [vmem:[#allocation11_spill] sm:$0xff] }
 0x9c4   :  { %v13204_v51 = vsel %vm5745_vm6, %v5744_v1, %v5568_v26  ;;  %vm5763_vm10 = vcmp.lt.s32.totalorder %v5762_v48, %v5571_v21  ;;  %v5782_v9 = vsel %vm5781_vm5, %v5573_v19, %v5574_v28  ;;  %v5579_v26 = vsel %vm5515_vm0, %v14832_v3, 512  ;;  %v15062_v19 = vld [vmem:[#allocation43_spill] sm:$0xff] }
 0x9c5   :  { %v13206_v41 = vpop.xlane.xlu1 %5451  ;;  %5731 = vmin.xlane.f32.xlu0 %v13197_v16  ;;  %v5748_v2 = vshra.s32 %v13204_v51, 16  ;;  %vm5801_vm6 = vcmp.lt.s32.totalorder %v5577_v40, %v5578_v12  ;;  %vm5783_vm0 = vcmp.lt.s32.totalorder %v5782_v9, %v5575_v18  ;;  %v5580_v38 = vsel %vm5516_vm15, %v14833_v43, 512 }
 0x9c6   :  { %15058 = vst [vmem:[#allocation18_spill] sm:$0xff] %v13206_v41  ;;  %vm5517_vm7 = vcmp.eq.f32.partialorder %v15059_v4, %v13206_v41  ;;  %vm5518_vm1 = vcmp.eq.f32.partialorder %v15060_v31, %v13206_v41  ;;  %vm5519_vm13 = vcmp.eq.f32.partialorder %v15061_v0, %v13206_v41  ;;  %vm5520_vm5 = vcmp.eq.f32.partialorder %v15062_v19, %v13206_v41  ;;  %v15068_v19 = vld [vmem:[#allocation47_spill] sm:$0xff]  ;;  %v15069_v41 = vld [vmem:[#allocation48_spill] sm:$0xff] }
 0x9c7   :  { %v5581_v28 = vsel %vm5517_vm7, %v14829_v22, 512  ;;  %v13224_v1 = vcvt.s32.f32 %v5748_v2  ;;  %v5582_v4 = vsel %vm5518_vm1, %v14830_v5, 512  ;;  %v5764_v31 = vsel %vm5763_vm10, %v5762_v48, %v5571_v21  ;;  %v15064_v48 = vld [vmem:[#allocation44_spill] sm:$0xff] }
 0x9c8   :  { %v5583_v0 = vsel %vm5519_vm13, %v14832_v3, 512  ;;  %vm5765_vm3 = vcmp.lt.s32.totalorder %v5764_v31, %v5572_v24  ;;  %v5802_v21 = vsel %vm5801_vm6, %v5577_v40, %v5578_v12  ;;  %vm5821_vm1 = vcmp.lt.s32.totalorder %v5581_v28, %v5582_v4  ;;  %v15066_v12 = vld [vmem:[#allocation46_spill] sm:$0xff] }
 0x9c9   :  { %v13230_v63 = vpop.xlane.xlu0 %5456  ;;  %5751 = vmin.xlane.f32.xlu1 %v13224_v1  ;;  %v13237_v2 = vsel %vm5765_vm3, %v5764_v31, %v5572_v24  ;;  %v5584_v24 = vsel %vm5520_vm5, %v14833_v43, 512  ;;  %v5784_v31 = vsel %vm5783_vm0, %v5782_v9, %v5575_v18  ;;  %vm5803_vm4 = vcmp.lt.s32.totalorder %v5802_v21, %v5579_v26 }
 0x9ca   :  { %vm5521_vm7 = vcmp.eq.f32.partialorder %v15063_v17, %v13230_v63  ;;  %vm5522_vm10 = vcmp.eq.f32.partialorder %v15064_v48, %v13230_v63  ;;  %v5768_v7 = vshra.s32 %v13237_v2, 16  ;;  %vm5523_vm13 = vcmp.eq.f32.partialorder %v15065_v39, %v13230_v63 }
 0x9cb   :  { %v5585_v14 = vsel %vm5521_vm7, %v14829_v22, 512  ;;  %v5586_v17 = vsel %vm5522_vm10, %v14830_v5, 512  ;;  %vm5524_vm15 = vcmp.eq.f32.partialorder %v15066_v12, %v13230_v63  ;;  %vm5785_vm6 = vcmp.lt.s32.totalorder %v5784_v31, %v5576_v25 }
 0x9cc   :  { %v13255_v40 = vcvt.s32.f32 %v5768_v7  ;;  %v13261_v23 = vsel %vm5785_vm6, %v5784_v31, %v5576_v25  ;;  %v5822_v56 = vsel %vm5821_vm1, %v5581_v28, %v5582_v4  ;;  %v5587_v7 = vsel %vm5523_vm13, %v14832_v3, 512  ;;  %v15070_v4 = vld [vmem:[#allocation6_spill] sm:$0xff] }
 0x9cd   :  { %v13259_v48 = vpop.xlane.xlu1 %5461  ;;  %vm5841_vm0 = vcmp.lt.s32.totalorder %v5585_v14, %v5586_v17  ;;  %v5788_v18 = vshra.s32 %v13261_v23, 16  ;;  %vm5823_vm3 = vcmp.lt.s32.totalorder %v5822_v56, %v5583_v0 }
 0x9ce   :  { %15067 = vst [vmem:[#allocation31_spill] sm:$0xff] %v13259_v48  ;;  %vm5525_vm5 = vcmp.eq.f32.partialorder %v15068_v19, %v13259_v48  ;;  %vm5526_vm7 = vcmp.eq.f32.partialorder %v15069_v41, %v13259_v48  ;;  %5771 = vmin.xlane.f32.xlu0 %v13255_v40  ;;  %vm5527_vm10 = vcmp.eq.f32.partialorder %v12837_v44, %v13259_v48  ;;  %v15071_v44 = vld [vmem:[#allocation7_spill] sm:$0xff] }
 0x9cf   :  { %v5589_v25 = vsel %vm5525_vm5, %v14829_v22, 512  ;;  %v5590_v9 = vsel %vm5526_vm7, %v14830_v5, 512  ;;  %v5804_v41 = vsel %vm5803_vm4, %v5802_v21, %v5579_v26  ;;  %v13280_v28 = vcvt.s32.f32 %v5788_v18 }
 0x9d0   :  { %vm5528_vm6 = vcmp.eq.f32.partialorder %v15070_v4, %v13259_v48  ;;  %vm5805_vm13 = vcmp.lt.s32.totalorder %v5804_v41, %v5580_v38  ;;  %v5591_v26 = vsel %vm5527_vm10, %v14832_v3, 512  ;;  %vm5861_vm1 = vcmp.lt.s32.totalorder %v5589_v25, %v5590_v9 }
 0x9d1   :  { %v13284_v39 = vpop.xlane.xlu0 %5466  ;;  %v13286_v31 = vsel %vm5805_vm13, %v5804_v41, %v5580_v38  ;;  %5791 = vmin.xlane.f32.xlu1 %v13280_v28  ;;  %v5588_v38 = vsel %vm5524_vm15, %v14833_v43, 512  ;;  %v5842_v37 = vsel %vm5841_vm0, %v5585_v14, %v5586_v17  ;;  %v5862_v17 = vsel %vm5861_vm1, %v5589_v25, %v5590_v9 }
 0x9d2   :  { %vm5529_vm5 = vcmp.eq.f32.partialorder %v12847_v35, %v13284_v39  ;;  %vm5530_vm7 = vcmp.eq.f32.partialorder %v15071_v44, %v13284_v39  ;;  %vm5531_vm4 = vcmp.eq.f32.partialorder %v12853_v46, %v13284_v39  ;;  %v5808_v21 = vshra.s32 %v13286_v31, 16 }
 0x9d3   :  { %vm5532_vm13 = vcmp.eq.f32.partialorder %v12859_v27, %v13284_v39  ;;  %v5593_v35 = vsel %vm5529_vm5, %v14829_v22, 512  ;;  %v5594_v19 = vsel %vm5530_vm7, %v14830_v5, 512  ;;  %v5824_v46 = vsel %vm5823_vm3, %v5822_v56, %v5583_v0 }
 0x9d4   :  { %v13305_v18 = vcvt.s32.f32 %v5808_v21  ;;  %v5595_v41 = vsel %vm5531_vm4, %v14832_v3, 512  ;;  %vm5825_vm10 = vcmp.lt.s32.totalorder %v5824_v46, %v5584_v24  ;;  %vm5881_vm7 = vcmp.lt.s32.totalorder %v5593_v35, %v5594_v19 }
 0x9d5   :  { %v13308_v44 = vpop.xlane.xlu1 %5471  ;;  %v13311_v60 = vsel %vm5825_vm10, %v5824_v46, %v5584_v24  ;;  %vm5843_vm10 = vcmp.lt.s32.totalorder %v5842_v37, %v5587_v7  ;;  %vm5863_vm14 = vcmp.lt.s32.totalorder %v5862_v17, %v5591_v26  ;;  %v5596_v12 = vsel %vm5532_vm13, %v14833_v43, 512 }
 0x9d6   :  { %vm5533_vm15 = vcmp.eq.f32.partialorder %v12863_v13, %v13308_v44  ;;  %vm5534_vm5 = vcmp.eq.f32.partialorder %v12866_v53, %v13308_v44  ;;  %vm5535_vm3 = vcmp.eq.f32.partialorder %v12869_v49, %v13308_v44  ;;  %5811 = vmin.xlane.f32.xlu0 %v13305_v18  ;;  %v5828_v56 = vshra.s32 %v13311_v60, 16 }
 0x9d7   :  { %v5597_v0 = vsel %vm5533_vm15, %v14829_v22, 512  ;;  %v5598_v14 = vsel %vm5534_vm5, %v14830_v5, 512  ;;  %vm5536_vm0 = vcmp.eq.f32.partialorder %v12876_v57, %v13308_v44  ;;  %v5592_v13 = vsel %vm5528_vm6, %v14833_v43, 512 }
 0x9d8   :  { %vm5901_vm4 = vcmp.lt.s32.totalorder %v5597_v0, %v5598_v14  ;;  %v13329_v53 = vcvt.s32.f32 %v5828_v56  ;;  %v5599_v49 = vsel %vm5535_vm3, %v14832_v3, 512  ;;  %v5844_v24 = vsel %vm5843_vm10, %v5842_v37, %v5587_v7 }
 0x9d9   :  { %vm5845_vm15 = vcmp.lt.s32.totalorder %v5844_v24, %v5588_v38  ;;  %v5882_v21 = vsel %vm5881_vm7, %v5593_v35, %v5594_v19  ;;  %v5864_v4 = vsel %vm5863_vm14, %v5862_v17, %v5591_v26  ;;  %v5902_v56 = vsel %vm5901_vm4, %v5597_v0, %v5598_v14  ;;  %v4952_v14 = vld [vmem:[%s14236_s2 + $0x6f8] sm:$0xff]  ;;  %v4951_v17 = vld [vmem:[%s14236_s2 + $0x6f0] sm:$0xff] }
 0x9da   :  { %5831 = vmin.xlane.f32.xlu1 %v13329_v53  ;;  %v13338_v46 = vsel %vm5845_vm15, %v5844_v24, %v5588_v38  ;;  %vm5883_vm6 = vcmp.lt.s32.totalorder %v5882_v21, %v5595_v41  ;;  %vm5865_vm5 = vcmp.lt.s32.totalorder %v5864_v4, %v5592_v13  ;;  %vm5903_vm1 = vcmp.lt.s32.totalorder %v5902_v56, %v5599_v49  ;;  %v4968_v24 = vld [vmem:[%s14236_s2 + $0x778] sm:$0xff] }
 0x9db   :  { %v5848_v48 = vshra.s32 %v13338_v46, 16  ;;  %v5884_v37 = vsel %vm5883_vm6, %v5882_v21, %v5595_v41  ;;  %v13341_v7 = vsel %vm5865_vm5, %v5864_v4, %v5592_v13  ;;  %v5600_v27 = vsel %vm5536_vm0, %v14833_v43, 512  ;;  %v4984_v13 = vld [vmem:[%s14236_s2 + $0x7f8] sm:$0xff]  ;;  %7776 = vmatprep.subr.mxu0 %v4952_v14  ;;  %v4935_v21 = vld [vmem:[%s14236_s2 + $0x670] sm:$0xff]  ;;  %v4965_v14 = vld [vmem:[%s14236_s2 + $0x760] sm:$0xff] }
 0x9dc   :  { %vm5885_vm3 = vcmp.lt.s32.totalorder %v5884_v37, %v5596_v12  ;;  %v5904_v25 = vsel %vm5903_vm1, %v5902_v56, %v5599_v49  ;;  %v5868_v26 = vshra.s32 %v13341_v7, 16  ;;  %v4936_v49 = vld [vmem:[%s14236_s2 + $0x678] sm:$0xff]  ;;  %7856 = vmatprep.subr.mxu1 %v4984_v13  ;;  %v4967_v4 = vld [vmem:[%s14236_s2 + $0x770] sm:$0xff]  ;;  %v4950_v56 = vld [vmem:[%s14236_s2 + $0x6e8] sm:$0xff] }
 0x9dd   :  { %v13347_v9 = vcvt.s32.f32 %v5848_v48  ;;  %v13350_v38 = vsel %vm5885_vm3, %v5884_v37, %v5596_v12  ;;  %vm5905_vm14 = vcmp.lt.s32.totalorder %v5904_v25, %v5600_v27  ;;  %v4983_v12 = vld [vmem:[%s14236_s2 + $0x7f0] sm:$0xff]  ;;  %7777 = vmatpush3.msra.mxu0 %v4936_v49  ;;  %7857 = vmatpush3.msra.mxu1 %v4968_v24  ;;  %v4982_v37 = vld [vmem:[%s14236_s2 + $0x7e8] sm:$0xff]  ;;  %v4948_v13 = vld [vmem:[%s14236_s2 + $0x6d8] sm:$0xff] }
 0x9de   :  { %v5888_v35 = vshra.s32 %v13350_v38, 16  ;;  %v13353_v19 = vsel %vm5905_vm14, %v5904_v25, %v5600_v27  ;;  %v13356_v41 = vcvt.s32.f32 %v5868_v26  ;;  %7778 = vmatprep.subr.mxu0 %v4951_v17  ;;  %7858 = vmatprep.subr.mxu1 %v4983_v12  ;;  %v4934_v27 = vld [vmem:[%s14236_s2 + $0x668] sm:$0xff]  ;;  %v4949_v26 = vld [vmem:[%s14236_s2 + $0x6e0] sm:$0xff]  ;;  %v4980_v49 = vld [vmem:[%s14236_s2 + $0x7d8] sm:$0xff] }
 0x9df   :  { %5851 = vmin.xlane.f32.xlu0 %v13347_v9  ;;  %v5908_v0 = vshra.s32 %v13353_v19, 16  ;;  %v4966_v25 = vld [vmem:[%s14236_s2 + $0x768] sm:$0xff]  ;;  %7779 = vmatpush3.msra.mxu0 %v4935_v21  ;;  %v4932_v24 = vld [vmem:[%s14236_s2 + $0x658] sm:$0xff]  ;;  %v4947_v12 = vld [vmem:[%s14236_s2 + $0x6d0] sm:$0xff] }
 0x9e0   :  { %v13359_v57 = vcvt.s32.f32 %v5888_v35  ;;  %5871 = vmin.xlane.f32.xlu1 %v13356_v41  ;;  %7859 = vmatpush3.msra.mxu1 %v4967_v4  ;;  %v4981_v35 = vld [vmem:[%s14236_s2 + $0x7e0] sm:$0xff]  ;;  %v4964_v17 = vld [vmem:[%s14236_s2 + $0x758] sm:$0xff]  ;;  %v4979_v21 = vld [vmem:[%s14236_s2 + $0x7d0] sm:$0xff] }
 0x9e1   :  { %v13362_v48 = vcvt.s32.f32 %v5908_v0  ;;  %7780 = vmatprep.subr.mxu0 %v4950_v56  ;;  %7860 = vmatprep.subr.mxu1 %v4982_v37  ;;  %v4933_v0 = vld [vmem:[%s14236_s2 + $0x660] sm:$0xff]  ;;  %v4931_v4 = vld [vmem:[%s14236_s2 + $0x650] sm:$0xff]  ;;  %v4946_v37 = vld [vmem:[%s14236_s2 + $0x6c8] sm:$0xff] }
 0x9e2   :  { %7781 = vmatpush3.msra.mxu0 %v4934_v27  ;;  %7861 = vmatpush3.msra.mxu1 %v4966_v25  ;;  %v4963_v56 = vld [vmem:[%s14236_s2 + $0x750] sm:$0xff]  ;;  %v4978_v27 = vld [vmem:[%s14236_s2 + $0x7c8] sm:$0xff] }
 0x9e3   :  { %5891 = vmin.xlane.f32.xlu0 %v13359_v57  ;;  %7782 = vmatprep.subr.mxu0 %v4949_v26  ;;  %v4930_v25 = vld [vmem:[%s14236_s2 + $0x648] sm:$0xff] }
 0x9e4   :  { %5911 = vmin.xlane.f32.xlu1 %v13362_v48  ;;  %7862 = vmatprep.subr.mxu1 %v4981_v35  ;;  %v4962_v26 = vld [vmem:[%s14236_s2 + $0x748] sm:$0xff]  ;;  %v4945_v35 = vld [vmem:[%s14236_s2 + $0x6c0] sm:$0xff] }
 0x9e5   :  { %7783 = vmatpush3.msra.mxu0 %v4933_v0  ;;  %7863 = vmatpush3.msra.mxu1 %v4965_v14  ;;  %v4977_v0 = vld [vmem:[%s14236_s2 + $0x7c0] sm:$0xff] }
 0x9e6   :  { %7784 = vmatprep.subr.mxu0 %v4948_v13  ;;  %7864 = vmatprep.subr.mxu1 %v4980_v49  ;;  %v4929_v14 = vld [vmem:[%s14236_s2 + $0x640] sm:$0xff]  ;;  %v4944_v49 = vld [vmem:[%s14236_s2 + $0x6b8] sm:$0xff] }
 0x9e7   :  { %7785 = vmatpush3.msra.mxu0 %v4932_v24  ;;  %7865 = vmatpush3.msra.mxu1 %v4964_v17  ;;  %v4961_v13 = vld [vmem:[%s14236_s2 + $0x740] sm:$0xff]  ;;  %v4976_v24 = vld [vmem:[%s14236_s2 + $0x7b8] sm:$0xff] }
 0x9e8   :  { %7786 = vmatprep.subr.mxu0 %v4947_v12  ;;  %7866 = vmatprep.subr.mxu1 %v4979_v21  ;;  %v4928_v17 = vld [vmem:[%s14236_s2 + $0x638] sm:$0xff]  ;;  %v4943_v21 = vld [vmem:[%s14236_s2 + $0x6b0] sm:$0xff] }
 0x9e9   :  { %7787 = vmatpush3.msra.mxu0 %v4931_v4  ;;  %7867 = vmatpush3.msra.mxu1 %v4963_v56  ;;  %v4960_v12 = vld [vmem:[%s14236_s2 + $0x738] sm:$0xff]  ;;  %v4975_v4 = vld [vmem:[%s14236_s2 + $0x7b0] sm:$0xff] }
 0x9ea   :  { %7788 = vmatprep.subr.mxu0 %v4946_v37  ;;  %7868 = vmatprep.subr.mxu1 %v4978_v27  ;;  %v4927_v56 = vld [vmem:[%s14236_s2 + $0x630] sm:$0xff]  ;;  %v4942_v27 = vld [vmem:[%s14236_s2 + $0x6a8] sm:$0xff] }
 0x9eb   :  { %7789 = vmatpush3.msra.mxu0 %v4930_v25  ;;  %7869 = vmatpush3.msra.mxu1 %v4962_v26  ;;  %v4959_v37 = vld [vmem:[%s14236_s2 + $0x730] sm:$0xff]  ;;  %v4974_v25 = vld [vmem:[%s14236_s2 + $0x7a8] sm:$0xff] }
 0x9ec   :  { %7790 = vmatprep.subr.mxu0 %v4945_v35  ;;  %7870 = vmatprep.subr.mxu1 %v4977_v0  ;;  %v4926_v26 = vld [vmem:[%s14236_s2 + $0x628] sm:$0xff]  ;;  %v4941_v0 = vld [vmem:[%s14236_s2 + $0x6a0] sm:$0xff] }
 0x9ed   :  { %7791 = vmatpush3.msra.mxu0 %v4929_v14  ;;  %7871 = vmatpush3.msra.mxu1 %v4961_v13  ;;  %v4958_v35 = vld [vmem:[%s14236_s2 + $0x728] sm:$0xff]  ;;  %v4973_v14 = vld [vmem:[%s14236_s2 + $0x7a0] sm:$0xff] }
 0x9ee   :  { %7792 = vmatprep.subr.mxu0 %v4944_v49  ;;  %7872 = vmatprep.subr.mxu1 %v4976_v24  ;;  %v4925_v13 = vld [vmem:[%s14236_s2 + $0x620] sm:$0xff]  ;;  %v4940_v24 = vld [vmem:[%s14236_s2 + $0x698] sm:$0xff] }
 0x9ef   :  { %7793 = vmatpush3.msra.mxu0 %v4928_v17  ;;  %7873 = vmatpush3.msra.mxu1 %v4960_v12  ;;  %v4957_v49 = vld [vmem:[%s14236_s2 + $0x720] sm:$0xff]  ;;  %v4972_v17 = vld [vmem:[%s14236_s2 + $0x798] sm:$0xff] }
 0x9f0   :  { %7794 = vmatprep.subr.mxu0 %v4943_v21  ;;  %7874 = vmatprep.subr.mxu1 %v4975_v4  ;;  %v4924_v12 = vld [vmem:[%s14236_s2 + $0x618] sm:$0xff]  ;;  %v4939_v4 = vld [vmem:[%s14236_s2 + $0x690] sm:$0xff] }
 0x9f1   :  { %7795 = vmatpush3.msra.mxu0 %v4927_v56  ;;  %7875 = vmatpush3.msra.mxu1 %v4959_v37  ;;  %v4956_v21 = vld [vmem:[%s14236_s2 + $0x718] sm:$0xff]  ;;  %v4971_v56 = vld [vmem:[%s14236_s2 + $0x790] sm:$0xff] }
 0x9f2   :  { %7796 = vmatprep.subr.mxu0 %v4942_v27  ;;  %7876 = vmatprep.subr.mxu1 %v4974_v25  ;;  %v4923_v37 = vld [vmem:[%s14236_s2 + $0x610] sm:$0xff]  ;;  %v4938_v25 = vld [vmem:[%s14236_s2 + $0x688] sm:$0xff] }
 0x9f3   :  { %7797 = vmatpush3.msra.mxu0 %v4926_v26  ;;  %7877 = vmatpush3.msra.mxu1 %v4958_v35  ;;  %v4955_v27 = vld [vmem:[%s14236_s2 + $0x710] sm:$0xff]  ;;  %v4970_v26 = vld [vmem:[%s14236_s2 + $0x788] sm:$0xff] }
 0x9f4   :  { %7798 = vmatprep.subr.mxu0 %v4941_v0  ;;  %7878 = vmatprep.subr.mxu1 %v4973_v14  ;;  %v4922_v35 = vld [vmem:[%s14236_s2 + $0x608] sm:$0xff]  ;;  %v5607_v14 = vand.u32 65535, %v12990_v30 }
 0x9f5   :  { %7799 = vmatpush3.msra.mxu0 %v4925_v13  ;;  %7879 = vmatpush3.msra.mxu1 %v4957_v49  ;;  %v4954_v0 = vld [vmem:[%s14236_s2 + $0x708] sm:$0xff] }
 0x9f6   :  { %7800 = vmatprep.subr.mxu0 %v4940_v24  ;;  %7880 = vmatprep.subr.mxu1 %v4972_v17  ;;  %v5609_v49 = vcvt.s32.f32 %v5607_v14  ;;  %v5627_v24 = vand.u32 65535, %v13019_v8  ;;  %v5667_v8 = vand.u32 65535, %v13093_v15  ;;  %v4969_v15 = vld [vmem:[%s14236_s2 + $0x780] sm:$0xff] }
 0x9f7   :  { %7801 = vmatpush3.msra.mxu0 %v4924_v12  ;;  %7881 = vmatpush3.msra.mxu1 %v4956_v21 }
 0x9f8   :  { %7802 = vmatprep.subr.mxu0 %v4939_v4  ;;  %7882 = vmatprep.subr.mxu1 %v4971_v56  ;;  %v5629_v21 = vcvt.s32.f32 %v5627_v24  ;;  %v5647_v4 = vand.u32 65535, %v13044_v58  ;;  %v5687_v58 = vand.u32 65535, %v13117_v34  ;;  %v4921_v34 = vld [vmem:[%s14236_s2 + $0x600] sm:$0xff]  ;;  %v5727_v24 = vand.u32 65535, %v13172_v54 }
 0x9f9   :  { %7803 = vmatpush3.msra.mxu0 %v4923_v37  ;;  %7883 = vmatpush3.msra.mxu1 %v4955_v27 }
 0x9fa   :  { %7804 = vmatprep.subr.mxu0 %v4938_v25  ;;  %7884 = vmatprep.subr.mxu1 %v4970_v26  ;;  %v5649_v37 = vcvt.s32.f32 %v5647_v4  ;;  %v5669_v25 = vcvt.s32.f32 %v5667_v8  ;;  %v5747_v4 = vand.u32 65535, %v13204_v51  ;;  %v5787_v51 = vand.u32 65535, %v13261_v23 }
 0x9fb   :  { %7805 = vmatpush3.msra.mxu0 %v4922_v35  ;;  %7885 = vmatpush3.msra.mxu1 %v4954_v0  ;;  %v5689_v35 = vcvt.s32.f32 %v5687_v58  ;;  %v5707_v0 = vand.u32 65535, %v13143_v45  ;;  %v5827_v23 = vand.u32 65535, %v13311_v60 }
 0x9fc   :  { %7886 = vmatprep.subr.mxu1 %v4969_v15  ;;  %v5749_v8 = vcvt.s32.f32 %v5747_v4 }
 0x9fd   :  { %v5829_v15 = vcvt.s32.f32 %v5827_v23 }
 0xa35   :  { %v13547_v13 = vpop.xlane.xlu0 %5611 }
 0xa36   :  { %vm5613_vm13 = vcmp.eq.f32.partialorder %v13022_v32, %v13547_v13 }
 0xa37   :  { %v5614_v17 = vsel %vm5613_vm13, %v5609_v49, inf  ;;  %v5709_v49 = vcvt.s32.f32 %v5707_v0 }
 0xa38   :  { %5615 = vmin.xlane.f32.xlu0 %v5614_v17 }
 0xa39   :  { %v13552_v12 = vpop.xlane.xlu1 %5631 }
 0xa3a   :  { %vm5633_vm7 = vcmp.eq.f32.partialorder %v13050_v59, %v13552_v12  ;;  %v5638_v4 = vcvt.f32.s32 %v13552_v12  ;;  %v15073_v12 = vld [vmem:[#allocation52_spill] sm:$0xff] }
 0xa3b   :  { %v5634_v56 = vsel %vm5633_vm7, %v5629_v21, inf  ;;  %v5729_v21 = vcvt.s32.f32 %v5727_v24 }
 0xa3c   :  { %5635 = vmin.xlane.f32.xlu1 %v5634_v56 }
 0xa3d   :  { %v13557_v30 = vpop.xlane.xlu0 %5651 }
 0xa3e   :  { %vm5653_vm0 = vcmp.eq.f32.partialorder %v13076_v52, %v13557_v30  ;;  %v4937_v52 = vld [vmem:[%s14236_s2 + $0x680] sm:$0xff] }
 0xa3f   :  { %v5654_v32 = vsel %vm5653_vm0, %v5649_v37, inf  ;;  %7806 = vmatprep.subr.mxu0 %v4937_v52 }
 0xa40   :  { %5655 = vmin.xlane.f32.xlu0 %v5654_v32  ;;  %7807 = vmatpush3.msra.mxu0 %v4921_v34  ;;  %v5867_v34 = vand.u32 65535, %v13341_v7 }
 0xa42   :  { %v13562_v27 = vpop.xlane.xlu1 %5671  ;;  %v5869_v24 = vcvt.s32.f32 %v5867_v34 }
 0xa43   :  { %vm5673_vm4 = vcmp.eq.f32.partialorder %v13109_v6, %v13562_v27  ;;  %v4953_v6 = vld [vmem:[%s14236_s2 + $0x700] sm:$0xff]  ;;  %s8027_s2 = smov [#allocation2]  }
 0xa44   :  { %v5674_v59 = vsel %vm5673_vm4, %v5669_v25, inf  ;;  %7887 = vmatpush3.msra.mxu1 %v4953_v6  ;;  %s6642_s17 = sshll.u32 %s8027_s2, 4  ;;  %s6643_s17 = int_to_ptr.vmem [resolvable:$true] %s6642_s17 }
 0xa45   :  { %5675 = vmin.xlane.f32.xlu1 %v5674_v59  ;;  %v13567_v26 = vpop.xlane.xlu0 %5691  ;;  %v5789_v59 = vcvt.s32.f32 %v5787_v51  ;;  %s8003_s18 = scalar_lea.vmem %s6643_s17, 16  ;;  %s8007_s3 = scalar_lea.vmem %s6643_s17, 32 }
 0xa46   :  { %vm5693_vm10 = vcmp.eq.f32.partialorder %v13135_v11, %v13567_v26  ;;  %p8004_p0 = scmp.ne.s32.totalorder %s6643_s17, %s8003_s18  ;;  %p8008_p1 = scmp.lt.s32.totalorder %s6643_s17, %s6643_s17 }
 0xa47   :  { %v5694_v45 = vsel %vm5693_vm10, %v5689_v35, inf  ;;  %v5807_v35 = vand.u32 65535, %v13286_v31  ;;  %p8009_p2 = scmp.lt.s32.totalorder %s8007_s3, %s8003_s18 }
 0xa48   :  { %5695 = vmin.xlane.f32.xlu0 %v5694_v45  ;;  %v5887_v45 = vand.u32 65535, %v13350_v38 }
 0xa49   :  { %v13584_v14 = vpop.xlane.xlu1 %5711  ;;  %v5809_v0 = vcvt.s32.f32 %v5807_v35  ;;  %v15074_v35 = vld [vmem:[#allocation53_spill] sm:$0xff]  ;;  %p8010_p3 = por %p8009_p2, %p8008_p1 }
 0xa4a   :  { %vm5713_vm15 = vcmp.eq.f32.partialorder %v13161_v36, %v13584_v14  ;;  %v5767_v36 = vand.u32 65535, %v13237_v2 }
 0xa4b   :  { %v5714_v17 = vsel %vm5713_vm15, %v5709_v49, inf  ;;  %p8011_p4 = pnand %p8010_p3, %p8004_p0 }
 0xa4c   :  { %5715 = vmin.xlane.f32.xlu1 %v5714_v17  ;;  %v5769_v25 = vcvt.s32.f32 %v5767_v36  ;;  %v5889_v17 = vcvt.s32.f32 %v5887_v45 }
 0xa4e   :  { %v13589_v11 = vpop.xlane.xlu0 %5731 }
 0xa4f   :  { %vm5733_vm6 = vcmp.eq.f32.partialorder %v13197_v16, %v13589_v11 }
 0xa50   :  { %v5734_v56 = vsel %vm5733_vm6, %v5729_v21, inf }
 0xa51   :  { %5735 = vmin.xlane.f32.xlu0 %v5734_v56 }
 0xa52   :  { %v13594_v37 = vpop.xlane.xlu1 %5751 }
 0xa53   :  { %vm5753_vm5 = vcmp.eq.f32.partialorder %v13224_v1, %v13594_v37 }
 0xa54   :  { %v5754_v54 = vsel %vm5753_vm5, %v5749_v8, inf }
 0xa55   :  { %5755 = vmin.xlane.f32.xlu1 %v5754_v54 }
 0xa57   :  { %v13599_v32 = vpop.xlane.xlu0 %5771 }
 0xa58   :  { %vm5773_vm1 = vcmp.eq.f32.partialorder %v13255_v40, %v13599_v32 }
 0xa59   :  { %v5774_v16 = vsel %vm5773_vm1, %v5769_v25, inf  ;;  %v5639_v25 = vshll.u32 %v5638_v4, 16  ;;  %v15080_v4 = vld [vmem:[#allocation57_spill] sm:$0xff] }
 0xa5a   :  { %5775 = vmin.xlane.f32.xlu0 %v5774_v16  ;;  %v13604_v58 = vpop.xlane.xlu1 %5791 }
 0xa5b   :  { %vm5793_vm3 = vcmp.eq.f32.partialorder %v13280_v28, %v13604_v58  ;;  %v5847_v28 = vand.u32 65535, %v13338_v46 }
 0xa5c   :  { %v5794_v1 = vsel %vm5793_vm3, %v5789_v59, inf }
 0xa5d   :  { %5795 = vmin.xlane.f32.xlu1 %v5794_v1  ;;  %v5849_v60 = vcvt.s32.f32 %v5847_v28  ;;  %v15075_v1 = vld [vmem:[#allocation22_spill] sm:$0xff] }
 0xa5f   :  { %v13609_v2 = vpop.xlane.xlu0 %5811 }
 0xa60   :  { %vm5813_vm14 = vcmp.eq.f32.partialorder %v13305_v18, %v13609_v2 }
 0xa61   :  { %v5814_v40 = vsel %vm5813_vm14, %v5809_v0, inf  ;;  %v13660_v0 = vsel %vm4794_vm9, %v15075_v1, %v15074_v35 }
 0xa62   :  { %5815 = vmin.xlane.f32.xlu0 %v5814_v40 }
 0xa63   :  { %v13614_v52 = vpop.xlane.xlu1 %5831 }
 0xa64   :  { %vm5833_vm13 = vcmp.eq.f32.partialorder %v13329_v53, %v13614_v52  ;;  %v5907_v53 = vand.u32 65535, %v13353_v19 }
 0xa65   :  { %v5834_v31 = vsel %vm5833_vm13, %v5829_v15, inf  ;;  %vm6404_vm13 = vcmp.lt.f32.partialorder %v12898_v47, %v13660_v0 }
 0xa66   :  { %5835 = vmin.xlane.f32.xlu1 %v5834_v31  ;;  %v5909_v21 = vcvt.s32.f32 %v5907_v53  ;;  %v5678_v31 = vcvt.f32.s32 %v13562_v27  ;;  %v15077_v27 = vld [vmem:[#allocation55_spill] sm:$0xff]  ;;  %v5698_v53 = vcvt.f32.s32 %v13567_v26  ;;  %v15079_v26 = vld [vmem:[#allocation56_spill] sm:$0xff] }
 0xa68   :  { %v13620_v6 = vpop.xlane.xlu0 %5851 }
 0xa69   :  { %vm5853_vm7 = vcmp.eq.f32.partialorder %v13347_v9, %v13620_v6  ;;  %v13625_v49 = vpop.xlane.xlu1 %5871 }
 0xa6a   :  { %v5854_v18 = vsel %vm5853_vm7, %v5849_v60, inf  ;;  %vm5873_vm0 = vcmp.eq.f32.partialorder %v13356_v41, %v13625_v49  ;;  %v5618_v41 = vcvt.f32.s32 %v13547_v13  ;;  %v15076_v60 = vld [vmem:[#allocation54_spill] sm:$0xff] }
 0xa6b   :  { %5855 = vmin.xlane.f32.xlu0 %v5854_v18  ;;  %v5874_v46 = vsel %vm5873_vm0, %v5869_v24, inf  ;;  %v15078_v18 = vld [vmem:[#allocation23_spill] sm:$0xff] }
 0xa6c   :  { %v13630_v7 = vpop.xlane.xlu0 %5891  ;;  %5875 = vmin.xlane.f32.xlu1 %v5874_v46  ;;  %v5619_v8 = vshll.u32 %v5618_v41, 16  ;;  %v13684_v24 = vsel %vm4795_vm12, %v15078_v18, %v15077_v27  ;;  %v15084_v27 = vld [vmem:[#allocation59_spill] sm:$0xff] }
 0xa6d   :  { %vm5893_vm4 = vcmp.eq.f32.partialorder %v13359_v57, %v13630_v7  ;;  %v13634_v9 = vpop.xlane.xlu1 %5911  ;;  %v5658_v57 = vcvt.f32.s32 %v13557_v30 }
 0xa6e   :  { %v5894_v38 = vsel %vm5893_vm4, %v5889_v17, inf  ;;  %vm5913_vm10 = vcmp.eq.f32.partialorder %v13362_v48, %v13634_v9  ;;  %v15072_v48 = vmov 1.0  }
 0xa6f   :  { %5895 = vmin.xlane.f32.xlu0 %v5894_v38  ;;  %v5914_v19 = vsel %vm5913_vm10, %v5909_v21, inf  ;;  %v5659_v23 = vshll.u32 %v5658_v57, 16  ;;  %v5679_v38 = vshll.u32 %v5678_v31, 16  ;;  %v15082_v57 = vld [vmem:[#allocation5_spill] sm:$0xff]  ;;  %v5738_v31 = vcvt.f32.s32 %v13589_v11 }
 0xa70   :  { %5915 = vmin.xlane.f32.xlu1 %v5914_v19  ;;  %v6565_v35 = vadd.s32 8, %v15082_v57  ;;  %v6570_v18 = vadd.s32 48, %v15082_v57 }
 0xac1   :  { %v5616_v56 = vpop.xlane.xlu0 %5615 }
 0xac2   :  { %v5617_v36 = vcvt.f32.s32 %v5616_v56  ;;  %v15081_v56 = vld [vmem:[#allocation25_spill] sm:$0xff] }
 0xac4   :  { %v5620_v54 = vadd.s32 %v5619_v8, %v5617_v36  ;;  %v13708_v8 = vsel %vm4796_vm8, %v15081_v56, %v15080_v4  ;;  %v5699_v36 = vshll.u32 %v5698_v53, 16  ;;  %v15085_v4 = vld [vmem:[#allocation60_spill] sm:$0xff] }
 0xac5   :  { %v5636_v51 = vpop.xlane.xlu1 %5635 }
 0xac6   :  { %v6419_v16 = vadd.s32 1536, %v5620_v54  ;;  %v5637_v59 = vcvt.f32.s32 %v5636_v51  ;;  %vm5922_vm15 = vcmp.eq.s32.totalorder %v14830_v5, %v5620_v54  ;;  %vm5924_vm6 = vcmp.eq.s32.totalorder %v14833_v43, %v5620_v54 }
 0xac7   :  { %7232 = vmatprep.mubr.msk.f32.mxu0 %vm5922_vm15, %v15072_v48  ;;  %7264 = vmatprep.mubr.msk.f32.mxu1 %vm5924_vm6, %v15072_v48  ;;  %vm5921_vm5 = vcmp.eq.s32.totalorder %v14829_v22, %v5620_v54  ;;  %vm5923_vm1 = vcmp.eq.s32.totalorder %v14832_v3, %v5620_v54  ;;  %vm6405_vm15 = vcmp.lt.f32.partialorder %v12953_v29, %v13684_v24  ;;  %v5718_v54 = vcvt.f32.s32 %v13584_v14 }
 0xac8   :  { %v5640_v13 = vadd.s32 %v5639_v25, %v5637_v59  ;;  %7233 = vmatmul.mubr.msk.f32.vlgmr.msra.gmra.mxu0 %vm5921_vm5, %v15072_v48  ;;  %7265 = vmatmul.mubr.msk.f32.vlgmr.msra.gmra.mxu1 %vm5923_vm1, %v15072_v48  ;;  %v13653_v30 = vsel %vm6403_vm11, %v6419_v16, %v15073_v12  ;;  %v6568_v51 = vadd.s32 32, %v15082_v57  ;;  %vm6406_vm1 = vcmp.lt.f32.partialorder %v12988_v61, %v13708_v8 }
 0xac9   :  { %v5656_v40 = vpop.xlane.xlu0 %5655  ;;  %v5719_v1 = vshll.u32 %v5718_v54, 16  ;;  %v6567_v54 = vadd.s32 24, %v15082_v57 }
 0xaca   :  { %v6420_v15 = vadd.s32 1536, %v5640_v13  ;;  %v5657_v28 = vcvt.f32.s32 %v5656_v40  ;;  %vm5926_vm3 = vcmp.eq.s32.totalorder %v14830_v5, %v5640_v13  ;;  %vm5928_vm14 = vcmp.eq.s32.totalorder %v14833_v43, %v5640_v13 }
 0xacb   :  { %7234 = vmatprep.mubr.msk.f32.mxu0 %vm5926_vm3, %v15072_v48  ;;  %7266 = vmatprep.mubr.msk.f32.mxu1 %vm5928_vm14, %v15072_v48  ;;  %vm5925_vm9 = vcmp.eq.s32.totalorder %v14829_v22, %v5640_v13  ;;  %vm5927_vm7 = vcmp.eq.s32.totalorder %v14832_v3, %v5640_v13  ;;  %v15083_v13 = vld [vmem:[#allocation58_spill] sm:$0xff]  ;;  %v6569_v40 = vadd.s32 40, %v15082_v57  ;;  %vm6580_vm14 = vcmp.eq.s32.totalorder %v15082_v57, %v14829_v22 }
 0xacc   :  { %v5660_v34 = vadd.s32 %v5659_v23, %v5657_v28  ;;  %7235 = vmatmul.mubr.msk.f32.gmra.mxu0 %vm5925_vm9, %v15072_v48  ;;  %7267 = vmatmul.mubr.msk.f32.gmra.mxu1 %vm5927_vm7, %v15072_v48  ;;  %v13677_v45 = vsel %vm6404_vm13, %v6420_v15, %v15076_v60  ;;  %vm6584_vm9 = vcmp.eq.s32.totalorder %v6568_v51, %v14829_v22  ;;  %v6596_v53 = vsel %vm6580_vm14, %v13653_v30, 0 }
 0xacd   :  { %vm15086_vm14 = vcmp.lt.f32.partialorder %v13042_v20, %v12912_v10 }
 0xace   :  { %v6421_v46 = vadd.s32 1536, %v5660_v34  ;;  %v5676_v17 = vpop.xlane.xlu1 %5675  ;;  %vm5930_vm0 = vcmp.eq.s32.totalorder %v14830_v5, %v5660_v34  ;;  %vm5932_vm4 = vcmp.eq.s32.totalorder %v14833_v43, %v5660_v34  ;;  %vm5929_vm10 = vcmp.eq.s32.totalorder %v14829_v22, %v5660_v34 }
 0xacf   :  { %v5677_v21 = vcvt.f32.s32 %v5676_v17  ;;  %7236 = vmatprep.mubr.msk.f32.mxu0 %vm5930_vm0, %v15072_v48  ;;  %7268 = vmatprep.mubr.msk.f32.mxu1 %vm5932_vm4, %v15072_v48  ;;  %vm5931_vm12 = vcmp.eq.s32.totalorder %v14832_v3, %v5660_v34  ;;  %v5758_v34 = vcvt.f32.s32 %v13594_v37  ;;  %v6566_v37 = vadd.s32 16, %v15082_v57 }
 0xad0   :  { %7237 = vmatmul.mubr.msk.f32.gmra.mxu0 %vm5929_vm10, %v15072_v48  ;;  %7269 = vmatmul.mubr.msk.f32.gmra.mxu1 %vm5931_vm12, %v15072_v48  ;;  %v13701_v19 = vsel %vm6405_vm15, %v6421_v46, %v15079_v26  ;;  %vm6581_vm12 = vcmp.eq.s32.totalorder %v6565_v35, %v14829_v22  ;;  %v5798_v35 = vcvt.f32.s32 %v13604_v58 }
 0xad1   :  { %v5680_v41 = vadd.s32 %v5679_v38, %v5677_v21  ;;  %v5696_v25 = vpop.xlane.xlu0 %5695  ;;  %v5739_v21 = vshll.u32 %v5738_v31, 16 }
 0xad2   :  { %v5697_v59 = vcvt.f32.s32 %v5696_v25  ;;  %v6597_v25 = vsel %vm6581_vm12, %v13677_v45, 0  ;;  %v5778_v45 = vcvt.f32.s32 %v13599_v32 }
 0xad3   :  { %v6422_v16 = vadd.s32 1536, %v5680_v41  ;;  %vm5934_vm6 = vcmp.eq.s32.totalorder %v14830_v5, %v5680_v41  ;;  %vm5936_vm5 = vcmp.eq.s32.totalorder %v14833_v43, %v5680_v41  ;;  %vm5933_vm8 = vcmp.eq.s32.totalorder %v14829_v22, %v5680_v41 }
 0xad4   :  { %7238 = vmatprep.mubr.msk.f32.mxu0 %vm5934_vm6, %v15072_v48  ;;  %7270 = vmatprep.mubr.msk.f32.mxu1 %vm5936_vm5, %v15072_v48  ;;  %vm5935_vm3 = vcmp.eq.s32.totalorder %v14832_v3, %v5680_v41  ;;  %v5700_v14 = vadd.s32 %v5699_v36, %v5697_v59  ;;  %vm6585_vm6 = vcmp.eq.s32.totalorder %v6569_v40, %v14829_v22  ;;  %v5759_v41 = vshll.u32 %v5758_v34, 16  ;;  %v15087_v40 = vld [vmem:[#allocation61_spill] sm:$0xff] }
 0xad5   :  { %7239 = vmatmul.mubr.msk.f32.gmra.mxu0 %vm5933_vm8, %v15072_v48  ;;  %7271 = vmatmul.mubr.msk.f32.gmra.mxu1 %vm5935_vm3, %v15072_v48  ;;  %v13726_v12 = vsel %vm6406_vm1, %v6422_v16, %v15083_v13  ;;  %v5716_v23 = vpop.xlane.xlu1 %5715  ;;  %v6571_v59 = vadd.s32 56, %v15082_v57 }
 0xad6   :  { %v6423_v15 = vadd.s32 1536, %v5700_v14  ;;  %v5717_v28 = vcvt.f32.s32 %v5716_v23  ;;  %vm5938_vm7 = vcmp.eq.s32.totalorder %v14830_v5, %v5700_v14  ;;  %vm5940_vm0 = vcmp.eq.s32.totalorder %v14833_v43, %v5700_v14 }
 0xad7   :  { %7240 = vmatprep.mubr.msk.f32.mxu0 %vm5938_vm7, %v15072_v48  ;;  %7272 = vmatprep.mubr.msk.f32.mxu1 %vm5940_vm0, %v15072_v48  ;;  %vm5937_vm4 = vcmp.eq.s32.totalorder %v14829_v22, %v5700_v14  ;;  %vm5939_vm10 = vcmp.eq.s32.totalorder %v14832_v3, %v5700_v14  ;;  %vm6586_vm0 = vcmp.eq.s32.totalorder %v6570_v18, %v14829_v22  ;;  %v15091_v18 = vld [vmem:[#allocation87_spill] sm:$0xff] }
 0xad8   :  { %v5720_v60 = vadd.s32 %v5719_v1, %v5717_v28  ;;  %v6439_v11 = vsel %vm6407_vm2, %v6423_v15, %v15084_v27  ;;  %v15088_v15 = vld [vmem:[#allocation49_spill] sm:$0xff]  ;;  %v6572_v28 = vadd.s32 64, %v15082_v57  ;;  %v5779_v27 = vshll.u32 %v5778_v45, 16 }
 0xad9   :  { %7241 = vmatmul.mubr.msk.f32.gmra.mxu0 %vm5937_vm4, %v15072_v48  ;;  %7273 = vmatmul.mubr.msk.f32.gmra.mxu1 %vm5939_vm10, %v15072_v48  ;;  %v6600_v46 = vsel %vm6584_vm9, %v6439_v11, 0  ;;  %vm6582_vm9 = vcmp.eq.s32.totalorder %v6566_v37, %v14829_v22  ;;  %v15090_v37 = vld [vmem:[#allocation89_spill] sm:$0xff] }
 0xada   :  { %v6424_v17 = vadd.s32 1536, %v5720_v60  ;;  %v5736_v38 = vpop.xlane.xlu0 %5735  ;;  %vm5942_vm5 = vcmp.eq.s32.totalorder %v14830_v5, %v5720_v60  ;;  %vm5944_vm8 = vcmp.eq.s32.totalorder %v14833_v43, %v5720_v60  ;;  %vm5941_vm3 = vcmp.eq.s32.totalorder %v14829_v22, %v5720_v60 }
 0xadb   :  { %v5737_v26 = vcvt.f32.s32 %v5736_v38  ;;  %7242 = vmatprep.mubr.msk.f32.mxu0 %vm5942_vm5, %v15072_v48  ;;  %7274 = vmatprep.mubr.msk.f32.mxu1 %vm5944_vm8, %v15072_v48  ;;  %vm5943_vm7 = vcmp.eq.s32.totalorder %v14832_v3, %v5720_v60  ;;  %v13763_v30 = vadd.s32 %v6600_v46, %v6596_v53  ;;  %vm15089_vm5 = vcmp.lt.f32.partialorder %v13070_v42, %v15088_v15  ;;  %v15092_v53 = vld [vmem:[#allocation8_spill] sm:$0xff] }
 0xadc   :  { %v6440_v56 = vsel %vm15086_vm14, %v6424_v17, %v15085_v4  ;;  %vm6583_vm8 = vcmp.eq.s32.totalorder %v6567_v54, %v14829_v22  ;;  %v6598_v58 = vsel %vm6582_vm9, %v13701_v19, 0  ;;  %vm15093_vm9 = vcmp.lt.f32.partialorder %v15091_v18, %v15092_v53  ;;  %v15094_v54 = vld [vmem:[#allocation90_spill] sm:$0xff] }
 0xadd   :  { %7243 = vmatmul.mubr.msk.f32.gmra.mxu0 %vm5941_vm3, %v15072_v48  ;;  %7275 = vmatmul.mubr.msk.f32.gmra.mxu1 %vm5943_vm7, %v15072_v48  ;;  %v5740_v36 = vadd.s32 %v5739_v21, %v5737_v26  ;;  %v6601_v51 = vsel %vm6585_vm6, %v6440_v56, 0  ;;  %vm6587_vm3 = vcmp.eq.s32.totalorder %v6571_v59, %v14829_v22  ;;  %v5799_v17 = vshll.u32 %v5798_v35, 16  ;;  %v15096_v59 = vld [vmem:[#allocation9_spill] sm:$0xff] }
 0xade   :  { %v5756_v16 = vpop.xlane.xlu1 %5755  ;;  %v13780_v14 = vadd.s32 %v6601_v51, %v6597_v25  ;;  %v6599_v21 = vsel %vm6583_vm8, %v13726_v12, 0  ;;  %v6573_v56 = vadd.s32 72, %v15082_v57  ;;  %v6574_v35 = vadd.s32 80, %v15082_v57 }
 0xadf   :  { %v6425_v13 = vadd.s32 1536, %v5740_v36  ;;  %v5757_v1 = vcvt.f32.s32 %v5756_v16  ;;  %vm5946_vm4 = vcmp.eq.s32.totalorder %v14830_v5, %v5740_v36  ;;  %vm5948_vm10 = vcmp.eq.s32.totalorder %v14833_v43, %v5740_v36  ;;  %v15095_v16 = vld [vmem:[#allocation16_spill] sm:$0xff] }
 0xae0   :  { %7244 = vmatprep.mubr.msk.f32.mxu0 %vm5946_vm4, %v15072_v48  ;;  %7276 = vmatprep.mubr.msk.f32.mxu1 %vm5948_vm10, %v15072_v48  ;;  %vm5945_vm12 = vcmp.eq.s32.totalorder %v14829_v22, %v5740_v36  ;;  %vm5947_vm6 = vcmp.eq.s32.totalorder %v14832_v3, %v5740_v36 }
 0xae1   :  { %v5760_v23 = vadd.s32 %v5759_v41, %v5757_v1  ;;  %7245 = vmatmul.mubr.msk.f32.gmra.mxu0 %vm5945_vm12, %v15072_v48  ;;  %7277 = vmatmul.mubr.msk.f32.gmra.mxu1 %vm5947_vm6, %v15072_v48  ;;  %v6441_v32 = vsel %vm15089_vm5, %v6425_v13, %v15087_v40  ;;  %v5818_v41 = vcvt.f32.s32 %v13609_v2  ;;  %v5838_v2 = vcvt.f32.s32 %v13614_v52 }
 0xae2   :  { %v6602_v31 = vsel %vm6586_vm0, %v6441_v32, 0  ;;  %vm6588_vm0 = vcmp.eq.s32.totalorder %v6572_v28, %v14829_v22 }
 0xae3   :  { %v6426_v34 = vadd.s32 1536, %v5760_v23  ;;  %v5776_v60 = vpop.xlane.xlu0 %5775  ;;  %vm5950_vm7 = vcmp.eq.s32.totalorder %v14830_v5, %v5760_v23  ;;  %vm5952_vm14 = vcmp.eq.s32.totalorder %v14833_v43, %v5760_v23  ;;  %vm5949_vm4 = vcmp.eq.s32.totalorder %v14829_v22, %v5760_v23 }
 0xae4   :  { %v5777_v11 = vcvt.f32.s32 %v5776_v60  ;;  %7246 = vmatprep.mubr.msk.f32.mxu0 %vm5950_vm7, %v15072_v48  ;;  %7278 = vmatprep.mubr.msk.f32.mxu1 %vm5952_vm14, %v15072_v48  ;;  %vm5951_vm10 = vcmp.eq.s32.totalorder %v14832_v3, %v5760_v23  ;;  %v13810_v19 = vadd.s32 %v6602_v31, %v6598_v58  ;;  %v5819_v1 = vshll.u32 %v5818_v41, 16  ;;  %v15098_v31 = vld [vmem:[#allocation68_spill] sm:$0xff]  ;;  %v15100_v60 = vld [vmem:[#allocation50_spill] sm:$0xff] }
 0xae5   :  { %7247 = vmatmul.mubr.msk.f32.gmra.mxu0 %vm5949_vm4, %v15072_v48  ;;  %7279 = vmatmul.mubr.msk.f32.gmra.mxu1 %vm5951_vm10, %v15072_v48  ;;  %v6442_v46 = vsel %vm15093_vm9, %v6426_v34, %v15090_v37  ;;  %vm6589_vm7 = vcmp.eq.s32.totalorder %v6573_v56, %v14829_v22  ;;  %v5839_v58 = vshll.u32 %v5838_v2, 16  ;;  %v15099_v34 = vld [vmem:[#allocation30_spill] sm:$0xff]  ;;  %v5918_v41 = vcvt.f32.s32 %v13634_v9  ;;  %v15103_v56 = vld [vmem:[#allocation88_spill] sm:$0xff] }
 0xae6   :  { %v5780_v38 = vadd.s32 %v5779_v27, %v5777_v11  ;;  %v6603_v26 = vsel %vm6587_vm3, %v6442_v46, 0  ;;  %v5796_v4 = vpop.xlane.xlu1 %5795  ;;  %vm15097_vm3 = vcmp.lt.f32.partialorder %v15095_v16, %v15096_v59  ;;  %v5858_v11 = vcvt.f32.s32 %v13620_v6 }
 0xae7   :  { %v13826_v36 = vadd.s32 %v6603_v26, %v6599_v21  ;;  %v5797_v51 = vcvt.f32.s32 %v5796_v4  ;;  %v6575_v46 = vadd.s32 88, %v15082_v57  ;;  %v5878_v21 = vcvt.f32.s32 %v13625_v49  ;;  %v15102_v49 = vld [vmem:[#allocation79_spill] sm:$0xff] }
 0xae8   :  { %v6427_v25 = vadd.s32 1536, %v5780_v38  ;;  %vm5954_vm12 = vcmp.eq.s32.totalorder %v14830_v5, %v5780_v38  ;;  %vm5956_vm6 = vcmp.eq.s32.totalorder %v14833_v43, %v5780_v38  ;;  %vm5953_vm5 = vcmp.eq.s32.totalorder %v14829_v22, %v5780_v38 }
 0xae9   :  { %7248 = vmatprep.mubr.msk.f32.mxu0 %vm5954_vm12, %v15072_v48  ;;  %7280 = vmatprep.mubr.msk.f32.mxu1 %vm5956_vm6, %v15072_v48  ;;  %vm5955_vm8 = vcmp.eq.s32.totalorder %v14832_v3, %v5780_v38  ;;  %v5800_v12 = vadd.s32 %v5799_v17, %v5797_v51  ;;  %vm6590_vm12 = vcmp.eq.s32.totalorder %v6574_v35, %v14829_v22  ;;  %v5898_v26 = vcvt.f32.s32 %v13630_v7  ;;  %v15107_v35 = vld [vmem:[#allocation26_spill] sm:$0xff] }
 0xaea   :  { %7249 = vmatmul.mubr.msk.f32.gmra.mxu0 %vm5953_vm5, %v15072_v48  ;;  %7281 = vmatmul.mubr.msk.f32.gmra.mxu1 %vm5955_vm8, %v15072_v48  ;;  %v6443_v13 = vsel %vm15097_vm3, %v6427_v25, %v15094_v54  ;;  %v15104_v25 = vld [vmem:[#allocation91_spill] sm:$0xff]  ;;  %v6576_v2 = vadd.s32 96, %v15082_v57  ;;  %v5859_v54 = vshll.u32 %v5858_v11, 16  ;;  %v5919_v11 = vshll.u32 %v5918_v41, 16 }
 0xaeb   :  { %v5816_v45 = vpop.xlane.xlu0 %5815  ;;  %v6604_v23 = vsel %vm6588_vm0, %v6443_v13, 0  ;;  %v6428_v52 = vadd.s32 1536, %v5800_v12  ;;  %vm5958_vm14 = vcmp.eq.s32.totalorder %v14830_v5, %v5800_v12  ;;  %vm5960_vm4 = vcmp.eq.s32.totalorder %v14833_v43, %v5800_v12 }
 0xaec   :  { %v5817_v40 = vcvt.f32.s32 %v5816_v45  ;;  %7250 = vmatprep.mubr.msk.f32.mxu0 %vm5958_vm14, %v15072_v48  ;;  %7282 = vmatprep.mubr.msk.f32.mxu1 %vm5960_vm4, %v15072_v48  ;;  %vm5957_vm10 = vcmp.eq.s32.totalorder %v14829_v22, %v5800_v12  ;;  %vm5959_vm9 = vcmp.eq.s32.totalorder %v14832_v3, %v5800_v12  ;;  %v13852_v32 = vadd.s32 %v13763_v30, %v6604_v23  ;;  %v15106_v45 = vld [vmem:[#allocation71_spill] sm:$0xff] }
 0xaed   :  { %vm15101_vm0 = vcmp.lt.f32.partialorder %v15099_v34, %v15100_v60  ;;  %v13885_v12 = vadd.s32 104, %v15082_v57  ;;  %vm6591_vm14 = vcmp.eq.s32.totalorder %v6575_v46, %v14829_v22 }
 0xaee   :  { %v5820_v28 = vadd.s32 %v5819_v1, %v5817_v40  ;;  %7251 = vmatmul.mubr.msk.f32.gmra.mxu0 %vm5957_vm10, %v15072_v48  ;;  %7283 = vmatmul.mubr.msk.f32.gmra.mxu1 %vm5959_vm9, %v15072_v48  ;;  %v6444_v27 = vsel %vm15101_vm0, %v6428_v52, %v15098_v31  ;;  %v5879_v52 = vshll.u32 %v5878_v21, 16  ;;  %v5899_v40 = vshll.u32 %v5898_v26, 16  ;;  %v15110_v31 = vld [vmem:[#allocation18_spill] sm:$0xff] }
 0xaef   :  { %v5836_v37 = vpop.xlane.xlu1 %5835  ;;  %v6605_v30 = vsel %vm6589_vm7, %v6444_v27, 0  ;;  %vm15105_vm7 = vcmp.lt.f32.partialorder %v15103_v56, %v15104_v25  ;;  %v15111_v27 = vld [vmem:[#allocation92_spill] sm:$0xff]  ;;  %v6578_v21 = vadd.s32 112, %v15082_v57 }
 0xaf0   :  { %v6429_v17 = vadd.s32 1536, %v5820_v28  ;;  %v5837_v38 = vcvt.f32.s32 %v5836_v37  ;;  %vm5962_vm6 = vcmp.eq.s32.totalorder %v14830_v5, %v5820_v28  ;;  %vm5964_vm5 = vcmp.eq.s32.totalorder %v14833_v43, %v5820_v28 }
 0xaf1   :  { %7252 = vmatprep.mubr.msk.f32.mxu0 %vm5962_vm6, %v15072_v48  ;;  %7284 = vmatprep.mubr.msk.f32.mxu1 %vm5964_vm5, %v15072_v48  ;;  %vm5961_vm8 = vcmp.eq.s32.totalorder %v14829_v22, %v5820_v28  ;;  %vm5963_vm3 = vcmp.eq.s32.totalorder %v14832_v3, %v5820_v28  ;;  %v13873_v6 = vadd.s32 %v13780_v14, %v6605_v30  ;;  %v15109_v28 = vld [vmem:[#allocation69_spill] sm:$0xff] }
 0xaf2   :  { %v5840_v4 = vadd.s32 %v5839_v58, %v5837_v38  ;;  %7253 = vmatmul.mubr.msk.f32.gmra.mxu0 %vm5961_vm8, %v15072_v48  ;;  %7285 = vmatmul.mubr.msk.f32.gmra.mxu1 %vm5963_vm3, %v15072_v48  ;;  %v6445_v51 = vsel %vm15105_vm7, %v6429_v17, %v15102_v49  ;;  %vm15112_vm6 = vcmp.lt.f32.partialorder %v15110_v31, %v15111_v27 }
 0xaf3   :  { %v6606_v7 = vsel %vm6590_vm12, %v6445_v51, 0  ;;  %vm15108_vm12 = vcmp.lt.f32.partialorder %v15107_v35, %v15106_v45  ;;  %vm6592_vm5 = vcmp.eq.s32.totalorder %v6576_v2, %v14829_v22  ;;  %vm6593_vm8 = vcmp.eq.s32.totalorder %v13885_v12, %v14829_v22 }
 0xaf4   :  { %v6430_v9 = vadd.s32 1536, %v5840_v4  ;;  %v5856_v14 = vpop.xlane.xlu0 %5855  ;;  %vm5966_vm4 = vcmp.eq.s32.totalorder %v14830_v5, %v5840_v4  ;;  %vm5968_vm10 = vcmp.eq.s32.totalorder %v14833_v43, %v5840_v4  ;;  %vm5965_vm9 = vcmp.eq.s32.totalorder %v14829_v22, %v5840_v4 }
 0xaf5   :  { %v5857_v13 = vcvt.f32.s32 %v5856_v14  ;;  %7254 = vmatprep.mubr.msk.f32.mxu0 %vm5966_vm4, %v15072_v48  ;;  %7286 = vmatprep.mubr.msk.f32.mxu1 %vm5968_vm10, %v15072_v48  ;;  %vm5967_vm0 = vcmp.eq.s32.totalorder %v14832_v3, %v5840_v4  ;;  %v13897_v1 = vadd.s32 %v13810_v19, %v6606_v7  ;;  %v13904_v23 = vsel %vm15108_vm12, %v15107_v35, %v15106_v45  ;;  %v5876_v58 = vpop.xlane.xlu1 %5875  ;;  %v15114_v14 = vld [vmem:[#allocation93_spill] sm:$0xff]  ;;  %v15117_v45 = vld [vmem:[#allocation51_spill] sm:$0xff] }
 0xaf6   :  { %7255 = vmatmul.mubr.msk.f32.gmra.mxu0 %vm5965_vm9, %v15072_v48  ;;  %7287 = vmatmul.mubr.msk.f32.gmra.mxu1 %vm5967_vm0, %v15072_v48  ;;  %v6446_v19 = vsel %vm15112_vm6, %v6430_v9, %v15109_v28  ;;  %v5877_v30 = vcvt.f32.s32 %v5876_v58  ;;  %v6579_v51 = vadd.s32 120, %v15082_v57  ;;  %v15113_v57 = vld [vmem:[#allocation70_spill] sm:$0xff]  ;;  %vm15115_vm6 = vcmp.lt.f32.partialorder %v13230_v63, %v15114_v14 }
 0xaf7   :  { %v5860_v37 = vadd.s32 %v5859_v54, %v5857_v13  ;;  %v6607_v17 = vsel %vm6591_vm14, %v6446_v19, 0  ;;  %v15116_v13 = vld [vmem:[#allocation81_spill] sm:$0xff]  ;;  %v15121_v58 = vld [vmem:[#allocation94_spill] sm:$0xff] }
 0xaf8   :  { %v5896_v38 = vpop.xlane.xlu0 %5895  ;;  %v6619_v26 = vadd.s32 %v13826_v36, %v6607_v17  ;;  %v5880_v49 = vadd.s32 %v5879_v52, %v5877_v30  ;;  %v15119_v52 = vld [vmem:[#allocation80_spill] sm:$0xff] }
 0xaf9   :  { %v6431_v4 = vadd.s32 1536, %v5860_v37  ;;  %vm5970_vm3 = vcmp.eq.s32.totalorder %v14830_v5, %v5860_v37  ;;  %vm5972_vm7 = vcmp.eq.s32.totalorder %v14833_v43, %v5860_v37  ;;  %vm5969_vm14 = vcmp.eq.s32.totalorder %v14829_v22, %v5860_v37  ;;  %v5916_v41 = vpop.xlane.xlu1 %5915 }
 0xafa   :  { %7256 = vmatprep.mubr.msk.f32.mxu0 %vm5970_vm3, %v15072_v48  ;;  %7288 = vmatprep.mubr.msk.f32.mxu1 %vm5972_vm7, %v15072_v48  ;;  %vm5971_vm4 = vcmp.eq.s32.totalorder %v14832_v3, %v5860_v37  ;;  %v5897_v46 = vcvt.f32.s32 %v5896_v38  ;;  %v6432_v7 = vadd.s32 1536, %v5880_v49  ;;  %vm5974_vm10 = vcmp.eq.s32.totalorder %v14830_v5, %v5880_v49  ;;  %v15123_v38 = vld [vmem:[#allocation72_spill] sm:$0xff] }
 0xafb   :  { %7257 = vmatmul.mubr.msk.f32.gmra.mxu0 %vm5969_vm14, %v15072_v48  ;;  %7289 = vmatmul.mubr.msk.f32.gmra.mxu1 %vm5971_vm4, %v15072_v48  ;;  %vm5976_vm9 = vcmp.eq.s32.totalorder %v14833_v43, %v5880_v49  ;;  %vm5973_vm0 = vcmp.eq.s32.totalorder %v14829_v22, %v5880_v49  ;;  %vm5975_vm12 = vcmp.eq.s32.totalorder %v14832_v3, %v5880_v49  ;;  %v5917_v9 = vcvt.f32.s32 %v5916_v41 }
 0xafc   :  { %v5900_v36 = vadd.s32 %v5899_v40, %v5897_v46  ;;  %7258 = vmatprep.mubr.msk.f32.mxu0 %vm5974_vm10, %v15072_v48  ;;  %7290 = vmatprep.mubr.msk.f32.mxu1 %vm5976_vm9, %v15072_v48  ;;  %v6447_v54 = vsel %vm15115_vm6, %v6431_v4, %v15113_v57  ;;  %vm6417_vm3 = vcmp.lt.f32.partialorder %v13284_v39, %v13904_v23  ;;  %v15120_v40 = vld [vmem:[#allocation31_spill] sm:$0xff] }
 0xafd   :  { %vm15118_vm7 = vcmp.lt.f32.partialorder %v15117_v45, %v15116_v13  ;;  %vm15122_vm14 = vcmp.lt.f32.partialorder %v15120_v40, %v15121_v58  ;;  %v6608_v19 = vsel %vm6592_vm5, %v6447_v54, 0  ;;  %v5920_v30 = vadd.s32 %v5919_v11, %v5917_v9 }
 0xafe   :  { %v13945_v35 = vsel %vm15118_vm7, %v15117_v45, %v15116_v13  ;;  %v6448_v28 = vsel %vm15122_vm14, %v6432_v7, %v15119_v52  ;;  %v6433_v37 = vadd.s32 1536, %v5900_v36  ;;  %vm5978_vm4 = vcmp.eq.s32.totalorder %v14830_v5, %v5900_v36 }
 0xaff   :  { %vm5980_vm10 = vcmp.eq.s32.totalorder %v14833_v43, %v5900_v36  ;;  %vm6418_vm9 = vcmp.lt.f32.partialorder %v13308_v44, %v13945_v35  ;;  %7259 = vmatmul.mubr.msk.f32.gmra.mxu0 %vm5973_vm0, %v15072_v48  ;;  %7291 = vmatmul.mubr.msk.f32.gmra.mxu1 %vm5975_vm12, %v15072_v48  ;;  %vm6594_vm6 = vcmp.eq.s32.totalorder %v6578_v21, %v14829_v22  ;;  %v6609_v2 = vsel %vm6593_vm8, %v6448_v28, 0  ;;  %v15124_v21 = vld [vmem:[#allocation73_spill] sm:$0xff] }
 0xb00   :  { %v6620_v11 = vadd.s32 %v13852_v32, %v6608_v19  ;;  %v6434_v17 = vadd.s32 1536, %v5920_v30  ;;  %7260 = vmatprep.mubr.msk.f32.mxu0 %vm5978_vm4, %v15072_v48  ;;  %7292 = vmatprep.mubr.msk.f32.mxu1 %vm5980_vm10, %v15072_v48  ;;  %vm5977_vm5 = vcmp.eq.s32.totalorder %v14829_v22, %v5900_v36  ;;  %vm5979_vm7 = vcmp.eq.s32.totalorder %v14832_v3, %v5900_v36 }
 0xb01   :  { %vm6595_vm0 = vcmp.eq.s32.totalorder %v6579_v51, %v14829_v22  ;;  %vm5982_vm12 = vcmp.eq.s32.totalorder %v14830_v5, %v5920_v30  ;;  %vm5984_vm14 = vcmp.eq.s32.totalorder %v14833_v43, %v5920_v30  ;;  %v6449_v32 = vsel %vm6417_vm3, %v6433_v37, %v15123_v38 }
 0xb02   :  { %v6621_v12 = vadd.s32 %v13873_v6, %v6609_v2  ;;  %v6450_v4 = vsel %vm6418_vm9, %v6434_v17, %v15124_v21  ;;  %v6610_v49 = vsel %vm6594_vm6, %v6449_v32, 0  ;;  %vm5981_vm8 = vcmp.eq.s32.totalorder %v14829_v22, %v5920_v30 }
 0xb03   :  { %7261 = vmatmul.mubr.msk.f32.gmra.mxu0 %vm5977_vm5, %v15072_v48  ;;  %7293 = vmatmul.mubr.msk.f32.gmra.mxu1 %vm5979_vm7, %v15072_v48  ;;  %v6611_v5 = vsel %vm6595_vm0, %v6450_v4, 0  ;;  %v6622_v43 = vadd.s32 %v13897_v1, %v6610_v49  ;;  %vm5983_vm4 = vcmp.eq.s32.totalorder %v14832_v3, %v5920_v30 }
 0xb04   :  { %v6624_v46 = vadd.s32 %v6621_v12, %v6620_v11  ;;  %7262 = vmatprep.mubr.msk.f32.mxu0 %vm5982_vm12, %v15072_v48  ;;  %7294 = vmatprep.mubr.msk.f32.mxu1 %vm5984_vm14, %v15072_v48  ;;  %v6623_v6 = vadd.s32 %v6619_v26, %v6611_v5 }
 0xb06   :  { %v6625_v41 = vadd.s32 %v6623_v6, %v6622_v43 }
 0xb07   :  { %7263 = vmatmul.mubr.msk.f32.gmra.mxu0 %vm5981_vm8, %v15072_v48  ;;  %7295 = vmatmul.mubr.msk.f32.gmra.mxu1 %vm5983_vm4, %v15072_v48 }
 0xb08   :  { %v6626_v51 = vadd.s32 %v6625_v41, %v6624_v46 }
 0xb0a   :  { %v6627_v7 = vrot.slane %v6626_v51, 4 }
 0xb0c   :  { %v6628_v36 = vadd.s32 %v6627_v7, %v6626_v51 }
 0xb0e   :  { %v6629_v9 = vrot.slane %v6628_v36, 2 }
 0xb10   :  { %v6630_v1 = vadd.s32 %v6629_v9, %v6628_v36 }
 0xb12   :  { %v6631_v57 = vrot.slane %v6630_v1, 1 }
 0xb14   :  { %v6632_v54 = vadd.s32 %v6631_v57, %v6630_v1 }
 0xb16   :  { %6633 = vst [vmem:[#allocation2] sm:$0x1] %v6632_v54 }
 0xb17   :  { %8014 = shalt.err (!%p8011_p4)
}
 0xb18   :  { %6645 = dma.vmem_to_hbm [thread:$0]  %s6643_s17, 16, %s14239_s5, [#allocation3]   ;;  %v15125_v2 = vld [vmem:[#allocation74_spill] sm:$0xff]  ;;  %vm15126_vm10 = vcmask 261120   ;;  %v7987_v32 = vld [vmem:[%s14234_s0] sm:$0xff]  ;;  %v15130_v1 = vld [vmem:[#allocation75_spill] sm:$0xff]  ;;  %vm15145_vm4 = vcmp.lt.f32.partialorder %v13070_v42, %v15088_v15 }
 0xb19   :  { %v15127_v62 = vld [vmem:[#allocation82_spill] sm:$0xff]  ;;  %vm15129_vm6 = vmmov %vm15126_vm10  ;;  %v15136_v61 = vld [vmem:[#allocation83_spill] sm:$0xff] }
 0xb1a   :  { %v7988_v51 = vld [vmem:[%s14234_s0 + $0x8] sm:$0xff]  ;;  %vm15132_vm5 = vmmov %vm15129_vm6 }
 0xb1b   :  { %vm15135_vm7 = vmmov %vm15132_vm5  ;;  %v15176_v23 = vld [vmem:[#allocation29_spill] sm:$0xff] }
 0xb88   :  { %v7808_v22 = vpop.f32.mrf.mxu0  ;;  %v7888_v3 = vpop.f32.mrf.mxu1 }
 0xb8a   :  { %v7809_v48 = vpop.f32.mrf.mxu0  ;;  %v7889_v26 = vpop.f32.mrf.mxu1 }
 0xb8b   :  { %v7810_v13 = vadd.f32 %v7809_v48, %v7808_v22  ;;  %v7890_v45 = vadd.f32 %v7889_v26, %v7888_v3  ;;  %v7989_v3 = vld [vmem:[%s14234_s0 + $0x10] sm:$0xff] }
 0xb8c   :  { %v7811_v52 = vpop.f32.mrf.mxu0  ;;  %v7891_v28 = vpop.f32.mrf.mxu1 }
 0xb8d   :  { %v6325_v19 = vadd.f32 %v7890_v45, %v7810_v13 }
 0xb8e   :  { %v7812_v37 = vpop.f32.mrf.mxu0  ;;  %v7892_v30 = vpop.f32.mrf.mxu1 }
 0xb8f   :  { %v6483_v11 = vsel %vm6403_vm11, %v6325_v19, %v15125_v2  ;;  %v7813_v17 = vadd.f32 %v7812_v37, %v7811_v52  ;;  %v7893_v38 = vadd.f32 %v7892_v30, %v7891_v28  ;;  %vm15128_vm11 = vmmov %vm15126_vm10  ;;  %v15134_v37 = vld [vmem:[#allocation76_spill] sm:$0xff] }
 0xb90   :  { %6499 = vst.msk [vmem:[%s14238_s4] sm:$0xff] %vm15126_vm10, %v6483_v11  ;;  %v6515_v12 = vsub.f32 %v6483_v11, %v7987_v32  ;;  %v7814_v21 = vpop.f32.mrf.mxu0  ;;  %v7894_v4 = vpop.f32.mrf.mxu1 }
 0xb91   :  { %v6330_v49 = vadd.f32 %v7893_v38, %v7813_v17  ;;  %v7990_v17 = vld [vmem:[%s14234_s0 + $0x18] sm:$0xff] }
 0xb92   :  { %v6531_v5 = vmul.f32 %v6515_v12, %v6515_v12  ;;  %v7815_v43 = vpop.f32.mrf.mxu0  ;;  %v7895_v46 = vpop.f32.mrf.mxu1 }
 0xb93   :  { %v6484_v50 = vsel %vm6404_vm13, %v6330_v49, %v15127_v62  ;;  %v7816_v6 = vadd.f32 %v7815_v43, %v7814_v21  ;;  %v7896_v41 = vadd.f32 %v7895_v46, %v7894_v4  ;;  %vm15131_vm13 = vmmov %vm15129_vm6  ;;  %v7991_v62 = vld [vmem:[%s14234_s0 + $0x20] sm:$0xff] }
 0xb94   :  { %6547 = vst.msk [vmem:[%s14240_s6] sm:$0xff] %vm15128_vm11, %v6531_v5  ;;  %v6516_v7 = vsub.f32 %v6484_v50, %v7988_v51  ;;  %v15139_v51 = vld [vmem:[#allocation77_spill] sm:$0xff]  ;;  %vm15148_vm11 = vcmp.lt.f32.partialorder %v15091_v18, %v15092_v53 }
 0xb95   :  { %6500 = vst.msk [vmem:[%s14238_s4 + $0x8] sm:$0xff] %vm15129_vm6, %v6484_v50  ;;  %v6335_v36 = vadd.f32 %v7896_v41, %v7816_v6  ;;  %v7817_v47 = vpop.f32.mrf.mxu0  ;;  %v7897_v0 = vpop.f32.mrf.mxu1 }
 0xb96   :  { %v6532_v9 = vmul.f32 %v6516_v7, %v6516_v7 }
 0xb97   :  { %v6485_v57 = vsel %vm6405_vm15, %v6335_v36, %v15130_v1  ;;  %v7818_v54 = vpop.f32.mrf.mxu0  ;;  %v7898_v22 = vpop.f32.mrf.mxu1  ;;  %vm15133_vm15 = vmmov %vm15132_vm5 }
 0xb98   :  { %6548 = vst.msk [vmem:[%s14240_s6 + $0x8] sm:$0xff] %vm15131_vm13, %v6532_v9  ;;  %v6517_v48 = vsub.f32 %v6485_v57, %v7989_v3  ;;  %v7819_v26 = vadd.f32 %v7818_v54, %v7817_v47  ;;  %v7899_v29 = vadd.f32 %v7898_v22, %v7897_v0  ;;  %v7992_v0 = vld [vmem:[%s14234_s0 + $0x28] sm:$0xff] }
 0xb99   :  { %6501 = vst.msk [vmem:[%s14238_s4 + $0x10] sm:$0xff] %vm15132_vm5, %v6485_v57  ;;  %v7820_v24 = vpop.f32.mrf.mxu0  ;;  %v7900_v13 = vpop.f32.mrf.mxu1 }
 0xb9a   :  { %v6533_v45 = vmul.f32 %v6517_v48, %v6517_v48  ;;  %v6340_v52 = vadd.f32 %v7899_v29, %v7819_v26  ;;  %v15144_v26 = vld [vmem:[#allocation78_spill] sm:$0xff] }
 0xb9b   :  { %v7821_v28 = vpop.f32.mrf.mxu0  ;;  %v7901_v19 = vpop.f32.mrf.mxu1 }
 0xb9c   :  { %6549 = vst.msk [vmem:[%s14240_s6 + $0x10] sm:$0xff] %vm15133_vm15, %v6533_v45  ;;  %v6486_v30 = vsel %vm6406_vm1, %v6340_v52, %v15134_v37  ;;  %v7822_v2 = vadd.f32 %v7821_v28, %v7820_v24  ;;  %v7902_v11 = vadd.f32 %v7901_v19, %v7900_v13  ;;  %vm15137_vm1 = vmmov %vm15132_vm5  ;;  %v7993_v45 = vld [vmem:[%s14234_s0 + $0x30] sm:$0xff]  ;;  %vm15153_vm15 = vcmp.lt.f32.partialorder %v15095_v16, %v15096_v59  ;;  %v15155_v16 = vld [vmem:[#allocation13_spill] sm:$0xff] }
 0xb9d   :  { %6502 = vst.msk [vmem:[%s14238_s4 + $0x18] sm:$0xff] %vm15135_vm7, %v6486_v30  ;;  %v6518_v38 = vsub.f32 %v6486_v30, %v7990_v17  ;;  %v7823_v32 = vpop.f32.mrf.mxu0  ;;  %v7903_v12 = vpop.f32.mrf.mxu1  ;;  %vm15138_vm0 = vmmov %vm15137_vm1  ;;  %v7994_v17 = vld [vmem:[%s14234_s0 + $0x38] sm:$0xff] }
 0xb9e   :  { %v6345_v21 = vadd.f32 %v7902_v11, %v7822_v2  ;;  %vm15141_vm12 = vmmov %vm15138_vm0  ;;  %v15147_v2 = vld [vmem:[#allocation84_spill] sm:$0xff] }
 0xb9f   :  { %v6534_v4 = vmul.f32 %v6518_v38, %v6518_v38  ;;  %v7824_v49 = vpop.f32.mrf.mxu0  ;;  %v7904_v5 = vpop.f32.mrf.mxu1  ;;  %vm15142_vm14 = vmmov %vm15138_vm0 }
 0xba0   :  { %v6487_v8 = vsel %vm6407_vm2, %v6345_v21, %v15136_v61  ;;  %v7825_v43 = vadd.f32 %v7824_v49, %v7823_v32  ;;  %v7905_v46 = vadd.f32 %v7904_v5, %v7903_v12  ;;  %vm15140_vm2 = vcmp.lt.f32.partialorder %v13042_v20, %v12912_v10  ;;  %vm15143_vm8 = vmmov %vm15138_vm0  ;;  %v15152_v61 = vld [vmem:[#allocation24_spill] sm:$0xff] }
 0xba1   :  { %6550 = vst.msk [vmem:[%s14240_s6 + $0x18] sm:$0xff] %vm15137_vm1, %v6534_v4  ;;  %v6519_v50 = vsub.f32 %v6487_v8, %v7991_v62  ;;  %v7826_v33 = vpop.f32.mrf.mxu0  ;;  %v7906_v55 = vpop.f32.mrf.mxu1  ;;  %vm15146_vm10 = vmmov %vm15138_vm0  ;;  %v7995_v62 = vld [vmem:[%s14234_s0 + $0x40] sm:$0xff]  ;;  %vm15156_vm1 = vcmp.lt.f32.partialorder %v15099_v34, %v15100_v60 }
 0xba2   :  { %6503 = vst.msk [vmem:[%s14238_s4 + $0x20] sm:$0xff] %vm15138_vm0, %v6487_v8  ;;  %v6350_v6 = vadd.f32 %v7905_v46, %v7825_v43  ;;  %vm15149_vm6 = vmmov %vm15138_vm0 }
 0xba3   :  { %v6535_v41 = vmul.f32 %v6519_v50, %v6519_v50  ;;  %v7827_v36 = vpop.f32.mrf.mxu0  ;;  %v7907_v47 = vpop.f32.mrf.mxu1  ;;  %vm15150_vm13 = vmmov %vm15138_vm0 }
 0xba4   :  { %v6488_v7 = vsel %vm15140_vm2, %v6350_v6, %v15139_v51  ;;  %v7828_v1 = vadd.f32 %v7827_v36, %v7826_v33  ;;  %v7908_v10 = vadd.f32 %v7907_v47, %v7906_v55  ;;  %vm15151_vm5 = vmmov %vm15138_vm0 }
 0xba5   :  { %6551 = vst.msk [vmem:[%s14240_s6 + $0x20] sm:$0xff] %vm15141_vm12, %v6535_v41  ;;  %v6520_v9 = vsub.f32 %v6488_v7, %v7992_v0  ;;  %v7829_v20 = vpop.f32.mrf.mxu0  ;;  %v7909_v57 = vpop.f32.mrf.mxu1  ;;  %vm15154_vm7 = vmmov %vm15138_vm0  ;;  %v7996_v0 = vld [vmem:[%s14234_s0 + $0x48] sm:$0xff]  ;;  %vm15159_vm12 = vcmp.lt.f32.partialorder %v15103_v56, %v15104_v25 }
 0xba6   :  { %6504 = vst.msk [vmem:[%s14238_s4 + $0x28] sm:$0xff] %vm15142_vm14, %v6488_v7  ;;  %v6355_v22 = vadd.f32 %v7908_v10, %v7828_v1  ;;  %vm15157_vm2 = vmmov %vm15138_vm0 }
 0xba7   :  { %v6536_v54 = vmul.f32 %v6520_v9, %v6520_v9  ;;  %v7830_v3 = vpop.f32.mrf.mxu0  ;;  %v7910_v48 = vpop.f32.mrf.mxu1  ;;  %vm15160_vm14 = vmmov %vm15138_vm0 }
 0xba8   :  { %v6489_v29 = vsel %vm15145_vm4, %v6355_v22, %v15144_v26  ;;  %v7831_v24 = vadd.f32 %v7830_v3, %v7829_v20  ;;  %v7911_v13 = vadd.f32 %v7910_v48, %v7909_v57  ;;  %v7997_v26 = vld [vmem:[%s14234_s0 + $0x50] sm:$0xff]  ;;  %vm15163_vm4 = vcmp.lt.f32.partialorder %v15110_v31, %v15111_v27 }
 0xba9   :  { %6552 = vst.msk [vmem:[%s14240_s6 + $0x28] sm:$0xff] %vm15143_vm8, %v6536_v54  ;;  %v6521_v52 = vsub.f32 %v6489_v29, %v7993_v45  ;;  %v15158_v54 = vld [vmem:[#allocation85_spill] sm:$0xff]  ;;  %vm15161_vm8 = vmmov %vm15138_vm0  ;;  %v15162_v45 = vld [vmem:[#allocation27_spill] sm:$0xff] }
 0xbaa   :  { %6505 = vst.msk [vmem:[%s14238_s4 + $0x30] sm:$0xff] %vm15146_vm10, %v6489_v29  ;;  %v6360_v28 = vadd.f32 %v7911_v13, %v7831_v24  ;;  %v7832_v19 = vpop.f32.mrf.mxu0  ;;  %v7912_v37 = vpop.f32.mrf.mxu1  ;;  %vm15164_vm10 = vmmov %vm15138_vm0 }
 0xbab   :  { %v6537_v30 = vmul.f32 %v6521_v52, %v6521_v52 }
 0xbac   :  { %v6490_v42 = vsel %vm15148_vm11, %v6360_v28, %v15147_v2  ;;  %v7833_v15 = vpop.f32.mrf.mxu0  ;;  %v7913_v11 = vpop.f32.mrf.mxu1  ;;  %vm15165_vm11 = vmmov %vm15138_vm0 }
 0xbad   :  { %6553 = vst.msk [vmem:[%s14240_s6 + $0x30] sm:$0xff] %vm15149_vm6, %v6537_v30  ;;  %v6522_v38 = vsub.f32 %v6490_v42, %v7994_v17  ;;  %v7834_v32 = vadd.f32 %v7833_v15, %v7832_v19  ;;  %v7914_v18 = vadd.f32 %v7913_v11, %v7912_v37  ;;  %v7998_v37 = vld [vmem:[%s14234_s0 + $0x58] sm:$0xff]  ;;  %vm15166_vm6 = vmmov %vm15138_vm0 }
 0xbae   :  { %6506 = vst.msk [vmem:[%s14238_s4 + $0x38] sm:$0xff] %vm15150_vm13, %v6490_v42  ;;  %v7835_v53 = vpop.f32.mrf.mxu0  ;;  %v7915_v12 = vpop.f32.mrf.mxu1  ;;  %vm15168_vm13 = vcmp.lt.f32.partialorder %v13230_v63, %v15114_v14  ;;  %v15170_v63 = vld [vmem:[#allocation86_spill] sm:$0xff] }
 0xbaf   :  { %v6538_v21 = vmul.f32 %v6522_v38, %v6522_v38  ;;  %v6365_v4 = vadd.f32 %v7914_v18, %v7834_v32  ;;  %v15167_v32 = vld [vmem:[#allocation15_spill] sm:$0xff] }
 0xbb0   :  { %v7836_v49 = vpop.f32.mrf.mxu0  ;;  %v7916_v5 = vpop.f32.mrf.mxu1 }
 0xbb1   :  { %6554 = vst.msk [vmem:[%s14240_s6 + $0x38] sm:$0xff] %vm15151_vm5, %v6538_v21  ;;  %v6491_v8 = vsel %vm15153_vm15, %v6365_v4, %v15152_v61  ;;  %v7837_v43 = vadd.f32 %v7836_v49, %v7835_v53  ;;  %v7917_v46 = vadd.f32 %v7916_v5, %v7915_v12  ;;  %vm15169_vm5 = vmmov %vm15138_vm0  ;;  %v7999_v21 = vld [vmem:[%s14234_s0 + $0x60] sm:$0xff]  ;;  %vm15171_vm15 = vcmp.lt.f32.partialorder %v15120_v40, %v15121_v58 }
 0xbb2   :  { %6507 = vst.msk [vmem:[%s14238_s4 + $0x40] sm:$0xff] %vm15154_vm7, %v6491_v8  ;;  %v6523_v50 = vsub.f32 %v6491_v8, %v7995_v62  ;;  %v7838_v6 = vpop.f32.mrf.mxu0  ;;  %v7918_v33 = vpop.f32.mrf.mxu1  ;;  %vm15172_vm7 = vmmov %vm15138_vm0 }
 0xbb3   :  { %v6370_v55 = vadd.f32 %v7917_v46, %v7837_v43 }
 0xbb4   :  { %v6539_v41 = vmul.f32 %v6523_v50, %v6523_v50  ;;  %v7839_v51 = vpop.f32.mrf.mxu0  ;;  %v7919_v7 = vpop.f32.mrf.mxu1 }
 0xbb5   :  { %v6492_v59 = vsel %vm15156_vm1, %v6370_v55, %v15155_v16  ;;  %v7840_v36 = vadd.f32 %v7839_v51, %v7838_v6  ;;  %v7920_v47 = vadd.f32 %v7919_v7, %v7918_v33  ;;  %vm15173_vm1 = vmmov %vm15138_vm0  ;;  %v8000_v6 = vld [vmem:[%s14234_s0 + $0x68] sm:$0xff]  ;;  %v15174_v16 = vld [vmem:[#allocation28_spill] sm:$0xff] }
 0xbb6   :  { %6555 = vst.msk [vmem:[%s14240_s6 + $0x40] sm:$0xff] %vm15138_vm0, %v6539_v41  ;;  %v6524_v9 = vsub.f32 %v6492_v59, %v7996_v0  ;;  %v7841_v1 = vpop.f32.mrf.mxu0  ;;  %v7921_v34 = vpop.f32.mrf.mxu1  ;;  %v8001_v0 = vld [vmem:[%s14234_s0 + $0x70] sm:$0xff] }
 0xbb7   :  { %6508 = vst.msk [vmem:[%s14238_s4 + $0x48] sm:$0xff] %vm15157_vm2, %v6492_v59  ;;  %v6375_v60 = vadd.f32 %v7920_v47, %v7840_v36  ;;  %vm15175_vm2 = vmmov %vm15138_vm0 }
 0xbb8   :  { %v6540_v10 = vmul.f32 %v6524_v9, %v6524_v9  ;;  %v7842_v20 = vpop.f32.mrf.mxu0  ;;  %v7922_v57 = vpop.f32.mrf.mxu1 }
 0xbb9   :  { %v6493_v22 = vsel %vm15159_vm12, %v6375_v60, %v15158_v54  ;;  %v7843_v3 = vadd.f32 %v7842_v20, %v7841_v1  ;;  %v7923_v48 = vadd.f32 %v7922_v57, %v7921_v34  ;;  %vm15178_vm12 = vmmov %vm15138_vm0  ;;  %v8002_v60 = vld [vmem:[%s14234_s0 + $0x78] sm:$0xff] }
 0xbba   :  { %6556 = vst.msk [vmem:[%s14240_s6 + $0x48] sm:$0xff] %vm15160_vm14, %v6540_v10  ;;  %v6525_v29 = vsub.f32 %v6493_v22, %v7997_v26  ;;  %vm15179_vm14 = vmmov %vm15138_vm0 }
 0xbbb   :  { %6509 = vst.msk [vmem:[%s14238_s4 + $0x50] sm:$0xff] %vm15161_vm8, %v6493_v22  ;;  %v6380_v24 = vadd.f32 %v7923_v48, %v7843_v3  ;;  %v7844_v56 = vpop.f32.mrf.mxu0  ;;  %v7924_v25 = vpop.f32.mrf.mxu1 }
 0xbbc   :  { %v6541_v13 = vmul.f32 %v6525_v29, %v6525_v29 }
 0xbbd   :  { %v6494_v52 = vsel %vm15163_vm4, %v6380_v24, %v15162_v45  ;;  %v7845_v28 = vpop.f32.mrf.mxu0  ;;  %v7925_v19 = vpop.f32.mrf.mxu1 }
 0xbbe   :  { %6557 = vst.msk [vmem:[%s14240_s6 + $0x50] sm:$0xff] %vm15164_vm10, %v6541_v13  ;;  %v6526_v30 = vsub.f32 %v6494_v52, %v7998_v37  ;;  %v7846_v2 = vadd.f32 %v7845_v28, %v7844_v56  ;;  %v7926_v31 = vadd.f32 %v7925_v19, %v7924_v25 }
 0xbbf   :  { %6510 = vst.msk [vmem:[%s14238_s4 + $0x58] sm:$0xff] %vm15165_vm11, %v6494_v52  ;;  %v7847_v27 = vpop.f32.mrf.mxu0  ;;  %v7927_v42 = vpop.f32.mrf.mxu1 }
 0xbc0   :  { %v6542_v15 = vmul.f32 %v6526_v30, %v6526_v30  ;;  %v6385_v11 = vadd.f32 %v7926_v31, %v7846_v2 }
 0xbc1   :  { %v7848_v17 = vpop.f32.mrf.mxu0  ;;  %v7928_v38 = vpop.f32.mrf.mxu1 }
 0xbc2   :  { %6558 = vst.msk [vmem:[%s14240_s6 + $0x58] sm:$0xff] %vm15166_vm6, %v6542_v15  ;;  %v6495_v18 = vsel %vm15168_vm13, %v6385_v11, %v15167_v32  ;;  %v7849_v53 = vadd.f32 %v7848_v17, %v7847_v27  ;;  %v7929_v12 = vadd.f32 %v7928_v38, %v7927_v42 }
 0xbc3   :  { %6511 = vst.msk [vmem:[%s14238_s4 + $0x60] sm:$0xff] %vm15169_vm5, %v6495_v18  ;;  %v6527_v4 = vsub.f32 %v6495_v18, %v7999_v21  ;;  %v7850_v49 = vpop.f32.mrf.mxu0  ;;  %v7930_v5 = vpop.f32.mrf.mxu1 }
 0xbc4   :  { %v6390_v61 = vadd.f32 %v7929_v12, %v7849_v53 }
 0xbc5   :  { %v6543_v8 = vmul.f32 %v6527_v4, %v6527_v4  ;;  %v7851_v43 = vpop.f32.mrf.mxu0  ;;  %v7931_v46 = vpop.f32.mrf.mxu1 }
 0xbc6   :  { %v6496_v14 = vsel %vm15171_vm15, %v6390_v61, %v15170_v63  ;;  %v7852_v62 = vadd.f32 %v7851_v43, %v7850_v49  ;;  %v7932_v50 = vadd.f32 %v7931_v46, %v7930_v5 }
 0xbc7   :  { %6559 = vst.msk [vmem:[%s14240_s6 + $0x60] sm:$0xff] %vm15172_vm7, %v6543_v8  ;;  %v6528_v33 = vsub.f32 %v6496_v14, %v8000_v6  ;;  %v7853_v55 = vpop.f32.mrf.mxu0  ;;  %v7933_v40 = vpop.f32.mrf.mxu1 }
 0xbc8   :  { %6512 = vst.msk [vmem:[%s14238_s4 + $0x68] sm:$0xff] %vm15173_vm1, %v6496_v14  ;;  %v6395_v58 = vadd.f32 %v7932_v50, %v7852_v62 }
 0xbc9   :  { %v6544_v41 = vmul.f32 %v6528_v33, %v6528_v33  ;;  %v7854_v51 = vpop.f32.mrf.mxu0  ;;  %v7934_v7 = vpop.f32.mrf.mxu1 }
 0xbca   :  { %v6497_v59 = vsel %vm6417_vm3, %v6395_v58, %v15174_v16  ;;  %v7855_v36 = vadd.f32 %v7854_v51, %v7853_v55  ;;  %v7935_v47 = vadd.f32 %v7934_v7, %v7933_v40  ;;  %vm15177_vm3 = vmmov %vm15138_vm0 }
 0xbcb   :  { %6560 = vst.msk [vmem:[%s14240_s6 + $0x68] sm:$0xff] %vm15138_vm0, %v6544_v41  ;;  %v6529_v9 = vsub.f32 %v6497_v59, %v8001_v0 }
 0xbcc   :  { %6513 = vst.msk [vmem:[%s14238_s4 + $0x70] sm:$0xff] %vm15175_vm2, %v6497_v59  ;;  %v6400_v1 = vadd.f32 %v7935_v47, %v7855_v36 }
 0xbcd   :  { %v6545_v39 = vmul.f32 %v6529_v9, %v6529_v9 }
 0xbce   :  { %v6498_v34 = vsel %vm6418_vm9, %v6400_v1, %v15176_v23 }
 0xbcf   :  { %6561 = vst.msk [vmem:[%s14240_s6 + $0x70] sm:$0xff] %vm15177_vm3, %v6545_v39  ;;  %v6530_v10 = vsub.f32 %v6498_v34, %v8002_v60 }
 0xbd0   :  { %6514 = vst.msk [vmem:[%s14238_s4 + $0x78] sm:$0xff] %vm15178_vm12, %v6498_v34 }
 0xbd1   :  { %v6546_v20 = vmul.f32 %v6530_v10, %v6530_v10 }
 0xbd3   :  { %6562 = vst.msk [vmem:[%s14240_s6 + $0x78] sm:$0xff] %vm15179_vm14, %v6546_v20 }
 0xbd4   :  { %8023 = dma.done.wait [#allocation3], 16  }
 0xbd5   :  { %8024 = vsyncadd [#allocation3], 4294967280 }
 0xbd6   :  { %6655 = vsyncpa [#allocation3], 1 }

</bundles_post_ra>
